<compile_context>
chip_gen: v6e
topology: v6e:2x2x1
jax: 0.10.0
libtpu: 0.0.40
codegen_flags: <defaults>
</compile_context>

<pallas_src>
import jax
import jax.numpy as jnp
from jax.experimental import pallas as pl
from jax.experimental.pallas import tpu as pltpu


def _mlp3_kernel(t_ref, x_ref, w1a_ref, w1b_ref, b1_ref,
                 w2_ref, b2_ref, w3_ref, b3_ref, o_ref):
    # t_ref/x_ref: (TN, 1) f32;  w1a/w1b/b1: (1, H1) f32
    # w2: (H1, H2) bf16;  b2/w3: (1, H2) f32;  b3: (1, 1) f32;  o: (TN, 1) f32

    # --- Layer 1 (2 -> H1) on the VPU: broadcast FMAs, no MXU pass ---
    h1 = t_ref[...] * w1a_ref[...] + x_ref[...] * w1b_ref[...] + b1_ref[...]
    h1 = jnp.maximum(h1, 0.0)

    # --- Layer 2 (H1 -> H2) on the MXU: bf16 operands, f32 accumulation ---
    h2 = jnp.dot(h1.astype(jnp.bfloat16), w2_ref[...],
                 preferred_element_type=jnp.float32)
    h2 = jnp.maximum(h2 + b2_ref[...], 0.0)

    # --- Layer 3 (H2 -> 1) on VPU mul + XLU lane reduce, no MXU pass ---
    o_ref[...] = jnp.sum(h2 * w3_ref[...], axis=-1, keepdims=True) + b3_ref[...]


def dumb_linear_forward(t, x, params, *, tile_n=1024):
    """Pallas implementation of DumbLinear(arch='3l').forward(t, x)."""
    w1, b1, w2, b2, w3, b3 = params
    n = t.shape[0]
    h1 = w1.shape[1]
    h2 = w2.shape[1]

    # Clamp tile to N (keeping sublane alignment) and pad N to a multiple.
    tile_n = min(tile_n, max(8, (n // 8) * 8 if n >= 8 else 8))
    tile_n = max(8, (tile_n // 8) * 8)
    n_pad = pl.cdiv(n, tile_n) * tile_n
    t2 = t.astype(jnp.float32).reshape(-1, 1)
    x2 = x.astype(jnp.float32).reshape(-1, 1)
    if n_pad != n:
        t2 = jnp.pad(t2, ((0, n_pad - n), (0, 0)))
        x2 = jnp.pad(x2, ((0, n_pad - n), (0, 0)))

    # Weight plumbing (glue): split w1 rows, bf16 w2, w3 as a lane-dense row.
    w1a = w1[0:1, :].astype(jnp.float32)          # (1, H1)
    w1b = w1[1:2, :].astype(jnp.float32)          # (1, H1)
    w2_bf16 = w2.astype(jnp.bfloat16)             # (H1, H2)
    w3_row = w3.reshape(1, h2).astype(jnp.float32)  # (1, H2)

    grid = (n_pad // tile_n,)
    cost = pl.CostEstimate(
        flops=2 * n_pad * (2 * h1 + h1 * h2 + h2),
        transcendentals=0,
        bytes_accessed=12 * n_pad + 2 * h1 * h2 + 4 * (3 * h1 + 2 * h2 + 2),
    )

    out = pl.pallas_call(
        _mlp3_kernel,
        out_shape=jax.ShapeDtypeStruct((n_pad, 1), jnp.float32),
        grid_spec=pltpu.PrefetchScalarGridSpec(
            num_scalar_prefetch=0,
            grid=grid,
            in_specs=[
                pl.BlockSpec((tile_n, 1), lambda i: (i, 0)),   # t column tile
                pl.BlockSpec((tile_n, 1), lambda i: (i, 0)),   # x column tile
                pl.BlockSpec((1, h1), lambda i: (0, 0)),       # w1 row 0
                pl.BlockSpec((1, h1), lambda i: (0, 0)),       # w1 row 1
                pl.BlockSpec((1, h1), lambda i: (0, 0)),       # b1
                pl.BlockSpec((h1, h2), lambda i: (0, 0)),      # w2 (bf16, resident)
                pl.BlockSpec((1, h2), lambda i: (0, 0)),       # b2
                pl.BlockSpec((1, h2), lambda i: (0, 0)),       # w3 row
                pl.BlockSpec((1, 1), lambda i: (0, 0)),        # b3
            ],
            out_specs=pl.BlockSpec((tile_n, 1), lambda i: (i, 0)),
        ),
        compiler_params=pltpu.CompilerParams(
            dimension_semantics=("parallel",)),
        cost_estimate=cost,
    )(t2, x2, w1a, w1b, b1, w2_bf16, b2, w3_row, b3)

    return out.reshape(-1)[:n]   # .view(-1)


def init_params_3l(key, base_width=128):
    """Deterministic init mimicking nn.Linear default (U[-1/sqrt(fan_in), +])."""
    dims = [(2, base_width * 2), (base_width * 2, base_width * 4), (base_width * 4, 1)]
    params = []
    for (fan_in, fan_out) in dims:
        key, kw, kb = jax.random.split(key, 3)
        bound = 1.0 / (fan_in ** 0.5)
        w = jax.random.uniform(kw, (fan_in, fan_out), jnp.float32, -bound, bound)
        b = jax.random.uniform(kb, (1, fan_out), jnp.float32, -bound, bound)
        params += [w, b]
    return tuple(params)


def _reference_forward(t, x, params):
    w1, b1, w2, b2, w3, b3 = params
    tx = jnp.stack((t, x), axis=-1)
    h = jnp.maximum(tx @ w1 + b1, 0.0)
    h = jnp.maximum(h @ w2 + b2, 0.0)
    return (h @ w3 + b3).reshape(-1)


if __name__ == "__main__":
    key = jax.random.PRNGKey(0)
    kp, kt, kx = jax.random.split(key, 3)

    base_width = 128
    params = init_params_3l(kp, base_width=base_width)

    N = 2048  # with tile_n=1024 -> 2 grid steps (keeps both v7x TCs busy)
    t = jax.random.normal(kt, (N,), jnp.float32)
    x = jax.random.normal(kx, (N,), jnp.float32)

    out = dumb_linear_forward(t, x, params, tile_n=1024)
    out = jax.block_until_ready(out)

    ref = _reference_forward(t, x, params)
    assert out.shape == (N,)
    # Tolerance loosened because the dominant 256x512 matmul uses bf16 operands
    # (f32 accumulation); everything else is f32.
    assert jnp.allclose(out, ref, atol=2e-2, rtol=2e-2)

    print("KERNEL_OK")
</pallas_src>

<mosaic_0001>
module attributes {stable_mosaic.version = 11 : i64} {
  func.func @_mlp3_kernel(%arg0: i32, %arg1: memref<1024x1xf32, #tpu.memory_space<vmem>>, %arg2: memref<1024x1xf32, #tpu.memory_space<vmem>>, %arg3: memref<1x256xf32, #tpu.memory_space<vmem>>, %arg4: memref<1x256xf32, #tpu.memory_space<vmem>>, %arg5: memref<1x256xf32, #tpu.memory_space<vmem>>, %arg6: memref<256x512xbf16, #tpu.memory_space<vmem>>, %arg7: memref<1x512xf32, #tpu.memory_space<vmem>>, %arg8: memref<1x512xf32, #tpu.memory_space<vmem>>, %arg9: memref<1x1xf32, #tpu.memory_space<vmem>>, %arg10: memref<1024x1xf32, #tpu.memory_space<vmem>>) attributes {dimension_semantics = [#tpu.dimension_semantics<parallel>], iteration_bounds = array<i64: 2>, scalar_prefetch = 0 : i64, scratch_operands = 0 : i64, tpu.core_type = #tpu.core_type<tc>, window_params = [{transform_indices = @transform_0, window_bounds = array<i64: 1024, 1>}, {transform_indices = @transform_1, window_bounds = array<i64: 1024, 1>}, {pipeline_mode = #tpu.pipeline_mode<synchronous>, transform_indices = @transform_2, window_bounds = array<i64: 1, 256>}, {pipeline_mode = #tpu.pipeline_mode<synchronous>, transform_indices = @transform_3, window_bounds = array<i64: 1, 256>}, {pipeline_mode = #tpu.pipeline_mode<synchronous>, transform_indices = @transform_4, window_bounds = array<i64: 1, 256>}, {pipeline_mode = #tpu.pipeline_mode<synchronous>, transform_indices = @transform_5, window_bounds = array<i64: 256, 512>}, {pipeline_mode = #tpu.pipeline_mode<synchronous>, transform_indices = @transform_6, window_bounds = array<i64: 1, 512>}, {pipeline_mode = #tpu.pipeline_mode<synchronous>, transform_indices = @transform_7, window_bounds = array<i64: 1, 512>}, {pipeline_mode = #tpu.pipeline_mode<synchronous>, transform_indices = @transform_8, window_bounds = array<i64: 1, 1>}, {transform_indices = @transform_9, window_bounds = array<i64: 1024, 1>}]} {
    %c0 = arith.constant 0 : index
    %c0_0 = arith.constant 0 : index
    %0 = vector.load %arg1[%c0, %c0_0] : memref<1024x1xf32, #tpu.memory_space<vmem>>, vector<1024x1xf32>
    %c0_1 = arith.constant 0 : index
    %c0_2 = arith.constant 0 : index
    %1 = vector.load %arg3[%c0_1, %c0_2] : memref<1x256xf32, #tpu.memory_space<vmem>>, vector<1x256xf32>
    %2 = vector.broadcast %0 : vector<1024x1xf32> to vector<1024x256xf32>
    %3 = vector.broadcast %1 : vector<1x256xf32> to vector<1024x256xf32>
    %4 = arith.mulf %2, %3 : vector<1024x256xf32>
    %c0_3 = arith.constant 0 : index
    %c0_4 = arith.constant 0 : index
    %5 = vector.load %arg2[%c0_3, %c0_4] : memref<1024x1xf32, #tpu.memory_space<vmem>>, vector<1024x1xf32>
    %c0_5 = arith.constant 0 : index
    %c0_6 = arith.constant 0 : index
    %6 = vector.load %arg4[%c0_5, %c0_6] : memref<1x256xf32, #tpu.memory_space<vmem>>, vector<1x256xf32>
    %7 = vector.broadcast %5 : vector<1024x1xf32> to vector<1024x256xf32>
    %8 = vector.broadcast %6 : vector<1x256xf32> to vector<1024x256xf32>
    %9 = arith.mulf %7, %8 : vector<1024x256xf32>
    %10 = arith.addf %4, %9 : vector<1024x256xf32>
    %c0_7 = arith.constant 0 : index
    %c0_8 = arith.constant 0 : index
    %11 = vector.load %arg5[%c0_7, %c0_8] : memref<1x256xf32, #tpu.memory_space<vmem>>, vector<1x256xf32>
    %12 = vector.broadcast %11 : vector<1x256xf32> to vector<1024x256xf32>
    %13 = arith.addf %10, %12 : vector<1024x256xf32>
    %cst = arith.constant 0.000000e+00 : f32
    %14 = vector.broadcast %cst : f32 to vector<1024x256xf32>
    %15 = arith.maximumf %13, %14 : vector<1024x256xf32>
    %16 = arith.truncf %15 : vector<1024x256xf32> to vector<1024x256xbf16>
    %c0_9 = arith.constant 0 : index
    %c0_10 = arith.constant 0 : index
    %17 = vector.load %arg6[%c0_9, %c0_10] : memref<256x512xbf16, #tpu.memory_space<vmem>>, vector<256x512xbf16>
    %cst_11 = arith.constant dense<0.000000e+00> : vector<1024x512xf32>
    %18 = tpu.matmul %16, %17, %cst_11 {dimension_numbers = #tpu.dot_dimension_numbers<[1], [0], [0], [1], [0, 0, 1, 1], [], []>} : vector<1024x256xbf16>, vector<256x512xbf16>, vector<1024x512xf32> -> vector<1024x512xf32>
    %c0_12 = arith.constant 0 : index
    %c0_13 = arith.constant 0 : index
    %19 = vector.load %arg7[%c0_12, %c0_13] : memref<1x512xf32, #tpu.memory_space<vmem>>, vector<1x512xf32>
    %20 = vector.broadcast %19 : vector<1x512xf32> to vector<1024x512xf32>
    %21 = arith.addf %18, %20 : vector<1024x512xf32>
    %cst_14 = arith.constant 0.000000e+00 : f32
    %22 = vector.broadcast %cst_14 : f32 to vector<1024x512xf32>
    %23 = arith.maximumf %21, %22 : vector<1024x512xf32>
    %c0_15 = arith.constant 0 : index
    %c0_16 = arith.constant 0 : index
    %24 = vector.load %arg8[%c0_15, %c0_16] : memref<1x512xf32, #tpu.memory_space<vmem>>, vector<1x512xf32>
    %25 = vector.broadcast %24 : vector<1x512xf32> to vector<1024x512xf32>
    %26 = arith.mulf %23, %25 : vector<1024x512xf32>
    %cst_17 = arith.constant dense<0.000000e+00> : vector<1024xf32>
    %27 = vector.multi_reduction <add>, %26, %cst_17 [1] : vector<1024x512xf32> to vector<1024xf32>
    %28 = vector.shape_cast %27 : vector<1024xf32> to vector<1024x1xf32>
    %c0_18 = arith.constant 0 : index
    %c0_19 = arith.constant 0 : index
    %29 = vector.load %arg9[%c0_18, %c0_19] : memref<1x1xf32, #tpu.memory_space<vmem>>, vector<1x1xf32>
    %30 = vector.broadcast %29 : vector<1x1xf32> to vector<1024x1xf32>
    %31 = arith.addf %28, %30 : vector<1024x1xf32>
    %c0_20 = arith.constant 0 : index
    %c0_21 = arith.constant 0 : index
    %32 = vector.load %arg10[%c0_20, %c0_21] : memref<1024x1xf32, #tpu.memory_space<vmem>>, vector<1024x1xf32>
    tpu.vector_store %arg10[%c0_20, %c0_21], %31 {strides = array<i32>} : memref<1024x1xf32, #tpu.memory_space<vmem>>, vector<1024x1xf32>,
    return
  }
  func.func @transform_0(%arg0: i32) -> (i32, i32) {
    %c0_i32 = arith.constant 0 : i32
    %c0_i32_0 = arith.constant 0 : i32
    return %arg0, %c0_i32 : i32, i32
  }
  func.func @transform_1(%arg0: i32) -> (i32, i32) {
    %c0_i32 = arith.constant 0 : i32
    %c0_i32_0 = arith.constant 0 : i32
    return %arg0, %c0_i32 : i32, i32
  }
  func.func @transform_2(%arg0: i32) -> (i32, i32) {
    %c0_i32 = arith.constant 0 : i32
    %c0_i32_0 = arith.constant 0 : i32
    %c0_i32_1 = arith.constant 0 : i32
    return %c0_i32, %c0_i32_0 : i32, i32
  }
  func.func @transform_3(%arg0: i32) -> (i32, i32) {
    %c0_i32 = arith.constant 0 : i32
    %c0_i32_0 = arith.constant 0 : i32
    %c0_i32_1 = arith.constant 0 : i32
    return %c0_i32, %c0_i32_0 : i32, i32
  }
  func.func @transform_4(%arg0: i32) -> (i32, i32) {
    %c0_i32 = arith.constant 0 : i32
    %c0_i32_0 = arith.constant 0 : i32
    %c0_i32_1 = arith.constant 0 : i32
    return %c0_i32, %c0_i32_0 : i32, i32
  }
  func.func @transform_5(%arg0: i32) -> (i32, i32) {
    %c0_i32 = arith.constant 0 : i32
    %c0_i32_0 = arith.constant 0 : i32
    %c0_i32_1 = arith.constant 0 : i32
    return %c0_i32, %c0_i32_0 : i32, i32
  }
  func.func @transform_6(%arg0: i32) -> (i32, i32) {
    %c0_i32 = arith.constant 0 : i32
    %c0_i32_0 = arith.constant 0 : i32
    %c0_i32_1 = arith.constant 0 : i32
    return %c0_i32, %c0_i32_0 : i32, i32
  }
  func.func @transform_7(%arg0: i32) -> (i32, i32) {
    %c0_i32 = arith.constant 0 : i32
    %c0_i32_0 = arith.constant 0 : i32
    %c0_i32_1 = arith.constant 0 : i32
    return %c0_i32, %c0_i32_0 : i32, i32
  }
  func.func @transform_8(%arg0: i32) -> (i32, i32) {
    %c0_i32 = arith.constant 0 : i32
    %c0_i32_0 = arith.constant 0 : i32
    %c0_i32_1 = arith.constant 0 : i32
    return %c0_i32, %c0_i32_0 : i32, i32
  }
  func.func @transform_9(%arg0: i32) -> (i32, i32) {
    %c0_i32 = arith.constant 0 : i32
    %c0_i32_0 = arith.constant 0 : i32
    return %arg0, %c0_i32 : i32, i32
  }
}

</mosaic_0001>

<bundles_post_ra>
// kernel: tpu_custom_call.1
= control target key start
LH: loop header
LB: loop body
LE: loop exit
PB: predicated region body
PF: predicated region fallthrough
CT: control target
= control target key end

     0   :  { %s7361_s11 = smov 0   ;;  %s13609_s0 = inlined_call_operand.vmem [shape: f32[2048,1], index: 0, kind: input, shape index: {}]   ;;  %s13610_s1 = inlined_call_operand.vmem [shape: f32[2048,1], index: 1, kind: input, shape index: {}]   ;;  %s13611_s2 = inlined_call_operand.vmem [shape: f32[1,256], index: 2, kind: input, shape index: {}]   ;;  %s13612_s3 = inlined_call_operand.vmem [shape: f32[1,256], index: 3, kind: input, shape index: {}]   ;;  %s13613_s4 = inlined_call_operand.vmem [shape: f32[1,256], index: 4, kind: input, shape index: {}]   ;;  %s13614_s5 = inlined_call_operand.vmem [shape: bf16[256,512], index: 5, kind: input, shape index: {}]   ;;  %s13615_s6 = inlined_call_operand.vmem [shape: f32[1,512], index: 6, kind: input, shape index: {}]   ;;  %s13616_s7 = inlined_call_operand.vmem [shape: f32[1,512], index: 7, kind: input, shape index: {}]   ;;  %s13617_s8 = inlined_call_operand.<no memory space> [shape: f32[1,1], index: 8, kind: input, shape index: {}]   ;;  %s13618_s9 = inlined_call_operand.vmem [shape: f32[2048,1], index: 9, kind: output, shape index: {}]  }
   0x1   :  { %v14_v0 = vstv %s13617_s8 }
   0x2   :  { %15 = vst [vmem:[#allocation2] sm:$0x1] %v14_v0 }
   0x3 LB: > { %s7110_s12 = sadd.s32 4294967295, %s7305_s11   ;;  %p7114_p0 = scmp.ge.s32.totalorder %s7305_s11, 1  ;;  %s7305_s11 = sphi %s7361_s11, %s21_s11  }
   0x4   : > { %p301_p1 = scmp.lt.s32.totalorder %s7305_s11, 3 }
   0x6   : > { %p302_p2 = pnand %p7114_p0, %p301_p1 }
   0x8   : > { %305 = sbr.rel (%p302_p2) target bundleno = 1376 (0x560), region = 56 }
   0xd   : > { %s7115_s13 = sshll.u32 %s7110_s12, 7  ;;  %v7307_v1 = vmov 0   ;;  %vm6913_vm0 = vcmask 7168  }
   0xe   : > { %7198 = vset.pattern.permute.xlu1 %v7307_v1  ;;  %7197 = vset.pattern.permute.xlu0 %v7307_v1  ;;  %p343_p3 = scmp.lt.s32.totalorder %s7115_s13, 255 }
  0x10   : > { %s14836_s13 = smov (!%p343_p3, %s7115_s13), 255 }
  0x11   : > { %s7369_s8 = sshll.u32 %s14836_s13, 3 }
  0x12   : > { %s7375_s16 = scalar_lea.vmem %s13609_s0, %s7369_s8  ;;  %s7727_s24 = scalar_lea.vmem %s13610_s1, %s7369_s8 }
  0x13   : > { %v362_v2 = vld [vmem:[%s7375_s16 + $0x10] sm:$0xff]  ;;  %v360_v3 = vld [vmem:[%s7375_s16] sm:$0xff]  ;;  %v363_v4 = vld [vmem:[%s7375_s16 + $0x18] sm:$0xff]  ;;  %s11545_s27 = scalar_lea.vmem %s13618_s9, %s7369_s8 }
  0x14   : > { %501 = vperm.xlu1 %7198, %v362_v2   ;;  %491 = vperm.xlu0 %7197, %v360_v3   ;;  %v361_v5 = vld [vmem:[%s7375_s16 + $0x8] sm:$0xff]  ;;  %v364_v7 = vld [vmem:[%s7375_s16 + $0x20] sm:$0xff]  ;;  %v367_v8 = vld [vmem:[%s7375_s16 + $0x38] sm:$0xff] }
  0x15   : > { %v365_v6 = vld [vmem:[%s7375_s16 + $0x28] sm:$0xff]  ;;  %v366_v9 = vld [vmem:[%s7375_s16 + $0x30] sm:$0xff]  ;;  %v368_v11 = vld [vmem:[%s7375_s16 + $0x40] sm:$0xff] }
  0x16   : > { %v369_v10 = vld [vmem:[%s7375_s16 + $0x48] sm:$0xff]  ;;  %v371_v12 = vld [vmem:[%s7375_s16 + $0x58] sm:$0xff]  ;;  %v370_v13 = vld [vmem:[%s7375_s16 + $0x50] sm:$0xff] }
  0x17   : > { %v373_v14 = vld [vmem:[%s7375_s16 + $0x68] sm:$0xff]  ;;  %v372_v15 = vld [vmem:[%s7375_s16 + $0x60] sm:$0xff]  ;;  %v375_v16 = vld [vmem:[%s7375_s16 + $0x78] sm:$0xff] }
  0x18   : > { %506 = vperm.xlu1 %7198, %v363_v4   ;;  %496 = vperm.xlu0 %7197, %v361_v5   ;;  %v374_v17 = vld [vmem:[%s7375_s16 + $0x70] sm:$0xff]  ;;  %v377_v18 = vld [vmem:[%s7375_s16 + $0x88] sm:$0xff]  ;;  %v376_v19 = vld [vmem:[%s7375_s16 + $0x80] sm:$0xff] }
  0x19   : > { %v379_v20 = vld [vmem:[%s7375_s16 + $0x98] sm:$0xff]  ;;  %v378_v21 = vld [vmem:[%s7375_s16 + $0x90] sm:$0xff]  ;;  %v381_v22 = vld [vmem:[%s7375_s16 + $0xa8] sm:$0xff] }
  0x1a   : > { %v380_v23 = vld [vmem:[%s7375_s16 + $0xa0] sm:$0xff]  ;;  %v383_v24 = vld [vmem:[%s7375_s16 + $0xb8] sm:$0xff]  ;;  %v382_v25 = vld [vmem:[%s7375_s16 + $0xb0] sm:$0xff] }
  0x1b   : > { %v385_v26 = vld [vmem:[%s7375_s16 + $0xc8] sm:$0xff]  ;;  %v384_v27 = vld [vmem:[%s7375_s16 + $0xc0] sm:$0xff]  ;;  %v387_v28 = vld [vmem:[%s7375_s16 + $0xd8] sm:$0xff] }
  0x1c   : > { %516 = vperm.xlu1 %7198, %v365_v6   ;;  %511 = vperm.xlu0 %7197, %v364_v7   ;;  %v386_v29 = vld [vmem:[%s7375_s16 + $0xd0] sm:$0xff]  ;;  %v389_v30 = vld [vmem:[%s7375_s16 + $0xe8] sm:$0xff]  ;;  %v388_v31 = vld [vmem:[%s7375_s16 + $0xe0] sm:$0xff] }
  0x1d   : > { %v391_v32 = vld [vmem:[%s7375_s16 + $0xf8] sm:$0xff]  ;;  %v390_v33 = vld [vmem:[%s7375_s16 + $0xf0] sm:$0xff]  ;;  %v393_v34 = vld [vmem:[%s7375_s16 + $0x108] sm:$0xff] }
  0x1e   : > { %v392_v35 = vld [vmem:[%s7375_s16 + $0x100] sm:$0xff]  ;;  %v395_v36 = vld [vmem:[%s7375_s16 + $0x118] sm:$0xff]  ;;  %v394_v37 = vld [vmem:[%s7375_s16 + $0x110] sm:$0xff] }
  0x1f   : > { %v397_v38 = vld [vmem:[%s7375_s16 + $0x128] sm:$0xff]  ;;  %v396_v39 = vld [vmem:[%s7375_s16 + $0x120] sm:$0xff]  ;;  %v399_v40 = vld [vmem:[%s7375_s16 + $0x138] sm:$0xff] }
  0x20   : > { %526 = vperm.xlu1 %7198, %v367_v8   ;;  %521 = vperm.xlu0 %7197, %v366_v9   ;;  %v398_v41 = vld [vmem:[%s7375_s16 + $0x130] sm:$0xff]  ;;  %v401_v42 = vld [vmem:[%s7375_s16 + $0x148] sm:$0xff]  ;;  %v400_v43 = vld [vmem:[%s7375_s16 + $0x140] sm:$0xff] }
  0x21   : > { %v403_v44 = vld [vmem:[%s7375_s16 + $0x158] sm:$0xff]  ;;  %v402_v45 = vld [vmem:[%s7375_s16 + $0x150] sm:$0xff]  ;;  %v405_v46 = vld [vmem:[%s7375_s16 + $0x168] sm:$0xff] }
  0x22   : > { %v404_v47 = vld [vmem:[%s7375_s16 + $0x160] sm:$0xff]  ;;  %v407_v48 = vld [vmem:[%s7375_s16 + $0x178] sm:$0xff]  ;;  %v406_v49 = vld [vmem:[%s7375_s16 + $0x170] sm:$0xff] }
  0x23   : > { %v409_v50 = vld [vmem:[%s7375_s16 + $0x188] sm:$0xff]  ;;  %v408_v51 = vld [vmem:[%s7375_s16 + $0x180] sm:$0xff]  ;;  %v411_v52 = vld [vmem:[%s7375_s16 + $0x198] sm:$0xff] }
  0x24   : > { %536 = vperm.xlu1 %7198, %v369_v10   ;;  %531 = vperm.xlu0 %7197, %v368_v11   ;;  %v410_v53 = vld [vmem:[%s7375_s16 + $0x190] sm:$0xff]  ;;  %v413_v54 = vld [vmem:[%s7375_s16 + $0x1a8] sm:$0xff]  ;;  %v412_v55 = vld [vmem:[%s7375_s16 + $0x1a0] sm:$0xff] }
  0x25   : > { %v415_v56 = vld [vmem:[%s7375_s16 + $0x1b8] sm:$0xff]  ;;  %v414_v57 = vld [vmem:[%s7375_s16 + $0x1b0] sm:$0xff]  ;;  %v417_v58 = vld [vmem:[%s7375_s16 + $0x1c8] sm:$0xff] }
  0x26   : > { %v416_v59 = vld [vmem:[%s7375_s16 + $0x1c0] sm:$0xff]  ;;  %v419_v60 = vld [vmem:[%s7375_s16 + $0x1d8] sm:$0xff]  ;;  %v418_v61 = vld [vmem:[%s7375_s16 + $0x1d0] sm:$0xff] }
  0x27   : > { %v421_v62 = vld [vmem:[%s7375_s16 + $0x1e8] sm:$0xff]  ;;  %v420_v63 = vld [vmem:[%s7375_s16 + $0x1e0] sm:$0xff]  ;;  %v423_v0 = vld [vmem:[%s7375_s16 + $0x1f8] sm:$0xff] }
  0x28   : > { %546 = vperm.xlu1 %7198, %v371_v12   ;;  %541 = vperm.xlu0 %7197, %v370_v13   ;;  %v422_v1 = vld [vmem:[%s7375_s16 + $0x1f0] sm:$0xff]  ;;  %v425_v4 = vld [vmem:[%s7375_s16 + $0x208] sm:$0xff]  ;;  %v424_v5 = vld [vmem:[%s7375_s16 + $0x200] sm:$0xff] }
  0x29   : > { %v427_v8 = vld [vmem:[%s7375_s16 + $0x218] sm:$0xff]  ;;  %v426_v9 = vld [vmem:[%s7375_s16 + $0x210] sm:$0xff]  ;;  %v429_v12 = vld [vmem:[%s7375_s16 + $0x228] sm:$0xff] }
  0x2a   : > { %v428_v13 = vld [vmem:[%s7375_s16 + $0x220] sm:$0xff] }
  0x2c   : > { %556 = vperm.xlu1 %7198, %v373_v14   ;;  %551 = vperm.xlu0 %7197, %v372_v15  }
  0x30   : > { %566 = vperm.xlu1 %7198, %v375_v16   ;;  %561 = vperm.xlu0 %7197, %v374_v17   ;;  %v431_v16 = vld [vmem:[%s7375_s16 + $0x238] sm:$0xff]  ;;  %v430_v17 = vld [vmem:[%s7375_s16 + $0x230] sm:$0xff] }
  0x34   : > { %576 = vperm.xlu1 %7198, %v377_v18   ;;  %571 = vperm.xlu0 %7197, %v376_v19  }
  0x38   : > { %586 = vperm.xlu1 %7198, %v379_v20   ;;  %581 = vperm.xlu0 %7197, %v378_v21   ;;  %v433_v20 = vld [vmem:[%s7375_s16 + $0x248] sm:$0xff]  ;;  %v432_v21 = vld [vmem:[%s7375_s16 + $0x240] sm:$0xff] }
  0x3c   : > { %596 = vperm.xlu1 %7198, %v381_v22   ;;  %591 = vperm.xlu0 %7197, %v380_v23  }
  0x40   : > { %606 = vperm.xlu1 %7198, %v383_v24   ;;  %601 = vperm.xlu0 %7197, %v382_v25   ;;  %v435_v24 = vld [vmem:[%s7375_s16 + $0x258] sm:$0xff]  ;;  %v434_v25 = vld [vmem:[%s7375_s16 + $0x250] sm:$0xff] }
  0x44   : > { %616 = vperm.xlu1 %7198, %v385_v26   ;;  %611 = vperm.xlu0 %7197, %v384_v27  }
  0x48   : > { %626 = vperm.xlu1 %7198, %v387_v28   ;;  %621 = vperm.xlu0 %7197, %v386_v29   ;;  %v437_v28 = vld [vmem:[%s7375_s16 + $0x268] sm:$0xff]  ;;  %v436_v29 = vld [vmem:[%s7375_s16 + $0x260] sm:$0xff] }
  0x4c   : > { %636 = vperm.xlu1 %7198, %v389_v30   ;;  %631 = vperm.xlu0 %7197, %v388_v31  }
  0x50   : > { %646 = vperm.xlu1 %7198, %v391_v32   ;;  %641 = vperm.xlu0 %7197, %v390_v33   ;;  %v439_v32 = vld [vmem:[%s7375_s16 + $0x278] sm:$0xff]  ;;  %v438_v33 = vld [vmem:[%s7375_s16 + $0x270] sm:$0xff] }
  0x54   : > { %656 = vperm.xlu1 %7198, %v393_v34   ;;  %651 = vperm.xlu0 %7197, %v392_v35  }
  0x58   : > { %666 = vperm.xlu1 %7198, %v395_v36   ;;  %661 = vperm.xlu0 %7197, %v394_v37   ;;  %v441_v36 = vld [vmem:[%s7375_s16 + $0x288] sm:$0xff]  ;;  %v440_v37 = vld [vmem:[%s7375_s16 + $0x280] sm:$0xff] }
  0x5c   : > { %676 = vperm.xlu1 %7198, %v397_v38   ;;  %671 = vperm.xlu0 %7197, %v396_v39  }
  0x60   : > { %686 = vperm.xlu1 %7198, %v399_v40   ;;  %681 = vperm.xlu0 %7197, %v398_v41   ;;  %v443_v40 = vld [vmem:[%s7375_s16 + $0x298] sm:$0xff]  ;;  %v7199_v41 = vld [vmem:[%s13614_s5 + $0xe4] ss:$16 sps:$4 sm:$0xff]  }
  0x61   : > { %3746 = vmatprep.subr.bf16.mxu0 %v7199_v41 }
  0x64   : > { %696 = vperm.xlu1 %7198, %v401_v42   ;;  %691 = vperm.xlu0 %7197, %v400_v43   ;;  %v7201_v42 = vld [vmem:[%s13614_s5 + $0xec] ss:$16 sps:$4 sm:$0xff]   ;;  %v442_v43 = vld [vmem:[%s7375_s16 + $0x290] sm:$0xff] }
  0x65   : > { %4419 = vmatprep.subr.bf16.mxu1 %v7201_v42  ;;  %v7233_v42 = vld [vmem:[%s13614_s5 + $0x40] ss:$16 sps:$4 sm:$0xff]  }
  0x68   : > { %706 = vperm.xlu1 %7198, %v403_v44   ;;  %701 = vperm.xlu0 %7197, %v402_v45  }
  0x6c   : > { %716 = vperm.xlu1 %7198, %v405_v46   ;;  %711 = vperm.xlu0 %7197, %v404_v47   ;;  %v7203_v46 = vld [vmem:[%s13614_s5 + $0xe0] ss:$16 sps:$4 sm:$0xff]   ;;  %v7204_v47 = vld [vmem:[%s13614_s5 + $0xe8] ss:$16 sps:$4 sm:$0xff]  }
  0x6d   : > { %3747 = vmatpush1.bf16.msra.mxu0 %v7203_v46  ;;  %4420 = vmatpush1.bf16.msra.mxu1 %v7204_v47  ;;  %v455_v46 = vld [vmem:[%s7375_s16 + $0x2f8] sm:$0xff]  ;;  %v7235_v47 = vld [vmem:[%s13614_s5 + $0x24] ss:$16 sps:$4 sm:$0xff]  }
  0x70   : > { %726 = vperm.xlu1 %7198, %v407_v48   ;;  %721 = vperm.xlu0 %7197, %v406_v49   ;;  %v445_v48 = vld [vmem:[%s7375_s16 + $0x2a8] sm:$0xff]  ;;  %v7205_v49 = vld [vmem:[%s13614_s5 + $0xc4] ss:$16 sps:$4 sm:$0xff]  }
  0x71   : > { %3748 = vmatprep.subr.bf16.mxu0 %v7205_v49  ;;  %v454_v49 = vld [vmem:[%s7375_s16 + $0x2f0] sm:$0xff] }
  0x74   : > { %736 = vperm.xlu1 %7198, %v409_v50   ;;  %731 = vperm.xlu0 %7197, %v408_v51   ;;  %v7207_v50 = vld [vmem:[%s13614_s5 + $0xcc] ss:$16 sps:$4 sm:$0xff]   ;;  %v444_v51 = vld [vmem:[%s7375_s16 + $0x2a0] sm:$0xff] }
  0x75   : > { %4421 = vmatprep.subr.bf16.mxu1 %v7207_v50 }
  0x78   : > { %746 = vperm.xlu1 %7198, %v411_v52   ;;  %741 = vperm.xlu0 %7197, %v410_v53  }
  0x7c   : > { %756 = vperm.xlu1 %7198, %v413_v54   ;;  %751 = vperm.xlu0 %7197, %v412_v55   ;;  %v7209_v54 = vld [vmem:[%s13614_s5 + $0xc0] ss:$16 sps:$4 sm:$0xff]   ;;  %v7210_v55 = vld [vmem:[%s13614_s5 + $0xc8] ss:$16 sps:$4 sm:$0xff]  }
  0x7d   : > { %3749 = vmatpush1.bf16.msra.mxu0 %v7209_v54  ;;  %4422 = vmatpush1.bf16.msra.mxu1 %v7210_v55  ;;  %v7239_v54 = vld [vmem:[%s13614_s5 + $0x20] ss:$16 sps:$4 sm:$0xff]   ;;  %v7240_v55 = vld [vmem:[%s13614_s5 + $0x28] ss:$16 sps:$4 sm:$0xff]  }
  0x80   : > { %766 = vperm.xlu1 %7198, %v415_v56   ;;  %761 = vperm.xlu0 %7197, %v414_v57   ;;  %v447_v56 = vld [vmem:[%s7375_s16 + $0x2b8] sm:$0xff]  ;;  %v7211_v57 = vld [vmem:[%s13614_s5 + $0xa4] ss:$16 sps:$4 sm:$0xff]  }
  0x81   : > { %3750 = vmatprep.subr.bf16.mxu0 %v7211_v57  ;;  %v7241_v57 = vld [vmem:[%s13614_s5 + $0x4] ss:$16 sps:$4 sm:$0xff]  }
  0x84   : > { %776 = vperm.xlu1 %7198, %v417_v58   ;;  %771 = vperm.xlu0 %7197, %v416_v59   ;;  %v7213_v58 = vld [vmem:[%s13614_s5 + $0xac] ss:$16 sps:$4 sm:$0xff]   ;;  %v446_v59 = vld [vmem:[%s7375_s16 + $0x2b0] sm:$0xff] }
  0x85   : > { %4423 = vmatprep.subr.bf16.mxu1 %v7213_v58  ;;  %v7243_v58 = vld [vmem:[%s13614_s5 + $0xc] ss:$16 sps:$4 sm:$0xff]  }
  0x88   : > { %786 = vperm.xlu1 %7198, %v419_v60   ;;  %781 = vperm.xlu0 %7197, %v418_v61  }
  0x8c   : > { %796 = vperm.xlu1 %7198, %v421_v62   ;;  %791 = vperm.xlu0 %7197, %v420_v63   ;;  %v7215_v62 = vld [vmem:[%s13614_s5 + $0xa0] ss:$16 sps:$4 sm:$0xff]   ;;  %v7216_v63 = vld [vmem:[%s13614_s5 + $0xa8] ss:$16 sps:$4 sm:$0xff]  }
  0x8d   : > { %3751 = vmatpush1.bf16.msra.mxu0 %v7215_v62  ;;  %4424 = vmatpush1.bf16.msra.mxu1 %v7216_v63 }
  0x8f   : > { %v7441_v2 = vpop.permute.xlu1 %501  ;;  %v7443_v3 = vpop.permute.xlu0 %491 }
  0x90   : > { %806 = vperm.xlu1 %7198, %v423_v0   ;;  %801 = vperm.xlu0 %7197, %v422_v1   ;;  %v449_v0 = vld [vmem:[%s7375_s16 + $0x2c8] sm:$0xff]  ;;  %v7217_v1 = vld [vmem:[%s13614_s5 + $0x84] ss:$16 sps:$4 sm:$0xff]  }
  0x91   : > { %3752 = vmatprep.subr.bf16.mxu0 %v7217_v1  ;;  %v7246_v1 = vld [vmem:[%s13614_s5 + $0x8] ss:$16 sps:$4 sm:$0xff]  }
  0x93   : > { %v7447_v6 = vpop.permute.xlu1 %506  ;;  %v7449_v7 = vpop.permute.xlu0 %496 }
  0x94   : > { %816 = vperm.xlu1 %7198, %v425_v4   ;;  %811 = vperm.xlu0 %7197, %v424_v5   ;;  %v7219_v4 = vld [vmem:[%s13614_s5 + $0x8c] ss:$16 sps:$4 sm:$0xff]   ;;  %v448_v5 = vld [vmem:[%s7375_s16 + $0x2c0] sm:$0xff] }
  0x95   : > { %4425 = vmatprep.subr.bf16.mxu1 %v7219_v4  ;;  %v459_v4 = vld [vmem:[%s7375_s16 + $0x318] sm:$0xff] }
  0x97   : > { %v7453_v10 = vpop.permute.xlu1 %516  ;;  %v7455_v11 = vpop.permute.xlu0 %511 }
  0x98   : > { %826 = vperm.xlu1 %7198, %v427_v8   ;;  %821 = vperm.xlu0 %7197, %v426_v9  }
  0x9b   : > { %v7459_v14 = vpop.permute.xlu1 %526  ;;  %v7461_v15 = vpop.permute.xlu0 %521 }
  0x9c   : > { %836 = vperm.xlu1 %7198, %v429_v12   ;;  %831 = vperm.xlu0 %7197, %v428_v13   ;;  %v7221_v12 = vld [vmem:[%s13614_s5 + $0x80] ss:$16 sps:$4 sm:$0xff]   ;;  %v7222_v13 = vld [vmem:[%s13614_s5 + $0x88] ss:$16 sps:$4 sm:$0xff]  }
  0x9d   : > { %3753 = vmatpush1.bf16.msra.mxu0 %v7221_v12  ;;  %4426 = vmatpush1.bf16.msra.mxu1 %v7222_v13  ;;  %v7249_v12 = vld [vmem:[%s13614_s5 + $0x1ec] ss:$16 sps:$4 sm:$0xff]   ;;  %v458_v13 = vld [vmem:[%s7375_s16 + $0x310] sm:$0xff] }
  0x9f   : > { %v7465_v18 = vpop.permute.xlu1 %536  ;;  %v7467_v19 = vpop.permute.xlu0 %531 }
  0xa0   : > { %846 = vperm.xlu1 %7198, %v431_v16   ;;  %841 = vperm.xlu0 %7197, %v430_v17   ;;  %v451_v16 = vld [vmem:[%s7375_s16 + $0x2d8] sm:$0xff]  ;;  %v7223_v17 = vld [vmem:[%s13614_s5 + $0x64] ss:$16 sps:$4 sm:$0xff]  }
  0xa1   : > { %3754 = vmatprep.subr.bf16.mxu0 %v7223_v17 }
  0xa3   : > { %v7471_v22 = vpop.permute.xlu1 %546  ;;  %v7473_v23 = vpop.permute.xlu0 %541 }
  0xa4   : > { %856 = vperm.xlu1 %7198, %v433_v20   ;;  %851 = vperm.xlu0 %7197, %v432_v21   ;;  %v7225_v20 = vld [vmem:[%s13614_s5 + $0x6c] ss:$16 sps:$4 sm:$0xff]   ;;  %v450_v21 = vld [vmem:[%s7375_s16 + $0x2d0] sm:$0xff] }
  0xa5   : > { %4427 = vmatprep.subr.bf16.mxu1 %v7225_v20  ;;  %v7251_v20 = vld [vmem:[%s13614_s5 + $0x1e0] ss:$16 sps:$4 sm:$0xff]  }
  0xa7   : > { %v7477_v26 = vpop.permute.xlu1 %556  ;;  %v7479_v27 = vpop.permute.xlu0 %551 }
  0xa8   : > { %866 = vperm.xlu1 %7198, %v435_v24   ;;  %861 = vperm.xlu0 %7197, %v434_v25  }
  0xab   : > { %v7483_v30 = vpop.permute.xlu1 %566  ;;  %v7485_v31 = vpop.permute.xlu0 %561 }
  0xac   : > { %876 = vperm.xlu1 %7198, %v437_v28   ;;  %871 = vperm.xlu0 %7197, %v436_v29   ;;  %v7227_v28 = vld [vmem:[%s13614_s5 + $0x60] ss:$16 sps:$4 sm:$0xff]   ;;  %v7228_v29 = vld [vmem:[%s13614_s5 + $0x68] ss:$16 sps:$4 sm:$0xff]  }
  0xad   : > { %3755 = vmatpush1.bf16.msra.mxu0 %v7227_v28  ;;  %4428 = vmatpush1.bf16.msra.mxu1 %v7228_v29  ;;  %v461_v28 = vld [vmem:[%s7375_s16 + $0x328] sm:$0xff]  ;;  %v7253_v29 = vld [vmem:[%s13614_s5 + $0x1c4] ss:$16 sps:$4 sm:$0xff]  }
  0xaf   : > { %v7489_v34 = vpop.permute.xlu1 %576  ;;  %v7491_v35 = vpop.permute.xlu0 %571 }
  0xb0   : > { %886 = vperm.xlu1 %7198, %v439_v32   ;;  %881 = vperm.xlu0 %7197, %v438_v33   ;;  %v453_v32 = vld [vmem:[%s7375_s16 + $0x2e8] sm:$0xff]  ;;  %v7229_v33 = vld [vmem:[%s13614_s5 + $0x44] ss:$16 sps:$4 sm:$0xff]  }
  0xb1   : > { %3756 = vmatprep.subr.bf16.mxu0 %v7229_v33  ;;  %v460_v33 = vld [vmem:[%s7375_s16 + $0x320] sm:$0xff] }
  0xb2   : > { %3757 = vmatpush1.bf16.msra.mxu0 %v7233_v42  ;;  %v7257_v42 = vld [vmem:[%s13614_s5 + $0x1c0] ss:$16 sps:$4 sm:$0xff]  }
  0xb3   : > { %v7495_v38 = vpop.permute.xlu1 %586  ;;  %v7497_v39 = vpop.permute.xlu0 %581  ;;  %3758 = vmatprep.subr.bf16.mxu0 %v7235_v47  ;;  %v7259_v47 = vld [vmem:[%s13614_s5 + $0x1a4] ss:$16 sps:$4 sm:$0xff]  }
  0xb4   : > { %896 = vperm.xlu1 %7198, %v441_v36   ;;  %891 = vperm.xlu0 %7197, %v440_v37   ;;  %v7231_v36 = vld [vmem:[%s13614_s5 + $0x4c] ss:$16 sps:$4 sm:$0xff]   ;;  %v452_v37 = vld [vmem:[%s7375_s16 + $0x2e0] sm:$0xff] }
  0xb5   : > { %4429 = vmatprep.subr.bf16.mxu1 %v7231_v36 }
  0xb6   : > { %3759 = vmatpush1.bf16.msra.mxu0 %v7239_v54 }
  0xb7   : > { %v7507_v44 = vpop.permute.xlu1 %596  ;;  %v7509_v45 = vpop.permute.xlu0 %591  ;;  %3760 = vmatprep.subr.bf16.mxu0 %v7241_v57  ;;  %v7264_v57 = vld [vmem:[%s13614_s5 + $0x1a8] ss:$16 sps:$4 sm:$0xff]  }
  0xb8   : > { %906 = vperm.xlu1 %7198, %v443_v40   ;;  %901 = vperm.xlu0 %7197, %v442_v43   ;;  %v7234_v43 = vld [vmem:[%s13614_s5 + $0x48] ss:$16 sps:$4 sm:$0xff]  }
  0xb9   : > { %4430 = vmatpush1.bf16.msra.mxu1 %v7234_v43  ;;  %v7258_v43 = vld [vmem:[%s13614_s5 + $0x1c8] ss:$16 sps:$4 sm:$0xff]  }
  0xbb   : > { %v7525_v52 = vpop.permute.xlu1 %606  ;;  %v7527_v53 = vpop.permute.xlu0 %601 }
  0xbc   : > { %916 = vperm.xlu1 %7198, %v445_v48   ;;  %911 = vperm.xlu0 %7197, %v444_v51   ;;  %v7237_v48 = vld [vmem:[%s13614_s5 + $0x2c] ss:$16 sps:$4 sm:$0xff]  }
  0xbd   : > { %4431 = vmatprep.subr.bf16.mxu1 %v7237_v48  ;;  %v7261_v48 = vld [vmem:[%s13614_s5 + $0x1ac] ss:$16 sps:$4 sm:$0xff]  }
  0xbe   : > { %4432 = vmatpush1.bf16.msra.mxu1 %v7240_v55 }
  0xbf   : > { %v7543_v60 = vpop.permute.xlu1 %616  ;;  %v7545_v61 = vpop.permute.xlu0 %611  ;;  %4433 = vmatprep.subr.bf16.mxu1 %v7243_v58  ;;  %v465_v58 = vld [vmem:[%s7375_s16 + $0x348] sm:$0xff] }
  0xc0   : > { %926 = vperm.xlu1 %7198, %v447_v56   ;;  %921 = vperm.xlu0 %7197, %v446_v59   ;;  %v457_v56 = vld [vmem:[%s7375_s16 + $0x308] sm:$0xff]  ;;  %v456_v59 = vld [vmem:[%s7375_s16 + $0x300] sm:$0xff] }
  0xc2   : > { %4434 = vmatpush1.bf16.msra.mxu1 %v7246_v1  ;;  %v464_v1 = vld [vmem:[%s7375_s16 + $0x340] sm:$0xff] }
  0xc3   : > { %v7561_v8 = vpop.permute.xlu1 %626  ;;  %v7563_v9 = vpop.permute.xlu0 %621  ;;  %4435 = vmatprep.subr.bf16.mxu1 %v7249_v12  ;;  %v7269_v12 = vld [vmem:[%s13614_s5 + $0x180] ss:$16 sps:$4 sm:$0xff]  }
  0xc4   : > { %936 = vperm.xlu1 %7198, %v449_v0   ;;  %931 = vperm.xlu0 %7197, %v448_v5   ;;  %v7245_v0 = vld [vmem:[%s13614_s5] ss:$16 sps:$4 sm:$0xff]   ;;  %v7247_v5 = vld [vmem:[%s13614_s5 + $0x1e4] ss:$16 sps:$4 sm:$0xff]  }
  0xc5   : > { %3761 = vmatpush1.bf16.msra.mxu0 %v7245_v0  ;;  %v7267_v0 = vld [vmem:[%s13614_s5 + $0x18c] ss:$16 sps:$4 sm:$0xff]  }
  0xc6   : > { %3762 = vmatprep.subr.bf16.mxu0 %v7247_v5 }
  0xc7   : > { %v7579_v24 = vpop.permute.xlu1 %636  ;;  %v7581_v25 = vpop.permute.xlu0 %631 }
  0xc8   : > { %946 = vperm.xlu1 %7198, %v451_v16   ;;  %941 = vperm.xlu0 %7197, %v450_v21   ;;  %v7252_v21 = vld [vmem:[%s13614_s5 + $0x1e8] ss:$16 sps:$4 sm:$0xff]  }
  0xc9   : > { %3763 = vmatpush2.bf16.msra.mxu0 %v7251_v20  ;;  %4436 = vmatpush2.bf16.msra.mxu1 %v7252_v21  ;;  %v467_v20 = vld [vmem:[%s7375_s16 + $0x358] sm:$0xff]  ;;  %v7271_v21 = vld [vmem:[%s13614_s5 + $0x164] ss:$16 sps:$4 sm:$0xff]  }
  0xca   : > { %3764 = vmatprep.subr.bf16.mxu0 %v7253_v29  ;;  %v466_v29 = vld [vmem:[%s7375_s16 + $0x350] sm:$0xff] }
  0xcb   : > { %v7597_v40 = vpop.permute.xlu1 %646  ;;  %v7599_v41 = vpop.permute.xlu0 %641 }
  0xcc   : > { %956 = vperm.xlu1 %7198, %v453_v32   ;;  %951 = vperm.xlu0 %7197, %v452_v37   ;;  %v7255_v32 = vld [vmem:[%s13614_s5 + $0x1cc] ss:$16 sps:$4 sm:$0xff]  }
  0xcd   : > { %4437 = vmatprep.subr.bf16.mxu1 %v7255_v32  ;;  %3765 = vmatpush2.bf16.msra.mxu0 %v7257_v42  ;;  %v7275_v42 = vld [vmem:[%s13614_s5 + $0x160] ss:$16 sps:$4 sm:$0xff]  }
  0xce   : > { %4438 = vmatpush2.bf16.msra.mxu1 %v7258_v43  ;;  %3766 = vmatprep.subr.bf16.mxu0 %v7259_v47  ;;  %v7276_v43 = vld [vmem:[%s13614_s5 + $0x168] ss:$16 sps:$4 sm:$0xff]   ;;  %v468_v47 = vld [vmem:[%s7375_s16 + $0x360] sm:$0xff] }
  0xcf   : > { %v7615_v50 = vpop.permute.xlu1 %656  ;;  %v7617_v51 = vpop.permute.xlu0 %651  ;;  %4439 = vmatprep.subr.bf16.mxu1 %v7261_v48  ;;  %v7277_v48 = vld [vmem:[%s13614_s5 + $0x144] ss:$16 sps:$4 sm:$0xff]  }
  0xd0   : > { %966 = vperm.xlu1 %7198, %v455_v46   ;;  %961 = vperm.xlu0 %7197, %v454_v49   ;;  %v463_v46 = vld [vmem:[%s7375_s16 + $0x338] sm:$0xff]  ;;  %v462_v49 = vld [vmem:[%s7375_s16 + $0x330] sm:$0xff] }
  0xd2   : > { %4440 = vmatpush2.bf16.msra.mxu1 %v7264_v57 }
  0xd3   : > { %v7633_v62 = vpop.permute.xlu1 %666  ;;  %v7635_v63 = vpop.permute.xlu0 %661  ;;  %4441 = vmatprep.subr.bf16.mxu1 %v7267_v0  ;;  %v1398_v0 = vld [vmem:[%s7727_s24 + $0x10] sm:$0xff] }
  0xd4   : > { %976 = vperm.xlu1 %7198, %v457_v56   ;;  %971 = vperm.xlu0 %7197, %v456_v59   ;;  %v7263_v56 = vld [vmem:[%s13614_s5 + $0x1a0] ss:$16 sps:$4 sm:$0xff]   ;;  %v7265_v59 = vld [vmem:[%s13614_s5 + $0x184] ss:$16 sps:$4 sm:$0xff]  }
  0xd5   : > { %3767 = vmatpush2.bf16.msra.mxu0 %v7263_v56 }
  0xd6   : > { %3768 = vmatprep.subr.bf16.mxu0 %v7265_v59  ;;  %v7282_v59 = vld [vmem:[%s13614_s5 + $0x148] ss:$16 sps:$4 sm:$0xff]  }
  0xd7   : > { %v7651_v16 = vpop.permute.xlu1 %676  ;;  %v7653_v17 = vpop.permute.xlu0 %671 }
  0xd8   : > { %986 = vperm.xlu1 %7198, %v459_v4   ;;  %981 = vperm.xlu0 %7197, %v458_v13   ;;  %v7270_v13 = vld [vmem:[%s13614_s5 + $0x188] ss:$16 sps:$4 sm:$0xff]  }
  0xd9   : > { %3769 = vmatpush2.bf16.msra.mxu0 %v7269_v12  ;;  %4442 = vmatpush2.bf16.msra.mxu1 %v7270_v13  ;;  %v7283_v12 = vld [vmem:[%s13614_s5 + $0x124] ss:$16 sps:$4 sm:$0xff]   ;;  %v7285_v13 = vld [vmem:[%s13614_s5 + $0x12c] ss:$16 sps:$4 sm:$0xff]  }
  0xda   : > { %3770 = vmatprep.subr.bf16.mxu0 %v7271_v21 }
  0xdb   : > { %v7669_v36 = vpop.permute.xlu1 %686  ;;  %v7671_v37 = vpop.permute.xlu0 %681 }
  0xdc   : > { %996 = vperm.xlu1 %7198, %v461_v28   ;;  %991 = vperm.xlu0 %7197, %v460_v33   ;;  %v7273_v28 = vld [vmem:[%s13614_s5 + $0x16c] ss:$16 sps:$4 sm:$0xff]  }
  0xdd   : > { %4443 = vmatprep.subr.bf16.mxu1 %v7273_v28  ;;  %3771 = vmatpush2.bf16.msra.mxu0 %v7275_v42  ;;  %v7287_v28 = vld [vmem:[%s13614_s5 + $0x120] ss:$16 sps:$4 sm:$0xff]  }
  0xde   : > { %4444 = vmatpush2.bf16.msra.mxu1 %v7276_v43  ;;  %3772 = vmatprep.subr.bf16.mxu0 %v7277_v48  ;;  %v1400_v42 = vld [vmem:[%s7727_s24 + $0x20] sm:$0xff]  ;;  %v1399_v43 = vld [vmem:[%s7727_s24 + $0x18] sm:$0xff] }
  0xdf   : > { %v7687_v54 = vpop.permute.xlu1 %696  ;;  %v7689_v55 = vpop.permute.xlu0 %691 }
  0xe0   : > { %1006 = vperm.xlu1 %7198, %v463_v46   ;;  %1001 = vperm.xlu0 %7197, %v462_v49   ;;  %v1396_v46 = vld [vmem:[%s7727_s24] sm:$0xff]  ;;  %v7279_v49 = vld [vmem:[%s13614_s5 + $0x14c] ss:$16 sps:$4 sm:$0xff]  }
  0xe1   : > { %4445 = vmatprep.subr.bf16.mxu1 %v7279_v49 }
  0xe2   : > { %4446 = vmatpush2.bf16.msra.mxu1 %v7282_v59  ;;  %v7294_v59 = vld [vmem:[%s13614_s5 + $0x108] ss:$16 sps:$4 sm:$0xff]  }
  0xe3   : > { %v7705_v4 = vpop.permute.xlu1 %706  ;;  %v7707_v5 = vpop.permute.xlu0 %701  ;;  %4447 = vmatprep.subr.bf16.mxu1 %v7285_v13 }
  0xe4   : > { %1016 = vperm.xlu1 %7198, %v465_v58   ;;  %1011 = vperm.xlu0 %7197, %v464_v1   ;;  %v7281_v58 = vld [vmem:[%s13614_s5 + $0x140] ss:$16 sps:$4 sm:$0xff]   ;;  %v1397_v1 = vld [vmem:[%s7727_s24 + $0x8] sm:$0xff] }
  0xe5   : > { %3773 = vmatpush2.bf16.msra.mxu0 %v7281_v58  ;;  %v7293_v58 = vld [vmem:[%s13614_s5 + $0x100] ss:$16 sps:$4 sm:$0xff]  }
  0xe6   : > { %3774 = vmatprep.subr.bf16.mxu0 %v7283_v12 }
  0xe7   : > { %v7729_v32 = vpop.permute.xlu1 %716  ;;  %v7731_v33 = vpop.permute.xlu0 %711 }
  0xe8   : > { %1026 = vperm.xlu1 %7198, %v467_v20   ;;  %1021 = vperm.xlu0 %7197, %v466_v29   ;;  %v7288_v29 = vld [vmem:[%s13614_s5 + $0x128] ss:$16 sps:$4 sm:$0xff]  }
  0xe9   : > { %3775 = vmatpush2.bf16.msra.mxu0 %v7287_v28  ;;  %4448 = vmatpush2.bf16.msra.mxu1 %v7288_v29  ;;  %v1404_v28 = vld [vmem:[%s7727_s24 + $0x40] sm:$0xff]  ;;  %v1403_v29 = vld [vmem:[%s7727_s24 + $0x38] sm:$0xff] }
  0xeb   : > { %v7747_v56 = vpop.permute.xlu1 %726  ;;  %v7749_v57 = vpop.permute.xlu0 %721 }
  0xec   : > { %1527 = vperm.xlu1 %7198, %v1396_v46   ;;  %1031 = vperm.xlu0 %7197, %v468_v47   ;;  %v7289_v46 = vld [vmem:[%s13614_s5 + $0x104] ss:$16 sps:$4 sm:$0xff]   ;;  %v7291_v47 = vld [vmem:[%s13614_s5 + $0x10c] ss:$16 sps:$4 sm:$0xff]  }
  0xed   : > { %3776 = vmatprep.subr.bf16.mxu0 %v7289_v46  ;;  %4449 = vmatprep.subr.bf16.mxu1 %v7291_v47  ;;  %v1406_v46 = vld [vmem:[%s7727_s24 + $0x50] sm:$0xff]  ;;  %v1405_v47 = vld [vmem:[%s7727_s24 + $0x48] sm:$0xff] }
  0xee   : > { %3777 = vmatpush2.bf16.msra.mxu0 %v7293_v58  ;;  %4450 = vmatpush2.bf16.msra.mxu1 %v7294_v59  ;;  %v1408_v59 = vld [vmem:[%s7727_s24 + $0x60] sm:$0xff] }
  0xef   : > { %v7765_v20 = vpop.permute.xlu1 %736  ;;  %v7767_v21 = vpop.permute.xlu0 %731 }
  0xf0   : > { %1537 = vperm.xlu1 %7198, %v1398_v0   ;;  %1532 = vperm.xlu0 %7197, %v1397_v1   ;;  %v1402_v0 = vld [vmem:[%s7727_s24 + $0x30] sm:$0xff]  ;;  %v1401_v1 = vld [vmem:[%s7727_s24 + $0x28] sm:$0xff] }
  0xf3   : > { %v7783_v48 = vpop.permute.xlu1 %746  ;;  %v7785_v49 = vpop.permute.xlu0 %741 }
  0xf4   : > { %13736 = vst [vmem:[#allocation3_spill] sm:$0xff] %v7783_v48  ;;  %13737 = vst [vmem:[#allocation4_spill] sm:$0xff] %v7785_v49  ;;  %1547 = vperm.xlu1 %7198, %v1400_v42   ;;  %1542 = vperm.xlu0 %7197, %v1399_v43   ;;  %v1435_v48 = vld [vmem:[%s7727_s24 + $0x138] sm:$0xff] }
  0xf7   : > { %v7795_v12 = vpop.permute.xlu1 %756  ;;  %v7797_v13 = vpop.permute.xlu0 %751 }
  0xf8   : > { %13738 = vst [vmem:[#allocation5_spill] sm:$0xff] %v7795_v12  ;;  %13739 = vst [vmem:[#allocation6_spill] sm:$0xff] %v7797_v13  ;;  %1557 = vperm.xlu1 %7198, %v1402_v0   ;;  %1552 = vperm.xlu0 %7197, %v1401_v1   ;;  %v1407_v0 = vld [vmem:[%s7727_s24 + $0x58] sm:$0xff] }
  0xf9   : > { %v1431_v12 = vld [vmem:[%s7727_s24 + $0x118] sm:$0xff] }
  0xfb   : > { %v7801_v42 = vpop.permute.xlu1 %766  ;;  %v7803_v43 = vpop.permute.xlu0 %761 }
  0xfc   : > { %13740 = vst [vmem:[#allocation7_spill] sm:$0xff] %v7801_v42  ;;  %13741 = vst [vmem:[#allocation8_spill] sm:$0xff] %v7803_v43  ;;  %1567 = vperm.xlu1 %7198, %v1404_v28   ;;  %1562 = vperm.xlu0 %7197, %v1403_v29   ;;  %v1410_v28 = vld [vmem:[%s7727_s24 + $0x70] sm:$0xff]  ;;  %v1409_v29 = vld [vmem:[%s7727_s24 + $0x68] sm:$0xff] }
  0xff   : > { %v7807_v58 = vpop.permute.xlu1 %776  ;;  %v7809_v13 = vpop.permute.xlu0 %771 }
 0x100   : > { %13742 = vst [vmem:[#allocation9_spill] sm:$0xff] %v7807_v58  ;;  %13743 = vst [vmem:[#allocation10_spill] sm:$0xff] %v7809_v13  ;;  %1577 = vperm.xlu1 %7198, %v1406_v46   ;;  %1572 = vperm.xlu0 %7197, %v1405_v47   ;;  %v1412_v46 = vld [vmem:[%s7727_s24 + $0x80] sm:$0xff]  ;;  %v1411_v47 = vld [vmem:[%s7727_s24 + $0x78] sm:$0xff] }
 0x103   : > { %v7813_v1 = vpop.permute.xlu1 %786  ;;  %v7815_v42 = vpop.permute.xlu0 %781 }
 0x104   : > { %13744 = vst [vmem:[#allocation11_spill] sm:$0xff] %v7813_v1  ;;  %13745 = vst [vmem:[#allocation12_spill] sm:$0xff] %v7815_v42  ;;  %1587 = vperm.xlu1 %7198, %v1408_v59   ;;  %1582 = vperm.xlu0 %7197, %v1407_v0   ;;  %v1414_v59 = vld [vmem:[%s7727_s24 + $0x90] sm:$0xff]  ;;  %v1413_v0 = vld [vmem:[%s7727_s24 + $0x88] sm:$0xff] }
 0x107   : > { %v7819_v43 = vpop.permute.xlu1 %796  ;;  %v7821_v58 = vpop.permute.xlu0 %791 }
 0x108   : > { %13746 = vst [vmem:[#allocation13_spill] sm:$0xff] %v7819_v43  ;;  %13747 = vst [vmem:[#allocation14_spill] sm:$0xff] %v7821_v58  ;;  %1597 = vperm.xlu1 %7198, %v1410_v28   ;;  %1592 = vperm.xlu0 %7197, %v1409_v29   ;;  %v1416_v28 = vld [vmem:[%s7727_s24 + $0xa0] sm:$0xff]  ;;  %v1415_v29 = vld [vmem:[%s7727_s24 + $0x98] sm:$0xff] }
 0x10b   : > { %v7825_v13 = vpop.permute.xlu1 %806  ;;  %v7827_v1 = vpop.permute.xlu0 %801 }
 0x10c   : > { %13748 = vst [vmem:[#allocation15_spill] sm:$0xff] %v7825_v13  ;;  %13749 = vst [vmem:[#allocation16_spill] sm:$0xff] %v7827_v1  ;;  %1607 = vperm.xlu1 %7198, %v1412_v46   ;;  %1602 = vperm.xlu0 %7197, %v1411_v47   ;;  %v1418_v46 = vld [vmem:[%s7727_s24 + $0xb0] sm:$0xff]  ;;  %v1417_v47 = vld [vmem:[%s7727_s24 + $0xa8] sm:$0xff] }
 0x10f   : > { %v7831_v42 = vpop.permute.xlu1 %816  ;;  %v7833_v43 = vpop.permute.xlu0 %811 }
 0x110   : > { %13750 = vst [vmem:[#allocation17_spill] sm:$0xff] %v7831_v42  ;;  %13751 = vst [vmem:[#allocation18_spill] sm:$0xff] %v7833_v43  ;;  %1617 = vperm.xlu1 %7198, %v1414_v59   ;;  %1612 = vperm.xlu0 %7197, %v1413_v0   ;;  %v1420_v59 = vld [vmem:[%s7727_s24 + $0xc0] sm:$0xff]  ;;  %v1419_v0 = vld [vmem:[%s7727_s24 + $0xb8] sm:$0xff] }
 0x113   : > { %v7837_v58 = vpop.permute.xlu1 %826  ;;  %v7839_v13 = vpop.permute.xlu0 %821 }
 0x114   : > { %13752 = vst [vmem:[#allocation19_spill] sm:$0xff] %v7837_v58  ;;  %13753 = vst [vmem:[#allocation20_spill] sm:$0xff] %v7839_v13  ;;  %1627 = vperm.xlu1 %7198, %v1416_v28   ;;  %1622 = vperm.xlu0 %7197, %v1415_v29   ;;  %v1422_v28 = vld [vmem:[%s7727_s24 + $0xd0] sm:$0xff]  ;;  %v1421_v29 = vld [vmem:[%s7727_s24 + $0xc8] sm:$0xff] }
 0x117   : > { %v7843_v1 = vpop.permute.xlu1 %836  ;;  %v7845_v42 = vpop.permute.xlu0 %831 }
 0x118   : > { %13754 = vst [vmem:[#allocation21_spill] sm:$0xff] %v7843_v1  ;;  %13755 = vst [vmem:[#allocation22_spill] sm:$0xff] %v7845_v42  ;;  %1637 = vperm.xlu1 %7198, %v1418_v46   ;;  %1632 = vperm.xlu0 %7197, %v1417_v47   ;;  %v1424_v46 = vld [vmem:[%s7727_s24 + $0xe0] sm:$0xff]  ;;  %v1423_v47 = vld [vmem:[%s7727_s24 + $0xd8] sm:$0xff] }
 0x11b   : > { %v7849_v43 = vpop.permute.xlu1 %846  ;;  %v7851_v58 = vpop.permute.xlu0 %841 }
 0x11c   : > { %13756 = vst [vmem:[#allocation23_spill] sm:$0xff] %v7849_v43  ;;  %13757 = vst [vmem:[#allocation24_spill] sm:$0xff] %v7851_v58  ;;  %1647 = vperm.xlu1 %7198, %v1420_v59   ;;  %1642 = vperm.xlu0 %7197, %v1419_v0   ;;  %v1426_v59 = vld [vmem:[%s7727_s24 + $0xf0] sm:$0xff]  ;;  %v1425_v0 = vld [vmem:[%s7727_s24 + $0xe8] sm:$0xff] }
 0x11f   : > { %v7855_v13 = vpop.permute.xlu1 %856  ;;  %v7857_v1 = vpop.permute.xlu0 %851 }
 0x120   : > { %13758 = vst [vmem:[#allocation25_spill] sm:$0xff] %v7855_v13  ;;  %13759 = vst [vmem:[#allocation26_spill] sm:$0xff] %v7857_v1  ;;  %1657 = vperm.xlu1 %7198, %v1422_v28   ;;  %1652 = vperm.xlu0 %7197, %v1421_v29   ;;  %v1428_v28 = vld [vmem:[%s7727_s24 + $0x100] sm:$0xff]  ;;  %v1427_v29 = vld [vmem:[%s7727_s24 + $0xf8] sm:$0xff]  ;;  %v1130_v1 = vlaneseq }
 0x123   : > { %v7861_v42 = vpop.permute.xlu1 %866  ;;  %v7863_v43 = vpop.permute.xlu0 %861 }
 0x124   : > { %13760 = vst [vmem:[#allocation27_spill] sm:$0xff] %v7861_v42  ;;  %13761 = vst [vmem:[#allocation28_spill] sm:$0xff] %v7863_v43  ;;  %1667 = vperm.xlu1 %7198, %v1424_v46   ;;  %1662 = vperm.xlu0 %7197, %v1423_v47   ;;  %v1430_v46 = vld [vmem:[%s7727_s24 + $0x110] sm:$0xff]  ;;  %v1429_v47 = vld [vmem:[%s7727_s24 + $0x108] sm:$0xff] }
 0x127   : > { %v7867_v58 = vpop.permute.xlu1 %876  ;;  %v7869_v13 = vpop.permute.xlu0 %871 }
 0x128   : > { %13762 = vst [vmem:[#allocation29_spill] sm:$0xff] %v7867_v58  ;;  %13763 = vst [vmem:[#allocation30_spill] sm:$0xff] %v7869_v13  ;;  %1677 = vperm.xlu1 %7198, %v1426_v59   ;;  %1672 = vperm.xlu0 %7197, %v1425_v0   ;;  %v7879_v58 = vshrl.u32 %v1130_v1, 7  ;;  %v1432_v0 = vld [vmem:[%s7727_s24 + $0x120] sm:$0xff] }
 0x129   : > { %v488_v1 = vld [vmem:[%s13611_s2] sm:$0x3] }
 0x12a   : > { %13766 = vst [vmem:[#allocation33_spill] sm:$0xff] %v7879_v58 }
 0x12b   : > { %v7873_v42 = vpop.permute.xlu1 %886  ;;  %v7875_v43 = vpop.permute.xlu0 %881 }
 0x12c   : > { %13764 = vst [vmem:[#allocation31_spill] sm:$0xff] %v7873_v42  ;;  %13765 = vst [vmem:[#allocation32_spill] sm:$0xff] %v7875_v43  ;;  %1687 = vperm.xlu1 %7198, %v1428_v28   ;;  %1682 = vperm.xlu0 %7197, %v1427_v29   ;;  %v7888_v42 = vsub.s32 0, %v7879_v58  ;;  %v7891_v28 = vsub.s32 1, %v7879_v58 }
 0x12e   : > { %13769 = vst [vmem:[#allocation36_spill] sm:$0xff] %v7888_v42  ;;  %13770 = vst [vmem:[#allocation37_spill] sm:$0xff] %v7891_v28  ;;  %v7906_v43 = vrot.slane %v488_v1, %v7891_v28 }
 0x12f   : > { %v7881_v13 = vpop.permute.xlu1 %896  ;;  %v7883_v59 = vpop.permute.xlu0 %891 }
 0x130   : > { %13767 = vst [vmem:[#allocation34_spill] sm:$0xff] %v7881_v13  ;;  %13768 = vst [vmem:[#allocation35_spill] sm:$0xff] %v7883_v59  ;;  %1697 = vperm.xlu1 %7198, %v1430_v46   ;;  %1692 = vperm.xlu0 %7197, %v1429_v47   ;;  %v1434_v46 = vld [vmem:[%s7727_s24 + $0x130] sm:$0xff]  ;;  %v1433_v47 = vld [vmem:[%s7727_s24 + $0x128] sm:$0xff]  ;;  %v7903_v59 = vrot.slane %v488_v1, %v7888_v42 }
 0x131   : > { %13773 = vst [vmem:[#allocation40_spill] sm:$0xff] %v7906_v43 }
 0x132   : > { %13772 = vst [vmem:[#allocation39_spill] sm:$0xff] %v7903_v59  ;;  %v7924_v1 = vmul.f32 %v7903_v59, %v7443_v3 }
 0x133   : > { %v7893_v29 = vpop.permute.xlu1 %906  ;;  %v7898_v13 = vpop.permute.xlu0 %901 }
 0x134   : > { %13771 = vst [vmem:[#allocation38_spill] sm:$0xff] %v7893_v29  ;;  %1707 = vperm.xlu1 %7198, %v1432_v0   ;;  %1702 = vperm.xlu0 %7197, %v1431_v12   ;;  %v1436_v29 = vld [vmem:[%s7727_s24 + $0x140] sm:$0xff]  ;;  %v7916_v0 = vmul.f32 %v7903_v59, %v7441_v2  ;;  %v7920_v12 = vmul.f32 %v7906_v43, %v7441_v2 }
 0x135   : > { %v7942_v2 = vmul.f32 %v7903_v59, %v7449_v7 }
 0x136   : > { %13775 = vst [vmem:[#allocation42_spill] sm:$0xff] %v7916_v0  ;;  %13776 = vst [vmem:[#allocation43_spill] sm:$0xff] %v7920_v12  ;;  %v7938_v0 = vmul.f32 %v7906_v43, %v7447_v6  ;;  %v7946_v12 = vmul.f32 %v7906_v43, %v7449_v7  ;;  %v1438_v7 = vld [vmem:[%s7727_s24 + $0x150] sm:$0xff] }
 0x137   : > { %v7908_v58 = vpop.permute.xlu1 %916  ;;  %v7910_v49 = vpop.permute.xlu0 %911 }
 0x138   : > { %13774 = vst [vmem:[#allocation41_spill] sm:$0xff] %v7910_v49  ;;  %1717 = vperm.xlu1 %7198, %v1434_v46   ;;  %1712 = vperm.xlu0 %7197, %v1433_v47   ;;  %v7928_v49 = vmul.f32 %v7906_v43, %v7443_v3  ;;  %v7934_v47 = vmul.f32 %v7903_v59, %v7447_v6  ;;  %13779 = vst [vmem:[#allocation46_spill] sm:$0xff] %v7938_v0 }
 0x139   : > { %v7960_v6 = vmul.f32 %v7903_v59, %v7455_v11  ;;  %v7964_v0 = vmul.f32 %v7906_v43, %v7455_v11  ;;  %v1437_v11 = vld [vmem:[%s7727_s24 + $0x148] sm:$0xff] }
 0x13a   : > { %13777 = vst [vmem:[#allocation44_spill] sm:$0xff] %v7928_v49  ;;  %13778 = vst [vmem:[#allocation45_spill] sm:$0xff] %v7934_v47  ;;  %v7952_v49 = vmul.f32 %v7903_v59, %v7453_v10  ;;  %v7956_v47 = vmul.f32 %v7906_v43, %v7453_v10  ;;  %v7977_v10 = vmul.f32 %v7903_v59, %v7461_v15 }
 0x13b   : > { %v7930_v46 = vpop.permute.xlu1 %926  ;;  %v7948_v3 = vpop.permute.xlu0 %921  ;;  %13781 = vst [vmem:[#allocation48_spill] sm:$0xff] %v7960_v6  ;;  %v7981_v6 = vmul.f32 %v7906_v43, %v7461_v15 }
 0x13c   : > { %1727 = vperm.xlu1 %7198, %v1436_v29   ;;  %13780 = vst [vmem:[#allocation47_spill] sm:$0xff] %v7952_v49  ;;  %1722 = vperm.xlu0 %7197, %v1435_v48   ;;  %v7969_v29 = vmul.f32 %v7903_v59, %v7459_v14  ;;  %v7973_v49 = vmul.f32 %v7906_v43, %v7459_v14  ;;  %13783 = vst [vmem:[#allocation50_spill] sm:$0xff] %v7977_v10 }
 0x13d   : > { %13784 = vst [vmem:[#allocation51_spill] sm:$0xff] %v7981_v6  ;;  %v7986_v48 = vmul.f32 %v7903_v59, %v7465_v18  ;;  %v7994_v14 = vmul.f32 %v7903_v59, %v7467_v19  ;;  %v7998_v10 = vmul.f32 %v7906_v43, %v7467_v19  ;;  %v8004_v6 = vmul.f32 %v7903_v59, %v7471_v22 }
 0x13e   : > { %13782 = vst [vmem:[#allocation49_spill] sm:$0xff] %v7969_v29  ;;  %v7990_v29 = vmul.f32 %v7906_v43, %v7465_v18  ;;  %v8012_v18 = vmul.f32 %v7903_v59, %v7473_v23 }
 0x13f   : > { %13785 = vst [vmem:[#allocation52_spill] sm:$0xff] %v7986_v48  ;;  %13786 = vst [vmem:[#allocation53_spill] sm:$0xff] %v7994_v14  ;;  %v8000_v15 = vpop.permute.xlu1 %936  ;;  %v8008_v48 = vmul.f32 %v7906_v43, %v7471_v22  ;;  %v8016_v14 = vmul.f32 %v7906_v43, %v7473_v23  ;;  %v8018_v19 = vpop.permute.xlu0 %931  ;;  %v8030_v22 = vmul.f32 %v7903_v59, %v7479_v27  ;;  %v1440_v23 = vld [vmem:[%s7727_s24 + $0x160] sm:$0xff] }
 0x140   : > { %13787 = vst [vmem:[#allocation54_spill] sm:$0xff] %v7998_v10  ;;  %13788 = vst [vmem:[#allocation55_spill] sm:$0xff] %v8004_v6  ;;  %1737 = vperm.xlu1 %7198, %v1438_v7   ;;  %v8022_v10 = vmul.f32 %v7903_v59, %v7477_v26  ;;  %v8026_v6 = vmul.f32 %v7906_v43, %v7477_v26  ;;  %1732 = vperm.xlu0 %7197, %v1437_v11  }
 0x141   : > { %13789 = vst [vmem:[#allocation56_spill] sm:$0xff] %v8012_v18  ;;  %v8034_v18 = vmul.f32 %v7906_v43, %v7479_v27  ;;  %v8039_v7 = vmul.f32 %v7903_v59, %v7483_v30  ;;  %v8047_v26 = vmul.f32 %v7903_v59, %v7485_v31  ;;  %v1439_v27 = vld [vmem:[%s7727_s24 + $0x158] sm:$0xff]  ;;  %v8056_v11 = vmul.f32 %v7903_v59, %v7489_v34 }
 0x142   : > { %13790 = vst [vmem:[#allocation57_spill] sm:$0xff] %v8022_v10  ;;  %13791 = vst [vmem:[#allocation58_spill] sm:$0xff] %v8026_v6  ;;  %v8043_v10 = vmul.f32 %v7906_v43, %v7483_v30  ;;  %v8051_v6 = vmul.f32 %v7906_v43, %v7485_v31  ;;  %v8064_v30 = vmul.f32 %v7903_v59, %v7491_v35 }
 0x143   : > { %13792 = vst [vmem:[#allocation59_spill] sm:$0xff] %v8039_v7  ;;  %13795 = vst [vmem:[#allocation62_spill] sm:$0xff] %v8056_v11  ;;  %v8060_v7 = vmul.f32 %v7906_v43, %v7489_v34  ;;  %v8070_v31 = vpop.permute.xlu1 %946  ;;  %v8078_v11 = vmul.f32 %v7906_v43, %v7495_v38  ;;  %v8082_v34 = vmul.f32 %v7903_v59, %v7497_v39 }
 0x144   : > { %13793 = vst [vmem:[#allocation60_spill] sm:$0xff] %v8043_v10  ;;  %13794 = vst [vmem:[#allocation61_spill] sm:$0xff] %v8051_v6  ;;  %v8068_v10 = vmul.f32 %v7906_v43, %v7491_v35  ;;  %v8074_v6 = vmul.f32 %v7903_v59, %v7495_v38  ;;  %v8088_v35 = vpop.permute.xlu0 %941  ;;  %1747 = vperm.xlu1 %7198, %v1440_v23   ;;  %v8100_v38 = vmul.f32 %v7903_v59, %v7509_v45 }
 0x145   : > { %13796 = vst [vmem:[#allocation63_spill] sm:$0xff] %v8060_v7  ;;  %13799 = vst [vmem:[#allocation66_spill] sm:$0xff] %v8078_v11  ;;  %v8086_v7 = vmul.f32 %v7906_v43, %v7497_v39  ;;  %v8104_v11 = vmul.f32 %v7906_v43, %v7509_v45  ;;  %1742 = vperm.xlu0 %7197, %v1439_v27   ;;  %v1442_v39 = vld [vmem:[%s7727_s24 + $0x170] sm:$0xff]  ;;  %v8109_v23 = vmul.f32 %v7903_v59, %v7525_v52  ;;  %v1441_v45 = vld [vmem:[%s7727_s24 + $0x168] sm:$0xff] }
 0x146   : > { %13797 = vst [vmem:[#allocation64_spill] sm:$0xff] %v8068_v10  ;;  %13798 = vst [vmem:[#allocation65_spill] sm:$0xff] %v8074_v6  ;;  %v8092_v10 = vmul.f32 %v7903_v59, %v7507_v44  ;;  %v8096_v6 = vmul.f32 %v7906_v43, %v7507_v44  ;;  %v8117_v44 = vmul.f32 %v7903_v59, %v7527_v53 }
 0x147   : > { %13802 = vst [vmem:[#allocation69_spill] sm:$0xff] %v8109_v23  ;;  %v8126_v27 = vmul.f32 %v7903_v59, %v7543_v60  ;;  %v8130_v23 = vmul.f32 %v7906_v43, %v7543_v60  ;;  %v8152_v60 = vmul.f32 %v7903_v59, %v7563_v9 }
 0x148   : > { %13800 = vst [vmem:[#allocation67_spill] sm:$0xff] %v8092_v10  ;;  %13801 = vst [vmem:[#allocation68_spill] sm:$0xff] %v8096_v6  ;;  %v8113_v10 = vmul.f32 %v7906_v43, %v7525_v52  ;;  %v8121_v6 = vmul.f32 %v7906_v43, %v7527_v53  ;;  %v8134_v52 = vmul.f32 %v7903_v59, %v7545_v61  ;;  %v8140_v53 = vpop.permute.xlu1 %956  ;;  %1757 = vperm.xlu1 %7198, %v1442_v39  }
 0x149   : > { %13805 = vst [vmem:[#allocation72_spill] sm:$0xff] %v8126_v27  ;;  %13806 = vst [vmem:[#allocation73_spill] sm:$0xff] %v8130_v23  ;;  %v8148_v27 = vmul.f32 %v7906_v43, %v7561_v8  ;;  %v8156_v23 = vmul.f32 %v7906_v43, %v7563_v9  ;;  %1752 = vperm.xlu0 %7197, %v1441_v45   ;;  %v1444_v9 = vld [vmem:[%s7727_s24 + $0x180] sm:$0xff]  ;;  %v8179_v39 = vmul.f32 %v7903_v59, %v7597_v40 }
 0x14a   : > { %13803 = vst [vmem:[#allocation70_spill] sm:$0xff] %v8113_v10  ;;  %13804 = vst [vmem:[#allocation71_spill] sm:$0xff] %v8121_v6  ;;  %v8138_v10 = vmul.f32 %v7906_v43, %v7545_v61  ;;  %v8144_v6 = vmul.f32 %v7903_v59, %v7561_v8  ;;  %v8158_v61 = vpop.permute.xlu0 %951  ;;  %v8170_v8 = vmul.f32 %v7903_v59, %v7581_v25 }
 0x14b   : > { %13809 = vst [vmem:[#allocation76_spill] sm:$0xff] %v8148_v27  ;;  %v8174_v27 = vmul.f32 %v7906_v43, %v7581_v25  ;;  %13812 = vst [vmem:[#allocation79_spill] sm:$0xff] %v8179_v39  ;;  %v1443_v25 = vld [vmem:[%s7727_s24 + $0x178] sm:$0xff]  ;;  %v8196_v45 = vmul.f32 %v7903_v59, %v7615_v50  ;;  %v8200_v39 = vmul.f32 %v7906_v43, %v7615_v50 }
 0x14c   : > { %13807 = vst [vmem:[#allocation74_spill] sm:$0xff] %v8138_v10  ;;  %13808 = vst [vmem:[#allocation75_spill] sm:$0xff] %v8144_v6  ;;  %v8162_v10 = vmul.f32 %v7903_v59, %v7579_v24  ;;  %v8166_v6 = vmul.f32 %v7906_v43, %v7579_v24  ;;  %v8187_v24 = vmul.f32 %v7903_v59, %v7599_v41  ;;  %1767 = vperm.xlu1 %7198, %v1444_v9  }
 0x14d   : > { %13815 = vst [vmem:[#allocation82_spill] sm:$0xff] %v8196_v45  ;;  %13816 = vst [vmem:[#allocation83_spill] sm:$0xff] %v8200_v39  ;;  %v8218_v45 = vmul.f32 %v7906_v43, %v7633_v62  ;;  %v8222_v50 = vmul.f32 %v7903_v59, %v7635_v63  ;;  %v8226_v39 = vmul.f32 %v7906_v43, %v7635_v63  ;;  %1762 = vperm.xlu0 %7197, %v1443_v25   ;;  %v1446_v63 = vld [vmem:[%s7727_s24 + $0x190] sm:$0xff]  ;;  %v1524_v25 = vld [vmem:[%s13612_s3] sm:$0x3] }
 0x14e   : > { %13810 = vst [vmem:[#allocation77_spill] sm:$0xff] %v8162_v10  ;;  %13811 = vst [vmem:[#allocation78_spill] sm:$0xff] %v8166_v6  ;;  %v8183_v10 = vmul.f32 %v7906_v43, %v7597_v40  ;;  %v8191_v6 = vmul.f32 %v7906_v43, %v7599_v41  ;;  %v8204_v40 = vmul.f32 %v7903_v59, %v7617_v51  ;;  %v8210_v41 = vpop.permute.xlu1 %966 }
 0x14f   : > { %13820 = vst [vmem:[#allocation87_spill] sm:$0xff] %v8218_v45  ;;  %13821 = vst [vmem:[#allocation88_spill] sm:$0xff] %v8222_v50  ;;  %v8244_v45 = vmul.f32 %v7906_v43, %v7653_v17  ;;  %v8249_v9 = vmul.f32 %v7903_v59, %v7669_v36 }
 0x150   : > { %13813 = vst [vmem:[#allocation80_spill] sm:$0xff] %v8183_v10  ;;  %13814 = vst [vmem:[#allocation81_spill] sm:$0xff] %v8191_v6  ;;  %v8208_v10 = vmul.f32 %v7906_v43, %v7617_v51  ;;  %v8214_v6 = vmul.f32 %v7903_v59, %v7633_v62  ;;  %v8228_v51 = vpop.permute.xlu0 %961  ;;  %v8240_v62 = vmul.f32 %v7903_v59, %v7653_v17  ;;  %v1445_v17 = vld [vmem:[%s7727_s24 + $0x188] sm:$0xff]  ;;  %1777 = vperm.xlu1 %7198, %v1446_v63  }
 0x151   : > { %13817 = vst [vmem:[#allocation84_spill] sm:$0xff] %v8204_v40  ;;  %13822 = vst [vmem:[#allocation89_spill] sm:$0xff] %v8226_v39  ;;  %1772 = vperm.xlu0 %7197, %v1445_v17   ;;  %v8327_v63 = vmul.f32 %v7906_v43, %v7731_v33 }
 0x152   : > { %13818 = vst [vmem:[#allocation85_spill] sm:$0xff] %v8208_v10  ;;  %13819 = vst [vmem:[#allocation86_spill] sm:$0xff] %v8214_v6  ;;  %v8232_v10 = vmul.f32 %v7903_v59, %v7651_v16  ;;  %v8236_v6 = vmul.f32 %v7906_v43, %v7651_v16  ;;  %v8257_v16 = vmul.f32 %v7903_v59, %v7671_v37 }
 0x153   : > { %13825 = vst [vmem:[#allocation92_spill] sm:$0xff] %v8240_v62  ;;  %13826 = vst [vmem:[#allocation93_spill] sm:$0xff] %v8244_v45 }
 0x154   : > { %13823 = vst [vmem:[#allocation90_spill] sm:$0xff] %v8232_v10  ;;  %13824 = vst [vmem:[#allocation91_spill] sm:$0xff] %v8236_v6  ;;  %v8253_v10 = vmul.f32 %v7906_v43, %v7669_v36  ;;  %v8261_v6 = vmul.f32 %v7906_v43, %v7671_v37  ;;  %v8273_v36 = vmul.f32 %v7906_v43, %v7687_v54 }
 0x155   : > { %13827 = vst [vmem:[#allocation94_spill] sm:$0xff] %v8249_v9  ;;  %13829 = vst [vmem:[#allocation96_spill] sm:$0xff] %v8257_v16  ;;  %v8269_v9 = vmul.f32 %v7903_v59, %v7687_v54  ;;  %v8281_v37 = vmul.f32 %v7906_v43, %v7689_v55  ;;  %v2688_v16 = vld [vmem:[%s13613_s4] sm:$0x3]  ;;  %v8294_v54 = vmul.f32 %v7906_v43, %v7705_v4 }
 0x156   : > { %13828 = vst [vmem:[#allocation95_spill] sm:$0xff] %v8253_v10  ;;  %13830 = vst [vmem:[#allocation97_spill] sm:$0xff] %v8261_v6  ;;  %v8277_v10 = vmul.f32 %v7903_v59, %v7689_v55  ;;  %v8283_v6 = vpop.permute.xlu1 %976  ;;  %v8302_v55 = vmul.f32 %v7906_v43, %v7707_v5  ;;  %v8334_v17 = vrot.slane %v2688_v16, %v7891_v28 }
 0x157   : > { %13831 = vst [vmem:[#allocation98_spill] sm:$0xff] %v8269_v9  ;;  %13832 = vst [vmem:[#allocation99_spill] sm:$0xff] %v8273_v36  ;;  %v8290_v9 = vmul.f32 %v7903_v59, %v7705_v4  ;;  %v8298_v36 = vmul.f32 %v7903_v59, %v7707_v5  ;;  %v1448_v4 = vld [vmem:[%s7727_s24 + $0x1a0] sm:$0xff]  ;;  %v8323_v5 = vmul.f32 %v7903_v59, %v7731_v33 }
 0x158   : > { %13833 = vst [vmem:[#allocation100_spill] sm:$0xff] %v8277_v10  ;;  %13834 = vst [vmem:[#allocation101_spill] sm:$0xff] %v8281_v37  ;;  %v8304_v37 = vpop.permute.xlu0 %971  ;;  %v8308_v10 = vmul.f32 %v7903_v59, %v7729_v32  ;;  %v8346_v33 = vmul.f32 %v7903_v59, %v7749_v57  ;;  %1787 = vperm.xlu1 %7198, %v1448_v4  }
 0x159   : > { %13835 = vst [vmem:[#allocation102_spill] sm:$0xff] %v8290_v9  ;;  %13836 = vst [vmem:[#allocation103_spill] sm:$0xff] %v8294_v54  ;;  %v8312_v9 = vmul.f32 %v7906_v43, %v7729_v32  ;;  %v8316_v54 = vrot.slane %v1524_v25, %v7888_v42  ;;  %v8331_v32 = vrot.slane %v2688_v16, %v7888_v42 }
 0x15a   : > { %13837 = vst [vmem:[#allocation104_spill] sm:$0xff] %v8298_v36  ;;  %13838 = vst [vmem:[#allocation105_spill] sm:$0xff] %v8302_v55  ;;  %v8319_v36 = vrot.slane %v1524_v25, %v7891_v28  ;;  %v8342_v25 = vmul.f32 %v7906_v43, %v7747_v56  ;;  %v8350_v42 = vmul.f32 %v7906_v43, %v7749_v57 }
 0x15b   : > { %13839 = vst [vmem:[#allocation106_spill] sm:$0xff] %v8308_v10  ;;  %13840 = vst [vmem:[#allocation107_spill] sm:$0xff] %v8312_v9  ;;  %v1447_v10 = vld [vmem:[%s7727_s24 + $0x198] sm:$0xff]  ;;  %v8338_v9 = vmul.f32 %v7903_v59, %v7747_v56  ;;  %v8356_v16 = vmul.f32 %v7903_v59, %v7765_v20  ;;  %v8360_v28 = vmul.f32 %v7906_v43, %v7765_v20  ;;  %v13855_v20 = vld [vmem:[#allocation4_spill] sm:$0xff] }
 0x15c   : > { %13841 = vst [vmem:[#allocation108_spill] sm:$0xff] %v8323_v5  ;;  %13842 = vst [vmem:[#allocation109_spill] sm:$0xff] %v8327_v63  ;;  %v8352_v63 = vpop.permute.xlu1 %986  ;;  %v8364_v56 = vmul.f32 %v7903_v59, %v7767_v21  ;;  %v8370_v57 = vpop.permute.xlu0 %981  ;;  %1782 = vperm.xlu0 %7197, %v1447_v10  }
 0x15d   : > { %13843 = vst [vmem:[#allocation110_spill] sm:$0xff] %v8334_v17  ;;  %13844 = vst [vmem:[#allocation111_spill] sm:$0xff] %v8338_v9  ;;  %v13852_v9 = vld [vmem:[#allocation3_spill] sm:$0xff] }
 0x15e   : > { %13845 = vst [vmem:[#allocation112_spill] sm:$0xff] %v8342_v25  ;;  %13846 = vst [vmem:[#allocation113_spill] sm:$0xff] %v8346_v33  ;;  %v8368_v25 = vmul.f32 %v7906_v43, %v7767_v21  ;;  %v1450_v21 = vld [vmem:[%s7727_s24 + $0x1b0] sm:$0xff] }
 0x15f   : > { %13847 = vst [vmem:[#allocation114_spill] sm:$0xff] %v8350_v42  ;;  %13848 = vst [vmem:[#allocation115_spill] sm:$0xff] %v8356_v16  ;;  %v8374_v42 = vmul.f32 %v7903_v59, %v13852_v9  ;;  %v8378_v16 = vmul.f32 %v7906_v43, %v13852_v9  ;;  %v13861_v9 = vld [vmem:[#allocation6_spill] sm:$0xff]  ;;  %1797 = vperm.xlu1 %7198, %v1450_v21  }
 0x160   : > { %13849 = vst [vmem:[#allocation116_spill] sm:$0xff] %v8360_v28  ;;  %13850 = vst [vmem:[#allocation117_spill] sm:$0xff] %v8364_v56  ;;  %v8382_v28 = vmul.f32 %v7903_v59, %v13855_v20  ;;  %v8386_v56 = vmul.f32 %v7906_v43, %v13855_v20  ;;  %v1449_v20 = vld [vmem:[%s7727_s24 + $0x1a8] sm:$0xff] }
 0x161   : > { %13851 = vst [vmem:[#allocation118_spill] sm:$0xff] %v8368_v25  ;;  %13853 = vst [vmem:[#allocation3_spill] sm:$0xff] %v8374_v42  ;;  %v13858_v25 = vld [vmem:[#allocation5_spill] sm:$0xff]  ;;  %1792 = vperm.xlu0 %7197, %v1449_v20  }
 0x162   : > { %13854 = vst [vmem:[#allocation119_spill] sm:$0xff] %v8378_v16  ;;  %13856 = vst [vmem:[#allocation4_spill] sm:$0xff] %v8382_v28  ;;  %v8391_v4 = vmul.f32 %v7903_v59, %v13858_v25  ;;  %v8395_v42 = vmul.f32 %v7906_v43, %v13858_v25  ;;  %v8399_v16 = vmul.f32 %v7903_v59, %v13861_v9  ;;  %v13867_v25 = vld [vmem:[#allocation8_spill] sm:$0xff] }
 0x163   : > { %13857 = vst [vmem:[#allocation120_spill] sm:$0xff] %v8386_v56  ;;  %v8403_v28 = vmul.f32 %v7906_v43, %v13861_v9  ;;  %v13864_v56 = vld [vmem:[#allocation7_spill] sm:$0xff]  ;;  %v8422_v9 = vpop.permute.xlu1 %996 }
 0x164   : > { %13859 = vst [vmem:[#allocation5_spill] sm:$0xff] %v8391_v4  ;;  %13860 = vst [vmem:[#allocation121_spill] sm:$0xff] %v8395_v42  ;;  %v8408_v10 = vmul.f32 %v7903_v59, %v13864_v56  ;;  %v8412_v4 = vmul.f32 %v7906_v43, %v13864_v56  ;;  %v8416_v42 = vmul.f32 %v7903_v59, %v13867_v25  ;;  %v13873_v56 = vld [vmem:[#allocation10_spill] sm:$0xff] }
 0x165   : > { %13862 = vst [vmem:[#allocation6_spill] sm:$0xff] %v8399_v16  ;;  %13863 = vst [vmem:[#allocation122_spill] sm:$0xff] %v8403_v28  ;;  %v8420_v16 = vmul.f32 %v7906_v43, %v13867_v25  ;;  %v13870_v28 = vld [vmem:[#allocation9_spill] sm:$0xff]  ;;  %v8440_v25 = vpop.permute.xlu0 %991 }
 0x166   : > { %13865 = vst [vmem:[#allocation7_spill] sm:$0xff] %v8408_v10  ;;  %13866 = vst [vmem:[#allocation123_spill] sm:$0xff] %v8412_v4  ;;  %v8426_v33 = vmul.f32 %v7903_v59, %v13870_v28  ;;  %v8430_v10 = vmul.f32 %v7906_v43, %v13870_v28  ;;  %v8434_v4 = vmul.f32 %v7903_v59, %v13873_v56  ;;  %v13879_v28 = vld [vmem:[#allocation12_spill] sm:$0xff] }
 0x167   : > { %13868 = vst [vmem:[#allocation8_spill] sm:$0xff] %v8416_v42  ;;  %13869 = vst [vmem:[#allocation124_spill] sm:$0xff] %v8420_v16  ;;  %v8438_v42 = vmul.f32 %v7906_v43, %v13873_v56  ;;  %v13876_v16 = vld [vmem:[#allocation11_spill] sm:$0xff] }
 0x168   : > { %13871 = vst [vmem:[#allocation9_spill] sm:$0xff] %v8426_v33  ;;  %13872 = vst [vmem:[#allocation125_spill] sm:$0xff] %v8430_v10  ;;  %v8444_v5 = vmul.f32 %v7903_v59, %v13876_v16  ;;  %v8448_v33 = vmul.f32 %v7906_v43, %v13876_v16  ;;  %v8452_v10 = vmul.f32 %v7903_v59, %v13879_v28  ;;  %v1452_v56 = vld [vmem:[%s7727_s24 + $0x1c0] sm:$0xff] }
 0x169   : > { %13874 = vst [vmem:[#allocation10_spill] sm:$0xff] %v8434_v4  ;;  %13875 = vst [vmem:[#allocation126_spill] sm:$0xff] %v8438_v42  ;;  %v8456_v4 = vmul.f32 %v7906_v43, %v13879_v28  ;;  %v13882_v42 = vld [vmem:[#allocation13_spill] sm:$0xff]  ;;  %v13885_v16 = vld [vmem:[#allocation14_spill] sm:$0xff]  ;;  %1807 = vperm.xlu1 %7198, %v1452_v56  }
 0x16a   : > { %13877 = vst [vmem:[#allocation11_spill] sm:$0xff] %v8444_v5  ;;  %13878 = vst [vmem:[#allocation127_spill] sm:$0xff] %v8448_v33  ;;  %v8461_v21 = vmul.f32 %v7903_v59, %v13882_v42  ;;  %v8465_v5 = vmul.f32 %v7906_v43, %v13882_v42  ;;  %v8469_v33 = vmul.f32 %v7903_v59, %v13885_v16  ;;  %v1451_v28 = vld [vmem:[%s7727_s24 + $0x1b8] sm:$0xff]  ;;  %v13891_v42 = vld [vmem:[#allocation16_spill] sm:$0xff] }
 0x16b   : > { %13880 = vst [vmem:[#allocation12_spill] sm:$0xff] %v8452_v10  ;;  %13881 = vst [vmem:[#allocation128_spill] sm:$0xff] %v8456_v4  ;;  %v8473_v10 = vmul.f32 %v7906_v43, %v13885_v16  ;;  %v13888_v4 = vld [vmem:[#allocation15_spill] sm:$0xff]  ;;  %v8492_v16 = vpop.permute.xlu1 %1006  ;;  %1802 = vperm.xlu0 %7197, %v1451_v28  }
 0x16c   : > { %13883 = vst [vmem:[#allocation13_spill] sm:$0xff] %v8461_v21  ;;  %13884 = vst [vmem:[#allocation129_spill] sm:$0xff] %v8465_v5  ;;  %v8478_v20 = vmul.f32 %v7903_v59, %v13888_v4  ;;  %v8482_v21 = vmul.f32 %v7906_v43, %v13888_v4  ;;  %v8486_v5 = vmul.f32 %v7903_v59, %v13891_v42  ;;  %v13897_v4 = vld [vmem:[#allocation18_spill] sm:$0xff] }
 0x16d   : > { %13886 = vst [vmem:[#allocation14_spill] sm:$0xff] %v8469_v33  ;;  %13887 = vst [vmem:[#allocation130_spill] sm:$0xff] %v8473_v10  ;;  %v8490_v33 = vmul.f32 %v7906_v43, %v13891_v42  ;;  %v13894_v10 = vld [vmem:[#allocation17_spill] sm:$0xff]  ;;  %v8510_v42 = vpop.permute.xlu0 %1001 }
 0x16e   : > { %13889 = vst [vmem:[#allocation15_spill] sm:$0xff] %v8478_v20  ;;  %13890 = vst [vmem:[#allocation131_spill] sm:$0xff] %v8482_v21  ;;  %v8496_v55 = vmul.f32 %v7903_v59, %v13894_v10  ;;  %v8500_v20 = vmul.f32 %v7906_v43, %v13894_v10  ;;  %v8504_v21 = vmul.f32 %v7903_v59, %v13897_v4  ;;  %v13903_v10 = vld [vmem:[#allocation20_spill] sm:$0xff] }
 0x16f   : > { %13892 = vst [vmem:[#allocation16_spill] sm:$0xff] %v8486_v5  ;;  %13893 = vst [vmem:[#allocation132_spill] sm:$0xff] %v8490_v33  ;;  %v8508_v5 = vmul.f32 %v7906_v43, %v13897_v4  ;;  %v13900_v33 = vld [vmem:[#allocation19_spill] sm:$0xff]  ;;  %v1454_v4 = vld [vmem:[%s7727_s24 + $0x1d0] sm:$0xff] }
 0x170   : > { %13895 = vst [vmem:[#allocation17_spill] sm:$0xff] %v8496_v55  ;;  %13896 = vst [vmem:[#allocation133_spill] sm:$0xff] %v8500_v20  ;;  %v8514_v45 = vmul.f32 %v7903_v59, %v13900_v33  ;;  %v8518_v55 = vmul.f32 %v7906_v43, %v13900_v33  ;;  %v8522_v20 = vmul.f32 %v7903_v59, %v13903_v10  ;;  %v13909_v33 = vld [vmem:[#allocation22_spill] sm:$0xff]  ;;  %1817 = vperm.xlu1 %7198, %v1454_v4  }
 0x171   : > { %13898 = vst [vmem:[#allocation18_spill] sm:$0xff] %v8504_v21  ;;  %13899 = vst [vmem:[#allocation134_spill] sm:$0xff] %v8508_v5  ;;  %v8526_v21 = vmul.f32 %v7906_v43, %v13903_v10  ;;  %v13906_v5 = vld [vmem:[#allocation21_spill] sm:$0xff]  ;;  %v1453_v10 = vld [vmem:[%s7727_s24 + $0x1c8] sm:$0xff] }
 0x172   : > { %13901 = vst [vmem:[#allocation19_spill] sm:$0xff] %v8514_v45  ;;  %13902 = vst [vmem:[#allocation135_spill] sm:$0xff] %v8518_v55  ;;  %v8531_v56 = vmul.f32 %v7903_v59, %v13906_v5  ;;  %v8535_v45 = vmul.f32 %v7906_v43, %v13906_v5  ;;  %v8539_v55 = vmul.f32 %v7903_v59, %v13909_v33  ;;  %v13915_v5 = vld [vmem:[#allocation24_spill] sm:$0xff]  ;;  %1812 = vperm.xlu0 %7197, %v1453_v10  }
 0x173   : > { %13904 = vst [vmem:[#allocation20_spill] sm:$0xff] %v8522_v20  ;;  %13905 = vst [vmem:[#allocation136_spill] sm:$0xff] %v8526_v21  ;;  %v8543_v20 = vmul.f32 %v7906_v43, %v13909_v33  ;;  %v13912_v21 = vld [vmem:[#allocation23_spill] sm:$0xff]  ;;  %v8562_v33 = vpop.permute.xlu1 %1016 }
 0x174   : > { %13907 = vst [vmem:[#allocation21_spill] sm:$0xff] %v8531_v56  ;;  %13908 = vst [vmem:[#allocation137_spill] sm:$0xff] %v8535_v45  ;;  %v8548_v28 = vmul.f32 %v7903_v59, %v13912_v21  ;;  %v8552_v56 = vmul.f32 %v7906_v43, %v13912_v21  ;;  %v8556_v45 = vmul.f32 %v7903_v59, %v13915_v5  ;;  %v13921_v21 = vld [vmem:[#allocation26_spill] sm:$0xff] }
 0x175   : > { %13910 = vst [vmem:[#allocation22_spill] sm:$0xff] %v8539_v55  ;;  %13911 = vst [vmem:[#allocation138_spill] sm:$0xff] %v8543_v20  ;;  %v8560_v55 = vmul.f32 %v7906_v43, %v13915_v5  ;;  %v13918_v20 = vld [vmem:[#allocation25_spill] sm:$0xff]  ;;  %v8580_v5 = vpop.permute.xlu0 %1011 }
 0x176   : > { %13913 = vst [vmem:[#allocation23_spill] sm:$0xff] %v8548_v28  ;;  %13914 = vst [vmem:[#allocation139_spill] sm:$0xff] %v8552_v56  ;;  %v8566_v62 = vmul.f32 %v7903_v59, %v13918_v20  ;;  %v8570_v28 = vmul.f32 %v7906_v43, %v13918_v20  ;;  %v8574_v56 = vmul.f32 %v7903_v59, %v13921_v21  ;;  %v13927_v20 = vld [vmem:[#allocation28_spill] sm:$0xff] }
 0x177   : > { %13916 = vst [vmem:[#allocation24_spill] sm:$0xff] %v8556_v45  ;;  %13917 = vst [vmem:[#allocation140_spill] sm:$0xff] %v8560_v55  ;;  %v8578_v45 = vmul.f32 %v7906_v43, %v13921_v21  ;;  %v13924_v55 = vld [vmem:[#allocation27_spill] sm:$0xff] }
 0x178   : > { %13919 = vst [vmem:[#allocation25_spill] sm:$0xff] %v8566_v62  ;;  %13920 = vst [vmem:[#allocation141_spill] sm:$0xff] %v8570_v28  ;;  %v8584_v39 = vmul.f32 %v7903_v59, %v13924_v55  ;;  %v8588_v62 = vmul.f32 %v7906_v43, %v13924_v55  ;;  %v8592_v28 = vmul.f32 %v7903_v59, %v13927_v20  ;;  %v1456_v21 = vld [vmem:[%s7727_s24 + $0x1e0] sm:$0xff] }
 0x179   : > { %13922 = vst [vmem:[#allocation26_spill] sm:$0xff] %v8574_v56  ;;  %13923 = vst [vmem:[#allocation142_spill] sm:$0xff] %v8578_v45  ;;  %v8596_v56 = vmul.f32 %v7906_v43, %v13927_v20  ;;  %v13930_v45 = vld [vmem:[#allocation29_spill] sm:$0xff]  ;;  %v13933_v55 = vld [vmem:[#allocation30_spill] sm:$0xff]  ;;  %1827 = vperm.xlu1 %7198, %v1456_v21   ;;  %v8671_v21 = vmul.f32 %v7903_v59, %v7908_v58 }
 0x17a   : > { %13925 = vst [vmem:[#allocation27_spill] sm:$0xff] %v8584_v39  ;;  %13926 = vst [vmem:[#allocation143_spill] sm:$0xff] %v8588_v62  ;;  %v8601_v4 = vmul.f32 %v7903_v59, %v13930_v45  ;;  %v8605_v39 = vmul.f32 %v7906_v43, %v13930_v45  ;;  %v8609_v62 = vmul.f32 %v7903_v59, %v13933_v55  ;;  %v1455_v20 = vld [vmem:[%s7727_s24 + $0x1d8] sm:$0xff]  ;;  %v13939_v45 = vld [vmem:[#allocation32_spill] sm:$0xff] }
 0x17b   : > { %13928 = vst [vmem:[#allocation28_spill] sm:$0xff] %v8592_v28  ;;  %13929 = vst [vmem:[#allocation144_spill] sm:$0xff] %v8596_v56  ;;  %v8613_v28 = vmul.f32 %v7906_v43, %v13933_v55  ;;  %v13936_v56 = vld [vmem:[#allocation31_spill] sm:$0xff]  ;;  %v8632_v55 = vpop.permute.xlu1 %1026  ;;  %1822 = vperm.xlu0 %7197, %v1455_v20   ;;  %v8688_v20 = vmul.f32 %v7903_v59, %v7930_v46 }
 0x17c   : > { %13931 = vst [vmem:[#allocation29_spill] sm:$0xff] %v8601_v4  ;;  %13932 = vst [vmem:[#allocation145_spill] sm:$0xff] %v8605_v39  ;;  %v8618_v10 = vmul.f32 %v7903_v59, %v13936_v56  ;;  %v8622_v4 = vmul.f32 %v7906_v43, %v13936_v56  ;;  %v8626_v39 = vmul.f32 %v7903_v59, %v13939_v45  ;;  %v13945_v56 = vld [vmem:[#allocation35_spill] sm:$0xff] }
 0x17d   : > { %13934 = vst [vmem:[#allocation30_spill] sm:$0xff] %v8609_v62  ;;  %13935 = vst [vmem:[#allocation146_spill] sm:$0xff] %v8613_v28  ;;  %v8630_v62 = vmul.f32 %v7906_v43, %v13939_v45  ;;  %v13942_v28 = vld [vmem:[#allocation34_spill] sm:$0xff]  ;;  %v8650_v45 = vpop.permute.xlu0 %1021 }
 0x17e   : > { %13937 = vst [vmem:[#allocation31_spill] sm:$0xff] %v8618_v10  ;;  %13938 = vst [vmem:[#allocation147_spill] sm:$0xff] %v8622_v4  ;;  %v8636_v50 = vmul.f32 %v7903_v59, %v13942_v28  ;;  %v8640_v10 = vmul.f32 %v7906_v43, %v13942_v28  ;;  %v8644_v4 = vmul.f32 %v7903_v59, %v13945_v56 }
 0x17f   : > { %13940 = vst [vmem:[#allocation32_spill] sm:$0xff] %v8626_v39  ;;  %13941 = vst [vmem:[#allocation148_spill] sm:$0xff] %v8630_v62  ;;  %v8648_v39 = vmul.f32 %v7906_v43, %v13945_v56  ;;  %v13948_v62 = vld [vmem:[#allocation38_spill] sm:$0xff]  ;;  %v8662_v28 = vmul.f32 %v7903_v59, %v7898_v13  ;;  %v1458_v56 = vld [vmem:[%s7727_s24 + $0x1f0] sm:$0xff] }
 0x180   : > { %13943 = vst [vmem:[#allocation34_spill] sm:$0xff] %v8636_v50  ;;  %13944 = vst [vmem:[#allocation149_spill] sm:$0xff] %v8640_v10  ;;  %v8654_v40 = vmul.f32 %v7903_v59, %v13948_v62  ;;  %v8658_v50 = vmul.f32 %v7906_v43, %v13948_v62  ;;  %v8666_v10 = vmul.f32 %v7906_v43, %v7898_v13  ;;  %v13955_v62 = vld [vmem:[#allocation41_spill] sm:$0xff]  ;;  %v1457_v13 = vld [vmem:[%s7727_s24 + $0x1e8] sm:$0xff]  ;;  %1837 = vperm.xlu1 %7198, %v1458_v56  }
 0x181   : > { %13946 = vst [vmem:[#allocation35_spill] sm:$0xff] %v8644_v4  ;;  %13947 = vst [vmem:[#allocation150_spill] sm:$0xff] %v8648_v39  ;;  %v8683_v39 = vmul.f32 %v7906_v43, %v13955_v62  ;;  %1832 = vperm.xlu0 %7197, %v1457_v13   ;;  %v8733_v56 = vmul.f32 %v7903_v59, %v8088_v35  ;;  %v8752_v13 = vmul.f32 %v7903_v59, %v8158_v61  ;;  %v14078_v4 = vld [vmem:[#allocation112_spill] sm:$0xff] }
 0x182   : > { %13949 = vst [vmem:[#allocation38_spill] sm:$0xff] %v8654_v40  ;;  %13950 = vst [vmem:[#allocation151_spill] sm:$0xff] %v8658_v50  ;;  %v8675_v40 = vmul.f32 %v7906_v43, %v7908_v58  ;;  %v8679_v50 = vmul.f32 %v7903_v59, %v13955_v62  ;;  %v8696_v58 = vmul.f32 %v7903_v59, %v7948_v3  ;;  %v1528_v62 = vpop.permute.xlu1 %1527 }
 0x183   : > { %13951 = vst [vmem:[#allocation152_spill] sm:$0xff] %v8662_v28  ;;  %13952 = vst [vmem:[#allocation153_spill] sm:$0xff] %v8666_v10 }
 0x184   : > { %13953 = vst [vmem:[#allocation154_spill] sm:$0xff] %v8671_v21  ;;  %13954 = vst [vmem:[#allocation155_spill] sm:$0xff] %v8675_v40  ;;  %v8692_v21 = vmul.f32 %v7906_v43, %v7930_v46  ;;  %v8700_v40 = vmul.f32 %v7906_v43, %v7948_v3  ;;  %v2176_v46 = vmul.f32 %v8316_v54, %v1528_v62 }
 0x185   : > { %13956 = vst [vmem:[#allocation41_spill] sm:$0xff] %v8679_v50  ;;  %13957 = vst [vmem:[#allocation156_spill] sm:$0xff] %v8683_v39  ;;  %v8704_v39 = vmul.f32 %v7903_v59, %v8000_v15  ;;  %v8712_v50 = vpop.permute.xlu0 %1031  ;;  %v8716_v3 = vmul.f32 %v7903_v59, %v8018_v19 }
 0x186   : > { %13958 = vst [vmem:[#allocation157_spill] sm:$0xff] %v8688_v20  ;;  %13959 = vst [vmem:[#allocation158_spill] sm:$0xff] %v8692_v21  ;;  %v8708_v20 = vmul.f32 %v7906_v43, %v8000_v15  ;;  %v2177_v21 = vmul.f32 %v8319_v36, %v1528_v62  ;;  %v8728_v15 = vmul.f32 %v7906_v43, %v8070_v31  ;;  %v1460_v62 = vld [vmem:[%s7727_s24 + $0x200] sm:$0xff] }
 0x187   : > { %13960 = vst [vmem:[#allocation159_spill] sm:$0xff] %v8696_v58  ;;  %13961 = vst [vmem:[#allocation160_spill] sm:$0xff] %v8700_v40  ;;  %v8720_v40 = vmul.f32 %v7906_v43, %v8018_v19  ;;  %v2432_v19 = vadd.f32 %v2176_v46, %v7924_v1  ;;  %v1459_v58 = vld [vmem:[%s7727_s24 + $0x1f8] sm:$0xff]  ;;  %v1538_v1 = vpop.permute.xlu1 %1537  ;;  %1847 = vperm.xlu1 %7198, %v1460_v62   ;;  %v8788_v62 = vmul.f32 %v7903_v59, %v8304_v37 }
 0x188   : > { %13962 = vst [vmem:[#allocation161_spill] sm:$0xff] %v8704_v39  ;;  %13963 = vst [vmem:[#allocation162_spill] sm:$0xff] %v8708_v20  ;;  %v8724_v39 = vmul.f32 %v7903_v59, %v8070_v31  ;;  %v8737_v20 = vmul.f32 %v7906_v43, %v8088_v35  ;;  %v8748_v31 = vmul.f32 %v7906_v43, %v8140_v53  ;;  %1842 = vperm.xlu0 %7197, %v1459_v58  }
 0x189   : > { %13964 = vst [vmem:[#allocation163_spill] sm:$0xff] %v8716_v3  ;;  %13965 = vst [vmem:[#allocation164_spill] sm:$0xff] %v8720_v40  ;;  %v13970_v40 = vld [vmem:[#allocation44_spill] sm:$0xff]  ;;  %v8756_v35 = vmul.f32 %v7906_v43, %v8158_v61  ;;  %v2181_v46 = vmul.f32 %v8319_v36, %v1538_v1  ;;  %v8773_v61 = vmul.f32 %v7906_v43, %v8228_v51 }
 0x18a   : > { %13966 = vst [vmem:[#allocation165_spill] sm:$0xff] %v8724_v39  ;;  %13967 = vst [vmem:[#allocation166_spill] sm:$0xff] %v8728_v15  ;;  %v2433_v3 = vadd.f32 %v2177_v21, %v13970_v40  ;;  %v8744_v39 = vmul.f32 %v7903_v59, %v8140_v53  ;;  %v8760_v40 = vmul.f32 %v7903_v59, %v8210_v41 }
 0x18b   : > { %13968 = vst [vmem:[#allocation167_spill] sm:$0xff] %v8733_v56  ;;  %13969 = vst [vmem:[#allocation168_spill] sm:$0xff] %v8737_v20  ;;  %v8764_v21 = vmul.f32 %v7906_v43, %v8210_v41  ;;  %v8768_v53 = vmul.f32 %v7903_v59, %v8228_v51  ;;  %v8777_v15 = vmul.f32 %v7903_v59, %v8283_v6  ;;  %v1461_v51 = vld [vmem:[%s7727_s24 + $0x208] sm:$0xff] }
 0x18c   : > { %13971 = vst [vmem:[#allocation44_spill] sm:$0xff] %v8744_v39  ;;  %13972 = vst [vmem:[#allocation169_spill] sm:$0xff] %v8748_v31  ;;  %v1533_v31 = vpop.permute.xlu0 %1532  ;;  %v8784_v39 = vmul.f32 %v7906_v43, %v8283_v6  ;;  %v8799_v58 = vmul.f32 %v7903_v59, %v8352_v63  ;;  %1852 = vperm.xlu0 %7197, %v1461_v51  }
 0x18d   : > { %13973 = vst [vmem:[#allocation170_spill] sm:$0xff] %v8752_v13  ;;  %13974 = vst [vmem:[#allocation171_spill] sm:$0xff] %v8756_v35  ;;  %v2179_v41 = vmul.f32 %v8319_v36, %v1533_v31  ;;  %v8795_v35 = vmul.f32 %v7906_v43, %v8304_v37  ;;  %v2180_v37 = vmul.f32 %v8316_v54, %v1538_v1  ;;  %v13989_v13 = vld [vmem:[#allocation46_spill] sm:$0xff] }
 0x18e   : > { %13975 = vst [vmem:[#allocation172_spill] sm:$0xff] %v8760_v40  ;;  %13976 = vst [vmem:[#allocation173_spill] sm:$0xff] %v8764_v21  ;;  %v2178_v40 = vmul.f32 %v8316_v54, %v1533_v31  ;;  %v1462_v21 = vld [vmem:[%s7727_s24 + $0x210] sm:$0xff] }
 0x18f   : > { %13977 = vst [vmem:[#allocation174_spill] sm:$0xff] %v8768_v53  ;;  %13978 = vst [vmem:[#allocation175_spill] sm:$0xff] %v8773_v61  ;;  %v2701_v61 = vadd.f32 %v8334_v17, %v2433_v3  ;;  %v2435_v31 = vadd.f32 %v2179_v41, %v7946_v12  ;;  %v8805_v3 = vmul.f32 %v7906_v43, %v8352_v63  ;;  %1857 = vperm.xlu1 %7198, %v1462_v21   ;;  %v13988_v21 = vld [vmem:[#allocation45_spill] sm:$0xff] }
 0x190   : > { %13979 = vst [vmem:[#allocation176_spill] sm:$0xff] %v8777_v15  ;;  %13980 = vst [vmem:[#allocation177_spill] sm:$0xff] %v8784_v39  ;;  %v2700_v15 = vadd.f32 %v8331_v32, %v2432_v19  ;;  %v2434_v6 = vadd.f32 %v2178_v40, %v7942_v2  ;;  %v1548_v39 = vpop.permute.xlu1 %1547  ;;  %v8809_v19 = vmul.f32 %v7903_v59, %v8370_v57  ;;  %v1543_v53 = vpop.permute.xlu0 %1542  ;;  %v1464_v40 = vld [vmem:[%s7727_s24 + $0x220] sm:$0xff] }
 0x191   : > { %13981 = vst [vmem:[#allocation178_spill] sm:$0xff] %v8788_v62  ;;  %13982 = vst [vmem:[#allocation179_spill] sm:$0xff] %v8795_v35  ;;  %v13986_v35 = vld [vmem:[#allocation43_spill] sm:$0xff]  ;;  %v2182_v2 = vmul.f32 %v8316_v54, %v1543_v53  ;;  %v2183_v12 = vmul.f32 %v8319_v36, %v1543_v53  ;;  %v2703_v41 = vadd.f32 %v8334_v17, %v2435_v31 }
 0x192   : > { %13983 = vst [vmem:[#allocation180_spill] sm:$0xff] %v8799_v58  ;;  %13984 = vst [vmem:[#allocation181_spill] sm:$0xff] %v8805_v3  ;;  %v2437_v62 = vadd.f32 %v2181_v46, %v13986_v35  ;;  %v2702_v63 = vadd.f32 %v8331_v32, %v2434_v6  ;;  %v8820_v3 = vmul.f32 %v7906_v43, %v8370_v57  ;;  %v1463_v58 = vld [vmem:[%s7727_s24 + $0x218] sm:$0xff]  ;;  %v2957_v35 = vmax.f32 %v2701_v61, 0.0 }
 0x193   : > { %13985 = vst [vmem:[#allocation182_spill] sm:$0xff] %v8809_v19  ;;  %v2185_v1 = vmul.f32 %v8319_v36, %v1548_v39  ;;  %v2956_v46 = vmax.f32 %v2700_v15, 0.0  ;;  %v2438_v19 = vadd.f32 %v2182_v2, %v13988_v21  ;;  %v2439_v20 = vadd.f32 %v2183_v12, %v13989_v13  ;;  %v13992_v61 = vld [vmem:[#allocation42_spill] sm:$0xff]  ;;  %1867 = vperm.xlu1 %7198, %v1464_v40  }
 0x194   : > { %13987 = vst [vmem:[#allocation43_spill] sm:$0xff] %v8820_v3  ;;  %v8826_v53 = vpop.permute.xlu1 %1557  ;;  %v2959_v51 = vmax.f32 %v2703_v41, 0.0  ;;  %v2958_v31 = vmax.f32 %v2702_v63, 0.0  ;;  %v8830_v6 = vmul.f32 %v7903_v59, %v8422_v9  ;;  %v8834_v57 = vmul.f32 %v7906_v43, %v8422_v9  ;;  %v1553_v3 = vpop.permute.xlu0 %1552  ;;  %1862 = vperm.xlu0 %7197, %v1463_v58  }
 0x195   : > { %v2436_v15 = vadd.f32 %v2180_v37, %v13992_v61  ;;  %v2705_v13 = vadd.f32 %v8334_v17, %v2437_v62  ;;  %v8840_v2 = vmul.f32 %v7903_v59, %v8440_v25  ;;  %v2187_v12 = vmul.f32 %v8319_v36, %v1553_v3 }
 0x196   : > { %13990 = vst [vmem:[#allocation45_spill] sm:$0xff] %v8830_v6  ;;  %13991 = vst [vmem:[#allocation46_spill] sm:$0xff] %v8834_v57  ;;  %v3213_v41 = vpack.c.bf16 %v2959_v51, %v2957_v35  ;;  %v3212_v63 = vpack.c.bf16 %v2958_v31, %v2956_v46  ;;  %v2441_v21 = vadd.f32 %v2185_v1, %v7964_v0  ;;  %v1466_v57 = vld [vmem:[%s7727_s24 + $0x230] sm:$0xff]  ;;  %v1465_v6 = vld [vmem:[%s7727_s24 + $0x228] sm:$0xff] }
 0x197   : > { %13993 = vst [vmem:[#allocation42_spill] sm:$0xff] %v8840_v2  ;;  %v2186_v9 = vmul.f32 %v8316_v54, %v1553_v3  ;;  %v2707_v37 = vadd.f32 %v8334_v17, %v2439_v20  ;;  %v2706_v40 = vadd.f32 %v8331_v32, %v2438_v19  ;;  %v8851_v62 = vmul.f32 %v7906_v43, %v8440_v25  ;;  %v13996_v51 = vld [vmem:[#allocation47_spill] sm:$0xff] }
 0x198   : > { %v8855_v61 = vmul.f32 %v7903_v59, %v8492_v16  ;;  %v2443_v58 = vadd.f32 %v2187_v12, %v7956_v47  ;;  %3778 = vmatprep.mubr.bf16.mxu0 %v3213_v41  ;;  %4451 = vmatprep.mubr.bf16.mxu1 %v3213_v41  ;;  %v1568_v0 = vpop.permute.xlu1 %1567  ;;  %v2184_v3 = vmul.f32 %v8316_v54, %v1548_v39  ;;  %v1563_v20 = vpop.permute.xlu0 %1562  ;;  %v2961_v19 = vmax.f32 %v2705_v13, 0.0  ;;  %v1468_v39 = vld [vmem:[%s7727_s24 + $0x240] sm:$0xff]  ;;  %v1467_v41 = vld [vmem:[%s7727_s24 + $0x238] sm:$0xff] }
 0x199   : > { %13994 = vst [vmem:[#allocation183_spill] sm:$0xff] %v8851_v62  ;;  %3779 = vmatmul.mubr.bf16.vlgmr.msra.gmra.mxu0 %v3212_v63  ;;  %4452 = vmatmul.mubr.bf16.vlgmr.msra.gmra.mxu1 %v3212_v63  ;;  %v2963_v1 = vmax.f32 %v2707_v37, 0.0  ;;  %v2704_v25 = vadd.f32 %v8331_v32, %v2436_v15  ;;  %v2189_v35 = vmul.f32 %v8319_v36, %v8826_v53  ;;  %v2962_v63 = vmax.f32 %v2706_v40, 0.0 }
 0x19a   : > { %13995 = vst [vmem:[#allocation184_spill] sm:$0xff] %v8855_v61  ;;  %v2191_v46 = vmul.f32 %v8319_v36, %v1563_v20  ;;  %1877 = vperm.xlu1 %7198, %v1466_v57   ;;  %1872 = vperm.xlu0 %7197, %v1465_v6   ;;  %v2711_v47 = vadd.f32 %v8334_v17, %v2443_v58  ;;  %v14053_v61 = vld [vmem:[#allocation87_spill] sm:$0xff] }
 0x19b   : > { %v2442_v31 = vadd.f32 %v2186_v9, %v13996_v51  ;;  %v3215_v12 = vpack.c.bf16 %v2963_v1, %v2961_v19  ;;  %v2709_v13 = vadd.f32 %v8334_v17, %v2441_v21  ;;  %v8870_v15 = vmul.f32 %v7906_v43, %v8492_v16  ;;  %v14001_v21 = vld [vmem:[#allocation48_spill] sm:$0xff] }
 0x19c   : > { %v8874_v37 = vmul.f32 %v7903_v59, %v8510_v42  ;;  %v8878_v6 = vmul.f32 %v7906_v43, %v8510_v42  ;;  %v8882_v57 = vmul.f32 %v7903_v59, %v8562_v33  ;;  %v8884_v9 = vpop.permute.xlu1 %1577  ;;  %v2440_v40 = vadd.f32 %v2184_v3, %v14001_v21  ;;  %v1573_v58 = vpop.permute.xlu0 %1572 }
 0x19d   : > { %13997 = vst [vmem:[#allocation47_spill] sm:$0xff] %v8870_v15  ;;  %v2447_v16 = vadd.f32 %v2191_v46, %v7973_v49  ;;  %3788 = vmatprep.mubr.bf16.mxu0 %v3215_v12  ;;  %4461 = vmatprep.mubr.bf16.mxu1 %v3215_v12  ;;  %v2960_v19 = vmax.f32 %v2704_v25, 0.0  ;;  %v2967_v1 = vmax.f32 %v2711_v47, 0.0  ;;  %v8890_v42 = vmul.f32 %v7906_v43, %v8562_v33  ;;  %v1470_v46 = vld [vmem:[%s7727_s24 + $0x250] sm:$0xff]  ;;  %v1469_v12 = vld [vmem:[%s7727_s24 + $0x248] sm:$0xff] }
 0x19e   : > { %13998 = vst [vmem:[#allocation185_spill] sm:$0xff] %v8874_v37  ;;  %13999 = vst [vmem:[#allocation186_spill] sm:$0xff] %v8878_v6  ;;  %v8894_v51 = vmul.f32 %v7903_v59, %v8580_v5  ;;  %1887 = vperm.xlu1 %7198, %v1468_v39   ;;  %1882 = vperm.xlu0 %7197, %v1467_v41   ;;  %v2190_v3 = vmul.f32 %v8316_v54, %v1563_v20  ;;  %v2965_v21 = vmax.f32 %v2709_v13, 0.0 }
 0x19f   : > { %14000 = vst [vmem:[#allocation187_spill] sm:$0xff] %v8882_v57  ;;  %14002 = vst [vmem:[#allocation48_spill] sm:$0xff] %v8890_v42  ;;  %v14004_v57 = vld [vmem:[#allocation51_spill] sm:$0xff]  ;;  %v3214_v49 = vpack.c.bf16 %v2962_v63, %v2960_v19  ;;  %v2710_v25 = vadd.f32 %v8331_v32, %v2442_v31  ;;  %v8903_v33 = vmul.f32 %v7906_v43, %v8580_v5  ;;  %v14014_v42 = vld [vmem:[#allocation53_spill] sm:$0xff] }
 0x1a0   : > { %14003 = vst [vmem:[#allocation188_spill] sm:$0xff] %v8894_v51  ;;  %v2445_v15 = vadd.f32 %v2189_v35, %v14004_v57  ;;  %v8907_v47 = vmul.f32 %v7903_v59, %v8632_v55  ;;  %v2188_v35 = vmul.f32 %v8316_v54, %v8826_v53  ;;  %v2195_v39 = vmul.f32 %v8319_v36, %v1573_v58  ;;  %v1588_v20 = vpop.permute.xlu1 %1587  ;;  %v1583_v41 = vpop.permute.xlu0 %1582 }
 0x1a1   : > { %14005 = vst [vmem:[#allocation51_spill] sm:$0xff] %v8903_v33  ;;  %3789 = vmatmul.mubr.bf16.gmra.mxu0 %v3214_v49  ;;  %4462 = vmatmul.mubr.bf16.gmra.mxu1 %v3214_v49  ;;  %v3217_v31 = vpack.c.bf16 %v2967_v1, %v2965_v21  ;;  %v2708_v63 = vadd.f32 %v8331_v32, %v2440_v40  ;;  %v14009_v49 = vld [vmem:[#allocation49_spill] sm:$0xff]  ;;  %v1472_v40 = vld [vmem:[%s7727_s24 + $0x260] sm:$0xff]  ;;  %v2966_v21 = vmax.f32 %v2710_v25, 0.0 }
 0x1a2   : > { %14006 = vst [vmem:[#allocation189_spill] sm:$0xff] %v8907_v47  ;;  %v2715_v5 = vadd.f32 %v8334_v17, %v2447_v16  ;;  %v8916_v13 = vmul.f32 %v7906_v43, %v8632_v55  ;;  %v2192_v57 = vmul.f32 %v8316_v54, %v1568_v0  ;;  %v2193_v53 = vmul.f32 %v8319_v36, %v1568_v0  ;;  %v1471_v16 = vld [vmem:[%s7727_s24 + $0x258] sm:$0xff] }
 0x1a3   : > { %1897 = vperm.xlu1 %7198, %v1470_v46   ;;  %1892 = vperm.xlu0 %7197, %v1469_v12   ;;  %v8922_v19 = vmul.f32 %v7903_v59, %v8650_v45  ;;  %v2446_v1 = vadd.f32 %v2190_v3, %v14009_v49  ;;  %v2713_v55 = vadd.f32 %v8334_v17, %v2445_v15  ;;  %v14011_v0 = vld [vmem:[#allocation50_spill] sm:$0xff] }
 0x1a4   : > { %14007 = vst [vmem:[#allocation190_spill] sm:$0xff] %v8916_v13  ;;  %3798 = vmatprep.mubr.bf16.mxu0 %v3217_v31  ;;  %4471 = vmatprep.mubr.bf16.mxu1 %v3217_v31  ;;  %v8930_v13 = vmul.f32 %v7906_v43, %v8650_v45  ;;  %v2444_v46 = vadd.f32 %v2188_v35, %v14011_v0  ;;  %v1598_v3 = vpop.permute.xlu1 %1597  ;;  %v1593_v25 = vpop.permute.xlu0 %1592  ;;  %v2964_v45 = vmax.f32 %v2708_v63, 0.0  ;;  %v2971_v49 = vmax.f32 %v2715_v5, 0.0  ;;  %v14015_v0 = vld [vmem:[#allocation54_spill] sm:$0xff]  ;;  %v14016_v5 = vld [vmem:[#allocation52_spill] sm:$0xff] }
 0x1a5   : > { %14008 = vst [vmem:[#allocation191_spill] sm:$0xff] %v8922_v19  ;;  %v2194_v12 = vmul.f32 %v8316_v54, %v1573_v58  ;;  %v2451_v47 = vadd.f32 %v2195_v39, %v7990_v29  ;;  %v8937_v31 = vmul.f32 %v7903_v59, %v8712_v50  ;;  %v8941_v15 = vmul.f32 %v7906_v43, %v8712_v50  ;;  %v1473_v59 = vld [vmem:[%s7727_s24 + $0x268] sm:$0xff]  ;;  %v14052_v33 = vld [vmem:[#allocation86_spill] sm:$0xff] }
 0x1a6   : > { %14010 = vst [vmem:[#allocation49_spill] sm:$0xff] %v8930_v13  ;;  %v2448_v35 = vadd.f32 %v2192_v57, %v14014_v42  ;;  %v2449_v13 = vadd.f32 %v2193_v53, %v14015_v0  ;;  %v2199_v58 = vmul.f32 %v8319_v36, %v1583_v41  ;;  %v2197_v29 = vmul.f32 %v8319_v36, %v8884_v9 }
 0x1a7   : > { %14012 = vst [vmem:[#allocation50_spill] sm:$0xff] %v8937_v31  ;;  %14013 = vst [vmem:[#allocation192_spill] sm:$0xff] %v8941_v15  ;;  %1907 = vperm.xlu1 %7198, %v1472_v40   ;;  %1902 = vperm.xlu0 %7197, %v1471_v16   ;;  %v3216_v39 = vpack.c.bf16 %v2966_v21, %v2964_v45  ;;  %v1474_v31 = vld [vmem:[%s7727_s24 + $0x270] sm:$0xff]  ;;  %v2969_v19 = vmax.f32 %v2713_v55, 0.0  ;;  %v2714_v50 = vadd.f32 %v8331_v32, %v2446_v1  ;;  %v14020_v15 = vld [vmem:[#allocation58_spill] sm:$0xff] }
 0x1a8   : > { %v2196_v63 = vmul.f32 %v8316_v54, %v8884_v9  ;;  %v2450_v42 = vadd.f32 %v2194_v12, %v14016_v5  ;;  %v1608_v57 = vpop.permute.xlu1 %1607  ;;  %v2712_v53 = vadd.f32 %v8331_v32, %v2444_v46  ;;  %v2719_v40 = vadd.f32 %v8334_v17, %v2451_v47  ;;  %v1603_v55 = vpop.permute.xlu0 %1602 }
 0x1a9   : > { %v2200_v16 = vmul.f32 %v8316_v54, %v1588_v20  ;;  %v2201_v21 = vmul.f32 %v8319_v36, %v1588_v20  ;;  %3799 = vmatmul.mubr.bf16.gmra.mxu0 %v3216_v39  ;;  %4472 = vmatmul.mubr.bf16.gmra.mxu1 %v3216_v39  ;;  %v3219_v1 = vpack.c.bf16 %v2971_v49, %v2969_v19  ;;  %v1476_v20 = vld [vmem:[%s7727_s24 + $0x280] sm:$0xff]  ;;  %v1475_v39 = vld [vmem:[%s7727_s24 + $0x278] sm:$0xff]  ;;  %v2970_v5 = vmax.f32 %v2714_v50, 0.0  ;;  %v14017_v19 = vld [vmem:[#allocation56_spill] sm:$0xff] }
 0x1aa   : > { %v2198_v45 = vmul.f32 %v8316_v54, %v1583_v41  ;;  %v2455_v9 = vadd.f32 %v2199_v58, %v8008_v48  ;;  %v2717_v46 = vadd.f32 %v8334_v17, %v2449_v13  ;;  %v2453_v47 = vadd.f32 %v2197_v29, %v8016_v14  ;;  %v14018_v50 = vld [vmem:[#allocation55_spill] sm:$0xff] }
 0x1ab   : > { %1917 = vperm.xlu1 %7198, %v1474_v31   ;;  %1912 = vperm.xlu0 %7197, %v1473_v59   ;;  %v2204_v12 = vmul.f32 %v8316_v54, %v1598_v3  ;;  %v2205_v0 = vmul.f32 %v8319_v36, %v1598_v3  ;;  %v2452_v49 = vadd.f32 %v2196_v63, %v14017_v19  ;;  %v2975_v31 = vmax.f32 %v2719_v40, 0.0 }
 0x1ac   : > { %3808 = vmatprep.mubr.bf16.mxu0 %v3219_v1  ;;  %4481 = vmatprep.mubr.bf16.mxu1 %v3219_v1  ;;  %v2203_v41 = vmul.f32 %v8319_v36, %v1593_v25  ;;  %v1618_v48 = vpop.permute.xlu1 %1617  ;;  %v2718_v59 = vadd.f32 %v8331_v32, %v2450_v42  ;;  %v8970_v14 = vadd.f32 %v2200_v16, %v8030_v22  ;;  %v1613_v3 = vpop.permute.xlu0 %1612  ;;  %v2968_v58 = vmax.f32 %v2712_v53, 0.0  ;;  %v14019_v22 = vld [vmem:[#allocation61_spill] sm:$0xff]  ;;  %v1477_v53 = vld [vmem:[%s7727_s24 + $0x288] sm:$0xff] }
 0x1ad   : > { %v2457_v13 = vadd.f32 %v2201_v21, %v8034_v18  ;;  %v2716_v29 = vadd.f32 %v8331_v32, %v2448_v35  ;;  %v2454_v1 = vadd.f32 %v2198_v45, %v14018_v50  ;;  %v2202_v63 = vmul.f32 %v8316_v54, %v1593_v25  ;;  %v1478_v21 = vld [vmem:[%s7727_s24 + $0x290] sm:$0xff]  ;;  %v1480_v50 = vld [vmem:[%s7727_s24 + $0x2a0] sm:$0xff] }
 0x1ae   : > { %v2973_v40 = vmax.f32 %v2717_v46, 0.0  ;;  %v2723_v19 = vadd.f32 %v8334_v17, %v2455_v9  ;;  %v8978_v42 = vadd.f32 %v2204_v12, %v8047_v26  ;;  %v8981_v16 = vadd.f32 %v2205_v0, %v14019_v22  ;;  %v14022_v22 = vld [vmem:[#allocation60_spill] sm:$0xff] }
 0x1af   : > { %1927 = vperm.xlu1 %7198, %v1476_v20   ;;  %1922 = vperm.xlu0 %7197, %v1475_v39   ;;  %v3218_v18 = vpack.c.bf16 %v2970_v5, %v2968_v58  ;;  %v2721_v35 = vadd.f32 %v8334_v17, %v2453_v47  ;;  %v2459_v45 = vadd.f32 %v2203_v41, %v14020_v15  ;;  %v2974_v46 = vmax.f32 %v2718_v59, 0.0  ;;  %v14021_v47 = vld [vmem:[#allocation57_spill] sm:$0xff] }
 0x1b0   : > { %v2207_v25 = vmul.f32 %v8319_v36, %v1603_v55  ;;  %v1628_v20 = vpop.permute.xlu1 %1627  ;;  %v3221_v39 = vpack.c.bf16 %v2975_v31, %v2973_v40  ;;  %v2208_v9 = vmul.f32 %v8316_v54, %v1608_v57  ;;  %v2209_v26 = vmul.f32 %v8319_v36, %v1608_v57  ;;  %v1623_v0 = vpop.permute.xlu0 %1622  ;;  %v1479_v40 = vld [vmem:[%s7727_s24 + $0x298] sm:$0xff] }
 0x1b1   : > { %v2206_v12 = vmul.f32 %v8316_v54, %v1603_v55  ;;  %3809 = vmatmul.mubr.bf16.gmra.mxu0 %v3218_v18  ;;  %4482 = vmatmul.mubr.bf16.gmra.mxu1 %v3218_v18  ;;  %v2972_v5 = vmax.f32 %v2716_v29, 0.0  ;;  %v2458_v58 = vadd.f32 %v2202_v63, %v14021_v47  ;;  %v2979_v15 = vmax.f32 %v2723_v19, 0.0 }
 0x1b2   : > { %v2720_v41 = vadd.f32 %v8331_v32, %v2452_v49  ;;  %v2722_v31 = vadd.f32 %v8331_v32, %v2454_v1  ;;  %v2212_v59 = vmul.f32 %v8316_v54, %v1618_v48  ;;  %v2213_v57 = vmul.f32 %v8319_v36, %v1618_v48  ;;  %3818 = vmatprep.mubr.bf16.mxu0 %v3221_v39  ;;  %v14023_v48 = vld [vmem:[#allocation64_spill] sm:$0xff] }
 0x1b3   : > { %1937 = vperm.xlu1 %7198, %v1478_v21   ;;  %1932 = vperm.xlu0 %7197, %v1477_v53   ;;  %v2210_v55 = vmul.f32 %v8316_v54, %v1613_v3  ;;  %v2977_v29 = vmax.f32 %v2721_v35, 0.0  ;;  %v2463_v63 = vadd.f32 %v2207_v25, %v14022_v22  ;;  %v2211_v18 = vmul.f32 %v8319_v36, %v1613_v3  ;;  %v1482_v22 = vld [vmem:[%s7727_s24 + $0x2b0] sm:$0xff] }
 0x1b4   : > { %4491 = vmatprep.mubr.bf16.mxu1 %v3221_v39  ;;  %v1638_v19 = vpop.permute.xlu1 %1637  ;;  %v3220_v21 = vpack.c.bf16 %v2974_v46, %v2972_v5  ;;  %v2727_v49 = vadd.f32 %v8334_v17, %v2459_v45  ;;  %v9003_v1 = vadd.f32 %v2208_v9, %v8064_v30  ;;  %v9006_v53 = vadd.f32 %v2209_v26, %v14023_v48  ;;  %v14024_v39 = vld [vmem:[#allocation59_spill] sm:$0xff]  ;;  %v1633_v43 = vpop.permute.xlu0 %1632  ;;  %v14025_v9 = vld [vmem:[#allocation62_spill] sm:$0xff] }
 0x1b5   : > { %v2462_v47 = vadd.f32 %v2206_v12, %v14024_v39  ;;  %v2725_v35 = vadd.f32 %v8334_v17, %v2457_v13  ;;  %v3223_v3 = vpack.c.bf16 %v2979_v15, %v2977_v29  ;;  %v2976_v25 = vmax.f32 %v2720_v41, 0.0  ;;  %v1481_v12 = vld [vmem:[%s7727_s24 + $0x2a8] sm:$0xff]  ;;  %v1483_v48 = vld [vmem:[%s7727_s24 + $0x2b8] sm:$0xff] }
 0x1b6   : > { %v2978_v46 = vmax.f32 %v2722_v31, 0.0  ;;  %v2726_v5 = vadd.f32 %v8331_v32, %v2458_v58  ;;  %v9012_v45 = vadd.f32 %v2212_v59, %v8082_v34  ;;  %v9015_v30 = vadd.f32 %v2213_v57, %v8086_v7 }
 0x1b7   : > { %1947 = vperm.xlu1 %7198, %v1480_v50   ;;  %1942 = vperm.xlu0 %7197, %v1479_v40   ;;  %v2466_v26 = vadd.f32 %v2210_v55, %v14025_v9  ;;  %v2724_v13 = vadd.f32 %v8331_v32, %v8970_v14  ;;  %v14026_v50 = vld [vmem:[#allocation63_spill] sm:$0xff]  ;;  %v2216_v15 = vmul.f32 %v8316_v54, %v1628_v20  ;;  %v2983_v31 = vmax.f32 %v2727_v49, 0.0 }
 0x1b8   : > { %v2467_v40 = vadd.f32 %v2211_v18, %v14026_v50  ;;  %v1648_v41 = vpop.permute.xlu1 %1647  ;;  %v2731_v58 = vadd.f32 %v8334_v17, %v2463_v63  ;;  %v2217_v34 = vmul.f32 %v8319_v36, %v1628_v20  ;;  %v2214_v7 = vmul.f32 %v8316_v54, %v1623_v0  ;;  %v1643_v57 = vpop.permute.xlu0 %1642 }
 0x1b9   : > { %v2215_v59 = vmul.f32 %v8319_v36, %v1623_v0  ;;  %3819 = vmatmul.mubr.bf16.gmra.mxu0 %v3220_v21  ;;  %4492 = vmatmul.mubr.bf16.gmra.mxu1 %v3220_v21  ;;  %v2981_v14 = vmax.f32 %v2725_v35, 0.0  ;;  %v2220_v55 = vmul.f32 %v8316_v54, %v1638_v19  ;;  %v3222_v29 = vpack.c.bf16 %v2978_v46, %v2976_v25  ;;  %v1484_v21 = vld [vmem:[%s7727_s24 + $0x2c0] sm:$0xff] }
 0x1ba   : > { %v2982_v18 = vmax.f32 %v2726_v5, 0.0  ;;  %v2729_v63 = vadd.f32 %v8334_v17, %v8981_v16  ;;  %v2221_v20 = vmul.f32 %v8319_v36, %v1638_v19  ;;  %v2218_v49 = vmul.f32 %v8316_v54, %v1633_v43  ;;  %3828 = vmatprep.mubr.bf16.mxu0 %v3223_v3  ;;  %4501 = vmatprep.mubr.bf16.mxu1 %v3223_v3  ;;  %v14027_v5 = vld [vmem:[#allocation65_spill] sm:$0xff] }
 0x1bb   : > { %1957 = vperm.xlu1 %7198, %v1482_v22   ;;  %1952 = vperm.xlu0 %7197, %v1481_v12   ;;  %v2219_v0 = vmul.f32 %v8319_v36, %v1633_v43  ;;  %v2980_v39 = vmax.f32 %v2724_v13, 0.0  ;;  %v9037_v35 = vadd.f32 %v2216_v15, %v8100_v38  ;;  %v3225_v25 = vpack.c.bf16 %v2983_v31, %v2981_v14  ;;  %v14028_v22 = vld [vmem:[#allocation66_spill] sm:$0xff]  ;;  %v1485_v14 = vld [vmem:[%s7727_s24 + $0x2c8] sm:$0xff] }
 0x1bc   : > { %v1658_v9 = vpop.permute.xlu1 %1657  ;;  %v2987_v46 = vmax.f32 %v2731_v58, 0.0  ;;  %v2730_v16 = vadd.f32 %v8331_v32, %v2462_v47  ;;  %v9041_v19 = vadd.f32 %v2217_v34, %v8104_v11  ;;  %v2470_v43 = vadd.f32 %v2214_v7, %v14027_v5  ;;  %v1653_v12 = vpop.permute.xlu0 %1652  ;;  %v14029_v11 = vld [vmem:[#allocation71_spill] sm:$0xff]  ;;  %v14031_v7 = vld [vmem:[#allocation68_spill] sm:$0xff] }
 0x1bd   : > { %v2471_v3 = vadd.f32 %v2215_v59, %v14028_v22  ;;  %v2728_v13 = vadd.f32 %v8331_v32, %v8978_v42  ;;  %v9048_v38 = vadd.f32 %v2220_v55, %v8117_v44  ;;  %v9050_v50 = vpack.c.bf16 %v2982_v18, %v2980_v39  ;;  %v14030_v58 = vld [vmem:[#allocation67_spill] sm:$0xff]  ;;  %v1486_v42 = vld [vmem:[%s7727_s24 + $0x2d0] sm:$0xff] }
 0x1be   : > { %v2985_v47 = vmax.f32 %v2729_v63, 0.0  ;;  %v2735_v15 = vadd.f32 %v8334_v17, %v2467_v40  ;;  %v9054_v31 = vadd.f32 %v2221_v20, %v14029_v11  ;;  %v9057_v34 = vadd.f32 %v2218_v49, %v14030_v58  ;;  %v1488_v22 = vld [vmem:[%s7727_s24 + $0x2e0] sm:$0xff] }
 0x1bf   : > { %1967 = vperm.xlu1 %7198, %v1484_v21   ;;  %1962 = vperm.xlu0 %7197, %v1483_v48   ;;  %v9060_v59 = vadd.f32 %v2219_v0, %v14031_v7  ;;  %v2733_v44 = vadd.f32 %v8334_v17, %v9006_v53  ;;  %v2224_v55 = vmul.f32 %v8316_v54, %v1648_v41  ;;  %v2986_v20 = vmax.f32 %v2730_v16, 0.0 }
 0x1c0   : > { %v2225_v18 = vmul.f32 %v8319_v36, %v1648_v41  ;;  %v1668_v63 = vpop.permute.xlu1 %1667  ;;  %v9068_v40 = vpack.c.bf16 %v2987_v46, %v2985_v47  ;;  %v2222_v21 = vmul.f32 %v8316_v54, %v1643_v57  ;;  %v1663_v49 = vpop.permute.xlu0 %1662  ;;  %v2984_v0 = vmax.f32 %v2728_v13, 0.0  ;;  %v14032_v47 = vld [vmem:[#allocation74_spill] sm:$0xff] }
 0x1c1   : > { %3829 = vmatmul.mubr.bf16.gmra.mxu0 %v3222_v29  ;;  %4502 = vmatmul.mubr.bf16.gmra.mxu1 %v3222_v29  ;;  %v2734_v48 = vadd.f32 %v8331_v32, %v2466_v26  ;;  %v2739_v53 = vadd.f32 %v8334_v17, %v2471_v3  ;;  %v2223_v39 = vmul.f32 %v8319_v36, %v1643_v57  ;;  %v2991_v46 = vmax.f32 %v2735_v15, 0.0  ;;  %v1487_v26 = vld [vmem:[%s7727_s24 + $0x2d8] sm:$0xff] }
 0x1c2   : > { %v2228_v41 = vmul.f32 %v8316_v54, %v1658_v9  ;;  %v2732_v16 = vadd.f32 %v8331_v32, %v9003_v1  ;;  %v2229_v5 = vmul.f32 %v8319_v36, %v1658_v9  ;;  %v2226_v29 = vmul.f32 %v8316_v54, %v1653_v12  ;;  %3838 = vmatprep.mubr.bf16.mxu0 %v3225_v25 }
 0x1c3   : > { %1977 = vperm.xlu1 %7198, %v1486_v42   ;;  %1972 = vperm.xlu0 %7197, %v1485_v14   ;;  %v2989_v13 = vmax.f32 %v2733_v44, 0.0  ;;  %v2737_v57 = vadd.f32 %v8334_v17, %v9015_v30  ;;  %v9084_v3 = vadd.f32 %v2224_v55, %v8134_v52  ;;  %v9087_v15 = vadd.f32 %v2225_v18, %v14032_v47  ;;  %v14034_v52 = vld [vmem:[#allocation70_spill] sm:$0xff] }
 0x1c4   : > { %4511 = vmatprep.mubr.bf16.mxu1 %v3225_v25  ;;  %v2227_v1 = vmul.f32 %v8319_v36, %v1653_v12  ;;  %v1678_v9 = vpop.permute.xlu1 %1677  ;;  %v9090_v11 = vpack.c.bf16 %v2986_v20, %v2984_v0  ;;  %v14033_v25 = vld [vmem:[#allocation69_spill] sm:$0xff]  ;;  %v1673_v7 = vpop.permute.xlu0 %1672  ;;  %v2990_v42 = vmax.f32 %v2734_v48, 0.0  ;;  %v2995_v14 = vmax.f32 %v2739_v53, 0.0  ;;  %v1489_v53 = vld [vmem:[%s7727_s24 + $0x2e8] sm:$0xff] }
 0x1c5   : > { %v9093_v58 = vadd.f32 %v2222_v21, %v14033_v25  ;;  %v2738_v30 = vadd.f32 %v8331_v32, %v2470_v43  ;;  %v2479_v44 = vadd.f32 %v2223_v39, %v14034_v52  ;;  %v9098_v55 = vadd.f32 %v2228_v41, %v8152_v60  ;;  %v14035_v21 = vld [vmem:[#allocation72_spill] sm:$0xff]  ;;  %v14036_v39 = vld [vmem:[#allocation73_spill] sm:$0xff] }
 0x1c6   : > { %v9100_v12 = vpack.c.bf16 %v2991_v46, %v2989_v13  ;;  %v2988_v18 = vmax.f32 %v2732_v16, 0.0  ;;  %v9103_v20 = vadd.f32 %v2229_v5, %v8156_v23  ;;  %v9106_v0 = vadd.f32 %v2226_v29, %v14035_v21  ;;  %v1490_v48 = vld [vmem:[%s7727_s24 + $0x2f0] sm:$0xff] }
 0x1c7   : > { %1987 = vperm.xlu1 %7198, %v1488_v22   ;;  %1982 = vperm.xlu0 %7197, %v1487_v26   ;;  %v2993_v47 = vmax.f32 %v2737_v57, 0.0  ;;  %v2736_v43 = vadd.f32 %v8331_v32, %v9012_v45  ;;  %v9113_v60 = vadd.f32 %v2227_v1, %v14036_v39  ;;  %v2232_v41 = vmul.f32 %v8316_v54, %v1668_v63  ;;  %v1491_v1 = vld [vmem:[%s7727_s24 + $0x2f8] sm:$0xff] }
 0x1c8   : > { %v2233_v46 = vmul.f32 %v8319_v36, %v1668_v63  ;;  %v2230_v16 = vmul.f32 %v8316_v54, %v1663_v49  ;;  %v1688_v23 = vpop.permute.xlu1 %1687  ;;  %v2231_v5 = vmul.f32 %v8319_v36, %v1663_v49  ;;  %v1683_v29 = vpop.permute.xlu0 %1682  ;;  %v9121_v45 = vpack.c.bf16 %v2990_v42, %v2988_v18  ;;  %v14038_v18 = vld [vmem:[#allocation76_spill] sm:$0xff]  ;;  %v14039_v39 = vld [vmem:[#allocation81_spill] sm:$0xff] }
 0x1c9   : > { %3839 = vmatmul.mubr.bf16.gmra.mxu0 %v9050_v50  ;;  %4512 = vmatmul.mubr.bf16.gmra.mxu1 %v9050_v50  ;;  %v9123_v22 = vpack.c.bf16 %v2995_v14, %v2993_v47  ;;  %v2994_v26 = vmax.f32 %v2738_v30, 0.0  ;;  %v2236_v13 = vmul.f32 %v8316_v54, %v1678_v9  ;;  %v2741_v63 = vadd.f32 %v8334_v17, %v9041_v19  ;;  %v1492_v50 = vld [vmem:[%s7727_s24 + $0x300] sm:$0xff] }
 0x1ca   : > { %v2743_v49 = vadd.f32 %v8334_v17, %v9060_v59  ;;  %v2237_v57 = vmul.f32 %v8319_v36, %v1678_v9  ;;  %3848 = vmatprep.mubr.bf16.mxu0 %v9068_v40  ;;  %4521 = vmatprep.mubr.bf16.mxu1 %v9068_v40  ;;  %v2992_v25 = vmax.f32 %v2736_v43, 0.0  ;;  %v2740_v42 = vadd.f32 %v8331_v32, %v9037_v35  ;;  %v14037_v9 = vld [vmem:[#allocation75_spill] sm:$0xff] }
 0x1cb   : > { %1997 = vperm.xlu1 %7198, %v1490_v48   ;;  %1992 = vperm.xlu0 %7197, %v1489_v53   ;;  %v2742_v14 = vadd.f32 %v8331_v32, %v9057_v34  ;;  %v9140_v19 = vadd.f32 %v2232_v41, %v8170_v8  ;;  %v9143_v59 = vadd.f32 %v2233_v46, %v8174_v27  ;;  %v2997_v53 = vmax.f32 %v2741_v63, 0.0  ;;  %v1494_v46 = vld [vmem:[%s7727_s24 + $0x310] sm:$0xff] }
 0x1cc   : > { %v9146_v30 = vadd.f32 %v2230_v16, %v14037_v9  ;;  %v2234_v40 = vmul.f32 %v8316_v54, %v1673_v7  ;;  %v1698_v52 = vpop.permute.xlu1 %1697  ;;  %v9150_v21 = vadd.f32 %v2231_v5, %v14038_v18  ;;  %v2235_v35 = vmul.f32 %v8319_v36, %v1673_v7  ;;  %v1693_v34 = vpop.permute.xlu0 %1692  ;;  %v1493_v7 = vld [vmem:[%s7727_s24 + $0x308] sm:$0xff] }
 0x1cd   : > { %v9153_v48 = vpack.c.bf16 %v2994_v26, %v2992_v25  ;;  %v2747_v8 = vadd.f32 %v8334_v17, %v2479_v44  ;;  %v9157_v27 = vadd.f32 %v2236_v13, %v8187_v24  ;;  %v2999_v47 = vmax.f32 %v2743_v49, 0.0  ;;  %v14040_v26 = vld [vmem:[#allocation77_spill] sm:$0xff] }
 0x1ce   : > { %v2745_v43 = vadd.f32 %v8334_v17, %v9054_v31  ;;  %v9162_v41 = vadd.f32 %v2237_v57, %v14039_v39  ;;  %v2996_v16 = vmax.f32 %v2740_v42, 0.0  ;;  %v2998_v5 = vmax.f32 %v2742_v14, 0.0  ;;  %v14042_v39 = vld [vmem:[#allocation84_spill] sm:$0xff] }
 0x1cf   : > { %2007 = vperm.xlu1 %7198, %v1492_v50   ;;  %2002 = vperm.xlu0 %7197, %v1491_v1   ;;  %v2746_v44 = vadd.f32 %v8331_v32, %v9093_v58  ;;  %v9169_v24 = vadd.f32 %v2234_v40, %v14040_v26  ;;  %v2240_v13 = vmul.f32 %v8316_v54, %v1688_v23  ;;  %v14041_v50 = vld [vmem:[#allocation78_spill] sm:$0xff]  ;;  %v3003_v25 = vmax.f32 %v2747_v8, 0.0 }
 0x1d0   : > { %v2241_v63 = vmul.f32 %v8319_v36, %v1688_v23  ;;  %v2238_v49 = vmul.f32 %v8316_v54, %v1683_v29  ;;  %v1708_v31 = vpop.permute.xlu1 %1707  ;;  %v9175_v57 = vadd.f32 %v2235_v35, %v14041_v50  ;;  %v2239_v1 = vmul.f32 %v8319_v36, %v1683_v29  ;;  %v1703_v58 = vpop.permute.xlu0 %1702  ;;  %v1495_v35 = vld [vmem:[%s7727_s24 + $0x318] sm:$0xff] }
 0x1d1   : > { %3849 = vmatmul.mubr.bf16.gmra.mxu0 %v9090_v11  ;;  %4522 = vmatmul.mubr.bf16.gmra.mxu1 %v9090_v11  ;;  %v2744_v42 = vadd.f32 %v8331_v32, %v9048_v38  ;;  %v2244_v23 = vmul.f32 %v8316_v54, %v1698_v52  ;;  %v2245_v14 = vmul.f32 %v8319_v36, %v1698_v52  ;;  %v3001_v29 = vmax.f32 %v2745_v43, 0.0  ;;  %v1496_v11 = vld [vmem:[%s7727_s24 + $0x320] sm:$0xff] }
 0x1d2   : > { %v9184_v9 = vpack.c.bf16 %v2999_v47, %v2997_v53  ;;  %v2242_v40 = vmul.f32 %v8316_v54, %v1693_v34  ;;  %v2243_v18 = vmul.f32 %v8319_v36, %v1693_v34  ;;  %3858 = vmatprep.mubr.bf16.mxu0 %v9100_v12  ;;  %4531 = vmatprep.mubr.bf16.mxu1 %v9100_v12  ;;  %v3002_v8 = vmax.f32 %v2746_v44, 0.0  ;;  %v14044_v47 = vld [vmem:[#allocation79_spill] sm:$0xff] }
 0x1d3   : > { %2017 = vperm.xlu1 %7198, %v1494_v46   ;;  %2012 = vperm.xlu0 %7197, %v1493_v7   ;;  %v9192_v38 = vpack.c.bf16 %v2998_v5, %v2996_v16  ;;  %v9195_v52 = vadd.f32 %v2240_v13, %v14042_v39  ;;  %v14043_v46 = vld [vmem:[#allocation85_spill] sm:$0xff]  ;;  %v9201_v43 = vadd.f32 %v2238_v49, %v14044_v47  ;;  %v14045_v7 = vld [vmem:[#allocation80_spill] sm:$0xff]  ;;  %v3000_v44 = vmax.f32 %v2744_v42, 0.0 }
 0x1d4   : > { %v9198_v53 = vadd.f32 %v2241_v63, %v14043_v46  ;;  %v1718_v34 = vpop.permute.xlu1 %1717  ;;  %v2751_v12 = vadd.f32 %v8334_v17, %v9113_v60  ;;  %v9206_v26 = vadd.f32 %v2239_v1, %v14045_v7  ;;  %v1713_v16 = vpop.permute.xlu0 %1712  ;;  %v9208_v5 = vpack.c.bf16 %v3003_v25, %v3001_v29  ;;  %v14046_v63 = vld [vmem:[#allocation88_spill] sm:$0xff]  ;;  %v14047_v49 = vld [vmem:[#allocation89_spill] sm:$0xff]  ;;  %v14048_v1 = vld [vmem:[#allocation82_spill] sm:$0xff] }
 0x1d5   : > { %v2749_v13 = vadd.f32 %v8334_v17, %v9087_v15  ;;  %v9213_v50 = vadd.f32 %v2244_v23, %v14046_v63  ;;  %v9216_v39 = vadd.f32 %v2245_v14, %v14047_v49  ;;  %v2750_v60 = vadd.f32 %v8331_v32, %v9106_v0  ;;  %v14049_v25 = vld [vmem:[#allocation83_spill] sm:$0xff]  ;;  %v1498_v42 = vld [vmem:[%s7727_s24 + $0x330] sm:$0xff] }
 0x1d6   : > { %v9221_v46 = vadd.f32 %v2242_v40, %v14048_v1  ;;  %v9224_v29 = vadd.f32 %v2243_v18, %v14049_v25  ;;  %v1497_v47 = vld [vmem:[%s7727_s24 + $0x328] sm:$0xff]  ;;  %v9228_v15 = vpack.c.bf16 %v3002_v8, %v3000_v44  ;;  %v2748_v23 = vadd.f32 %v8331_v32, %v9084_v3 }
 0x1d7   : > { %2027 = vperm.xlu1 %7198, %v1496_v11   ;;  %2022 = vperm.xlu0 %7197, %v1495_v35   ;;  %v2248_v14 = vmul.f32 %v8316_v54, %v1708_v31  ;;  %v2249_v11 = vmul.f32 %v8319_v36, %v1708_v31  ;;  %v3007_v7 = vmax.f32 %v2751_v12, 0.0  ;;  %v2755_v0 = vadd.f32 %v8334_v17, %v9150_v21  ;;  %v14050_v1 = vld [vmem:[#allocation92_spill] sm:$0xff] }
 0x1d8   : > { %v1728_v35 = vpop.permute.xlu1 %1727  ;;  %v2246_v40 = vmul.f32 %v8316_v54, %v1703_v58  ;;  %v2247_v18 = vmul.f32 %v8319_v36, %v1703_v58  ;;  %v1723_v3 = vpop.permute.xlu0 %1722  ;;  %v3005_v8 = vmax.f32 %v2749_v13, 0.0  ;;  %v2754_v31 = vadd.f32 %v8331_v32, %v9146_v30  ;;  %v1499_v30 = vld [vmem:[%s7727_s24 + $0x338] sm:$0xff] }
 0x1d9   : > { %3859 = vmatmul.mubr.bf16.gmra.mxu0 %v9121_v45  ;;  %4532 = vmatmul.mubr.bf16.gmra.mxu1 %v9121_v45  ;;  %v2252_v12 = vmul.f32 %v8316_v54, %v1718_v34  ;;  %v2253_v44 = vmul.f32 %v8319_v36, %v1718_v34  ;;  %v3006_v21 = vmax.f32 %v2750_v60, 0.0  ;;  %v2753_v58 = vadd.f32 %v8334_v17, %v9103_v20  ;;  %v1500_v45 = vld [vmem:[%s7727_s24 + $0x340] sm:$0xff]  ;;  %v14051_v60 = vld [vmem:[#allocation93_spill] sm:$0xff] }
 0x1da   : > { %v2250_v63 = vmul.f32 %v8316_v54, %v1713_v16  ;;  %v2251_v49 = vmul.f32 %v8319_v36, %v1713_v16  ;;  %3868 = vmatprep.mubr.bf16.mxu0 %v9123_v22  ;;  %4541 = vmatprep.mubr.bf16.mxu1 %v9123_v22  ;;  %v3004_v13 = vmax.f32 %v2748_v23, 0.0  ;;  %v2752_v34 = vadd.f32 %v8331_v32, %v9098_v55 }
 0x1db   : > { %2037 = vperm.xlu1 %7198, %v1498_v42   ;;  %2032 = vperm.xlu0 %7197, %v1497_v47   ;;  %v9255_v25 = vadd.f32 %v2248_v14, %v14050_v1  ;;  %v9258_v42 = vadd.f32 %v2249_v11, %v14051_v60  ;;  %v9260_v47 = vpack.c.bf16 %v3007_v7, %v3005_v8  ;;  %v3011_v16 = vmax.f32 %v2755_v0, 0.0  ;;  %v14054_v1 = vld [vmem:[#allocation96_spill] sm:$0xff]  ;;  %v14055_v60 = vld [vmem:[#allocation97_spill] sm:$0xff]  ;;  %v14056_v0 = vld [vmem:[#allocation90_spill] sm:$0xff] }
 0x1dc   : > { %v1738_v20 = vpop.permute.xlu1 %1737  ;;  %v9263_v22 = vadd.f32 %v2246_v40, %v14052_v33  ;;  %v9266_v23 = vadd.f32 %v2247_v18, %v14053_v61  ;;  %v1733_v51 = vpop.permute.xlu0 %1732  ;;  %v3010_v55 = vmax.f32 %v2754_v31, 0.0  ;;  %v2759_v14 = vadd.f32 %v8334_v17, %v9175_v57  ;;  %v14057_v61 = vld [vmem:[#allocation91_spill] sm:$0xff]  ;;  %v1502_v8 = vld [vmem:[%s7727_s24 + $0x350] sm:$0xff] }
 0x1dd   : > { %v9271_v11 = vadd.f32 %v2252_v12, %v14054_v1  ;;  %v9274_v6 = vadd.f32 %v2253_v44, %v14055_v60  ;;  %v9276_v7 = vpack.c.bf16 %v3006_v21, %v3004_v13  ;;  %v3009_v33 = vmax.f32 %v2753_v58, 0.0  ;;  %v1501_v31 = vld [vmem:[%s7727_s24 + $0x348] sm:$0xff] }
 0x1de   : > { %v9279_v40 = vadd.f32 %v2250_v63, %v14056_v0  ;;  %v9282_v18 = vadd.f32 %v2251_v49, %v14057_v61  ;;  %v3008_v57 = vmax.f32 %v2752_v34, 0.0  ;;  %v2757_v12 = vadd.f32 %v8334_v17, %v9143_v59  ;;  %v14059_v0 = vld [vmem:[#allocation101_spill] sm:$0xff] }
 0x1df   : > { %2047 = vperm.xlu1 %7198, %v1500_v45   ;;  %2042 = vperm.xlu0 %7197, %v1499_v30   ;;  %v2256_v44 = vmul.f32 %v8316_v54, %v1728_v35  ;;  %v2257_v45 = vmul.f32 %v8319_v36, %v1728_v35  ;;  %v2254_v21 = vmul.f32 %v8316_v54, %v1723_v3  ;;  %v3015_v59 = vmax.f32 %v2759_v14, 0.0  ;;  %v1503_v14 = vld [vmem:[%s7727_s24 + $0x358] sm:$0xff] }
 0x1e0   : > { %v1748_v30 = vpop.permute.xlu1 %1747  ;;  %v9291_v58 = vpack.c.bf16 %v3011_v16, %v3009_v33  ;;  %v2255_v63 = vmul.f32 %v8319_v36, %v1723_v3  ;;  %v1743_v49 = vpop.permute.xlu0 %1742  ;;  %v9296_v13 = vpack.c.bf16 %v3010_v55, %v3008_v57  ;;  %v2758_v35 = vadd.f32 %v8331_v32, %v9169_v24  ;;  %v469_v55 = vld [vmem:[%s7375_s16 + $0x368] sm:$0xff] }
 0x1e1   : > { %3869 = vmatmul.mubr.bf16.gmra.mxu0 %v9153_v48  ;;  %4542 = vmatmul.mubr.bf16.gmra.mxu1 %v9153_v48  ;;  %v2260_v34 = vmul.f32 %v8316_v54, %v1738_v20  ;;  %v2261_v16 = vmul.f32 %v8319_v36, %v1738_v20  ;;  %v2756_v3 = vadd.f32 %v8331_v32, %v9140_v19  ;;  %v3013_v24 = vmax.f32 %v2757_v12, 0.0  ;;  %v14058_v20 = vld [vmem:[#allocation100_spill] sm:$0xff]  ;;  %v14060_v19 = vld [vmem:[#allocation94_spill] sm:$0xff] }
 0x1e2   : > { %v2258_v1 = vmul.f32 %v8316_v54, %v1733_v51  ;;  %v2259_v48 = vmul.f32 %v8319_v36, %v1733_v51  ;;  %3878 = vmatprep.mubr.bf16.mxu0 %v9184_v9  ;;  %4551 = vmatprep.mubr.bf16.mxu1 %v9184_v9  ;;  %v2761_v60 = vadd.f32 %v8334_v17, %v9162_v41 }
 0x1e3   : > { %2057 = vperm.xlu1 %7198, %v1502_v8   ;;  %2052 = vperm.xlu0 %7197, %v1501_v31   ;;  %v9313_v33 = vadd.f32 %v2256_v44, %v14058_v20  ;;  %v9316_v61 = vadd.f32 %v2257_v45, %v14059_v0  ;;  %v9319_v8 = vadd.f32 %v2254_v21, %v14060_v19  ;;  %v14061_v31 = vld [vmem:[#allocation95_spill] sm:$0xff]  ;;  %v3014_v44 = vmax.f32 %v2758_v35, 0.0  ;;  %v14062_v20 = vld [vmem:[#allocation104_spill] sm:$0xff]  ;;  %v14063_v21 = vld [vmem:[#allocation105_spill] sm:$0xff] }
 0x1e4   : > { %v1758_v51 = vpop.permute.xlu1 %1757  ;;  %v2763_v9 = vadd.f32 %v8334_v17, %v9206_v26  ;;  %v9324_v57 = vadd.f32 %v2255_v63, %v14061_v31  ;;  %v1753_v12 = vpop.permute.xlu0 %1752  ;;  %v9326_v41 = vpack.c.bf16 %v3015_v59, %v3013_v24  ;;  %v2762_v45 = vadd.f32 %v8331_v32, %v9201_v43  ;;  %v14064_v63 = vld [vmem:[#allocation98_spill] sm:$0xff]  ;;  %v14065_v59 = vld [vmem:[#allocation99_spill] sm:$0xff] }
 0x1e5   : > { %v9331_v0 = vadd.f32 %v2260_v34, %v14062_v20  ;;  %v9334_v19 = vadd.f32 %v2261_v16, %v14063_v21  ;;  %v3012_v62 = vmax.f32 %v2756_v3, 0.0  ;;  %v2760_v26 = vadd.f32 %v8331_v32, %v9157_v27  ;;  %v1505_v24 = vld [vmem:[%s7727_s24 + $0x368] sm:$0xff]  ;;  %v1504_v43 = vld [vmem:[%s7727_s24 + $0x360] sm:$0xff] }
 0x1e6   : > { %v9339_v31 = vadd.f32 %v2258_v1, %v14064_v63  ;;  %v9342_v35 = vadd.f32 %v2259_v48, %v14065_v59  ;;  %v3017_v37 = vmax.f32 %v2761_v60, 0.0  ;;  %v2767_v34 = vadd.f32 %v8334_v17, %v9224_v29 }
 0x1e7   : > { %1036 = vperm.xlu1 %7198, %v469_v55   ;;  %2062 = vperm.xlu0 %7197, %v1503_v14   ;;  %v2264_v16 = vmul.f32 %v8316_v54, %v1748_v30  ;;  %v2265_v55 = vmul.f32 %v8319_v36, %v1748_v30  ;;  %v2262_v3 = vmul.f32 %v8316_v54, %v1743_v49  ;;  %v3019_v27 = vmax.f32 %v2763_v9, 0.0 }
 0x1e8   : > { %v1768_v14 = vpop.permute.xlu1 %1767  ;;  %v2263_v1 = vmul.f32 %v8319_v36, %v1743_v49  ;;  %v1763_v48 = vpop.permute.xlu0 %1762  ;;  %v9354_v60 = vpack.c.bf16 %v3014_v44, %v3012_v62  ;;  %v3018_v29 = vmax.f32 %v2762_v45, 0.0  ;;  %v2765_v20 = vadd.f32 %v8334_v17, %v9198_v53  ;;  %v471_v62 = vld [vmem:[%s7375_s16 + $0x378] sm:$0xff]  ;;  %v470_v53 = vld [vmem:[%s7375_s16 + $0x370] sm:$0xff] }
 0x1e9   : > { %3879 = vmatmul.mubr.bf16.gmra.mxu0 %v9192_v38  ;;  %4552 = vmatmul.mubr.bf16.gmra.mxu1 %v9192_v38  ;;  %v2268_v30 = vmul.f32 %v8316_v54, %v1758_v51  ;;  %v2269_v21 = vmul.f32 %v8319_v36, %v1758_v51  ;;  %v3016_v49 = vmax.f32 %v2760_v26, 0.0  ;;  %v2764_v9 = vadd.f32 %v8331_v32, %v9195_v52  ;;  %v14066_v45 = vld [vmem:[#allocation108_spill] sm:$0xff]  ;;  %v14067_v26 = vld [vmem:[#allocation109_spill] sm:$0xff]  ;;  %v14068_v52 = vld [vmem:[#allocation102_spill] sm:$0xff] }
 0x1ea   : > { %v2266_v38 = vmul.f32 %v8316_v54, %v1753_v12  ;;  %v2267_v63 = vmul.f32 %v8319_v36, %v1753_v12  ;;  %3888 = vmatprep.mubr.bf16.mxu0 %v9208_v5  ;;  %4561 = vmatprep.mubr.bf16.mxu1 %v9208_v5  ;;  %v3023_v44 = vmax.f32 %v2767_v34, 0.0  ;;  %v2766_v51 = vadd.f32 %v8331_v32, %v9221_v46  ;;  %v14069_v5 = vld [vmem:[#allocation103_spill] sm:$0xff] }
 0x1eb   : > { %2072 = vperm.xlu1 %7198, %v1505_v24   ;;  %2067 = vperm.xlu0 %7197, %v1504_v43   ;;  %v9371_v59 = vadd.f32 %v2264_v16, %v14066_v45  ;;  %v9374_v24 = vadd.f32 %v2265_v55, %v14067_v26  ;;  %v9377_v43 = vadd.f32 %v2262_v3, %v14068_v52  ;;  %v3021_v46 = vmax.f32 %v2765_v20, 0.0  ;;  %v14070_v55 = vld [vmem:[#allocation113_spill] sm:$0xff]  ;;  %v14072_v3 = vld [vmem:[#allocation114_spill] sm:$0xff] }
 0x1ec   : > { %v1778_v12 = vpop.permute.xlu1 %1777  ;;  %v9379_v2 = vpack.c.bf16 %v3019_v27, %v3017_v37  ;;  %v9382_v56 = vadd.f32 %v2263_v1, %v14069_v5  ;;  %v1773_v34 = vpop.permute.xlu0 %1772  ;;  %v9384_v10 = vpack.c.bf16 %v3018_v29, %v3016_v49  ;;  %v2771_v16 = vadd.f32 %v8334_v17, %v9266_v23  ;;  %v14073_v1 = vld [vmem:[#allocation106_spill] sm:$0xff]  ;;  %v14074_v29 = vld [vmem:[#allocation107_spill] sm:$0xff]  ;;  %v1506_v23 = vld [vmem:[%s7727_s24 + $0x370] sm:$0xff] }
 0x1ed   : > { %v9389_v45 = vadd.f32 %v2268_v30, %v14070_v55  ;;  %v9392_v26 = vadd.f32 %v2269_v21, %v14072_v3  ;;  %v3020_v37 = vmax.f32 %v2764_v9, 0.0  ;;  %v2769_v27 = vadd.f32 %v8334_v17, %v9216_v39  ;;  %v1507_v49 = vld [vmem:[%s7727_s24 + $0x378] sm:$0xff] }
 0x1ee   : > { %v9397_v52 = vadd.f32 %v2266_v38, %v14073_v1  ;;  %v9400_v20 = vadd.f32 %v2267_v63, %v14074_v29  ;;  %v9404_v5 = vpack.c.bf16 %v3023_v44, %v3021_v46  ;;  %v3022_v30 = vmax.f32 %v2766_v51, 0.0  ;;  %v14075_v1 = vld [vmem:[#allocation117_spill] sm:$0xff]  ;;  %v14076_v29 = vld [vmem:[#allocation118_spill] sm:$0xff] }
 0x1ef   : > { %14071 = vst [vmem:[#allocation53_spill] sm:$0xff] %v9389_v45  ;;  %1046 = vperm.xlu1 %7198, %v471_v62   ;;  %1041 = vperm.xlu0 %7197, %v470_v53   ;;  %v2272_v21 = vmul.f32 %v8316_v54, %v1768_v14  ;;  %v2273_v62 = vmul.f32 %v8319_v36, %v1768_v14  ;;  %v3027_v44 = vmax.f32 %v2771_v16, 0.0  ;;  %v472_v16 = vld [vmem:[%s7375_s16 + $0x380] sm:$0xff]  ;;  %v3025_v3 = vmax.f32 %v2769_v27, 0.0 }
 0x1f0   : > { %v2270_v9 = vmul.f32 %v8316_v54, %v1763_v48  ;;  %v1788_v53 = vpop.permute.xlu1 %1787  ;;  %v2770_v39 = vadd.f32 %v8331_v32, %v9263_v22  ;;  %v2271_v38 = vmul.f32 %v8319_v36, %v1763_v48  ;;  %v1783_v63 = vpop.permute.xlu0 %1782  ;;  %v2768_v51 = vadd.f32 %v8331_v32, %v9213_v50  ;;  %v473_v50 = vld [vmem:[%s7375_s16 + $0x388] sm:$0xff] }
 0x1f1   : > { %3889 = vmatmul.mubr.bf16.gmra.mxu0 %v9228_v15  ;;  %4562 = vmatmul.mubr.bf16.gmra.mxu1 %v9228_v15  ;;  %v2775_v14 = vadd.f32 %v8334_v17, %v9282_v18  ;;  %v2276_v46 = vmul.f32 %v8316_v54, %v1778_v12  ;;  %v2277_v22 = vmul.f32 %v8319_v36, %v1778_v12 }
 0x1f2   : > { %v2773_v48 = vadd.f32 %v8334_v17, %v9258_v42  ;;  %v2274_v55 = vmul.f32 %v8316_v54, %v1773_v34  ;;  %v2275_v15 = vmul.f32 %v8319_v36, %v1773_v34  ;;  %3898 = vmatprep.mubr.bf16.mxu0 %v9260_v47  ;;  %4571 = vmatprep.mubr.bf16.mxu1 %v9260_v47  ;;  %v14077_v42 = vld [vmem:[#allocation111_spill] sm:$0xff]  ;;  %v3026_v34 = vmax.f32 %v2770_v39, 0.0 }
 0x1f3   : > { %2082 = vperm.xlu1 %7198, %v1507_v49   ;;  %2077 = vperm.xlu0 %7197, %v1506_v23   ;;  %v9428_v18 = vpack.c.bf16 %v3022_v30, %v3020_v37  ;;  %v9431_v12 = vadd.f32 %v2272_v21, %v14075_v1  ;;  %v9434_v49 = vadd.f32 %v2273_v62, %v14076_v29  ;;  %v3031_v27 = vmax.f32 %v2775_v14, 0.0  ;;  %v14079_v21 = vld [vmem:[#allocation4_spill] sm:$0xff] }
 0x1f4   : > { %v9437_v23 = vadd.f32 %v2270_v9, %v14077_v42  ;;  %v1798_v28 = vpop.permute.xlu1 %1797  ;;  %v9440_v47 = vadd.f32 %v2271_v38, %v14078_v4  ;;  %v1793_v45 = vpop.permute.xlu0 %1792  ;;  %v9442_v37 = vpack.c.bf16 %v3027_v44, %v3025_v3  ;;  %v2774_v30 = vadd.f32 %v8331_v32, %v9279_v40  ;;  %v14081_v1 = vld [vmem:[#allocation120_spill] sm:$0xff]  ;;  %v14083_v42 = vld [vmem:[#allocation115_spill] sm:$0xff] }
 0x1f5   : > { %v9447_v62 = vadd.f32 %v2276_v46, %v14079_v21  ;;  %v9450_v9 = vadd.f32 %v2277_v22, %v14081_v1  ;;  %v3024_v39 = vmax.f32 %v2768_v51, 0.0  ;;  %v3029_v29 = vmax.f32 %v2773_v48, 0.0  ;;  %v14084_v38 = vld [vmem:[#allocation116_spill] sm:$0xff]  ;;  %v1508_v40 = vld [vmem:[%s7727_s24 + $0x380] sm:$0xff] }
 0x1f6   : > { %v9453_v4 = vadd.f32 %v2274_v55, %v14083_v42  ;;  %v9456_v44 = vadd.f32 %v2275_v15, %v14084_v38  ;;  %v2280_v14 = vmul.f32 %v8316_v54, %v1788_v53  ;;  %v1509_v3 = vld [vmem:[%s7727_s24 + $0x388] sm:$0xff]  ;;  %v2772_v46 = vadd.f32 %v8331_v32, %v9255_v25  ;;  %v14088_v38 = vld [vmem:[#allocation122_spill] sm:$0xff] }
 0x1f7   : > { %14080 = vst [vmem:[#allocation54_spill] sm:$0xff] %v9447_v62  ;;  %14082 = vst [vmem:[#allocation52_spill] sm:$0xff] %v9450_v9  ;;  %1056 = vperm.xlu1 %7198, %v473_v50   ;;  %1051 = vperm.xlu0 %7197, %v472_v16   ;;  %v2281_v22 = vmul.f32 %v8319_v36, %v1788_v53  ;;  %v2278_v50 = vmul.f32 %v8316_v54, %v1783_v63  ;;  %v3030_v53 = vmax.f32 %v2774_v30, 0.0  ;;  %v474_v30 = vld [vmem:[%s7375_s16 + $0x390] sm:$0xff] }
 0x1f8   : > { %v1808_v16 = vpop.permute.xlu1 %1807  ;;  %v9465_v51 = vpack.c.bf16 %v3026_v34, %v3024_v39  ;;  %v2779_v48 = vadd.f32 %v8334_v17, %v9324_v57  ;;  %v2279_v55 = vmul.f32 %v8319_v36, %v1783_v63  ;;  %v1803_v15 = vpop.permute.xlu0 %1802  ;;  %v9472_v25 = vpack.c.bf16 %v3031_v27, %v3029_v29  ;;  %v14085_v63 = vld [vmem:[#allocation33_spill] sm:$0xff] }
 0x1f9   : > { %3899 = vmatmul.mubr.bf16.gmra.mxu0 %v9276_v7  ;;  %4572 = vmatmul.mubr.bf16.gmra.mxu1 %v9276_v7  ;;  %v2777_v21 = vadd.f32 %v8334_v17, %v9274_v6  ;;  %v2284_v34 = vmul.f32 %v8316_v54, %v1798_v28  ;;  %v2285_v1 = vmul.f32 %v8319_v36, %v1798_v28  ;;  %v14086_v7 = vld [vmem:[#allocation6_spill] sm:$0xff]  ;;  %v3028_v29 = vmax.f32 %v2772_v46, 0.0 }
 0x1fa   : > { %v2778_v57 = vadd.f32 %v8331_v32, %v9319_v8  ;;  %v9482_v42 = vadd.f32 %v2280_v14, %v14086_v7  ;;  %v2282_v27 = vmul.f32 %v8316_v54, %v1793_v45  ;;  %3908 = vmatprep.mubr.bf16.mxu0 %v9291_v58  ;;  %4581 = vmatprep.mubr.bf16.mxu1 %v9291_v58  ;;  %v475_v6 = vld [vmem:[%s7375_s16 + $0x398] sm:$0xff]  ;;  %v14090_v8 = vld [vmem:[#allocation3_spill] sm:$0xff]  ;;  %v3035_v39 = vmax.f32 %v2779_v48, 0.0 }
 0x1fb   : > { %2092 = vperm.xlu1 %7198, %v1509_v3   ;;  %2087 = vperm.xlu0 %7197, %v1508_v40   ;;  %v2776_v28 = vadd.f32 %v8331_v32, %v9271_v11  ;;  %v9492_v3 = vadd.f32 %v2281_v22, %v14088_v38  ;;  %v9495_v40 = vadd.f32 %v2278_v50, %v14090_v8  ;;  %v3033_v11 = vmax.f32 %v2777_v21, 0.0  ;;  %v14092_v22 = vld [vmem:[#allocation8_spill] sm:$0xff] }
 0x1fc   : > { %14087 = vst [vmem:[#allocation56_spill] sm:$0xff] %v9482_v42  ;;  %v2283_v14 = vmul.f32 %v8319_v36, %v1793_v45  ;;  %v1818_v7 = vpop.permute.xlu1 %1817  ;;  %v14091_v42 = vld [vmem:[#allocation119_spill] sm:$0xff]  ;;  %v2288_v46 = vmul.f32 %v8316_v54, %v1808_v16  ;;  %v1813_v62 = vpop.permute.xlu0 %1812  ;;  %v9502_v9 = vpack.c.bf16 %v3030_v53, %v3028_v29  ;;  %v9505_v38 = vadd.f32 %v2284_v34, %v14092_v22  ;;  %v14094_v50 = vld [vmem:[#allocation124_spill] sm:$0xff]  ;;  %v1511_v53 = vld [vmem:[%s7727_s24 + $0x398] sm:$0xff] }
 0x1fd   : > { %14089 = vst [vmem:[#allocation55_spill] sm:$0xff] %v9492_v3  ;;  %v9499_v58 = vadd.f32 %v2279_v55, %v14091_v42  ;;  %v9508_v8 = vadd.f32 %v2285_v1, %v14094_v50  ;;  %v3034_v45 = vmax.f32 %v2778_v57, 0.0  ;;  %v2783_v48 = vadd.f32 %v8334_v17, %v9342_v35  ;;  %v14096_v55 = vld [vmem:[#allocation5_spill] sm:$0xff] }
 0x1fe   : > { %14093 = vst [vmem:[#allocation61_spill] sm:$0xff] %v9505_v38  ;;  %v9513_v42 = vadd.f32 %v2282_v27, %v14096_v55  ;;  %v2292_v3 = vmul.f32 %v8316_v54, %v1818_v7  ;;  %v1510_v29 = vld [vmem:[%s7727_s24 + $0x390] sm:$0xff]  ;;  %v3032_v21 = vmax.f32 %v2776_v28, 0.0  ;;  %v2781_v34 = vadd.f32 %v8334_v17, %v9316_v61  ;;  %v14099_v27 = vld [vmem:[#allocation10_spill] sm:$0xff] }
 0x1ff   : > { %14095 = vst [vmem:[#allocation58_spill] sm:$0xff] %v9508_v8  ;;  %1066 = vperm.xlu1 %7198, %v475_v6   ;;  %1061 = vperm.xlu0 %7197, %v474_v30   ;;  %v14098_v22 = vld [vmem:[#allocation121_spill] sm:$0xff]  ;;  %v2289_v6 = vmul.f32 %v8319_v36, %v1808_v16  ;;  %v9524_v30 = vpack.c.bf16 %v3035_v39, %v3033_v11  ;;  %v14106_v8 = vld [vmem:[#allocation128_spill] sm:$0xff] }
 0x200   : > { %14097 = vst [vmem:[#allocation57_spill] sm:$0xff] %v9513_v42  ;;  %v9521_v1 = vadd.f32 %v2283_v14, %v14098_v22  ;;  %v1828_v57 = vpop.permute.xlu1 %1827  ;;  %v2782_v35 = vadd.f32 %v8331_v32, %v9339_v31  ;;  %v2544_v50 = vadd.f32 %v2288_v46, %v14099_v27  ;;  %v2286_v55 = vmul.f32 %v8316_v54, %v1803_v15  ;;  %v1823_v61 = vpop.permute.xlu0 %1822  ;;  %v14100_v22 = vld [vmem:[#allocation12_spill] sm:$0xff]  ;;  %v14104_v16 = vld [vmem:[#allocation9_spill] sm:$0xff] }
 0x201   : > { %v2290_v28 = vmul.f32 %v8316_v54, %v1813_v62  ;;  %3909 = vmatmul.mubr.bf16.gmra.mxu0 %v9296_v13  ;;  %4582 = vmatmul.mubr.bf16.gmra.mxu1 %v9296_v13  ;;  %v2287_v39 = vmul.f32 %v8319_v36, %v1803_v15  ;;  %v9535_v31 = vpack.c.bf16 %v3034_v45, %v3032_v21  ;;  %v3039_v14 = vmax.f32 %v2783_v48, 0.0  ;;  %v477_v13 = vld [vmem:[%s7375_s16 + $0x3a8] sm:$0xff]  ;;  %v476_v15 = vld [vmem:[%s7375_s16 + $0x3a0] sm:$0xff] }
 0x202   : > { %v2780_v46 = vadd.f32 %v8331_v32, %v9313_v33  ;;  %v2293_v11 = vmul.f32 %v8319_v36, %v1818_v7  ;;  %v2548_v27 = vadd.f32 %v2292_v3, %v14100_v22  ;;  %v2296_v38 = vmul.f32 %v8316_v54, %v1828_v57  ;;  %3918 = vmatprep.mubr.bf16.mxu0 %v9326_v41  ;;  %v14103_v22 = vld [vmem:[#allocation7_spill] sm:$0xff] }
 0x203   : > { %2102 = vperm.xlu1 %7198, %v1511_v53   ;;  %2097 = vperm.xlu0 %7197, %v1510_v29   ;;  %v3037_v53 = vmax.f32 %v2781_v34, 0.0  ;;  %v14101_v29 = vld [vmem:[#allocation126_spill] sm:$0xff]  ;;  %v2291_v48 = vmul.f32 %v8319_v36, %v1813_v62  ;;  %v3038_v33 = vmax.f32 %v2782_v35, 0.0  ;;  %v2787_v7 = vadd.f32 %v8334_v17, %v9382_v56 }
 0x204   : > { %4591 = vmatprep.mubr.bf16.mxu1 %v9326_v41  ;;  %v9547_v45 = vadd.f32 %v2289_v6, %v14101_v29  ;;  %v1838_v21 = vpop.permute.xlu1 %1837  ;;  %v9553_v3 = vadd.f32 %v8331_v32, %v2544_v50  ;;  %v9556_v41 = vadd.f32 %v2286_v55, %v14103_v22  ;;  %v2546_v34 = vadd.f32 %v2290_v28, %v14104_v16  ;;  %v1833_v29 = vpop.permute.xlu0 %1832  ;;  %v14109_v28 = vld [vmem:[#allocation14_spill] sm:$0xff] }
 0x205   : > { %v2294_v6 = vmul.f32 %v8316_v54, %v1823_v61  ;;  %v9563_v35 = vpack.c.bf16 %v3039_v14, %v3037_v53  ;;  %v3036_v56 = vmax.f32 %v2780_v46, 0.0  ;;  %v2785_v50 = vadd.f32 %v8334_v17, %v9334_v19 }
 0x206   : > { %14102 = vst [vmem:[#allocation60_spill] sm:$0xff] %v9547_v45  ;;  %v14105_v45 = vld [vmem:[#allocation123_spill] sm:$0xff]  ;;  %v9568_v42 = vadd.f32 %v2293_v11, %v14106_v8  ;;  %v9571_v55 = vadd.f32 %v8331_v32, %v2548_v27  ;;  %v2552_v16 = vadd.f32 %v2296_v38, %v14109_v28  ;;  %v2300_v22 = vmul.f32 %v8316_v54, %v1838_v21 }
 0x207   : > { %v9561_v62 = vadd.f32 %v2287_v39, %v14105_v45  ;;  %1076 = vperm.xlu1 %7198, %v477_v13   ;;  %1071 = vperm.xlu0 %7197, %v476_v15   ;;  %v1513_v39 = vld [vmem:[%s7727_s24 + $0x3a8] sm:$0xff]  ;;  %v1512_v45 = vld [vmem:[%s7727_s24 + $0x3a0] sm:$0xff]  ;;  %v14110_v13 = vld [vmem:[#allocation125_spill] sm:$0xff]  ;;  %v2297_v14 = vmul.f32 %v8319_v36, %v1828_v57  ;;  %v9581_v53 = vpack.c.bf16 %v3038_v33, %v3036_v56  ;;  %v3043_v19 = vmax.f32 %v2787_v7, 0.0 }
 0x208   : > { %14107 = vst [vmem:[#allocation64_spill] sm:$0xff] %v9568_v42  ;;  %14108 = vst [vmem:[#allocation59_spill] sm:$0xff] %v9571_v55  ;;  %v9578_v15 = vadd.f32 %v2291_v48, %v14110_v13  ;;  %v1848_v46 = vpop.permute.xlu1 %1847  ;;  %v9585_v11 = vadd.f32 %v8331_v32, %v2546_v34  ;;  %v14112_v27 = vld [vmem:[#allocation11_spill] sm:$0xff]  ;;  %v2298_v28 = vmul.f32 %v8316_v54, %v1833_v29  ;;  %v1843_v57 = vpop.permute.xlu0 %1842  ;;  %v3041_v7 = vmax.f32 %v2785_v50, 0.0  ;;  %v14120_v42 = vld [vmem:[#allocation132_spill] sm:$0xff] }
 0x209   : > { %v2550_v38 = vadd.f32 %v2294_v6, %v14112_v27  ;;  %3919 = vmatmul.mubr.bf16.gmra.mxu0 %v9354_v60  ;;  %4592 = vmatmul.mubr.bf16.gmra.mxu1 %v9354_v60  ;;  %v2295_v48 = vmul.f32 %v8319_v36, %v1823_v61  ;;  %v2304_v33 = vmul.f32 %v8316_v54, %v1848_v46  ;;  %v14114_v27 = vld [vmem:[#allocation16_spill] sm:$0xff]  ;;  %v479_v61 = vld [vmem:[%s7375_s16 + $0x3b8] sm:$0xff] }
 0x20a   : > { %14111 = vst [vmem:[#allocation62_spill] sm:$0xff] %v9585_v11  ;;  %v2784_v34 = vadd.f32 %v8331_v32, %v9331_v0  ;;  %v9597_v56 = vadd.f32 %v8331_v32, %v2552_v16  ;;  %v2301_v13 = vmul.f32 %v8319_v36, %v1838_v21  ;;  %v2556_v60 = vadd.f32 %v2300_v22, %v14114_v27  ;;  %v14117_v27 = vld [vmem:[#allocation13_spill] sm:$0xff] }
 0x20b   : > { %2112 = vperm.xlu1 %7198, %v1513_v39   ;;  %2107 = vperm.xlu0 %7197, %v1512_v45   ;;  %v478_v39 = vld [vmem:[%s7375_s16 + $0x3b0] sm:$0xff]  ;;  %v14115_v45 = vld [vmem:[#allocation130_spill] sm:$0xff]  ;;  %v2302_v0 = vmul.f32 %v8316_v54, %v1843_v57  ;;  %v9609_v6 = vpack.c.bf16 %v3043_v19, %v3041_v7  ;;  %v2786_v16 = vadd.f32 %v8331_v32, %v9377_v43 }
 0x20c   : > { %14113 = vst [vmem:[#allocation63_spill] sm:$0xff] %v9597_v56  ;;  %3928 = vmatprep.mubr.bf16.mxu0 %v9379_v2  ;;  %4601 = vmatprep.mubr.bf16.mxu1 %v9379_v2  ;;  %v9606_v50 = vadd.f32 %v2297_v14, %v14115_v45  ;;  %v1858_v8 = vpop.permute.xlu1 %1857  ;;  %v9615_v22 = vadd.f32 %v8331_v32, %v2550_v38  ;;  %v1853_v45 = vpop.permute.xlu0 %1852  ;;  %v14119_v19 = vld [vmem:[#allocation18_spill] sm:$0xff]  ;;  %v3040_v43 = vmax.f32 %v2784_v34, 0.0  ;;  %v14124_v38 = vld [vmem:[#allocation129_spill] sm:$0xff] }
 0x20d   : > { %v2299_v2 = vmul.f32 %v8319_v36, %v1833_v29  ;;  %v2554_v14 = vadd.f32 %v2298_v28, %v14117_v27  ;;  %v2560_v7 = vadd.f32 %v2304_v33, %v14119_v19  ;;  %v9625_v21 = vadd.f32 %v8334_v17, %v9374_v24 }
 0x20e   : > { %14116 = vst [vmem:[#allocation65_spill] sm:$0xff] %v9606_v50  ;;  %v14118_v50 = vld [vmem:[#allocation127_spill] sm:$0xff]  ;;  %v9629_v11 = vadd.f32 %v2301_v13, %v14120_v42  ;;  %v9632_v29 = vadd.f32 %v8331_v32, %v2556_v60  ;;  %v2308_v28 = vmul.f32 %v8316_v54, %v1858_v8  ;;  %v2305_v33 = vmul.f32 %v8319_v36, %v1848_v46 }
 0x20f   : > { %v9620_v55 = vadd.f32 %v2295_v48, %v14118_v50  ;;  %1086 = vperm.xlu1 %7198, %v479_v61   ;;  %1081 = vperm.xlu0 %7197, %v478_v39   ;;  %v1515_v48 = vld [vmem:[%s7727_s24 + $0x3b8] sm:$0xff]  ;;  %v1514_v50 = vld [vmem:[%s7727_s24 + $0x3b0] sm:$0xff]  ;;  %v14123_v61 = vld [vmem:[#allocation15_spill] sm:$0xff]  ;;  %v2306_v39 = vmul.f32 %v8316_v54, %v1853_v45  ;;  %v3042_v27 = vmax.f32 %v2786_v16, 0.0  ;;  %v9642_v42 = vadd.f32 %v2299_v2, %v14124_v38 }
 0x210   : > { %14121 = vst [vmem:[#allocation66_spill] sm:$0xff] %v9629_v11  ;;  %14122 = vst [vmem:[#allocation71_spill] sm:$0xff] %v9632_v29  ;;  %v2558_v34 = vadd.f32 %v2302_v0, %v14123_v61  ;;  %v1868_v24 = vpop.permute.xlu1 %1867  ;;  %v9645_v13 = vadd.f32 %v8331_v32, %v2554_v14  ;;  %v1863_v46 = vpop.permute.xlu0 %1862  ;;  %v2791_v60 = vadd.f32 %v8334_v17, %v9400_v20  ;;  %v3045_v14 = vmax.f32 %v9625_v21, 0.0  ;;  %v14128_v61 = vld [vmem:[#allocation20_spill] sm:$0xff]  ;;  %v14132_v21 = vld [vmem:[#allocation17_spill] sm:$0xff] }
 0x211   : > { %14125 = vst [vmem:[#allocation67_spill] sm:$0xff] %v9642_v42  ;;  %3929 = vmatmul.mubr.bf16.gmra.mxu0 %v9384_v10  ;;  %4602 = vmatmul.mubr.bf16.gmra.mxu1 %v9384_v10  ;;  %v9652_v0 = vadd.f32 %v8331_v32, %v2560_v7  ;;  %v2303_v16 = vmul.f32 %v8319_v36, %v1843_v57  ;;  %v481_v7 = vld [vmem:[%s7375_s16 + $0x3c8] sm:$0xff]  ;;  %v14129_v57 = vld [vmem:[#allocation134_spill] sm:$0xff] }
 0x212   : > { %14126 = vst [vmem:[#allocation68_spill] sm:$0xff] %v9645_v13  ;;  %v2312_v2 = vmul.f32 %v8316_v54, %v1868_v24  ;;  %v2309_v10 = vmul.f32 %v8319_v36, %v1858_v8  ;;  %v2564_v19 = vadd.f32 %v2308_v28, %v14128_v61  ;;  %v2310_v20 = vmul.f32 %v8316_v54, %v1863_v46  ;;  %v480_v38 = vld [vmem:[%s7375_s16 + $0x3c0] sm:$0xff] }
 0x213   : > { %14127 = vst [vmem:[#allocation74_spill] sm:$0xff] %v9652_v0  ;;  %2122 = vperm.xlu1 %7198, %v1515_v48   ;;  %2117 = vperm.xlu0 %7197, %v1514_v50   ;;  %v9665_v11 = vadd.f32 %v2305_v33, %v14129_v57  ;;  %v9668_v48 = vadd.f32 %v8331_v32, %v2558_v34  ;;  %v14133_v57 = vld [vmem:[#allocation131_spill] sm:$0xff] }
 0x214   : > { %3938 = vmatprep.mubr.bf16.mxu0 %v9404_v5  ;;  %4611 = vmatprep.mubr.bf16.mxu1 %v9404_v5  ;;  %v2562_v50 = vadd.f32 %v2306_v39, %v14132_v21  ;;  %v9672_v29 = vpack.c.bf16 %v3042_v27, %v3040_v43  ;;  %v2307_v28 = vmul.f32 %v8319_v36, %v1853_v45  ;;  %v3047_v5 = vmax.f32 %v2791_v60, 0.0  ;;  %v14135_v39 = vld [vmem:[#allocation22_spill] sm:$0xff]  ;;  %v14136_v45 = vld [vmem:[#allocation136_spill] sm:$0xff] }
 0x215   : > { %14130 = vst [vmem:[#allocation69_spill] sm:$0xff] %v9665_v11  ;;  %14131 = vst [vmem:[#allocation70_spill] sm:$0xff] %v9668_v48  ;;  %v1878_v61 = vpop.permute.xlu1 %1877  ;;  %v1873_v56 = vpop.permute.xlu0 %1872  ;;  %v2790_v33 = vadd.f32 %v8331_v32, %v9397_v52  ;;  %v9679_v11 = vadd.f32 %v2303_v16, %v14133_v57  ;;  %v2313_v34 = vmul.f32 %v8319_v36, %v1868_v24  ;;  %v14139_v52 = vld [vmem:[#allocation19_spill] sm:$0xff] }
 0x216   : > { %v2568_v21 = vadd.f32 %v2312_v2, %v14135_v39  ;;  %v2788_v43 = vadd.f32 %v8331_v32, %v9371_v59  ;;  %v9687_v8 = vadd.f32 %v2309_v10, %v14136_v45  ;;  %v9690_v60 = vadd.f32 %v8331_v32, %v2564_v19  ;;  %v1517_v57 = vld [vmem:[%s7727_s24 + $0x3c8] sm:$0xff]  ;;  %v14141_v39 = vld [vmem:[#allocation133_spill] sm:$0xff] }
 0x217   : > { %14134 = vst [vmem:[#allocation72_spill] sm:$0xff] %v9679_v11  ;;  %1096 = vperm.xlu1 %7198, %v481_v7   ;;  %v2566_v16 = vadd.f32 %v2310_v20, %v14139_v52  ;;  %1091 = vperm.xlu0 %7197, %v480_v38   ;;  %v9696_v2 = vadd.f32 %v8331_v32, %v2562_v50  ;;  %v1516_v20 = vld [vmem:[%s7727_s24 + $0x3c0] sm:$0xff]  ;;  %v3046_v50 = vmax.f32 %v2790_v33, 0.0 }
 0x218   : > { %14137 = vst [vmem:[#allocation73_spill] sm:$0xff] %v9687_v8  ;;  %14138 = vst [vmem:[#allocation75_spill] sm:$0xff] %v9690_v60  ;;  %v2311_v59 = vmul.f32 %v8319_v36, %v1863_v46  ;;  %v2316_v7 = vmul.f32 %v8316_v54, %v1878_v61  ;;  %v9701_v27 = vadd.f32 %v2307_v28, %v14141_v39  ;;  %v14143_v52 = vld [vmem:[#allocation138_spill] sm:$0xff]  ;;  %v3044_v28 = vmax.f32 %v2788_v43, 0.0  ;;  %v14149_v43 = vld [vmem:[#allocation24_spill] sm:$0xff] }
 0x219   : > { %14140 = vst [vmem:[#allocation76_spill] sm:$0xff] %v9696_v2  ;;  %v2314_v10 = vmul.f32 %v8316_v54, %v1873_v56  ;;  %v1888_v19 = vpop.permute.xlu1 %1887  ;;  %3939 = vmatmul.mubr.bf16.gmra.mxu0 %v9428_v18  ;;  %4612 = vmatmul.mubr.bf16.gmra.mxu1 %v9428_v18  ;;  %v1883_v38 = vpop.permute.xlu0 %1882  ;;  %v9707_v45 = vpack.c.bf16 %v3047_v5, %v3045_v14  ;;  %v483_v5 = vld [vmem:[%s7375_s16 + $0x3d8] sm:$0xff]  ;;  %v482_v60 = vld [vmem:[%s7375_s16 + $0x3d0] sm:$0xff] }
 0x21a   : > { %14142 = vst [vmem:[#allocation81_spill] sm:$0xff] %v9701_v27  ;;  %v9710_v46 = vadd.f32 %v2313_v34, %v14143_v52  ;;  %v9713_v24 = vadd.f32 %v8331_v32, %v2568_v21  ;;  %v2793_v39 = vadd.f32 %v8334_v17, %v9392_v26  ;;  %v9719_v18 = vadd.f32 %v8331_v32, %v2566_v16  ;;  %v14147_v21 = vld [vmem:[#allocation135_spill] sm:$0xff]  ;;  %v14150_v16 = vld [vmem:[#allocation21_spill] sm:$0xff] }
 0x21b   : > { %2132 = vperm.xlu1 %7198, %v1517_v57   ;;  %v2317_v14 = vmul.f32 %v8319_v36, %v1878_v61  ;;  %3948 = vmatprep.mubr.bf16.mxu0 %v9442_v37  ;;  %v2795_v33 = vadd.f32 %v8334_v17, %v9440_v47  ;;  %v9729_v26 = vadd.f32 %v2311_v59, %v14147_v21  ;;  %v14151_v34 = vld [vmem:[#allocation53_spill] sm:$0xff] }
 0x21c   : > { %14144 = vst [vmem:[#allocation77_spill] sm:$0xff] %v9710_v46  ;;  %14145 = vst [vmem:[#allocation78_spill] sm:$0xff] %v9713_v24  ;;  %4621 = vmatprep.mubr.bf16.mxu1 %v9442_v37  ;;  %v2572_v57 = vadd.f32 %v2316_v7, %v14149_v43  ;;  %2127 = vperm.xlu0 %7197, %v1516_v20   ;;  %v2794_v61 = vadd.f32 %v8331_v32, %v9437_v23  ;;  %v3049_v23 = vmax.f32 %v2793_v39, 0.0  ;;  %v14152_v43 = vld [vmem:[#allocation140_spill] sm:$0xff] }
 0x21d   : > { %14146 = vst [vmem:[#allocation84_spill] sm:$0xff] %v9719_v18  ;;  %14148 = vst [vmem:[#allocation85_spill] sm:$0xff] %v9729_v26  ;;  %v2570_v52 = vadd.f32 %v2314_v10, %v14150_v16  ;;  %v2320_v37 = vmul.f32 %v8316_v54, %v1888_v19  ;;  %v9737_v47 = vpack.c.bf16 %v3046_v50, %v3044_v28  ;;  %v1519_v26 = vld [vmem:[%s7727_s24 + $0x3d8] sm:$0xff]  ;;  %v3051_v50 = vmax.f32 %v2795_v33, 0.0  ;;  %v1518_v33 = vld [vmem:[%s7727_s24 + $0x3d0] sm:$0xff] }
 0x21e   : > { %v1898_v8 = vpop.permute.xlu1 %1897  ;;  %v1893_v46 = vpop.permute.xlu0 %1892  ;;  %v2792_v59 = vadd.f32 %v8331_v32, %v14151_v34  ;;  %v2315_v7 = vmul.f32 %v8319_v36, %v1873_v56  ;;  %v2318_v20 = vmul.f32 %v8316_v54, %v1883_v38  ;;  %v9746_v16 = vadd.f32 %v2317_v14, %v14152_v43  ;;  %v14156_v10 = vld [vmem:[#allocation26_spill] sm:$0xff] }
 0x21f   : > { %1106 = vperm.xlu1 %7198, %v483_v5   ;;  %v2799_v28 = vadd.f32 %v8334_v17, %v9456_v44  ;;  %v9752_v34 = vadd.f32 %v8331_v32, %v2572_v57  ;;  %v2324_v56 = vmul.f32 %v8316_v54, %v1898_v8  ;;  %v2322_v21 = vmul.f32 %v8316_v54, %v1893_v46 }
 0x220   : > { %14153 = vst [vmem:[#allocation79_spill] sm:$0xff] %v9746_v16  ;;  %1101 = vperm.xlu0 %7197, %v482_v60   ;;  %v3050_v39 = vmax.f32 %v2794_v61, 0.0  ;;  %v9757_v5 = vadd.f32 %v8331_v32, %v2570_v52  ;;  %v2576_v14 = vadd.f32 %v2320_v37, %v14156_v10  ;;  %v3048_v57 = vmax.f32 %v2792_v59, 0.0  ;;  %v14157_v52 = vld [vmem:[#allocation23_spill] sm:$0xff]  ;;  %v14158_v10 = vld [vmem:[#allocation137_spill] sm:$0xff] }
 0x221   : > { %14154 = vst [vmem:[#allocation80_spill] sm:$0xff] %v9752_v34  ;;  %3949 = vmatmul.mubr.bf16.gmra.mxu0 %v9465_v51  ;;  %4622 = vmatmul.mubr.bf16.gmra.mxu1 %v9465_v51  ;;  %v2797_v16 = vadd.f32 %v8334_v17, %v9434_v49  ;;  %v2321_v60 = vmul.f32 %v8319_v36, %v1888_v19  ;;  %v485_v49 = vld [vmem:[%s7375_s16 + $0x3e8] sm:$0xff]  ;;  %v3055_v19 = vmax.f32 %v2799_v28, 0.0 }
 0x222   : > { %14155 = vst [vmem:[#allocation88_spill] sm:$0xff] %v9757_v5  ;;  %v1908_v43 = vpop.permute.xlu1 %1907  ;;  %v1903_v44 = vpop.permute.xlu0 %1902  ;;  %v2319_v61 = vmul.f32 %v8319_v36, %v1883_v38  ;;  %v2574_v24 = vadd.f32 %v2318_v20, %v14157_v52  ;;  %v2325_v37 = vmul.f32 %v8319_v36, %v1898_v8  ;;  %v9770_v18 = vadd.f32 %v2315_v7, %v14158_v10  ;;  %v14160_v20 = vld [vmem:[#allocation28_spill] sm:$0xff]  ;;  %v14161_v8 = vld [vmem:[#allocation25_spill] sm:$0xff]  ;;  %v484_v10 = vld [vmem:[%s7375_s16 + $0x3e0] sm:$0xff] }
 0x223   : > { %2142 = vperm.xlu1 %7198, %v1519_v26   ;;  %v2323_v51 = vmul.f32 %v8319_v36, %v1893_v46  ;;  %3958 = vmatprep.mubr.bf16.mxu0 %v9472_v25  ;;  %v9776_v59 = vpack.c.bf16 %v3051_v50, %v3049_v23  ;;  %v2580_v52 = vadd.f32 %v2324_v56, %v14160_v20  ;;  %v9786_v46 = vld [vmem:[%s13615_s6] sm:$0xf]  ;;  %v14168_v38 = vld [vmem:[#allocation144_spill] sm:$0xff] }
 0x224   : > { %14159 = vst [vmem:[#allocation89_spill] sm:$0xff] %v9770_v18  ;;  %4631 = vmatprep.mubr.bf16.mxu1 %v9472_v25  ;;  %v2578_v26 = vadd.f32 %v2322_v21, %v14161_v8  ;;  %2137 = vperm.xlu0 %7197, %v1518_v33   ;;  %v9781_v7 = vpack.c.bf16 %v3050_v39, %v3048_v57  ;;  %v3053_v21 = vmax.f32 %v2797_v16, 0.0  ;;  %v14163_v33 = vld [vmem:[#allocation142_spill] sm:$0xff]  ;;  %v14165_v57 = vld [vmem:[#allocation139_spill] sm:$0xff] }
 0x225   : > { %v9790_v23 = vadd.f32 %v8331_v32, %v2576_v14  ;;  %v2328_v50 = vmul.f32 %v8316_v54, %v1908_v43  ;;  %v9795_v39 = vadd.f32 %v2321_v60, %v14163_v33  ;;  %v9798_v20 = vadd.f32 %v2319_v61, %v14165_v57  ;;  %v14170_v14 = vld [vmem:[#allocation141_spill] sm:$0xff]  ;;  %v1521_v18 = vld [vmem:[%s7727_s24 + $0x3e8] sm:$0xff]  ;;  %v14175_v33 = vld [vmem:[#allocation30_spill] sm:$0xff] }
 0x226   : > { %v1918_v28 = vpop.permute.xlu1 %1917  ;;  %v1913_v56 = vpop.permute.xlu0 %1912  ;;  %v9801_v8 = vadd.f32 %v8331_v32, %v2574_v24  ;;  %v9804_v25 = vadd.f32 %v2325_v37, %v14168_v38  ;;  %v9807_v34 = vadd.f32 %v2323_v51, %v14170_v14  ;;  %v2326_v5 = vmul.f32 %v8316_v54, %v1903_v44  ;;  %v14172_v60 = vld [vmem:[#allocation36_spill] sm:$0xff]  ;;  %v9820_v24 = vld [vmem:[%s13616_s7] sm:$0xf] }
 0x227   : > { %14162 = vst [vmem:[#allocation82_spill] sm:$0xff] %v9790_v23  ;;  %14164 = vst [vmem:[#allocation83_spill] sm:$0xff] %v9795_v39  ;;  %1116 = vperm.xlu1 %7198, %v485_v49   ;;  %v9811_v16 = vpack.c.bf16 %v3055_v19, %v3053_v21  ;;  %v9815_v61 = vrot.slane %v9786_v46, %v14172_v60  ;;  %v9823_v37 = vadd.f32 %v8331_v32, %v2580_v52  ;;  %v14176_v38 = vld [vmem:[#allocation27_spill] sm:$0xff]  ;;  %v14177_v39 = vld [vmem:[#allocation32_spill] sm:$0xff] }
 0x228   : > { %14166 = vst [vmem:[#allocation92_spill] sm:$0xff] %v9798_v20  ;;  %14167 = vst [vmem:[#allocation93_spill] sm:$0xff] %v9801_v8  ;;  %v9826_v51 = vadd.f32 %v8331_v32, %v2578_v26  ;;  %v2332_v49 = vmul.f32 %v8316_v54, %v1918_v28  ;;  %1111 = vperm.xlu0 %7197, %v484_v10   ;;  %v2798_v19 = vadd.f32 %v8331_v32, %v9453_v4  ;;  %v1520_v26 = vld [vmem:[%s7727_s24 + $0x3e0] sm:$0xff] }
 0x229   : > { %14169 = vst [vmem:[#allocation86_spill] sm:$0xff] %v9804_v25  ;;  %14171 = vst [vmem:[#allocation87_spill] sm:$0xff] %v9807_v34  ;;  %v2329_v21 = vmul.f32 %v8319_v36, %v1908_v43  ;;  %v2584_v57 = vadd.f32 %v2328_v50, %v14175_v33  ;;  %v2330_v14 = vmul.f32 %v8316_v54, %v1913_v56  ;;  %3959 = vmatmul.mubr.bf16.gmra.mxu0 %v9502_v9  ;;  %v14178_v8 = vld [vmem:[#allocation146_spill] sm:$0xff] }
 0x22a   : > { %14173 = vst [vmem:[#allocation96_spill] sm:$0xff] %v9823_v37  ;;  %14174 = vst [vmem:[#allocation97_spill] sm:$0xff] %v9826_v51  ;;  %v1928_v25 = vpop.permute.xlu1 %1927  ;;  %4632 = vmatmul.mubr.bf16.gmra.mxu1 %v9502_v9  ;;  %v1923_v52 = vpop.permute.xlu0 %1922  ;;  %v2327_v10 = vmul.f32 %v8319_v36, %v1903_v44  ;;  %v9842_v43 = vrot.slane %v9820_v24, %v14172_v60  ;;  %v2796_v50 = vadd.f32 %v8331_v32, %v9431_v12  ;;  %v486_v44 = vld [vmem:[%s7375_s16 + $0x3f0] sm:$0xff]  ;;  %v14182_v37 = vld [vmem:[#allocation143_spill] sm:$0xff] }
 0x22b   : > { %v2336_v4 = vmul.f32 %v8316_v54, %v1928_v25  ;;  %2152 = vperm.xlu1 %7198, %v1521_v18   ;;  %v2582_v23 = vadd.f32 %v2326_v5, %v14176_v38  ;;  %v2333_v9 = vmul.f32 %v8319_v36, %v1918_v28  ;;  %v2331_v34 = vmul.f32 %v8319_v36, %v1913_v56  ;;  %v487_v18 = vld [vmem:[%s7375_s16 + $0x3f8] sm:$0xff] }
 0x22c   : > { %3968 = vmatprep.mubr.bf16.mxu0 %v9524_v30  ;;  %4641 = vmatprep.mubr.bf16.mxu1 %v9524_v30  ;;  %v2588_v12 = vadd.f32 %v2332_v49, %v14177_v39  ;;  %v3054_v33 = vmax.f32 %v2798_v19, 0.0  ;;  %v9857_v5 = vadd.f32 %v2329_v21, %v14178_v8  ;;  %v9860_v28 = vadd.f32 %v8331_v32, %v2584_v57  ;;  %v14181_v56 = vld [vmem:[#allocation29_spill] sm:$0xff]  ;;  %v14184_v39 = vld [vmem:[#allocation35_spill] sm:$0xff]  ;;  %v14186_v57 = vld [vmem:[#allocation148_spill] sm:$0xff] }
 0x22d   : > { %2147 = vperm.xlu0 %7197, %v1520_v26   ;;  %v2586_v38 = vadd.f32 %v2330_v14, %v14181_v56  ;;  %v2334_v30 = vmul.f32 %v8316_v54, %v1923_v52  ;;  %v9866_v60 = vadd.f32 %v2327_v10, %v14182_v37  ;;  %v2592_v49 = vadd.f32 %v2336_v4, %v14184_v39  ;;  %v14188_v14 = vld [vmem:[#allocation145_spill] sm:$0xff] }
 0x22e   : > { %14179 = vst [vmem:[#allocation90_spill] sm:$0xff] %v9857_v5  ;;  %14180 = vst [vmem:[#allocation91_spill] sm:$0xff] %v9860_v28  ;;  %v1938_v20 = vpop.permute.xlu1 %1937  ;;  %v1933_v2 = vpop.permute.xlu0 %1932  ;;  %v3052_v8 = vmax.f32 %v2796_v50, 0.0  ;;  %v9871_v21 = vadd.f32 %v8331_v32, %v2582_v23  ;;  %v9874_v26 = vadd.f32 %v2333_v9, %v14186_v57  ;;  %v9877_v56 = vadd.f32 %v2331_v34, %v14188_v14  ;;  %v1523_v37 = vld [vmem:[%s7727_s24 + $0x3f8] sm:$0xff] }
 0x22f   : > { %14183 = vst [vmem:[#allocation100_spill] sm:$0xff] %v9866_v60  ;;  %v2340_v19 = vmul.f32 %v8316_v54, %v1938_v20  ;;  %1126 = vperm.xlu1 %7198, %v487_v18   ;;  %v2338_v5 = vmul.f32 %v8316_v54, %v1933_v2  ;;  %v9882_v10 = vadd.f32 %v8331_v32, %v2588_v12  ;;  %v14191_v50 = vsub.s32 2, %v14085_v63  ;;  %v14193_v12 = vld [vmem:[#allocation31_spill] sm:$0xff] }
 0x230   : > { %14185 = vst [vmem:[#allocation101_spill] sm:$0xff] %v9871_v21  ;;  %14187 = vst [vmem:[#allocation94_spill] sm:$0xff] %v9874_v26  ;;  %v9884_v4 = vpack.c.bf16 %v3054_v33, %v3052_v8  ;;  %v2803_v9 = vadd.f32 %v8334_v17, %v9499_v58  ;;  %v9895_v18 = vadd.f32 %v8331_v32, %v2586_v38  ;;  %v1522_v8 = vld [vmem:[%s7727_s24 + $0x3f0] sm:$0xff]  ;;  %v14197_v26 = vld [vmem:[#allocation34_spill] sm:$0xff] }
 0x231   : > { %14189 = vst [vmem:[#allocation95_spill] sm:$0xff] %v9877_v56  ;;  %14190 = vst [vmem:[#allocation104_spill] sm:$0xff] %v9882_v10  ;;  %1121 = vperm.xlu0 %7197, %v486_v44   ;;  %v9889_v23 = vrot.slane %v9786_v46, %v14191_v50  ;;  %v2337_v39 = vmul.f32 %v8319_v36, %v1928_v25  ;;  %v2590_v57 = vadd.f32 %v2334_v30, %v14193_v12  ;;  %v14195_v50 = vld [vmem:[#allocation152_spill] sm:$0xff]  ;;  %v14209_v56 = vld [vmem:[#allocation149_spill] sm:$0xff] }
 0x232   : > { %14192 = vst [vmem:[#allocation105_spill] sm:$0xff] %v9895_v18  ;;  %v1948_v44 = vpop.permute.xlu1 %1947  ;;  %3969 = vmatmul.mubr.bf16.gmra.mxu0 %v9535_v31  ;;  %4642 = vmatmul.mubr.bf16.gmra.mxu1 %v9535_v31  ;;  %v1943_v33 = vpop.permute.xlu0 %1942  ;;  %v9903_v14 = vadd.f32 %v8331_v32, %v2592_v49  ;;  %v2335_v58 = vmul.f32 %v8319_v36, %v1923_v52  ;;  %v14196_v38 = vld [vmem:[#allocation52_spill] sm:$0xff] }
 0x233   : > { %v2596_v34 = vadd.f32 %v2340_v19, %v14195_v50  ;;  %2162 = vperm.xlu1 %7198, %v1523_v37   ;;  %v2801_v25 = vadd.f32 %v8334_v17, %v14196_v38  ;;  %v2341_v12 = vmul.f32 %v8319_v36, %v1938_v20  ;;  %v2594_v28 = vadd.f32 %v2338_v5, %v14197_v26  ;;  %v14199_v5 = vld [vmem:[#allocation150_spill] sm:$0xff] }
 0x234   : > { %14194 = vst [vmem:[#allocation98_spill] sm:$0xff] %v9903_v14  ;;  %v2344_v31 = vmul.f32 %v8316_v54, %v1948_v44  ;;  %3978 = vmatprep.mubr.bf16.mxu0 %v9563_v35  ;;  %4651 = vmatprep.mubr.bf16.mxu1 %v9563_v35  ;;  %v2339_v49 = vmul.f32 %v8319_v36, %v1933_v2  ;;  %v14198_v19 = vsub.s32 2, %v14085_v63  ;;  %v3059_v50 = vmax.f32 %v2803_v9, 0.0  ;;  %v14202_v2 = vld [vmem:[#allocation147_spill] sm:$0xff] }
 0x235   : > { %2157 = vperm.xlu0 %7197, %v1522_v8   ;;  %v9924_v26 = vadd.f32 %v2337_v39, %v14199_v5  ;;  %v9927_v38 = vadd.f32 %v8331_v32, %v2590_v57  ;;  %v2342_v35 = vmul.f32 %v8316_v54, %v1943_v33  ;;  %v9931_v8 = vadd.f32 %v2335_v58, %v14202_v2  ;;  %v14205_v39 = vld [vmem:[#allocation153_spill] sm:$0xff] }
 0x236   : > { %v9920_v37 = vrot.slane %v9820_v24, %v14198_v19  ;;  %v1958_v52 = vpop.permute.xlu1 %1957  ;;  %v1953_v30 = vpop.permute.xlu0 %1952  ;;  %v9934_v10 = vadd.f32 %v8331_v32, %v2596_v34  ;;  %v3057_v19 = vmax.f32 %v2801_v25, 0.0  ;;  %v9939_v5 = vadd.f32 %v2341_v12, %v14205_v39  ;;  %v14211_v12 = vld [vmem:[#allocation38_spill] sm:$0xff] }
 0x237   : > { %14200 = vst [vmem:[#allocation99_spill] sm:$0xff] %v9924_v26  ;;  %14201 = vst [vmem:[#allocation108_spill] sm:$0xff] %v9927_v38  ;;  %v2348_v9 = vmul.f32 %v8316_v54, %v1958_v52  ;;  %v9942_v57 = vadd.f32 %v8331_v32, %v2594_v28  ;;  %v14208_v26 = vld [vmem:[#allocation41_spill] sm:$0xff]  ;;  %v9946_v21 = vadd.f32 %v2339_v49, %v14209_v56  ;;  %v14213_v49 = vld [vmem:[#allocation159_spill] sm:$0xff] }
 0x238   : > { %14203 = vst [vmem:[#allocation109_spill] sm:$0xff] %v9931_v8  ;;  %14204 = vst [vmem:[#allocation102_spill] sm:$0xff] %v9934_v10  ;;  %v2600_v18 = vadd.f32 %v2344_v31, %v14208_v26  ;;  %v2345_v58 = vmul.f32 %v8319_v36, %v1948_v44  ;;  %v2346_v34 = vmul.f32 %v8316_v54, %v1953_v30  ;;  %v14212_v56 = vld [vmem:[#allocation37_spill] sm:$0xff]  ;;  %v14217_v44 = vld [vmem:[#allocation154_spill] sm:$0xff] }
 0x239   : > { %14206 = vst [vmem:[#allocation103_spill] sm:$0xff] %v9939_v5  ;;  %14207 = vst [vmem:[#allocation113_spill] sm:$0xff] %v9942_v57  ;;  %v9950_v2 = vpack.c.bf16 %v3059_v50, %v3057_v19  ;;  %v2343_v20 = vmul.f32 %v8319_v36, %v1943_v33  ;;  %v2598_v39 = vadd.f32 %v2342_v35, %v14211_v12  ;;  %v14218_v10 = vld [vmem:[#allocation54_spill] sm:$0xff]  ;;  %v14229_v38 = vld [vmem:[#allocation157_spill] sm:$0xff] }
 0x23a   : > { %14210 = vst [vmem:[#allocation114_spill] sm:$0xff] %v9946_v21  ;;  %v1968_v5 = vpop.permute.xlu1 %1967  ;;  %3979 = vmatmul.mubr.bf16.gmra.mxu0 %v9581_v53  ;;  %4652 = vmatmul.mubr.bf16.gmra.mxu1 %v9581_v53  ;;  %v1963_v28 = vpop.permute.xlu0 %1962  ;;  %v9959_v31 = vrot.slane %v9786_v46, %v14212_v56  ;;  %v2604_v50 = vadd.f32 %v2348_v9, %v14213_v49  ;;  %v14215_v9 = vld [vmem:[#allocation156_spill] sm:$0xff]  ;;  %v14219_v53 = vld [vmem:[#allocation151_spill] sm:$0xff] }
 0x23b   : > { %3988 = vmatprep.mubr.bf16.mxu0 %v9609_v6  ;;  %v9966_v33 = vrot.slane %v9820_v24, %v14212_v56  ;;  %v2802_v26 = vadd.f32 %v8331_v32, %v9495_v40  ;;  %v9972_v35 = vadd.f32 %v8331_v32, %v2600_v18  ;;  %v2349_v19 = vmul.f32 %v8319_v36, %v1958_v52 }
 0x23c   : > { %v2352_v12 = vmul.f32 %v8316_v54, %v1968_v5  ;;  %4661 = vmatprep.mubr.bf16.mxu1 %v9609_v6  ;;  %v9978_v49 = vadd.f32 %v2345_v58, %v14215_v9  ;;  %v2602_v56 = vadd.f32 %v2346_v34, %v14217_v44  ;;  %v2350_v25 = vmul.f32 %v8316_v54, %v1963_v28 }
 0x23d   : > { %14214 = vst [vmem:[#allocation106_spill] sm:$0xff] %v9972_v35  ;;  %v2800_v40 = vadd.f32 %v8331_v32, %v14218_v10  ;;  %v9985_v57 = vadd.f32 %v2343_v20, %v14219_v53  ;;  %v9988_v18 = vadd.f32 %v8331_v32, %v2598_v39  ;;  %v2347_v52 = vmul.f32 %v8319_v36, %v1953_v30  ;;  %v14225_v53 = vld [vmem:[#allocation160_spill] sm:$0xff] }
 0x23e   : > { %14216 = vst [vmem:[#allocation107_spill] sm:$0xff] %v9978_v49  ;;  %v1978_v14 = vpop.permute.xlu1 %1977  ;;  %v1973_v6 = vpop.permute.xlu0 %1972  ;;  %v14222_v58 = vsub.s32 3, %v14085_v63  ;;  %v9997_v34 = vadd.f32 %v8331_v32, %v2604_v50  ;;  %v3058_v39 = vmax.f32 %v2802_v26, 0.0  ;;  %v10007_v49 = vadd.f32 %v2349_v19, %v14225_v53  ;;  %v14230_v26 = vld [vmem:[#allocation155_spill] sm:$0xff] }
 0x23f   : > { %14220 = vst [vmem:[#allocation117_spill] sm:$0xff] %v9985_v57  ;;  %14221 = vst [vmem:[#allocation118_spill] sm:$0xff] %v9988_v18  ;;  %v2356_v10 = vmul.f32 %v8316_v54, %v1978_v14  ;;  %v14227_v57 = vld [vmem:[#allocation163_spill] sm:$0xff]  ;;  %v10012_v50 = vadd.f32 %v8331_v32, %v2602_v56  ;;  %v2606_v63 = vadd.f32 %v2350_v25, %v14229_v38  ;;  %v3056_v8 = vmax.f32 %v2800_v40, 0.0  ;;  %v14317_v18 = vld [vmem:[#allocation49_spill] sm:$0xff] }
 0x240   : > { %v9994_v9 = vrot.slane %v9786_v46, %v14222_v58  ;;  %14223 = vst [vmem:[#allocation111_spill] sm:$0xff] %v9997_v34  ;;  %v14224_v20 = vmov %v14222_v58  ;;  %14226 = vst [vmem:[#allocation112_spill] sm:$0xff] %v10007_v49  ;;  %v2608_v21 = vadd.f32 %v2352_v12, %v14227_v57  ;;  %v2354_v46 = vmul.f32 %v8316_v54, %v1973_v6  ;;  %v14232_v38 = vld [vmem:[#allocation167_spill] sm:$0xff]  ;;  %v14241_v34 = vld [vmem:[#allocation57_spill] sm:$0xff] }
 0x241   : > { %v10003_v44 = vrot.slane %v9820_v24, %v14224_v20  ;;  %14228 = vst [vmem:[#allocation4_spill] sm:$0xff] %v10012_v50  ;;  %v2353_v58 = vmul.f32 %v8319_v36, %v1968_v5  ;;  %v10018_v20 = vadd.f32 %v2347_v52, %v14230_v26  ;;  %v2351_v19 = vmul.f32 %v8319_v36, %v1963_v28  ;;  %v14233_v40 = vld [vmem:[#allocation55_spill] sm:$0xff]  ;;  %v14235_v26 = vld [vmem:[#allocation161_spill] sm:$0xff] }
 0x242   : > { %v1988_v53 = vpop.permute.xlu1 %1987  ;;  %3989 = vmatmul.mubr.bf16.gmra.mxu0 %v9672_v29  ;;  %4662 = vmatmul.mubr.bf16.gmra.mxu1 %v9672_v29  ;;  %v1983_v57 = vpop.permute.xlu0 %1982  ;;  %v2807_v12 = vadd.f32 %v8334_v17, %v9521_v1  ;;  %v2612_v25 = vadd.f32 %v2356_v10, %v14232_v38  ;;  %v10028_v56 = vpack.c.bf16 %v3058_v39, %v3056_v8  ;;  %v14236_v38 = vld [vmem:[#allocation164_spill] sm:$0xff] }
 0x243   : > { %14231 = vst [vmem:[#allocation120_spill] sm:$0xff] %v10018_v20  ;;  %3998 = vmatprep.mubr.bf16.mxu0 %v9707_v45  ;;  %v2805_v28 = vadd.f32 %v8334_v17, %v14233_v40  ;;  %v10033_v52 = vadd.f32 %v8331_v32, %v2608_v21  ;;  %v2357_v29 = vmul.f32 %v8319_v36, %v1978_v14  ;;  %v14239_v21 = vld [vmem:[#allocation158_spill] sm:$0xff] }
 0x244   : > { %v2610_v30 = vadd.f32 %v2354_v46, %v14235_v26  ;;  %v2360_v1 = vmul.f32 %v8316_v54, %v1988_v53  ;;  %4671 = vmatprep.mubr.bf16.mxu1 %v9707_v45  ;;  %v10041_v5 = vadd.f32 %v2353_v58, %v14236_v38  ;;  %v10044_v8 = vadd.f32 %v8331_v32, %v2606_v63  ;;  %v14243_v38 = vld [vmem:[#allocation56_spill] sm:$0xff] }
 0x245   : > { %14234 = vst [vmem:[#allocation115_spill] sm:$0xff] %v10033_v52  ;;  %v2355_v39 = vmul.f32 %v8319_v36, %v1973_v6  ;;  %v10048_v40 = vadd.f32 %v2351_v19, %v14239_v21  ;;  %v2358_v14 = vmul.f32 %v8316_v54, %v1983_v57  ;;  %v3063_v24 = vmax.f32 %v2807_v12, 0.0  ;;  %v14244_v21 = vld [vmem:[#allocation168_spill] sm:$0xff]  ;;  %v14247_v12 = vld [vmem:[#allocation170_spill] sm:$0xff]  ;;  %v14250_v19 = vld [vmem:[#allocation165_spill] sm:$0xff] }
 0x246   : > { %14237 = vst [vmem:[#allocation116_spill] sm:$0xff] %v10041_v5  ;;  %14238 = vst [vmem:[#allocation33_spill] sm:$0xff] %v10044_v8  ;;  %v1998_v46 = vpop.permute.xlu1 %1997  ;;  %v1993_v26 = vpop.permute.xlu0 %1992  ;;  %v2806_v45 = vadd.f32 %v8331_v32, %v14241_v34  ;;  %v10054_v10 = vadd.f32 %v8331_v32, %v2612_v25  ;;  %v3061_v63 = vmax.f32 %v2805_v28, 0.0  ;;  %v2804_v6 = vadd.f32 %v8331_v32, %v14243_v38  ;;  %v14248_v25 = vld [vmem:[#allocation162_spill] sm:$0xff] }
 0x247   : > { %14240 = vst [vmem:[#allocation6_spill] sm:$0xff] %v10048_v40  ;;  %v2364_v58 = vmul.f32 %v8316_v54, %v1998_v46  ;;  %v10061_v5 = vadd.f32 %v2357_v29, %v14244_v21  ;;  %v10064_v40 = vadd.f32 %v8331_v32, %v2610_v30  ;;  %v2616_v49 = vadd.f32 %v2360_v1, %v14247_v12  ;;  %v14251_v12 = vld [vmem:[#allocation174_spill] sm:$0xff] }
 0x248   : > { %14242 = vst [vmem:[#allocation122_spill] sm:$0xff] %v10054_v10  ;;  %v10069_v50 = vadd.f32 %v2355_v39, %v14248_v25  ;;  %v2361_v28 = vmul.f32 %v8319_v36, %v1988_v53  ;;  %v2362_v35 = vmul.f32 %v8316_v54, %v1993_v26  ;;  %v2359_v38 = vmul.f32 %v8319_v36, %v1983_v57 }
 0x249   : > { %14245 = vst [vmem:[#allocation3_spill] sm:$0xff] %v10061_v5  ;;  %14246 = vst [vmem:[#allocation119_spill] sm:$0xff] %v10064_v40  ;;  %v2614_v52 = vadd.f32 %v2358_v14, %v14250_v19  ;;  %v10077_v1 = vpack.c.bf16 %v3063_v24, %v3061_v63  ;;  %v3062_v21 = vmax.f32 %v2806_v45, 0.0  ;;  %v2620_v25 = vadd.f32 %v2364_v58, %v14251_v12  ;;  %v14253_v24 = vld [vmem:[#allocation58_spill] sm:$0xff]  ;;  %v14254_v63 = vld [vmem:[#allocation171_spill] sm:$0xff] }
 0x24a   : > { %14249 = vst [vmem:[#allocation8_spill] sm:$0xff] %v10069_v50  ;;  %v2008_v29 = vpop.permute.xlu1 %2007  ;;  %3999 = vmatmul.mubr.bf16.gmra.mxu0 %v9737_v47  ;;  %4672 = vmatmul.mubr.bf16.gmra.mxu1 %v9737_v47  ;;  %v2003_v30 = vpop.permute.xlu0 %2002  ;;  %v3060_v53 = vmax.f32 %v2804_v6, 0.0  ;;  %v2811_v57 = vadd.f32 %v8334_v17, %v9561_v62  ;;  %v10086_v19 = vadd.f32 %v8331_v32, %v2616_v49  ;;  %v14256_v12 = vld [vmem:[#allocation44_spill] sm:$0xff]  ;;  %v14257_v14 = vld [vmem:[#allocation166_spill] sm:$0xff]  ;;  %v14266_v40 = vld [vmem:[#allocation61_spill] sm:$0xff] }
 0x24b   : > { %4008 = vmatprep.mubr.bf16.mxu0 %v9776_v59  ;;  %v2368_v47 = vmul.f32 %v8316_v54, %v2008_v29  ;;  %4681 = vmatprep.mubr.bf16.mxu1 %v9776_v59  ;;  %v2809_v45 = vadd.f32 %v8334_v17, %v14253_v24  ;;  %v10093_v58 = vadd.f32 %v2361_v28, %v14254_v63  ;;  %v14267_v50 = vld [vmem:[#allocation169_spill] sm:$0xff] }
 0x24c   : > { %14252 = vst [vmem:[#allocation124_spill] sm:$0xff] %v10086_v19  ;;  %v2365_v6 = vmul.f32 %v8319_v36, %v1998_v46  ;;  %v2618_v39 = vadd.f32 %v2362_v35, %v14256_v12  ;;  %v2366_v62 = vmul.f32 %v8316_v54, %v2003_v30  ;;  %v10099_v34 = vadd.f32 %v2359_v38, %v14257_v14  ;;  %v14261_v14 = vld [vmem:[#allocation178_spill] sm:$0xff] }
 0x24d   : > { %14255 = vst [vmem:[#allocation5_spill] sm:$0xff] %v10093_v58  ;;  %v10102_v49 = vadd.f32 %v8331_v32, %v2614_v52  ;;  %v2363_v59 = vmul.f32 %v8319_v36, %v1993_v26  ;;  %v10105_v24 = vpack.c.bf16 %v3062_v21, %v3060_v53  ;;  %v10108_v28 = vadd.f32 %v8331_v32, %v2620_v25  ;;  %v14262_v58 = vld [vmem:[#allocation175_spill] sm:$0xff]  ;;  %v14265_v25 = vld [vmem:[#allocation172_spill] sm:$0xff]  ;;  %v14302_v19 = vld [vmem:[#allocation46_spill] sm:$0xff] }
 0x24e   : > { %14258 = vst [vmem:[#allocation121_spill] sm:$0xff] %v10099_v34  ;;  %v2018_v10 = vpop.permute.xlu1 %2017  ;;  %v2013_v5 = vpop.permute.xlu0 %2012  ;;  %v3067_v35 = vmax.f32 %v2811_v57, 0.0  ;;  %v2810_v63 = vadd.f32 %v8331_v32, %v9556_v41  ;;  %v2624_v52 = vadd.f32 %v2368_v47, %v14261_v14  ;;  %v3065_v26 = vmax.f32 %v2809_v45, 0.0 }
 0x24f   : > { %14259 = vst [vmem:[#allocation10_spill] sm:$0xff] %v10102_v49  ;;  %14260 = vst [vmem:[#allocation12_spill] sm:$0xff] %v10108_v28  ;;  %v2372_v46 = vmul.f32 %v8316_v54, %v2018_v10  ;;  %v2370_v12 = vmul.f32 %v8316_v54, %v2013_v5  ;;  %v10117_v34 = vadd.f32 %v2365_v6, %v14262_v58  ;;  %v14269_v6 = vld [vmem:[#allocation182_spill] sm:$0xff]  ;;  %v14305_v49 = vld [vmem:[#allocation59_spill] sm:$0xff] }
 0x250   : > { %v10120_v21 = vadd.f32 %v8331_v32, %v2618_v39  ;;  %v2622_v53 = vadd.f32 %v2366_v62, %v14265_v25  ;;  %v2808_v57 = vadd.f32 %v8331_v32, %v14266_v40  ;;  %v10127_v38 = vadd.f32 %v2363_v59, %v14267_v50 }
 0x251   : > { %14263 = vst [vmem:[#allocation126_spill] sm:$0xff] %v10117_v34  ;;  %v2369_v47 = vmul.f32 %v8319_v36, %v2008_v29  ;;  %v2367_v45 = vmul.f32 %v8319_v36, %v2003_v30  ;;  %v2628_v62 = vadd.f32 %v2372_v46, %v14269_v6  ;;  %v10136_v40 = vpack.c.bf16 %v3067_v35, %v3065_v26  ;;  %v14271_v30 = vld [vmem:[#allocation176_spill] sm:$0xff]  ;;  %v14282_v34 = vld [vmem:[#allocation42_spill] sm:$0xff] }
 0x252   : > { %14264 = vst [vmem:[#allocation7_spill] sm:$0xff] %v10120_v21  ;;  %14268 = vst [vmem:[#allocation9_spill] sm:$0xff] %v10127_v38  ;;  %v2028_v14 = vpop.permute.xlu1 %2027  ;;  %4009 = vmatmul.mubr.bf16.gmra.mxu0 %v9781_v7  ;;  %4682 = vmatmul.mubr.bf16.gmra.mxu1 %v9781_v7  ;;  %v2023_v39 = vpop.permute.xlu0 %2022  ;;  %v3066_v50 = vmax.f32 %v2810_v63, 0.0  ;;  %v10139_v59 = vadd.f32 %v8331_v32, %v2624_v52  ;;  %v2373_v29 = vmul.f32 %v8319_v36, %v2018_v10  ;;  %v14273_v63 = vld [vmem:[#allocation179_spill] sm:$0xff]  ;;  %v14276_v7 = vld [vmem:[#allocation173_spill] sm:$0xff] }
 0x253   : > { %4018 = vmatprep.mubr.bf16.mxu0 %v9811_v16  ;;  %v2626_v25 = vadd.f32 %v2370_v12, %v14271_v30  ;;  %v2376_v41 = vmul.f32 %v8316_v54, %v2028_v14  ;;  %4691 = vmatprep.mubr.bf16.mxu1 %v9811_v16  ;;  %v10147_v46 = vadd.f32 %v8331_v32, %v2622_v53  ;;  %v3064_v26 = vmax.f32 %v2808_v57, 0.0  ;;  %v14275_v12 = vld [vmem:[#allocation60_spill] sm:$0xff] }
 0x254   : > { %14270 = vst [vmem:[#allocation123_spill] sm:$0xff] %v10139_v59  ;;  %v2374_v35 = vmul.f32 %v8316_v54, %v2023_v39  ;;  %v10151_v6 = vadd.f32 %v2369_v47, %v14273_v63  ;;  %v2371_v52 = vmul.f32 %v8319_v36, %v2013_v5  ;;  %v2813_v30 = vadd.f32 %v8334_v17, %v14275_v12  ;;  %v14279_v63 = vld [vmem:[#allocation43_spill] sm:$0xff]  ;;  %v14290_v59 = vld [vmem:[#allocation64_spill] sm:$0xff] }
 0x255   : > { %14272 = vst [vmem:[#allocation128_spill] sm:$0xff] %v10147_v46  ;;  %v2815_v16 = vadd.f32 %v8334_v17, %v9578_v15  ;;  %v10159_v28 = vadd.f32 %v2367_v45, %v14276_v7  ;;  %v10162_v53 = vadd.f32 %v8331_v32, %v2628_v62  ;;  %v10165_v47 = vpack.c.bf16 %v3066_v50, %v3064_v26  ;;  %v14283_v62 = vld [vmem:[#allocation180_spill] sm:$0xff]  ;;  %v14284_v50 = vld [vmem:[#allocation177_spill] sm:$0xff] }
 0x256   : > { %14274 = vst [vmem:[#allocation14_spill] sm:$0xff] %v10151_v6  ;;  %v2038_v10 = vpop.permute.xlu1 %2037  ;;  %v2033_v58 = vpop.permute.xlu0 %2032  ;;  %v10169_v6 = vadd.f32 %v2373_v29, %v14279_v63  ;;  %v10172_v12 = vadd.f32 %v8331_v32, %v2626_v25  ;;  %v2632_v15 = vadd.f32 %v2376_v41, %v14282_v34  ;;  %v2377_v7 = vmul.f32 %v8319_v36, %v2028_v14  ;;  %v14286_v14 = vld [vmem:[#allocation185_spill] sm:$0xff] }
 0x257   : > { %14277 = vst [vmem:[#allocation125_spill] sm:$0xff] %v10159_v28  ;;  %14278 = vst [vmem:[#allocation11_spill] sm:$0xff] %v10162_v53  ;;  %v2380_v57 = vmul.f32 %v8316_v54, %v2038_v10  ;;  %v2630_v28 = vadd.f32 %v2374_v35, %v14283_v62  ;;  %v2378_v21 = vmul.f32 %v8316_v54, %v2033_v58  ;;  %v3069_v34 = vmax.f32 %v2813_v30, 0.0 }
 0x258   : > { %14280 = vst [vmem:[#allocation16_spill] sm:$0xff] %v10169_v6  ;;  %14281 = vst [vmem:[#allocation130_spill] sm:$0xff] %v10172_v12  ;;  %v10180_v26 = vadd.f32 %v2371_v52, %v14284_v50  ;;  %v2375_v5 = vmul.f32 %v8319_v36, %v2023_v39  ;;  %v3071_v41 = vmax.f32 %v2815_v16, 0.0  ;;  %v14287_v52 = vmax.f32 %v9553_v3, 0.0  ;;  %v14288_v50 = vld [vmem:[#allocation62_spill] sm:$0xff] }
 0x259   : > { %v3780_v63 = vpop.f32.mrf.mxu0  ;;  %v2636_v45 = vadd.f32 %v2380_v57, %v14286_v14  ;;  %v4453_v35 = vpop.f32.mrf.mxu1  ;;  %v14289_v39 = vmax.f32 %v14288_v50, 0.0  ;;  %v10200_v30 = vadd.f32 %v8331_v32, %v2632_v15  ;;  %v2381_v16 = vmul.f32 %v8319_v36, %v2038_v10  ;;  %v14292_v14 = vld [vmem:[#allocation183_spill] sm:$0xff]  ;;  %v14296_v15 = vld [vmem:[#allocation181_spill] sm:$0xff] }
 0x25a   : > { %14285 = vst [vmem:[#allocation13_spill] sm:$0xff] %v10180_v26  ;;  %v2048_v29 = vpop.permute.xlu1 %2047  ;;  %4019 = vmatmul.mubr.bf16.gmra.mxu0 %v9884_v4  ;;  %4692 = vmatmul.mubr.bf16.gmra.mxu1 %v9884_v4  ;;  %v2043_v62 = vpop.permute.xlu0 %2042  ;;  %v10196_v26 = vadd.f32 %v8334_v17, %v14290_v59  ;;  %v10206_v50 = vadd.f32 %v2377_v7, %v14292_v14 }
 0x25b   : > { %4028 = vmatprep.mubr.bf16.mxu0 %v9950_v2  ;;  %v10192_v6 = vpack.c.bf16 %v14289_v39, %v14287_v52  ;;  %14291 = vst [vmem:[#allocation127_spill] sm:$0xff] %v10200_v30  ;;  %v2384_v57 = vmul.f32 %v8316_v54, %v2048_v29  ;;  %4701 = vmatprep.mubr.bf16.mxu1 %v9950_v2  ;;  %v3782_v3 = vpop.f32.mrf.mxu0  ;;  %v14295_v39 = vld [vmem:[#allocation45_spill] sm:$0xff]  ;;  %v4455_v4 = vpop.f32.mrf.mxu1 }
 0x25c   : > { %14293 = vst [vmem:[#allocation18_spill] sm:$0xff] %v10206_v50  ;;  %v10209_v52 = vadd.f32 %v8331_v32, %v2630_v28  ;;  %v2379_v59 = vmul.f32 %v8319_v36, %v2033_v58  ;;  %v2634_v25 = vadd.f32 %v2378_v21, %v14295_v39  ;;  %v10214_v53 = vadd.f32 %v2375_v5, %v14296_v15  ;;  %v14299_v15 = vld [vmem:[#allocation186_spill] sm:$0xff] }
 0x25d   : > { %v2382_v10 = vmul.f32 %v8316_v54, %v2043_v62  ;;  %v3784_v46 = vpop.f32.mrf.mxu0  ;;  %v10217_v2 = vpack.c.bf16 %v3071_v41, %v3069_v34  ;;  %v10221_v7 = vadd.f32 %v8334_v17, %v9620_v55  ;;  %v10224_v28 = vadd.f32 %v8331_v32, %v2636_v45  ;;  %v4457_v14 = vpop.f32.mrf.mxu1  ;;  %v14301_v34 = vld [vmem:[#allocation188_spill] sm:$0xff] }
 0x25e   : > { %14294 = vst [vmem:[#allocation132_spill] sm:$0xff] %v10209_v52  ;;  %14297 = vst [vmem:[#allocation15_spill] sm:$0xff] %v10214_v53  ;;  %v2058_v12 = vpop.permute.xlu1 %2057  ;;  %v3781_v58 = vadd.f32 %v3780_v63, %v9815_v61  ;;  %v4454_v21 = vadd.f32 %v4453_v35, %v9889_v23  ;;  %v10231_v50 = vadd.f32 %v2381_v16, %v14299_v15  ;;  %v2053_v35 = vpop.permute.xlu0 %2052  ;;  %v14306_v39 = vmax.f32 %v14305_v49, 0.0  ;;  %v14314_v49 = vld [vmem:[#allocation47_spill] sm:$0xff] }
 0x25f   : > { %14298 = vst [vmem:[#allocation129_spill] sm:$0xff] %v10224_v28  ;;  %v2640_v41 = vadd.f32 %v2384_v57, %v14301_v34  ;;  %v3783_v55 = vadd.f32 %v3782_v3, %v9959_v31  ;;  %v3786_v53 = vpop.f32.mrf.mxu0  ;;  %v10237_v38 = vadd.f32 %v2379_v59, %v14302_v19  ;;  %v10240_v63 = vadd.f32 %v8331_v32, %v2634_v25  ;;  %v4459_v5 = vpop.f32.mrf.mxu1  ;;  %v14309_v3 = vld [vmem:[#allocation184_spill] sm:$0xff]  ;;  %v14311_v28 = vld [vmem:[#allocation51_spill] sm:$0xff] }
 0x260   : > { %14300 = vst [vmem:[#allocation20_spill] sm:$0xff] %v10231_v50  ;;  %v14307_v16 = vmax.f32 %v9615_v22, 0.0  ;;  %v2385_v57 = vmul.f32 %v8319_v36, %v2048_v29  ;;  %v2638_v34 = vadd.f32 %v2382_v10, %v14309_v3  ;;  %v4456_v45 = vadd.f32 %v4455_v4, %v9994_v9 }
 0x261   : > { %14303 = vst [vmem:[#allocation134_spill] sm:$0xff] %v10237_v38  ;;  %14304 = vst [vmem:[#allocation17_spill] sm:$0xff] %v10240_v63  ;;  %v3790_v19 = vpop.f32.mrf.mxu0  ;;  %v5092_v22 = vmax.f32 %v3781_v58, 0.0  ;;  %v5094_v59 = vmax.f32 %v4454_v21, 0.0  ;;  %v4463_v29 = vpop.f32.mrf.mxu1  ;;  %v10260_v4 = vadd.f32 %v8331_v32, %v2640_v41  ;;  %v5093_v10 = vmax.f32 %v3783_v55, 0.0 }
 0x262   : > { %v10246_v15 = vpack.c.bf16 %v14307_v16, %v14306_v39  ;;  %v10251_v50 = vpop.permute.xlu1 %1036  ;;  %4029 = vmatmul.mubr.bf16.gmra.mxu0 %v10028_v56  ;;  %4702 = vmatmul.mubr.bf16.gmra.mxu1 %v10028_v56  ;;  %v2383_v39 = vmul.f32 %v8319_v36, %v2043_v62  ;;  %v2388_v16 = vmul.f32 %v8316_v54, %v2058_v12  ;;  %v5095_v30 = vmax.f32 %v4456_v45, 0.0  ;;  %v14316_v45 = vld [vmem:[#allocation191_spill] sm:$0xff] }
 0x263   : > { %4038 = vmatprep.mubr.bf16.mxu0 %v10077_v1  ;;  %14310 = vst [vmem:[#allocation22_spill] sm:$0xff] %v10260_v4  ;;  %v3787_v3 = vadd.f32 %v3786_v53, %v9959_v31  ;;  %4711 = vmatprep.mubr.bf16.mxu1 %v10077_v1  ;;  %v3792_v56 = vpop.f32.mrf.mxu0  ;;  %v2389_v58 = vmul.f32 %v8319_v36, %v2058_v12  ;;  %v4465_v25 = vpop.f32.mrf.mxu1  ;;  %v14319_v4 = vld [vmem:[#allocation187_spill] sm:$0xff] }
 0x264   : > { %14308 = vst [vmem:[#allocation131_spill] sm:$0xff] %v10246_v15  ;;  %v3785_v62 = vadd.f32 %v3784_v46, %v9815_v61  ;;  %v4458_v21 = vadd.f32 %v4457_v14, %v9889_v23  ;;  %v10270_v41 = vadd.f32 %v2385_v57, %v14311_v28  ;;  %v10273_v55 = vadd.f32 %v8331_v32, %v2638_v34  ;;  %v2063_v14 = vpop.permute.xlu0 %2062 }
 0x265   : > { %v2386_v53 = vmul.f32 %v8316_v54, %v2053_v35  ;;  %v3794_v1 = vpop.f32.mrf.mxu0  ;;  %v5626_v38 = vmul.f32 %v9842_v43, %v5092_v22  ;;  %v10278_v63 = vadd.f32 %v2383_v39, %v14314_v49  ;;  %v5097_v12 = vmax.f32 %v3787_v3, 0.0  ;;  %v4467_v52 = vpop.f32.mrf.mxu1 }
 0x266   : > { %14312 = vst [vmem:[#allocation136_spill] sm:$0xff] %v10270_v41  ;;  %14313 = vst [vmem:[#allocation19_spill] sm:$0xff] %v10273_v55  ;;  %v4460_v46 = vadd.f32 %v4459_v5, %v9994_v9  ;;  %v5628_v57 = vmul.f32 %v9920_v37, %v5094_v59  ;;  %v5627_v34 = vmul.f32 %v9966_v33, %v5093_v10  ;;  %v2073_v8 = vpop.permute.xlu1 %2072  ;;  %v5096_v49 = vmax.f32 %v3785_v62, 0.0 }
 0x267   : > { %14315 = vst [vmem:[#allocation133_spill] sm:$0xff] %v10278_v63  ;;  %v2644_v41 = vadd.f32 %v2388_v16, %v14316_v45  ;;  %v3796_v20 = vpop.f32.mrf.mxu0  ;;  %v10286_v22 = vadd.f32 %v2389_v58, %v14317_v18  ;;  %v5098_v39 = vmax.f32 %v4458_v21, 0.0  ;;  %v2387_v3 = vmul.f32 %v8319_v36, %v2053_v35  ;;  %v4469_v5 = vpop.f32.mrf.mxu1 }
 0x268   : > { %v5629_v28 = vmul.f32 %v10003_v44, %v5095_v30  ;;  %v2642_v59 = vadd.f32 %v2386_v53, %v14319_v4  ;;  %v2390_v10 = vmul.f32 %v8316_v54, %v2063_v14  ;;  %v5631_v18 = vmul.f32 %v9966_v33, %v5097_v12  ;;  %v2068_v63 = vpop.permute.xlu0 %2067 }
 0x269   : > { %14318 = vst [vmem:[#allocation138_spill] sm:$0xff] %v10286_v22  ;;  %v10293_v60 = vpop.f32.mrf.mxu0  ;;  %v5099_v16 = vmax.f32 %v4460_v46, 0.0  ;;  %v3791_v35 = vadd.f32 %v3790_v19, %v9815_v61  ;;  %v3793_v58 = vadd.f32 %v3792_v56, %v9959_v31  ;;  %v10300_v62 = vpop.f32.mrf.mxu1  ;;  %v6138_v30 = vadd.f32 %v5627_v34, %v5626_v38  ;;  %v14321_v56 = vld [vmem:[#allocation48_spill] sm:$0xff] }
 0x26a   : > { %4039 = vmatmul.mubr.bf16.gmra.mxu0 %v10105_v24  ;;  %4712 = vmatmul.mubr.bf16.gmra.mxu1 %v10105_v24  ;;  %v10305_v4 = vadd.f32 %v8331_v32, %v2644_v41  ;;  %v4464_v21 = vadd.f32 %v4463_v29, %v9889_v23  ;;  %v2394_v24 = vmul.f32 %v8316_v54, %v2073_v8  ;;  %v14324_v29 = vld [vmem:[#allocation39_spill] sm:$0xff]  ;;  %v14325_v34 = vld [vmem:[#allocation40_spill] sm:$0xff] }
 0x26b   : > { %4048 = vmatprep.mubr.bf16.mxu0 %v10136_v40  ;;  %4721 = vmatprep.mubr.bf16.mxu1 %v10136_v40  ;;  %v3802_v53 = vpop.f32.mrf.mxu0  ;;  %v5630_v12 = vmul.f32 %v9842_v43, %v5096_v49  ;;  %v5632_v19 = vmul.f32 %v9920_v37, %v5098_v39  ;;  %v10312_v46 = vadd.f32 %v2387_v3, %v14321_v56  ;;  %v10315_v40 = vpop.f32.mrf.mxu1  ;;  %v14326_v49 = vld [vmem:[#allocation189_spill] sm:$0xff]  ;;  %v5101_v51 = vmax.f32 %v3793_v58, 0.0  ;;  %v14331_v58 = vld [vmem:[#allocation50_spill] sm:$0xff] }
 0x26c   : > { %14320 = vst [vmem:[#allocation135_spill] sm:$0xff] %v10305_v4  ;;  %v2391_v45 = vmul.f32 %v8319_v36, %v2063_v14  ;;  %v10318_v38 = vadd.f32 %v8331_v32, %v2642_v59  ;;  %v1358_v41 = vmul.f32 %v14324_v29, %v10251_v50  ;;  %v1359_v22 = vmul.f32 %v14325_v34, %v10251_v50  ;;  %v10325_v39 = vpop.permute.xlu1 %1046 }
 0x26d   : > { %14322 = vst [vmem:[#allocation24_spill] sm:$0xff] %v10312_v46  ;;  %v2646_v55 = vadd.f32 %v2390_v10, %v14326_v49  ;;  %v10327_v3 = vpop.f32.mrf.mxu0  ;;  %v6143_v56 = vadd.f32 %v5631_v18, %v5630_v12  ;;  %v5633_v14 = vmul.f32 %v10003_v44, %v5099_v16  ;;  %v5100_v46 = vmax.f32 %v3791_v35, 0.0  ;;  %v10330_v0 = vpop.f32.mrf.mxu1  ;;  %v14327_v10 = vld [vmem:[#allocation190_spill] sm:$0xff] }
 0x26e   : > { %14323 = vst [vmem:[#allocation21_spill] sm:$0xff] %v10318_v38  ;;  %v5102_v59 = vmax.f32 %v4464_v21, 0.0  ;;  %v4466_v27 = vadd.f32 %v4465_v25, %v9994_v9  ;;  %v2650_v48 = vadd.f32 %v2394_v24, %v1358_v41  ;;  %v3795_v11 = vadd.f32 %v3794_v1, %v9815_v61 }
 0x26f   : > { %v10334_v50 = vpop.f32.mrf.mxu0  ;;  %v10337_v49 = vadd.f32 %v2391_v45, %v14327_v10  ;;  %v4468_v13 = vadd.f32 %v4467_v52, %v9889_v23  ;;  %v2392_v18 = vmul.f32 %v8316_v54, %v2068_v63  ;;  %v6139_v16 = vadd.f32 %v6138_v30, %v5628_v57  ;;  %v10341_v35 = vpop.f32.mrf.mxu1 }
 0x270   : > { %v10345_v21 = vadd.f32 %v8331_v32, %v2646_v55  ;;  %v2395_v25 = vmul.f32 %v8319_v36, %v2073_v8  ;;  %v3797_v1 = vadd.f32 %v3796_v20, %v9959_v31  ;;  %v5635_v57 = vmul.f32 %v9966_v33, %v5101_v51  ;;  %v10356_v45 = vpop.permute.xlu0 %1041  ;;  %v2083_v10 = vpop.permute.xlu1 %2082 }
 0x271   : > { %14328 = vst [vmem:[#allocation53_spill] sm:$0xff] %v10337_v49  ;;  %v10349_v24 = vpop.f32.mrf.mxu0  ;;  %v4470_v30 = vadd.f32 %v4469_v5, %v9994_v9  ;;  %v6140_v12 = vadd.f32 %v6139_v16, %v5629_v28  ;;  %v10358_v55 = vpop.f32.mrf.mxu1  ;;  %v5634_v20 = vmul.f32 %v9842_v43, %v5100_v46  ;;  %v5103_v8 = vmax.f32 %v4466_v27, 0.0 }
 0x272   : > { %14329 = vst [vmem:[#allocation140_spill] sm:$0xff] %v10345_v21  ;;  %4049 = vmatmul.mubr.bf16.gmra.mxu0 %v10165_v47  ;;  %4722 = vmatmul.mubr.bf16.gmra.mxu1 %v10165_v47  ;;  %v10364_v47 = vadd.f32 %v8331_v32, %v2650_v48  ;;  %v5104_v41 = vmax.f32 %v3795_v11, 0.0  ;;  %v5636_v28 = vmul.f32 %v9920_v37, %v5102_v59  ;;  %v5106_v5 = vmax.f32 %v4468_v13, 0.0 }
 0x273   : > { %4058 = vmatprep.mubr.bf16.mxu0 %v10217_v2  ;;  %4731 = vmatprep.mubr.bf16.mxu1 %v10217_v2  ;;  %v10366_v51 = vpop.f32.mrf.mxu0  ;;  %v2393_v16 = vmul.f32 %v8319_v36, %v2068_v63  ;;  %v2648_v52 = vadd.f32 %v2392_v18, %v14331_v58  ;;  %v10371_v4 = vpop.f32.mrf.mxu1  ;;  %v10374_v27 = vadd.f32 %v2395_v25, %v1359_v22  ;;  %v5105_v48 = vmax.f32 %v3797_v1, 0.0 }
 0x274   : > { %14330 = vst [vmem:[#allocation26_spill] sm:$0xff] %v10364_v47  ;;  %6141 = vadd.xlane.f32.xlu0 %v6140_v12  ;;  %v3801_v11 = vadd.f32 %v10293_v60, %v9815_v61  ;;  %v6148_v49 = vadd.f32 %v5635_v57, %v5634_v20  ;;  %v5107_v59 = vmax.f32 %v4470_v30, 0.0  ;;  %v3803_v13 = vadd.f32 %v3802_v53, %v9959_v31  ;;  %v14333_v57 = vld [vmem:[#allocation192_spill] sm:$0xff] }
 0x275   : > { %14332 = vst [vmem:[#allocation23_spill] sm:$0xff] %v10374_v27  ;;  %v10378_v46 = vpop.f32.mrf.mxu0  ;;  %v6144_v63 = vadd.f32 %v6143_v56, %v5632_v19  ;;  %v10381_v38 = vpop.f32.mrf.mxu1  ;;  %v5637_v18 = vmul.f32 %v10003_v44, %v5103_v8  ;;  %v5638_v22 = vmul.f32 %v9842_v43, %v5104_v41  ;;  %v4474_v25 = vadd.f32 %v10300_v62, %v9889_v23 }
 0x276   : > { %v5640_v60 = vmul.f32 %v9920_v37, %v5106_v5  ;;  %v10392_v30 = vadd.f32 %v2393_v16, %v14333_v57  ;;  %v10395_v53 = vadd.f32 %v8331_v32, %v2648_v52  ;;  %v2078_v56 = vpop.permute.xlu0 %2077  ;;  %v5639_v20 = vmul.f32 %v9966_v33, %v5105_v48  ;;  %v10404_v5 = vpop.permute.xlu1 %1056 }
 0x277   : > { %v10388_v1 = vpop.f32.mrf.mxu0  ;;  %v6145_v19 = vadd.f32 %v6144_v63, %v5633_v14  ;;  %v10397_v12 = vpop.f32.mrf.mxu1  ;;  %v1362_v8 = vmul.f32 %v14324_v29, %v10325_v39  ;;  %v5108_v62 = vmax.f32 %v3801_v11, 0.0  ;;  %v4476_v41 = vadd.f32 %v10315_v40, %v9994_v9 }
 0x278   : > { %14334 = vst [vmem:[#allocation137_spill] sm:$0xff] %v10392_v30  ;;  %14335 = vst [vmem:[#allocation28_spill] sm:$0xff] %v10395_v53  ;;  %v5641_v14 = vmul.f32 %v10003_v44, %v5107_v59  ;;  %v1363_v52 = vmul.f32 %v14325_v34, %v10325_v39  ;;  %v5109_v48 = vmax.f32 %v3803_v13, 0.0  ;;  %v2398_v11 = vmul.f32 %v8316_v54, %v2083_v10 }
 0x279   : > { %v10406_v16 = vpop.f32.mrf.mxu0  ;;  %6146 = vadd.xlane.f32.xlu1 %v6145_v19  ;;  %v10414_v63 = vpop.f32.mrf.mxu1  ;;  %v5110_v40 = vmax.f32 %v4474_v25, 0.0  ;;  %v1360_v57 = vmul.f32 %v14324_v29, %v10356_v45  ;;  %v2399_v58 = vmul.f32 %v8319_v36, %v2083_v10  ;;  %v4478_v39 = vadd.f32 %v10330_v0, %v9889_v23 }
 0x27a   : > { %4059 = vmatmul.mubr.bf16.gmra.mxu0 %v10192_v6  ;;  %4732 = vmatmul.mubr.bf16.gmra.mxu1 %v10192_v6  ;;  %v3805_v6 = vadd.f32 %v10327_v3, %v9815_v61  ;;  %v2396_v59 = vmul.f32 %v8316_v54, %v2078_v56  ;;  %v3807_v13 = vadd.f32 %v10334_v50, %v9959_v31  ;;  %v5111_v3 = vmax.f32 %v4476_v41, 0.0  ;;  %v1052_v50 = vpop.permute.xlu0 %1051 }
 0x27b   : > { %v10421_v2 = vpop.f32.mrf.mxu0  ;;  %v6149_v19 = vadd.f32 %v6148_v49, %v5636_v28  ;;  %v10428_v25 = vpop.f32.mrf.mxu1  ;;  %v6153_v47 = vadd.f32 %v5639_v20, %v5638_v22  ;;  %v5642_v27 = vmul.f32 %v9842_v43, %v5108_v62  ;;  %v1361_v10 = vmul.f32 %v14325_v34, %v10356_v45 }
 0x27c   : > { %v5643_v21 = vmul.f32 %v9966_v33, %v5109_v48  ;;  %v2654_v0 = vadd.f32 %v2398_v11, %v1362_v8  ;;  %v4480_v42 = vadd.f32 %v10341_v35, %v9994_v9  ;;  %v5644_v28 = vmul.f32 %v9920_v37, %v5110_v40  ;;  %v2093_v62 = vpop.permute.xlu1 %2092 }
 0x27d   : > { %v10433_v30 = vpop.f32.mrf.mxu0  ;;  %v6150_v17 = vadd.f32 %v6149_v19, %v5637_v18  ;;  %v10438_v49 = vpop.f32.mrf.mxu1  ;;  %v10441_v22 = vadd.f32 %v2399_v58, %v1363_v52  ;;  %v5112_v20 = vmax.f32 %v3805_v6, 0.0  ;;  %v2397_v45 = vmul.f32 %v8319_v36, %v2078_v56 }
 0x27e   : > { %v5114_v15 = vmax.f32 %v4478_v39, 0.0  ;;  %v2652_v48 = vadd.f32 %v2396_v59, %v1360_v57  ;;  %v5113_v8 = vmax.f32 %v3807_v13, 0.0  ;;  %v3813_v35 = vadd.f32 %v10366_v51, %v9959_v31 }
 0x27f   : > { %14336 = vst [vmem:[#allocation25_spill] sm:$0xff] %v10441_v22  ;;  %v10444_v41 = vpop.f32.mrf.mxu0  ;;  %6151 = vadd.xlane.f32.xlu0 %v6150_v17  ;;  %v10448_v18 = vpop.f32.mrf.mxu1  ;;  %v5645_v11 = vmul.f32 %v10003_v44, %v5111_v3  ;;  %v3811_v58 = vadd.f32 %v10349_v24, %v9815_v61  ;;  %v4484_v56 = vadd.f32 %v10358_v55, %v9889_v23  ;;  %v5115_v17 = vmax.f32 %v4480_v42, 0.0 }
 0x280   : > { %v6154_v52 = vadd.f32 %v6153_v47, %v5640_v60  ;;  %v6158_v6 = vadd.f32 %v5643_v21, %v5642_v27  ;;  %v10458_v57 = vadd.f32 %v8331_v32, %v2654_v0  ;;  %v4486_v51 = vadd.f32 %v10371_v4, %v9994_v9  ;;  %v2088_v4 = vpop.permute.xlu0 %2087 }
 0x281   : > { %v10455_v40 = vpop.f32.mrf.mxu0  ;;  %v10462_v39 = vpop.f32.mrf.mxu1  ;;  %v5646_v59 = vmul.f32 %v9842_v43, %v5112_v20  ;;  %v5117_v13 = vmax.f32 %v3813_v35, 0.0  ;;  %v2402_v19 = vmul.f32 %v8316_v54, %v2093_v62  ;;  %v5648_v47 = vmul.f32 %v9920_v37, %v5114_v15 }
 0x282   : > { %14337 = vst [vmem:[#allocation142_spill] sm:$0xff] %v10458_v57  ;;  %v6155_v24 = vadd.f32 %v6154_v52, %v5641_v14  ;;  %v10469_v21 = vadd.f32 %v2397_v45, %v1361_v10  ;;  %v10472_v27 = vadd.f32 %v8331_v32, %v2652_v48  ;;  %v5647_v42 = vmul.f32 %v9966_v33, %v5113_v8  ;;  %v10481_v15 = vpop.permute.xlu1 %1066 }
 0x283   : > { %v10466_v55 = vpop.f32.mrf.mxu0  ;;  %v10475_v60 = vpop.f32.mrf.mxu1  ;;  %v1366_v3 = vmul.f32 %v14324_v29, %v10404_v5  ;;  %v5116_v14 = vmax.f32 %v3811_v58, 0.0  ;;  %v5118_v0 = vmax.f32 %v4484_v56, 0.0  ;;  %v3815_v20 = vadd.f32 %v10378_v46, %v9815_v61 }
 0x284   : > { %14338 = vst [vmem:[#allocation139_spill] sm:$0xff] %v10469_v21  ;;  %14339 = vst [vmem:[#allocation144_spill] sm:$0xff] %v10472_v27  ;;  %6156 = vadd.xlane.f32.xlu0 %v6155_v24  ;;  %v5649_v45 = vmul.f32 %v10003_v44, %v5115_v17  ;;  %v1367_v48 = vmul.f32 %v14325_v34, %v10404_v5  ;;  %v5119_v8 = vmax.f32 %v4486_v51, 0.0 }
 0x285   : > { %v10483_v10 = vpop.f32.mrf.mxu0  ;;  %v2403_v35 = vmul.f32 %v8319_v36, %v2093_v62  ;;  %v10489_v52 = vpop.f32.mrf.mxu1  ;;  %v1364_v58 = vmul.f32 %v14324_v29, %v1052_v50  ;;  %v5651_v56 = vmul.f32 %v9966_v33, %v5117_v13  ;;  %v2658_v24 = vadd.f32 %v2402_v19, %v1366_v3 }
 0x286   : > { %v4488_v46 = vadd.f32 %v10381_v38, %v9889_v23  ;;  %v6163_v21 = vadd.f32 %v5647_v42, %v5646_v59  ;;  %v2400_v17 = vmul.f32 %v8316_v54, %v2088_v4  ;;  %v3817_v5 = vadd.f32 %v10388_v1, %v9959_v31 }
 0x287   : > { %v10495_v22 = vpop.f32.mrf.mxu0  ;;  %v6159_v51 = vadd.f32 %v6158_v6, %v5644_v28  ;;  %v10500_v62 = vpop.f32.mrf.mxu1  ;;  %v5650_v27 = vmul.f32 %v9842_v43, %v5116_v14  ;;  %v10504_v57 = vmul.f32 %v9920_v37, %v5118_v0  ;;  %v1365_v13 = vmul.f32 %v14325_v34, %v1052_v50 }
 0x288   : > { %14340 = vst [vmem:[#allocation141_spill] sm:$0xff] %v10500_v62  ;;  %v5120_v19 = vmax.f32 %v3815_v20, 0.0  ;;  %v10510_v59 = vmul.f32 %v10003_v44, %v5119_v8  ;;  %v10512_v42 = vadd.f32 %v2403_v35, %v1367_v48  ;;  %v2401_v1 = vmul.f32 %v8319_v36, %v2088_v4  ;;  %v1062_v6 = vpop.permute.xlu0 %1061  ;;  %v2103_v20 = vpop.permute.xlu1 %2102 }
 0x289   : > { %v10507_v38 = vpop.f32.mrf.mxu0  ;;  %v6160_v28 = vadd.f32 %v6159_v51, %v5645_v11  ;;  %v10515_v3 = vpop.f32.mrf.mxu1  ;;  %v6168_v14 = vadd.f32 %v5651_v56, %v5650_v27  ;;  %v10518_v0 = vadd.f32 %v8331_v32, %v2658_v24  ;;  %v5122_v62 = vmax.f32 %v4488_v46, 0.0 }
 0x28a   : > { %14341 = vst [vmem:[#allocation36_spill] sm:$0xff] %v10507_v38  ;;  %14342 = vst [vmem:[#allocation30_spill] sm:$0xff] %v10512_v42  ;;  %v4490_v50 = vadd.f32 %v10397_v12, %v9994_v9  ;;  %v2656_v8 = vadd.f32 %v2400_v17, %v1364_v58  ;;  %v5121_v48 = vmax.f32 %v3817_v5, 0.0  ;;  %v14344_v4 = vmax.f32 %v10196_v26, 0.0 }
 0x28b   : > { %14343 = vst [vmem:[#allocation27_spill] sm:$0xff] %v10518_v0  ;;  %v10522_v38 = vpop.f32.mrf.mxu0  ;;  %6161 = vadd.xlane.f32.xlu1 %v6160_v28  ;;  %v14345_v11 = vmax.f32 %v10221_v7, 0.0  ;;  %v3823_v27 = vadd.f32 %v10421_v2, %v9959_v31  ;;  %v10530_v56 = vpop.f32.mrf.mxu1  ;;  %v5654_v24 = vmul.f32 %v9842_v43, %v5120_v19  ;;  %v3821_v12 = vadd.f32 %v10406_v16, %v9815_v61  ;;  %v14355_v0 = vld [vmem:[#allocation67_spill] sm:$0xff] }
 0x28c   : > { %v4494_v58 = vadd.f32 %v10414_v63, %v9889_v23  ;;  %v6164_v46 = vadd.f32 %v6163_v21, %v5648_v47  ;;  %v10540_v7 = vadd.f32 %v2401_v1, %v1365_v13  ;;  %v4496_v2 = vadd.f32 %v10428_v25, %v9994_v9  ;;  %v14347_v47 = vld [vmem:[#allocation131_spill] sm:$0xff]  ;;  %v10570_v26 = vpop.permute.xlu1 %1076 }
 0x28d   : > { %v3271_v35 = vpack.c.bf16 %v14345_v11, %v14344_v4  ;;  %v10537_v17 = vpop.f32.mrf.mxu0  ;;  %v2406_v5 = vmul.f32 %v8316_v54, %v2103_v20  ;;  %v10545_v51 = vpop.f32.mrf.mxu1  ;;  %v5123_v16 = vmax.f32 %v4490_v50, 0.0  ;;  %v5125_v19 = vmax.f32 %v3823_v27, 0.0 }
 0x28e   : > { %14346 = vst [vmem:[#allocation32_spill] sm:$0xff] %v10540_v7  ;;  %v6165_v28 = vadd.f32 %v6164_v46, %v5649_v45  ;;  %v3825_v63 = vadd.f32 %v10433_v30, %v9815_v61  ;;  %v5656_v13 = vmul.f32 %v9920_v37, %v5122_v62  ;;  %v10555_v25 = vadd.f32 %v8331_v32, %v2656_v8  ;;  %v2098_v45 = vpop.permute.xlu0 %2097 }
 0x28f   : > { %4068 = vmatprep.mubr.bf16.mxu0 %v3271_v35  ;;  %4741 = vmatprep.mubr.bf16.mxu1 %v3271_v35  ;;  %v10551_v21 = vpop.f32.mrf.mxu0  ;;  %v5655_v1 = vmul.f32 %v9966_v33, %v5121_v48  ;;  %v1370_v50 = vmul.f32 %v14324_v29, %v10481_v15  ;;  %v10560_v4 = vpop.f32.mrf.mxu1  ;;  %v5124_v30 = vmax.f32 %v3821_v12, 0.0  ;;  %v5126_v11 = vmax.f32 %v4494_v58, 0.0 }
 0x290   : > { %4069 = vmatmul.mubr.bf16.gmra.mxu0 %v14347_v47  ;;  %4742 = vmatmul.mubr.bf16.gmra.mxu1 %v14347_v47  ;;  %14348 = vst [vmem:[#allocation146_spill] sm:$0xff] %v10555_v25  ;;  %v2407_v35 = vmul.f32 %v8319_v36, %v2103_v20  ;;  %v4498_v27 = vadd.f32 %v10438_v49, %v9889_v23  ;;  %v5127_v46 = vmax.f32 %v4496_v2, 0.0  ;;  %v5128_v58 = vmax.f32 %v3825_v63, 0.0 }
 0x291   : > { %6166 = vadd.xlane.f32.xlu0 %v6165_v28  ;;  %v10565_v62 = vpop.f32.mrf.mxu0  ;;  %v1371_v8 = vmul.f32 %v14325_v34, %v10481_v15  ;;  %v1368_v48 = vmul.f32 %v14324_v29, %v1062_v6  ;;  %v2662_v47 = vadd.f32 %v2406_v5, %v1370_v50  ;;  %v10572_v42 = vpop.f32.mrf.mxu1  ;;  %v5657_v12 = vmul.f32 %v10003_v44, %v5123_v16 }
 0x292   : > { %v5659_v20 = vmul.f32 %v9966_v33, %v5125_v19  ;;  %v2404_v49 = vmul.f32 %v8316_v54, %v2098_v45  ;;  %v6173_v7 = vadd.f32 %v5655_v1, %v5654_v24  ;;  %v1369_v15 = vmul.f32 %v14325_v34, %v1062_v6 }
 0x293   : > { %v10577_v28 = vpop.f32.mrf.mxu0  ;;  %v3827_v2 = vadd.f32 %v10444_v41, %v9959_v31  ;;  %v6169_v5 = vadd.f32 %v6168_v14, %v10504_v57  ;;  %v10583_v50 = vpop.f32.mrf.mxu1  ;;  %v5658_v53 = vmul.f32 %v9842_v43, %v5124_v30  ;;  %v10587_v16 = vmul.f32 %v9920_v37, %v5126_v11 }
 0x294   : > { %v10589_v19 = vadd.f32 %v2407_v35, %v1371_v8  ;;  %v5130_v63 = vmax.f32 %v4498_v27, 0.0  ;;  %v10594_v24 = vmul.f32 %v10003_v44, %v5127_v46  ;;  %v10597_v6 = vadd.f32 %v8331_v32, %v2662_v47  ;;  %v1072_v27 = vpop.permute.xlu0 %1071  ;;  %v14353_v47 = vld [vmem:[#allocation65_spill] sm:$0xff] }
 0x295   : > { %v10591_v25 = vpop.f32.mrf.mxu0  ;;  %v4500_v41 = vadd.f32 %v10448_v18, %v9994_v9  ;;  %v6170_v57 = vadd.f32 %v6169_v5, %v10510_v59  ;;  %v10602_v14 = vpop.f32.mrf.mxu1  ;;  %v6178_v1 = vadd.f32 %v5659_v20, %v5658_v53  ;;  %v5662_v30 = vmul.f32 %v9842_v43, %v5128_v58 }
 0x296   : > { %14349 = vst [vmem:[#allocation29_spill] sm:$0xff] %v10589_v19  ;;  %14350 = vst [vmem:[#allocation143_spill] sm:$0xff] %v10597_v6  ;;  %v2405_v11 = vmul.f32 %v8319_v36, %v2098_v45  ;;  %v2660_v35 = vadd.f32 %v2404_v49, %v1368_v48  ;;  %v5129_v46 = vmax.f32 %v3827_v2, 0.0  ;;  %v14354_v19 = vld [vmem:[#allocation110_spill] sm:$0xff]  ;;  %v3833_v59 = vadd.f32 %v10466_v55, %v9959_v31  ;;  %v2113_v53 = vpop.permute.xlu1 %2112 }
 0x297   : > { %14351 = vst [vmem:[#allocation35_spill] sm:$0xff] %v10602_v14  ;;  %v10606_v8 = vpop.f32.mrf.mxu0  ;;  %6171 = vadd.xlane.f32.xlu1 %v6170_v57  ;;  %v2821_v6 = vadd.f32 %v14354_v19, %v14353_v47  ;;  %v2823_v18 = vadd.f32 %v14354_v19, %v14355_v0  ;;  %v10614_v20 = vpop.f32.mrf.mxu1  ;;  %v10617_v45 = vmul.f32 %v9920_v37, %v5130_v63  ;;  %v5131_v5 = vmax.f32 %v4500_v41, 0.0 }
 0x298   : > { %14352 = vst [vmem:[#allocation148_spill] sm:$0xff] %v10606_v8  ;;  %14356 = vst [vmem:[#allocation145_spill] sm:$0xff] %v10614_v20  ;;  %v3831_v48 = vadd.f32 %v10455_v40, %v9815_v61  ;;  %v4504_v58 = vadd.f32 %v10462_v39, %v9889_v23  ;;  %v6174_v49 = vadd.f32 %v6173_v7, %v5656_v13  ;;  %v5133_v63 = vmax.f32 %v3833_v59, 0.0 }
 0x299   : > { %v10623_v2 = vpop.f32.mrf.mxu0  ;;  %v3077_v0 = vmax.f32 %v2821_v6, 0.0  ;;  %v3079_v57 = vmax.f32 %v2823_v18, 0.0  ;;  %v4506_v55 = vadd.f32 %v10475_v60, %v9994_v9  ;;  %v10627_v47 = vpop.f32.mrf.mxu1  ;;  %v10629_v20 = vadd.f32 %v2405_v11, %v1369_v15 }
 0x29a   : > { %v6175_v8 = vadd.f32 %v6174_v49, %v5657_v12  ;;  %v2410_v40 = vmul.f32 %v8316_v54, %v2113_v53  ;;  %v10635_v39 = vadd.f32 %v8331_v32, %v2660_v35  ;;  %v5663_v7 = vmul.f32 %v9966_v33, %v5129_v46  ;;  %v2108_v18 = vpop.permute.xlu0 %2107 }
 0x29b   : > { %14357 = vst [vmem:[#allocation31_spill] sm:$0xff] %v10629_v20  ;;  %v10632_v14 = vpop.f32.mrf.mxu0  ;;  %v3273_v13 = vpack.c.bf16 %v3079_v57, %v3077_v0  ;;  %v3835_v6 = vadd.f32 %v10483_v10, %v9815_v61  ;;  %v10640_v60 = vpop.f32.mrf.mxu1  ;;  %v1374_v15 = vmul.f32 %v14324_v29, %v10570_v26  ;;  %v5132_v41 = vmax.f32 %v3831_v48, 0.0 }
 0x29c   : > { %14358 = vst [vmem:[#allocation152_spill] sm:$0xff] %v10635_v39  ;;  %v5134_v12 = vmax.f32 %v4504_v58, 0.0  ;;  %6176 = vadd.xlane.f32.xlu0 %v6175_v8  ;;  %v4508_v11 = vadd.f32 %v10489_v52, %v9889_v23  ;;  %v5665_v46 = vmul.f32 %v10003_v44, %v5131_v5  ;;  %v1375_v59 = vmul.f32 %v14325_v34, %v10570_v26  ;;  %v1087_v57 = vpop.permute.xlu1 %1086 }
 0x29d   : > { %v10646_v35 = vpop.f32.mrf.mxu0  ;;  %v1372_v10 = vmul.f32 %v14324_v29, %v1072_v27  ;;  %4078 = vmatprep.mubr.bf16.mxu0 %v3273_v13  ;;  %4751 = vmatprep.mubr.bf16.mxu1 %v3273_v13  ;;  %v5135_v49 = vmax.f32 %v4506_v55, 0.0  ;;  %v10652_v0 = vpop.f32.mrf.mxu1  ;;  %v1373_v8 = vmul.f32 %v14325_v34, %v1072_v27  ;;  %v5667_v48 = vmul.f32 %v9966_v33, %v5133_v63 }
 0x29e   : > { %14359 = vst [vmem:[#allocation52_spill] sm:$0xff] %v10646_v35  ;;  %14360 = vst [vmem:[#allocation34_spill] sm:$0xff] %v10652_v0  ;;  %v2411_v52 = vmul.f32 %v8319_v36, %v2113_v53  ;;  %v2666_v58 = vadd.f32 %v2410_v40, %v1374_v15  ;;  %v6183_v5 = vadd.f32 %v5663_v7, %v5662_v30  ;;  %v5136_v39 = vmax.f32 %v3835_v6, 0.0  ;;  %v14366_v15 = vld [vmem:[#allocation68_spill] sm:$0xff] }
 0x29f   : > { %v10657_v20 = vpop.f32.mrf.mxu0  ;;  %v2408_v26 = vmul.f32 %v8316_v54, %v2108_v18  ;;  %v6179_v35 = vadd.f32 %v6178_v1, %v10587_v16  ;;  %v10661_v13 = vpop.f32.mrf.mxu1  ;;  %v5666_v55 = vmul.f32 %v9842_v43, %v5132_v41  ;;  %v10665_v27 = vmul.f32 %v9920_v37, %v5134_v12  ;;  %v14364_v1 = vld [vmem:[#allocation63_spill] sm:$0xff] }
 0x2a0   : > { %14361 = vst [vmem:[#allocation150_spill] sm:$0xff] %v10657_v20  ;;  %14362 = vst [vmem:[#allocation147_spill] sm:$0xff] %v10661_v13  ;;  %v5138_v63 = vmax.f32 %v4508_v11, 0.0  ;;  %v3837_v53 = vadd.f32 %v10495_v22, %v9959_v31  ;;  %v10672_v30 = vmul.f32 %v10003_v44, %v5135_v49  ;;  %v2409_v7 = vmul.f32 %v8319_v36, %v2108_v18  ;;  %v14370_v49 = vld [vmem:[#allocation141_spill] sm:$0xff]  ;;  %v1082_v18 = vpop.permute.xlu0 %1081 }
 0x2a1   : > { %v10669_v40 = vpop.f32.mrf.mxu0  ;;  %v6180_v16 = vadd.f32 %v6179_v35, %v10594_v24  ;;  %v14365_v6 = vmax.f32 %v14364_v1, 0.0  ;;  %v14367_v41 = vmax.f32 %v14366_v15, 0.0  ;;  %v10680_v12 = vpop.f32.mrf.mxu1  ;;  %v10682_v11 = vadd.f32 %v5667_v48, %v5666_v55  ;;  %v14372_v48 = vld [vmem:[#allocation66_spill] sm:$0xff]  ;;  %v14373_v15 = vld [vmem:[#allocation72_spill] sm:$0xff] }
 0x2a2   : > { %14363 = vst [vmem:[#allocation153_spill] sm:$0xff] %v10669_v40  ;;  %v10684_v20 = vadd.f32 %v2411_v52, %v1375_v59  ;;  %v10687_v22 = vadd.f32 %v8331_v32, %v2666_v58  ;;  %v4510_v40 = vadd.f32 %v14370_v49, %v9994_v9  ;;  %v5670_v1 = vmul.f32 %v9842_v43, %v5136_v39  ;;  %v2123_v39 = vpop.permute.xlu1 %2122 }
 0x2a3   : > { %v3272_v13 = vpack.c.bf16 %v14367_v41, %v14365_v6  ;;  %v10691_v0 = vpop.f32.mrf.mxu0  ;;  %v2664_v6 = vadd.f32 %v2408_v26, %v1372_v10  ;;  %6181 = vadd.xlane.f32.xlu1 %v6180_v16  ;;  %v2825_v59 = vadd.f32 %v14354_v19, %v14372_v48  ;;  %v10697_v52 = vpop.f32.mrf.mxu1  ;;  %v10700_v58 = vmul.f32 %v9920_v37, %v5138_v63  ;;  %v14375_v16 = vld [vmem:[#allocation36_spill] sm:$0xff] }
 0x2a4   : > { %14368 = vst [vmem:[#allocation41_spill] sm:$0xff] %v10684_v20  ;;  %14369 = vst [vmem:[#allocation149_spill] sm:$0xff] %v10687_v22  ;;  %v5137_v55 = vmax.f32 %v3837_v53, 0.0  ;;  %v2827_v41 = vadd.f32 %v14354_v19, %v14373_v15  ;;  %v3843_v49 = vadd.f32 %v10522_v38, %v9959_v31  ;;  %v10708_v26 = vadd.f32 %v2409_v7, %v1373_v8 }
 0x2a5   : > { %4079 = vmatmul.mubr.bf16.gmra.mxu0 %v3272_v13  ;;  %4752 = vmatmul.mubr.bf16.gmra.mxu1 %v3272_v13  ;;  %v10706_v10 = vpop.f32.mrf.mxu0  ;;  %v3841_v48 = vadd.f32 %v14375_v16, %v9815_v61  ;;  %v4514_v63 = vadd.f32 %v10515_v3, %v9889_v23  ;;  %v6184_v53 = vadd.f32 %v6183_v5, %v10617_v45  ;;  %v10715_v13 = vpop.f32.mrf.mxu1  ;;  %v5139_v35 = vmax.f32 %v4510_v40, 0.0 }
 0x2a6   : > { %14374 = vst [vmem:[#allocation38_spill] sm:$0xff] %v10708_v26  ;;  %v3081_v15 = vmax.f32 %v2825_v59, 0.0  ;;  %v3083_v20 = vmax.f32 %v2827_v41, 0.0  ;;  %v4516_v38 = vadd.f32 %v10530_v56, %v9994_v9  ;;  %v10722_v8 = vadd.f32 %v8331_v32, %v2664_v6  ;;  %v2118_v59 = vpop.permute.xlu0 %2117 }
 0x2a7   : > { %v10719_v24 = vpop.f32.mrf.mxu0  ;;  %v5141_v7 = vmax.f32 %v3843_v49, 0.0  ;;  %v6185_v16 = vadd.f32 %v6184_v53, %v5665_v46  ;;  %v2414_v26 = vmul.f32 %v8316_v54, %v2123_v39  ;;  %v10725_v3 = vpop.f32.mrf.mxu1  ;;  %v5671_v45 = vmul.f32 %v9966_v33, %v5137_v55 }
 0x2a8   : > { %14376 = vst [vmem:[#allocation37_spill] sm:$0xff] %v10722_v8  ;;  %14377 = vst [vmem:[#allocation159_spill] sm:$0xff] %v10725_v3  ;;  %v3275_v5 = vpack.c.bf16 %v3083_v20, %v3081_v15  ;;  %v3845_v40 = vadd.f32 %v10537_v17, %v9815_v61  ;;  %v4518_v56 = vadd.f32 %v10545_v51, %v9889_v23  ;;  %v5140_v49 = vmax.f32 %v3841_v48, 0.0 }
 0x2a9   : > { %v10732_v41 = vpop.f32.mrf.mxu0  ;;  %v1378_v6 = vmul.f32 %v14324_v29, %v1087_v57  ;;  %v1379_v46 = vmul.f32 %v14325_v34, %v1087_v57  ;;  %v5142_v53 = vmax.f32 %v4514_v63, 0.0  ;;  %6186 = vadd.xlane.f32.xlu0 %v6185_v16  ;;  %v10736_v8 = vpop.f32.mrf.mxu1  ;;  %v5673_v20 = vmul.f32 %v10003_v44, %v5139_v35 }
 0x2aa   : > { %14378 = vst [vmem:[#allocation156_spill] sm:$0xff] %v10732_v41  ;;  %14379 = vst [vmem:[#allocation154_spill] sm:$0xff] %v10736_v8  ;;  %v1376_v55 = vmul.f32 %v14324_v29, %v1082_v18  ;;  %v1377_v17 = vmul.f32 %v14325_v34, %v1082_v18  ;;  %4088 = vmatprep.mubr.bf16.mxu0 %v3275_v5  ;;  %4761 = vmatprep.mubr.bf16.mxu1 %v3275_v5  ;;  %v5143_v51 = vmax.f32 %v4516_v38, 0.0  ;;  %v1097_v16 = vpop.permute.xlu1 %1096 }
 0x2ab   : > { %v10741_v15 = vpop.f32.mrf.mxu0  ;;  %v5675_v22 = vmul.f32 %v9966_v33, %v5141_v7  ;;  %v2415_v57 = vmul.f32 %v8319_v36, %v2123_v39  ;;  %v2670_v48 = vadd.f32 %v2414_v26, %v1378_v6  ;;  %v2412_v63 = vmul.f32 %v8316_v54, %v2118_v59  ;;  %v10746_v8 = vpop.f32.mrf.mxu1 }
 0x2ac   : > { %14380 = vst [vmem:[#allocation54_spill] sm:$0xff] %v10741_v15  ;;  %14381 = vst [vmem:[#allocation151_spill] sm:$0xff] %v10746_v8  ;;  %v6193_v35 = vadd.f32 %v5671_v45, %v5670_v1  ;;  %v5144_v41 = vmax.f32 %v3845_v40, 0.0  ;;  %v5146_v3 = vmax.f32 %v4518_v56, 0.0  ;;  %v6189_v18 = vadd.f32 %v10682_v11, %v10665_v27  ;;  %v14384_v45 = vld [vmem:[#allocation71_spill] sm:$0xff]  ;;  %v14386_v56 = vld [vmem:[#allocation70_spill] sm:$0xff]  ;;  %v1092_v8 = vpop.permute.xlu0 %1091 }
 0x2ad   : > { %v10750_v5 = vpop.f32.mrf.mxu0  ;;  %v5674_v38 = vmul.f32 %v9842_v43, %v5140_v49  ;;  %v10754_v7 = vmul.f32 %v9920_v37, %v5142_v53  ;;  %v2413_v39 = vmul.f32 %v8319_v36, %v2118_v59  ;;  %v3847_v26 = vadd.f32 %v10551_v21, %v9959_v31  ;;  %v10759_v6 = vpop.f32.mrf.mxu1 }
 0x2ae   : > { %14382 = vst [vmem:[#allocation160_spill] sm:$0xff] %v10750_v5  ;;  %14383 = vst [vmem:[#allocation163_spill] sm:$0xff] %v10759_v6  ;;  %v10762_v1 = vmul.f32 %v10003_v44, %v5143_v51  ;;  %v4520_v27 = vadd.f32 %v10560_v4, %v9994_v9  ;;  %v6190_v11 = vadd.f32 %v6189_v18, %v10672_v30  ;;  %v14385_v40 = vmax.f32 %v14384_v45, 0.0 }
 0x2af   : > { %v14387_v49 = vmax.f32 %v14386_v56, 0.0  ;;  %v10771_v5 = vpop.f32.mrf.mxu0  ;;  %v10773_v59 = vadd.f32 %v5675_v22, %v5674_v38  ;;  %v10775_v21 = vadd.f32 %v2415_v57, %v1379_v46  ;;  %v10778_v6 = vadd.f32 %v8331_v32, %v2670_v48  ;;  %v10780_v15 = vpop.f32.mrf.mxu1  ;;  %v14391_v22 = vld [vmem:[#allocation69_spill] sm:$0xff] }
 0x2b0   : > { %v2668_v51 = vadd.f32 %v2412_v63, %v1376_v55  ;;  %v5678_v18 = vmul.f32 %v9842_v43, %v5144_v41  ;;  %v10785_v45 = vmul.f32 %v9920_v37, %v5146_v3  ;;  %6191 = vadd.xlane.f32.xlu1 %v6190_v11  ;;  %v2829_v46 = vadd.f32 %v14354_v19, %v14391_v22  ;;  %v14393_v63 = vld [vmem:[#allocation81_spill] sm:$0xff] }
 0x2b1   : > { %v3274_v53 = vpack.c.bf16 %v14387_v49, %v14385_v40  ;;  %14388 = vst [vmem:[#allocation157_spill] sm:$0xff] %v10775_v21  ;;  %14389 = vst [vmem:[#allocation155_spill] sm:$0xff] %v10778_v6  ;;  %v10789_v57 = vpop.f32.mrf.mxu0  ;;  %v10791_v48 = vadd.f32 %v2413_v39, %v1377_v17  ;;  %v5145_v55 = vmax.f32 %v3847_v26, 0.0  ;;  %v2831_v38 = vadd.f32 %v14354_v19, %v14393_v63  ;;  %v2133_v40 = vpop.permute.xlu1 %2132 }
 0x2b2   : > { %v3853_v41 = vadd.f32 %v10577_v28, %v9959_v31  ;;  %v10797_v3 = vpop.f32.mrf.mxu1  ;;  %v5147_v11 = vmax.f32 %v4520_v27, 0.0  ;;  %v3851_v56 = vadd.f32 %v10565_v62, %v9815_v61  ;;  %v4524_v49 = vadd.f32 %v10572_v42, %v9889_v23 }
 0x2b3   : > { %4089 = vmatmul.mubr.bf16.gmra.mxu0 %v3274_v53  ;;  %14392 = vst [vmem:[#allocation167_spill] sm:$0xff] %v10791_v48  ;;  %4762 = vmatmul.mubr.bf16.gmra.mxu1 %v3274_v53  ;;  %v6194_v17 = vadd.f32 %v6193_v35, %v10700_v58  ;;  %v10804_v39 = vpop.f32.mrf.mxu0  ;;  %v10807_v26 = vadd.f32 %v8331_v32, %v2668_v51  ;;  %v3085_v53 = vmax.f32 %v2829_v46, 0.0  ;;  %v3087_v22 = vmax.f32 %v2831_v38, 0.0  ;;  %v14397_v38 = vld [vmem:[#allocation35_spill] sm:$0xff] }
 0x2b4   : > { %v4526_v28 = vadd.f32 %v10583_v50, %v9994_v9  ;;  %v10811_v63 = vpop.f32.mrf.mxu1  ;;  %v5149_v27 = vmax.f32 %v3853_v41, 0.0  ;;  %v2418_v62 = vmul.f32 %v8316_v54, %v2133_v40  ;;  %v3855_v42 = vadd.f32 %v10591_v25, %v9815_v61  ;;  %v2128_v50 = vpop.permute.xlu0 %2127 }
 0x2b5   : > { %14394 = vst [vmem:[#allocation55_spill] sm:$0xff] %v10807_v26  ;;  %14395 = vst [vmem:[#allocation161_spill] sm:$0xff] %v10811_v63  ;;  %v6195_v30 = vadd.f32 %v6194_v17, %v5673_v20  ;;  %v10816_v58 = vpop.f32.mrf.mxu0  ;;  %v5679_v35 = vmul.f32 %v9966_v33, %v5145_v55  ;;  %v1382_v51 = vmul.f32 %v14324_v29, %v1097_v16  ;;  %v5148_v17 = vmax.f32 %v3851_v56, 0.0 }
 0x2b6   : > { %14396 = vst [vmem:[#allocation164_spill] sm:$0xff] %v10816_v58  ;;  %v3277_v46 = vpack.c.bf16 %v3087_v22, %v3085_v53  ;;  %v4528_v21 = vadd.f32 %v14397_v38, %v9889_v23  ;;  %v10822_v48 = vpop.f32.mrf.mxu1  ;;  %v10825_v20 = vmul.f32 %v10003_v44, %v5147_v11  ;;  %v1383_v41 = vmul.f32 %v14325_v34, %v1097_v16 }
 0x2b7   : > { %14398 = vst [vmem:[#allocation158_spill] sm:$0xff] %v10822_v48  ;;  %v5150_v25 = vmax.f32 %v4524_v49, 0.0  ;;  %6196 = vadd.xlane.f32.xlu0 %v6195_v30  ;;  %v10828_v4 = vpop.f32.mrf.mxu0  ;;  %v1380_v55 = vmul.f32 %v14324_v29, %v1092_v8  ;;  %v1381_v53 = vmul.f32 %v14325_v34, %v1092_v8  ;;  %v5151_v22 = vmax.f32 %v4526_v28, 0.0  ;;  %v1107_v30 = vpop.permute.xlu1 %1106 }
 0x2b8   : > { %14399 = vst [vmem:[#allocation57_spill] sm:$0xff] %v10828_v4  ;;  %4098 = vmatprep.mubr.bf16.mxu0 %v3277_v46  ;;  %4771 = vmatprep.mubr.bf16.mxu1 %v3277_v46  ;;  %v2419_v38 = vmul.f32 %v8319_v36, %v2133_v40  ;;  %v10833_v26 = vpop.f32.mrf.mxu1  ;;  %v5683_v11 = vmul.f32 %v9966_v33, %v5149_v27  ;;  %v5152_v16 = vmax.f32 %v3855_v42, 0.0  ;;  %v5154_v58 = vmax.f32 %v4528_v21, 0.0 }
 0x2b9   : > { %14400 = vst [vmem:[#allocation56_spill] sm:$0xff] %v10833_v26  ;;  %v2674_v6 = vadd.f32 %v2418_v62, %v1382_v51  ;;  %v2416_v56 = vmul.f32 %v8316_v54, %v2128_v50  ;;  %v10837_v49 = vpop.f32.mrf.mxu0  ;;  %v6203_v48 = vadd.f32 %v5679_v35, %v5678_v18  ;;  %v2417_v8 = vmul.f32 %v8319_v36, %v2128_v50  ;;  %v14403_v62 = vld [vmem:[#allocation148_spill] sm:$0xff]  ;;  %v14404_v51 = vld [vmem:[#allocation145_spill] sm:$0xff]  ;;  %v1102_v26 = vpop.permute.xlu0 %1101 }
 0x2ba   : > { %14401 = vst [vmem:[#allocation168_spill] sm:$0xff] %v10837_v49  ;;  %v6199_v28 = vadd.f32 %v10773_v59, %v10754_v7  ;;  %v10842_v46 = vpop.f32.mrf.mxu1  ;;  %v5682_v40 = vmul.f32 %v9842_v43, %v5148_v17  ;;  %v10846_v27 = vmul.f32 %v9920_v37, %v5150_v25  ;;  %v3857_v42 = vadd.f32 %v14403_v62, %v9959_v31  ;;  %v14407_v59 = vld [vmem:[#allocation74_spill] sm:$0xff]  ;;  %v14409_v17 = vld [vmem:[#allocation76_spill] sm:$0xff] }
 0x2bb   : > { %14402 = vst [vmem:[#allocation170_spill] sm:$0xff] %v10842_v46  ;;  %v4530_v49 = vadd.f32 %v14404_v51, %v9994_v9  ;;  %v10852_v18 = vpop.f32.mrf.mxu0  ;;  %v10855_v21 = vmul.f32 %v10003_v44, %v5151_v22  ;;  %v10857_v35 = vadd.f32 %v2419_v38, %v1383_v41  ;;  %v14408_v50 = vmax.f32 %v14407_v59, 0.0  ;;  %v14414_v59 = vld [vmem:[#allocation73_spill] sm:$0xff] }
 0x2bc   : > { %14405 = vst [vmem:[#allocation162_spill] sm:$0xff] %v10852_v18  ;;  %v6200_v7 = vadd.f32 %v6199_v28, %v10762_v1  ;;  %v14410_v25 = vmax.f32 %v14409_v17, 0.0  ;;  %v10864_v63 = vpop.f32.mrf.mxu1  ;;  %v6208_v62 = vadd.f32 %v5683_v11, %v5682_v40  ;;  %v10867_v51 = vadd.f32 %v8331_v32, %v2674_v6 }
 0x2bd   : > { %14406 = vst [vmem:[#allocation165_spill] sm:$0xff] %v10857_v35  ;;  %v5686_v18 = vmul.f32 %v9842_v43, %v5152_v16  ;;  %v2672_v22 = vadd.f32 %v2416_v56, %v1380_v55  ;;  %v10870_v4 = vpop.f32.mrf.mxu0  ;;  %v10874_v1 = vmul.f32 %v9920_v37, %v5154_v58  ;;  %v10876_v28 = vadd.f32 %v2417_v8, %v1381_v53  ;;  %v14415_v55 = vld [vmem:[#allocation85_spill] sm:$0xff]  ;;  %v2143_v58 = vpop.permute.xlu1 %2142 }
 0x2be   : > { %v3276_v46 = vpack.c.bf16 %v14410_v25, %v14408_v50  ;;  %14411 = vst [vmem:[#allocation174_spill] sm:$0xff] %v10867_v51  ;;  %6201 = vadd.xlane.f32.xlu1 %v6200_v7  ;;  %v2833_v11 = vadd.f32 %v14354_v19, %v14414_v59  ;;  %v10880_v40 = vpop.f32.mrf.mxu1  ;;  %v5153_v6 = vmax.f32 %v3857_v42, 0.0  ;;  %v5155_v50 = vmax.f32 %v4530_v49, 0.0 }
 0x2bf   : > { %14413 = vst [vmem:[#allocation58_spill] sm:$0xff] %v10876_v28  ;;  %v2835_v16 = vadd.f32 %v14354_v19, %v14415_v55  ;;  %v3863_v56 = vadd.f32 %v10632_v14, %v9959_v31  ;;  %v10886_v17 = vpop.f32.mrf.mxu0  ;;  %v3861_v53 = vadd.f32 %v10623_v2, %v9815_v61  ;;  %v4534_v8 = vadd.f32 %v10627_v47, %v9889_v23 }
 0x2c0   : > { %4099 = vmatmul.mubr.bf16.gmra.mxu0 %v3276_v46  ;;  %4772 = vmatmul.mubr.bf16.gmra.mxu1 %v3276_v46  ;;  %v4536_v42 = vadd.f32 %v10640_v60, %v9994_v9  ;;  %v6204_v49 = vadd.f32 %v6203_v48, %v10785_v45  ;;  %v10895_v46 = vpop.f32.mrf.mxu1  ;;  %v10898_v7 = vadd.f32 %v8331_v32, %v2672_v22  ;;  %v3089_v25 = vmax.f32 %v2833_v11, 0.0  ;;  %v14419_v60 = vld [vmem:[#allocation52_spill] sm:$0xff]  ;;  %v2138_v45 = vpop.permute.xlu0 %2137  ;;  %v14421_v11 = vld [vmem:[#allocation34_spill] sm:$0xff] }
 0x2c1   : > { %14416 = vst [vmem:[#allocation171_spill] sm:$0xff] %v10895_v46  ;;  %v1386_v14 = vmul.f32 %v14324_v29, %v1107_v30  ;;  %v3091_v59 = vmax.f32 %v2835_v16, 0.0  ;;  %v10901_v55 = vpop.f32.mrf.mxu0  ;;  %v5157_v2 = vmax.f32 %v3863_v56, 0.0  ;;  %v2422_v47 = vmul.f32 %v8316_v54, %v2143_v58 }
 0x2c2   : > { %14417 = vst [vmem:[#allocation44_spill] sm:$0xff] %v10898_v7  ;;  %14418 = vst [vmem:[#allocation166_spill] sm:$0xff] %v10901_v55  ;;  %v6205_v38 = vadd.f32 %v6204_v49, %v10825_v20  ;;  %v3865_v35 = vadd.f32 %v14419_v60, %v9815_v61  ;;  %v10907_v48 = vpop.f32.mrf.mxu1  ;;  %v5687_v22 = vmul.f32 %v9966_v33, %v5153_v6  ;;  %v5156_v56 = vmax.f32 %v3861_v53, 0.0 }
 0x2c3   : > { %14420 = vst [vmem:[#allocation178_spill] sm:$0xff] %v10907_v48  ;;  %v1387_v28 = vmul.f32 %v14325_v34, %v1107_v30  ;;  %v3279_v41 = vpack.c.bf16 %v3091_v59, %v3089_v25  ;;  %v4538_v16 = vadd.f32 %v14421_v11, %v9889_v23  ;;  %v10913_v7 = vpop.f32.mrf.mxu0  ;;  %v10916_v20 = vmul.f32 %v10003_v44, %v5155_v50 }
 0x2c4   : > { %14422 = vst [vmem:[#allocation175_spill] sm:$0xff] %v10913_v7  ;;  %v5158_v49 = vmax.f32 %v4534_v8, 0.0  ;;  %v5159_v51 = vmax.f32 %v4536_v42, 0.0  ;;  %6206 = vadd.xlane.f32.xlu0 %v6205_v38  ;;  %v10918_v60 = vpop.f32.mrf.mxu1  ;;  %v1384_v6 = vmul.f32 %v14324_v29, %v1102_v26  ;;  %v1385_v30 = vmul.f32 %v14325_v34, %v1102_v26  ;;  %v1117_v42 = vpop.permute.xlu1 %1116  ;;  %v14427_v26 = vld [vmem:[#allocation150_spill] sm:$0xff] }
 0x2c5   : > { %14423 = vst [vmem:[#allocation172_spill] sm:$0xff] %v10918_v60  ;;  %4108 = vmatprep.mubr.bf16.mxu0 %v3279_v41  ;;  %4781 = vmatprep.mubr.bf16.mxu1 %v3279_v41  ;;  %v2420_v25 = vmul.f32 %v8316_v54, %v2138_v45  ;;  %v10924_v59 = vpop.f32.mrf.mxu0  ;;  %v5691_v50 = vmul.f32 %v9966_v33, %v5157_v2  ;;  %v5160_v38 = vmax.f32 %v3865_v35, 0.0  ;;  %v5162_v55 = vmax.f32 %v4538_v16, 0.0 }
 0x2c6   : > { %14425 = vst [vmem:[#allocation61_spill] sm:$0xff] %v10924_v59  ;;  %v2423_v53 = vmul.f32 %v8319_v36, %v2143_v58  ;;  %v2678_v8 = vadd.f32 %v2422_v47, %v1386_v14  ;;  %v10928_v11 = vpop.f32.mrf.mxu1  ;;  %v2421_v48 = vmul.f32 %v8319_v36, %v2138_v45  ;;  %v3867_v60 = vadd.f32 %v14427_v26, %v9959_v31  ;;  %v14429_v45 = vld [vmem:[#allocation147_spill] sm:$0xff] }
 0x2c7   : > { %14426 = vst [vmem:[#allocation169_spill] sm:$0xff] %v10928_v11  ;;  %v6209_v41 = vadd.f32 %v6208_v62, %v10846_v27  ;;  %v10934_v7 = vpop.f32.mrf.mxu0  ;;  %v6213_v59 = vadd.f32 %v5687_v22, %v5686_v18  ;;  %v5690_v2 = vmul.f32 %v9842_v43, %v5156_v56  ;;  %v10938_v58 = vmul.f32 %v9920_v37, %v5158_v49  ;;  %v14430_v27 = vld [vmem:[#allocation75_spill] sm:$0xff]  ;;  %v14432_v11 = vld [vmem:[#allocation84_spill] sm:$0xff]  ;;  %v1112_v56 = vpop.permute.xlu0 %1111 }
 0x2c8   : > { %14428 = vst [vmem:[#allocation182_spill] sm:$0xff] %v10934_v7  ;;  %v10941_v35 = vmul.f32 %v10003_v44, %v5159_v51  ;;  %v10943_v14 = vpop.f32.mrf.mxu1  ;;  %v2676_v47 = vadd.f32 %v2420_v25, %v1384_v6  ;;  %v4540_v16 = vadd.f32 %v14429_v45, %v9994_v9  ;;  %v14431_v62 = vmax.f32 %v14430_v27, 0.0  ;;  %v14437_v45 = vld [vmem:[#allocation77_spill] sm:$0xff] }
 0x2c9   : > { %v6210_v26 = vadd.f32 %v6209_v41, %v10855_v21  ;;  %v14433_v18 = vmax.f32 %v14432_v11, 0.0  ;;  %v10952_v7 = vpop.f32.mrf.mxu0  ;;  %v6218_v49 = vadd.f32 %v5691_v50, %v5690_v2  ;;  %v10954_v46 = vadd.f32 %v2423_v53, %v1387_v28  ;;  %v14438_v53 = vld [vmem:[#allocation153_spill] sm:$0xff] }
 0x2ca   : > { %v10957_v51 = vadd.f32 %v8331_v32, %v2678_v8  ;;  %v5694_v6 = vmul.f32 %v9842_v43, %v5160_v38  ;;  %v10960_v25 = vpop.f32.mrf.mxu1  ;;  %v10963_v21 = vmul.f32 %v9920_v37, %v5162_v55  ;;  %v10965_v41 = vadd.f32 %v2421_v48, %v1385_v30  ;;  %v14439_v2 = vld [vmem:[#allocation89_spill] sm:$0xff] }
 0x2cb   : > { %v3278_v22 = vpack.c.bf16 %v14433_v18, %v14431_v62  ;;  %14434 = vst [vmem:[#allocation176_spill] sm:$0xff] %v10954_v46  ;;  %v5161_v11 = vmax.f32 %v3867_v60, 0.0  ;;  %6211 = vadd.xlane.f32.xlu1 %v6210_v26  ;;  %v2837_v50 = vadd.f32 %v14354_v19, %v14437_v45  ;;  %v10969_v28 = vpop.f32.mrf.mxu0  ;;  %v3871_v8 = vadd.f32 %v14438_v53, %v9815_v61  ;;  %v2153_v60 = vpop.permute.xlu1 %2152 }
 0x2cc   : > { %14435 = vst [vmem:[#allocation179_spill] sm:$0xff] %v10957_v51  ;;  %14436 = vst [vmem:[#allocation60_spill] sm:$0xff] %v10965_v41  ;;  %v4544_v38 = vadd.f32 %v10680_v12, %v9889_v23  ;;  %v2839_v55 = vadd.f32 %v14354_v19, %v14439_v2  ;;  %v3873_v48 = vadd.f32 %v10691_v0, %v9959_v31  ;;  %v10979_v30 = vpop.f32.mrf.mxu1  ;;  %v5163_v27 = vmax.f32 %v4540_v16, 0.0  ;;  %v2148_v41 = vpop.permute.xlu0 %2147 }
 0x2cd   : > { %4109 = vmatmul.mubr.bf16.gmra.mxu0 %v3278_v22  ;;  %4782 = vmatmul.mubr.bf16.gmra.mxu1 %v3278_v22  ;;  %v10982_v26 = vadd.f32 %v8331_v32, %v2676_v47  ;;  %v4546_v62 = vadd.f32 %v10697_v52, %v9994_v9  ;;  %v6214_v18 = vadd.f32 %v6213_v59, %v10874_v1  ;;  %v10987_v12 = vpop.f32.mrf.mxu0  ;;  %v3093_v53 = vmax.f32 %v2837_v50, 0.0 }
 0x2ce   : > { %14441 = vst [vmem:[#allocation43_spill] sm:$0xff] %v10987_v12  ;;  %v1390_v22 = vmul.f32 %v14324_v29, %v1117_v42  ;;  %v1391_v45 = vmul.f32 %v14325_v34, %v1117_v42  ;;  %v3095_v0 = vmax.f32 %v2839_v55, 0.0  ;;  %v10991_v2 = vpop.f32.mrf.mxu1  ;;  %v5165_v46 = vmax.f32 %v3873_v48, 0.0 }
 0x2cf   : > { %14440 = vst [vmem:[#allocation173_spill] sm:$0xff] %v10982_v26  ;;  %14442 = vst [vmem:[#allocation42_spill] sm:$0xff] %v10991_v2  ;;  %v6215_v47 = vadd.f32 %v6214_v18, %v10916_v20  ;;  %v2426_v16 = vmul.f32 %v8316_v54, %v2153_v60  ;;  %v3875_v52 = vadd.f32 %v10706_v10, %v9815_v61  ;;  %v10997_v1 = vpop.f32.mrf.mxu0  ;;  %v5164_v26 = vmax.f32 %v3871_v8, 0.0  ;;  %v1127_v2 = vpop.permute.xlu1 %1126 }
 0x2d0   : > { %v5695_v59 = vmul.f32 %v9966_v33, %v5161_v11  ;;  %v5166_v51 = vmax.f32 %v4544_v38, 0.0  ;;  %v3281_v42 = vpack.c.bf16 %v3095_v0, %v3093_v53  ;;  %v11000_v50 = vpop.f32.mrf.mxu1  ;;  %v11003_v55 = vmul.f32 %v10003_v44, %v5163_v27 }
 0x2d1   : > { %v5167_v48 = vmax.f32 %v4546_v62, 0.0  ;;  %6216 = vadd.xlane.f32.xlu0 %v6215_v47  ;;  %v2427_v20 = vmul.f32 %v8319_v36, %v2153_v60  ;;  %v4548_v10 = vadd.f32 %v10715_v13, %v9889_v23  ;;  %v11008_v18 = vpop.f32.mrf.mxu0  ;;  %v1388_v11 = vmul.f32 %v14324_v29, %v1112_v56 }
 0x2d2   : > { %14443 = vst [vmem:[#allocation180_spill] sm:$0xff] %v11008_v18  ;;  %v1389_v8 = vmul.f32 %v14325_v34, %v1112_v56  ;;  %4118 = vmatprep.mubr.bf16.mxu0 %v3281_v42  ;;  %4791 = vmatprep.mubr.bf16.mxu1 %v3281_v42  ;;  %v2424_v38 = vmul.f32 %v8316_v54, %v2148_v41  ;;  %v11014_v27 = vpop.f32.mrf.mxu1  ;;  %v5168_v53 = vmax.f32 %v3875_v52, 0.0 }
 0x2d3   : > { %14445 = vst [vmem:[#allocation177_spill] sm:$0xff] %v11014_v27  ;;  %v5699_v62 = vmul.f32 %v9966_v33, %v5165_v46  ;;  %v2682_v60 = vadd.f32 %v2426_v16, %v1390_v22  ;;  %v3877_v13 = vadd.f32 %v10719_v24, %v9959_v31  ;;  %v11019_v0 = vpop.f32.mrf.mxu0  ;;  %v6223_v47 = vadd.f32 %v5695_v59, %v5694_v6  ;;  %v14449_v24 = vld [vmem:[#allocation159_spill] sm:$0xff] }
 0x2d4   : > { %14446 = vst [vmem:[#allocation185_spill] sm:$0xff] %v11019_v0  ;;  %v5698_v12 = vmul.f32 %v9842_v43, %v5164_v26  ;;  %v11023_v56 = vmul.f32 %v9920_v37, %v5166_v51  ;;  %v6219_v42 = vadd.f32 %v6218_v49, %v10938_v58  ;;  %v11026_v18 = vpop.f32.mrf.mxu1  ;;  %v11029_v46 = vmul.f32 %v10003_v44, %v5167_v48  ;;  %v14450_v58 = vld [vmem:[#allocation78_spill] sm:$0xff]  ;;  %v14452_v0 = vld [vmem:[#allocation88_spill] sm:$0xff] }
 0x2d5   : > { %14447 = vst [vmem:[#allocation62_spill] sm:$0xff] %v11026_v18  ;;  %v11031_v22 = vadd.f32 %v2427_v20, %v1391_v45  ;;  %v5170_v16 = vmax.f32 %v4548_v10, 0.0  ;;  %v4550_v52 = vadd.f32 %v14449_v24, %v9994_v9  ;;  %v11035_v6 = vpop.f32.mrf.mxu0  ;;  %v2425_v26 = vmul.f32 %v8319_v36, %v2148_v41 }
 0x2d6   : > { %v2680_v51 = vadd.f32 %v2424_v38, %v1388_v11  ;;  %v6220_v59 = vadd.f32 %v6219_v42, %v10941_v35  ;;  %v14451_v49 = vmax.f32 %v14450_v58, 0.0  ;;  %v14453_v18 = vmax.f32 %v14452_v0, 0.0  ;;  %v11043_v48 = vpop.f32.mrf.mxu1  ;;  %v14457_v35 = vld [vmem:[#allocation156_spill] sm:$0xff]  ;;  %v1122_v42 = vpop.permute.xlu0 %1121 }
 0x2d7   : > { %14448 = vst [vmem:[#allocation64_spill] sm:$0xff] %v11031_v22  ;;  %14454 = vst [vmem:[#allocation183_spill] sm:$0xff] %v11043_v48  ;;  %v6228_v45 = vadd.f32 %v5699_v62, %v5698_v12  ;;  %v11046_v20 = vadd.f32 %v8331_v32, %v2682_v60  ;;  %v5702_v10 = vmul.f32 %v9842_v43, %v5168_v53  ;;  %v5169_v24 = vmax.f32 %v3877_v13, 0.0  ;;  %v11049_v22 = vpop.f32.mrf.mxu0  ;;  %v14459_v12 = vld [vmem:[#allocation79_spill] sm:$0xff]  ;;  %v14461_v58 = vld [vmem:[#allocation92_spill] sm:$0xff] }
 0x2d8   : > { %v3280_v27 = vpack.c.bf16 %v14453_v18, %v14451_v49  ;;  %6221 = vadd.xlane.f32.xlu1 %v6220_v59  ;;  %v3881_v38 = vadd.f32 %v14457_v35, %v9815_v61  ;;  %v14458_v18 = vld [vmem:[#allocation154_spill] sm:$0xff]  ;;  %v2841_v62 = vadd.f32 %v14354_v19, %v14459_v12  ;;  %v11058_v60 = vpop.f32.mrf.mxu1  ;;  %v11061_v53 = vmul.f32 %v9920_v37, %v5170_v16  ;;  %v14466_v12 = vld [vmem:[#allocation151_spill] sm:$0xff] }
 0x2d9   : > { %14455 = vst [vmem:[#allocation45_spill] sm:$0xff] %v11046_v20  ;;  %v4554_v0 = vadd.f32 %v14458_v18, %v9889_v23  ;;  %14460 = vst [vmem:[#allocation181_spill] sm:$0xff] %v11058_v60  ;;  %v5171_v13 = vmax.f32 %v4550_v52, 0.0  ;;  %v2843_v59 = vadd.f32 %v14354_v19, %v14461_v58  ;;  %v14462_v49 = vld [vmem:[#allocation54_spill] sm:$0xff]  ;;  %v11067_v11 = vpop.f32.mrf.mxu0  ;;  %v11069_v18 = vadd.f32 %v2425_v26, %v1389_v8  ;;  %v2163_v52 = vpop.permute.xlu1 %2162 }
 0x2da   : > { %4119 = vmatmul.mubr.bf16.gmra.mxu0 %v3280_v27  ;;  %4792 = vmatmul.mubr.bf16.gmra.mxu1 %v3280_v27  ;;  %v3883_v35 = vadd.f32 %v14462_v49, %v9959_v31  ;;  %14463 = vst [vmem:[#allocation186_spill] sm:$0xff] %v11067_v11  ;;  %v11072_v41 = vadd.f32 %v8331_v32, %v2680_v51  ;;  %v11077_v27 = vpop.f32.mrf.mxu1  ;;  %v3097_v49 = vmax.f32 %v2841_v62, 0.0  ;;  %v5172_v8 = vmax.f32 %v3881_v38, 0.0 }
 0x2db   : > { %14464 = vst [vmem:[#allocation188_spill] sm:$0xff] %v11069_v18  ;;  %v4556_v20 = vadd.f32 %v14466_v12, %v9994_v9  ;;  %v6224_v16 = vadd.f32 %v6223_v47, %v10963_v21  ;;  %14467 = vst [vmem:[#allocation59_spill] sm:$0xff] %v11077_v27  ;;  %v5703_v58 = vmul.f32 %v9966_v33, %v5169_v24  ;;  %v3099_v48 = vmax.f32 %v2843_v59, 0.0  ;;  %v11081_v11 = vpop.f32.mrf.mxu0 }
 0x2dc   : > { %14465 = vst [vmem:[#allocation46_spill] sm:$0xff] %v11072_v41  ;;  %v1394_v60 = vmul.f32 %v14324_v29, %v1127_v2  ;;  %v5174_v26 = vmax.f32 %v4554_v0, 0.0  ;;  %v5173_v51 = vmax.f32 %v3883_v35, 0.0  ;;  %v11084_v41 = vpop.f32.mrf.mxu1  ;;  %v11087_v21 = vmul.f32 %v10003_v44, %v5171_v13  ;;  %v2158_v35 = vpop.permute.xlu0 %2157 }
 0x2dd   : > { %v6225_v18 = vadd.f32 %v6224_v16, %v11003_v55  ;;  %14468 = vst [vmem:[#allocation184_spill] sm:$0xff] %v11084_v41  ;;  %v1395_v47 = vmul.f32 %v14325_v34, %v1127_v2  ;;  %v3283_v12 = vpack.c.bf16 %v3099_v48, %v3097_v49  ;;  %v2430_v24 = vmul.f32 %v8316_v54, %v2163_v52  ;;  %v11091_v27 = vpop.f32.mrf.mxu0  ;;  %v14470_v55 = vld [vmem:[#allocation160_spill] sm:$0xff]  ;;  %v14473_v49 = vld [vmem:[#allocation163_spill] sm:$0xff] }
 0x2de   : > { %14469 = vst [vmem:[#allocation51_spill] sm:$0xff] %v11091_v27  ;;  %v1392_v62 = vmul.f32 %v14324_v29, %v1122_v42  ;;  %v5175_v59 = vmax.f32 %v4556_v20, 0.0  ;;  %v2431_v38 = vmul.f32 %v8319_v36, %v2163_v52  ;;  %v3885_v0 = vadd.f32 %v14470_v55, %v9815_v61  ;;  %v11097_v16 = vpop.f32.mrf.mxu1  ;;  %v14481_v27 = vld [vmem:[#allocation83_spill] sm:$0xff] }
 0x2df   : > { %6226 = vadd.xlane.f32.xlu0 %v6225_v18  ;;  %14471 = vst [vmem:[#allocation47_spill] sm:$0xff] %v11097_v16  ;;  %v6233_v2 = vadd.f32 %v5703_v58, %v5702_v10  ;;  %v1393_v48 = vmul.f32 %v14325_v34, %v1122_v42  ;;  %4128 = vmatprep.mubr.bf16.mxu0 %v3283_v12  ;;  %v11103_v20 = vpop.f32.mrf.mxu0 }
 0x2e0   : > { %4801 = vmatprep.mubr.bf16.mxu1 %v3283_v12  ;;  %v4558_v29 = vadd.f32 %v14473_v49, %v9889_v23  ;;  %14474 = vst [vmem:[#allocation191_spill] sm:$0xff] %v11103_v20  ;;  %v5706_v18 = vmul.f32 %v9842_v43, %v5172_v8  ;;  %v5708_v52 = vmul.f32 %v9920_v37, %v5174_v26  ;;  %v11110_v41 = vpop.f32.mrf.mxu1 }
 0x2e1   : > { %v5707_v55 = vmul.f32 %v9966_v33, %v5173_v51  ;;  %v3887_v16 = vadd.f32 %v10771_v5, %v9959_v31  ;;  %14475 = vst [vmem:[#allocation49_spill] sm:$0xff] %v11110_v41  ;;  %v2686_v10 = vadd.f32 %v2430_v24, %v1394_v60  ;;  %v2428_v34 = vmul.f32 %v8316_v54, %v2158_v35  ;;  %v11116_v12 = vpop.f32.mrf.mxu0  ;;  %v14477_v24 = vld [vmem:[#allocation80_spill] sm:$0xff]  ;;  %v14479_v41 = vld [vmem:[#allocation93_spill] sm:$0xff] }
 0x2e2   : > { %v4560_v42 = vadd.f32 %v10780_v15, %v9994_v9  ;;  %v6229_v58 = vadd.f32 %v6228_v45, %v11023_v56  ;;  %v5709_v8 = vmul.f32 %v10003_v44, %v5175_v59  ;;  %v11119_v26 = vadd.f32 %v2431_v38, %v1395_v47  ;;  %v11121_v13 = vpop.f32.mrf.mxu1 }
 0x2e3   : > { %v5176_v51 = vmax.f32 %v3885_v0, 0.0  ;;  %v5177_v49 = vmax.f32 %v3887_v16, 0.0  ;;  %v5178_v5 = vmax.f32 %v4558_v29, 0.0  ;;  %v14478_v54 = vmax.f32 %v14477_v24, 0.0  ;;  %v11130_v45 = vpop.f32.mrf.mxu0 }
 0x2e4   : > { %14476 = vst [vmem:[#allocation187_spill] sm:$0xff] %v11119_v26  ;;  %v6230_v60 = vadd.f32 %v6229_v58, %v11029_v46  ;;  %v14480_v20 = vmax.f32 %v14479_v41, 0.0  ;;  %v2845_v56 = vadd.f32 %v14354_v19, %v14481_v27  ;;  %v6238_v59 = vadd.f32 %v5707_v55, %v5706_v18  ;;  %v11137_v46 = vpop.f32.mrf.mxu1  ;;  %v14482_v41 = vld [vmem:[#allocation87_spill] sm:$0xff] }
 0x2e5   : > { %v2429_v47 = vmul.f32 %v8319_v36, %v2158_v35  ;;  %v3891_v38 = vadd.f32 %v10789_v57, %v9815_v61  ;;  %v4564_v0 = vadd.f32 %v10797_v3, %v9889_v23  ;;  %v2684_v16 = vadd.f32 %v2428_v34, %v1392_v62  ;;  %v11143_v18 = vpop.f32.mrf.mxu0 }
 0x2e6   : > { %v3282_v15 = vpack.c.bf16 %v14480_v20, %v14478_v54  ;;  %v5179_v29 = vmax.f32 %v4560_v42, 0.0  ;;  %6231 = vadd.xlane.f32.xlu1 %v6230_v60  ;;  %v2847_v27 = vadd.f32 %v14354_v19, %v14482_v41  ;;  %v3893_v20 = vadd.f32 %v10804_v39, %v9959_v31  ;;  %v11151_v35 = vpop.f32.mrf.mxu1 }
 0x2e7   : > { %v11146_v36 = vadd.f32 %v8331_v32, %v2686_v10  ;;  %v5710_v57 = vmul.f32 %v9842_v43, %v5176_v51  ;;  %v5711_v3 = vmul.f32 %v9966_v33, %v5177_v49  ;;  %v6234_v62 = vadd.f32 %v6233_v2, %v11061_v53  ;;  %v11154_v39 = vpop.f32.mrf.mxu0 }
 0x2e8   : > { %4129 = vmatmul.mubr.bf16.gmra.mxu0 %v3282_v15  ;;  %4802 = vmatmul.mubr.bf16.gmra.mxu1 %v3282_v15  ;;  %v5712_v55 = vmul.f32 %v9920_v37, %v5178_v5  ;;  %v3101_v34 = vmax.f32 %v2845_v56, 0.0  ;;  %v3103_v42 = vmax.f32 %v2847_v27, 0.0  ;;  %v5181_v58 = vmax.f32 %v3893_v20, 0.0  ;;  %v11159_v54 = vpop.f32.mrf.mxu1  ;;  %v14486_v5 = vld [vmem:[#allocation57_spill] sm:$0xff]  ;;  %v14490_v20 = vld [vmem:[#allocation158_spill] sm:$0xff] }
 0x2e9   : > { %14483 = vst [vmem:[#allocation48_spill] sm:$0xff] %v11146_v36  ;;  %v11156_v60 = vadd.f32 %v2429_v47, %v1393_v48  ;;  %v5180_v10 = vmax.f32 %v3891_v38, 0.0  ;;  %v5182_v24 = vmax.f32 %v4564_v0, 0.0  ;;  %v6235_v51 = vadd.f32 %v6234_v62, %v11087_v21  ;;  %v11167_v56 = vpop.f32.mrf.mxu0  ;;  %v14487_v48 = vld [vmem:[#allocation161_spill] sm:$0xff]  ;;  %v14488_v21 = vld [vmem:[#allocation164_spill] sm:$0xff] }
 0x2ea   : > { %v11162_v49 = vadd.f32 %v8331_v32, %v2684_v16  ;;  %v5713_v53 = vmul.f32 %v10003_v44, %v5179_v29  ;;  %v3285_v2 = vpack.c.bf16 %v3103_v42, %v3101_v34  ;;  %v3897_v15 = vadd.f32 %v14486_v5, %v9959_v31  ;;  %v11173_v27 = vpop.f32.mrf.mxu1 }
 0x2eb   : > { %14484 = vst [vmem:[#allocation39_spill] sm:$0xff] %v11156_v60  ;;  %v6243_v41 = vadd.f32 %v5711_v3, %v5710_v57  ;;  %v4566_v47 = vadd.f32 %v14487_v48, %v9994_v9  ;;  %6236 = vadd.xlane.f32.xlu0 %v6235_v51  ;;  %v3895_v38 = vadd.f32 %v14488_v21, %v9815_v61  ;;  %v14491_v57 = vld [vmem:[#allocation56_spill] sm:$0xff]  ;;  %v11181_v34 = vpop.f32.mrf.mxu0  ;;  %v14493_v51 = vld [vmem:[#allocation82_spill] sm:$0xff]  ;;  %v14495_v48 = vld [vmem:[#allocation97_spill] sm:$0xff] }
 0x2ec   : > { %14485 = vst [vmem:[#allocation40_spill] sm:$0xff] %v11162_v49  ;;  %v6239_v0 = vadd.f32 %v6238_v59, %v5708_v52  ;;  %4138 = vmatprep.mubr.bf16.mxu0 %v3285_v2  ;;  %4811 = vmatprep.mubr.bf16.mxu1 %v3285_v2  ;;  %v5715_v29 = vmul.f32 %v9966_v33, %v5181_v58  ;;  %14492 = vst [vmem:[#allocation189_spill] sm:$0xff] %v11181_v34  ;;  %v14494_v5 = vmax.f32 %v14493_v51, 0.0  ;;  %v11189_v16 = vpop.f32.mrf.mxu1  ;;  %v14500_v49 = vld [vmem:[#allocation86_spill] sm:$0xff] }
 0x2ed   : > { %v4568_v62 = vadd.f32 %v14490_v20, %v9889_v23  ;;  %v4570_v3 = vadd.f32 %v14491_v57, %v9994_v9  ;;  %v5714_v42 = vmul.f32 %v9842_v43, %v5180_v10  ;;  %v5716_v52 = vmul.f32 %v9920_v37, %v5182_v24  ;;  %14497 = vst [vmem:[#allocation190_spill] sm:$0xff] %v11189_v16  ;;  %v14498_v20 = vld [vmem:[#allocation168_spill] sm:$0xff]  ;;  %v14499_v57 = vld [vmem:[#allocation170_spill] sm:$0xff]  ;;  %v11197_v32 = vpop.f32.mrf.mxu0 }
 0x2ee   : > { %v6240_v59 = vadd.f32 %v6239_v0, %v5709_v8  ;;  %v14496_v21 = vmax.f32 %v14495_v48, 0.0  ;;  %v5185_v58 = vmax.f32 %v3897_v15, 0.0  ;;  %v3901_v26 = vadd.f32 %v14498_v20, %v9815_v61  ;;  %14501 = vst [vmem:[#allocation50_spill] sm:$0xff] %v11197_v32  ;;  %v14502_v0 = vld [vmem:[#allocation100_spill] sm:$0xff]  ;;  %v14503_v15 = vld [vmem:[#allocation162_spill] sm:$0xff]  ;;  %v11203_v48 = vpop.f32.mrf.mxu1 }
 0x2ef   : > { %v4574_v60 = vadd.f32 %v14499_v57, %v9889_v23  ;;  %v2849_v10 = vadd.f32 %v14354_v19, %v14500_v49  ;;  %v5183_v8 = vmax.f32 %v4566_v47, 0.0  ;;  %v5184_v24 = vmax.f32 %v3895_v38, 0.0  ;;  %v11205_v49 = vpop.f32.mrf.mxu0 }
 0x2f0   : > { %v3284_v2 = vpack.c.bf16 %v14496_v21, %v14494_v5  ;;  %6241 = vadd.xlane.f32.xlu1 %v6240_v59  ;;  %v2851_v51 = vadd.f32 %v14354_v19, %v14502_v0  ;;  %v3903_v5 = vadd.f32 %v14503_v15, %v9959_v31  ;;  %v6248_v21 = vadd.f32 %v5715_v29, %v5714_v42  ;;  %v11209_v16 = vpop.f32.mrf.mxu1 }
 0x2f1   : > { %v5186_v20 = vmax.f32 %v4568_v62, 0.0  ;;  %v5187_v57 = vmax.f32 %v4570_v3, 0.0  ;;  %v3105_v36 = vmax.f32 %v2849_v10, 0.0  ;;  %v6244_v38 = vadd.f32 %v6243_v41, %v5712_v55 }
 0x2f2   : > { %4139 = vmatmul.mubr.bf16.gmra.mxu0 %v3284_v2  ;;  %4812 = vmatmul.mubr.bf16.gmra.mxu1 %v3284_v2  ;;  %v3107_v32 = vmax.f32 %v2851_v51, 0.0  ;;  %v5189_v47 = vmax.f32 %v3903_v5, 0.0  ;;  %v3905_v59 = vadd.f32 %v10870_v4, %v9815_v61  ;;  %v5719_v0 = vmul.f32 %v9966_v33, %v5185_v58  ;;  %v11214_v62 = vpop.f32.mrf.mxu0  ;;  %v11218_v41 = vpop.f32.mrf.mxu1 }
 0x2f3   : > { %v5188_v15 = vmax.f32 %v3901_v26, 0.0  ;;  %v5190_v34 = vmax.f32 %v4574_v60, 0.0  ;;  %v3907_v29 = vadd.f32 %v10886_v17, %v9959_v31  ;;  %v5717_v3 = vmul.f32 %v10003_v44, %v5183_v8  ;;  %14504 = vst [vmem:[#allocation192_spill] sm:$0xff] %v11218_v41 }
 0x2f4   : > { %v5718_v42 = vmul.f32 %v9842_v43, %v5184_v24  ;;  %v3287_v2 = vpack.c.bf16 %v3107_v32, %v3105_v36  ;;  %v6245_v55 = vadd.f32 %v6244_v38, %v5713_v53  ;;  %v5720_v4 = vmul.f32 %v9920_v37, %v5186_v20  ;;  %v11224_v58 = vpop.f32.mrf.mxu0  ;;  %v11229_v8 = vpop.f32.mrf.mxu1  ;;  %v14509_v38 = vld [vmem:[#allocation166_spill] sm:$0xff] }
 0x2f5   : > { %v5723_v10 = vmul.f32 %v9966_v33, %v5189_v47  ;;  %v4576_v26 = vadd.f32 %v10864_v63, %v9994_v9  ;;  %v5192_v60 = vmax.f32 %v3905_v59, 0.0  ;;  %14505 = vst [vmem:[#allocation131_spill] sm:$0xff] %v11224_v58  ;;  %v5721_v17 = vmul.f32 %v10003_v44, %v5187_v57  ;;  %14506 = vst [vmem:[#allocation65_spill] sm:$0xff] %v11229_v8  ;;  %v14507_v63 = vld [vmem:[#allocation171_spill] sm:$0xff] }
 0x2f6   : > { %4148 = vmatprep.mubr.bf16.mxu0 %v3287_v2  ;;  %4821 = vmatprep.mubr.bf16.mxu1 %v3287_v2  ;;  %v4578_v36 = vadd.f32 %v10880_v40, %v9889_v23  ;;  %v5193_v53 = vmax.f32 %v3907_v29, 0.0  ;;  %v6249_v32 = vadd.f32 %v6248_v21, %v5716_v52  ;;  %v6253_v24 = vadd.f32 %v5719_v0, %v5718_v42  ;;  %v11235_v47 = vpop.f32.mrf.mxu0  ;;  %v14510_v40 = vld [vmem:[#allocation96_spill] sm:$0xff]  ;;  %v14512_v52 = vld [vmem:[#allocation101_spill] sm:$0xff]  ;;  %v14514_v0 = vld [vmem:[#allocation90_spill] sm:$0xff]  ;;  %v11245_v42 = vpop.f32.mrf.mxu1 }
 0x2f7   : > { %v5722_v51 = vmul.f32 %v9842_v43, %v5188_v15  ;;  %v5724_v5 = vmul.f32 %v9920_v37, %v5190_v34  ;;  %6246 = vadd.xlane.f32.xlu0 %v6245_v55  ;;  %v4580_v20 = vadd.f32 %v14507_v63, %v9994_v9  ;;  %14508 = vst [vmem:[#allocation110_spill] sm:$0xff] %v11235_v47  ;;  %v14511_v29 = vmax.f32 %v14510_v40, 0.0  ;;  %v14516_v8 = vld [vmem:[#allocation95_spill] sm:$0xff] }
 0x2f8   : > { %v6250_v57 = vadd.f32 %v6249_v32, %v5717_v3  ;;  %v3911_v59 = vadd.f32 %v14509_v38, %v9815_v61  ;;  %v14513_v21 = vmax.f32 %v14512_v52, 0.0  ;;  %v2853_v15 = vadd.f32 %v14354_v19, %v14514_v0  ;;  %14515 = vst [vmem:[#allocation67_spill] sm:$0xff] %v11245_v42  ;;  %v11250_v32 = vpop.f32.mrf.mxu0 }
 0x2f9   : > { %v6258_v34 = vadd.f32 %v5723_v10, %v5722_v51  ;;  %v5191_v55 = vmax.f32 %v4576_v26, 0.0  ;;  %v5726_v63 = vmul.f32 %v9842_v43, %v5192_v60  ;;  %v2855_v3 = vadd.f32 %v14354_v19, %v14516_v8  ;;  %14517 = vst [vmem:[#allocation63_spill] sm:$0xff] %v11250_v32  ;;  %v11257_v10 = vpop.f32.mrf.mxu1  ;;  %v14521_v8 = vld [vmem:[#allocation172_spill] sm:$0xff]  ;;  %v14522_v32 = vld [vmem:[#allocation61_spill] sm:$0xff] }
 0x2fa   : > { %v3286_v2 = vpack.c.bf16 %v14513_v21, %v14511_v29  ;;  %v5194_v38 = vmax.f32 %v4578_v36, 0.0  ;;  %v5727_v40 = vmul.f32 %v9966_v33, %v5193_v53  ;;  %6251 = vadd.xlane.f32.xlu1 %v6250_v57  ;;  %v14518_v29 = vld [vmem:[#allocation178_spill] sm:$0xff]  ;;  %v14519_v21 = vld [vmem:[#allocation175_spill] sm:$0xff]  ;;  %14520 = vst [vmem:[#allocation68_spill] sm:$0xff] %v11257_v10  ;;  %v3109_v26 = vmax.f32 %v2853_v15, 0.0  ;;  %v11261_v36 = vpop.f32.mrf.mxu0 }
 0x2fb   : > { %v4584_v52 = vadd.f32 %v14518_v29, %v9889_v23  ;;  %v3913_v0 = vadd.f32 %v14519_v21, %v9959_v31  ;;  %v3111_v60 = vmax.f32 %v2855_v3, 0.0  ;;  %v4586_v51 = vadd.f32 %v14521_v8, %v9994_v9  ;;  %v11265_v58 = vpop.f32.mrf.mxu1  ;;  %v14523_v15 = vld [vmem:[#allocation182_spill] sm:$0xff] }
 0x2fc   : > { %4149 = vmatmul.mubr.bf16.gmra.mxu0 %v3286_v2  ;;  %4822 = vmatmul.mubr.bf16.gmra.mxu1 %v3286_v2  ;;  %v6254_v42 = vadd.f32 %v6253_v24, %v5720_v4  ;;  %v5195_v53 = vmax.f32 %v4580_v20, 0.0  ;;  %v5196_v57 = vmax.f32 %v3911_v59, 0.0  ;;  %v3915_v29 = vadd.f32 %v14522_v32, %v9815_v61  ;;  %v11270_v41 = vpop.f32.mrf.mxu0  ;;  %v14524_v59 = vld [vmem:[#allocation169_spill] sm:$0xff] }
 0x2fd   : > { %v5197_v47 = vmax.f32 %v3913_v0, 0.0  ;;  %v5725_v21 = vmul.f32 %v10003_v44, %v5191_v55  ;;  %v3289_v10 = vpack.c.bf16 %v3111_v60, %v3109_v26  ;;  %v3917_v3 = vadd.f32 %v14523_v15, %v9959_v31  ;;  %v11275_v8 = vpop.f32.mrf.mxu1  ;;  %v14528_v15 = vld [vmem:[#allocation105_spill] sm:$0xff] }
 0x2fe   : > { %v6255_v2 = vadd.f32 %v6254_v42, %v5721_v17  ;;  %v5728_v4 = vmul.f32 %v9920_v37, %v5194_v38  ;;  %v6263_v24 = vadd.f32 %v5727_v40, %v5726_v63  ;;  %v5198_v20 = vmax.f32 %v4584_v52, 0.0  ;;  %14525 = vst [vmem:[#allocation141_spill] sm:$0xff] %v11275_v8  ;;  %v11280_v26 = vpop.f32.mrf.mxu0  ;;  %v14526_v52 = vld [vmem:[#allocation91_spill] sm:$0xff] }
 0x2ff   : > { %v4588_v0 = vadd.f32 %v14524_v59, %v9889_v23  ;;  %4158 = vmatprep.mubr.bf16.mxu0 %v3289_v10  ;;  %4831 = vmatprep.mubr.bf16.mxu1 %v3289_v10  ;;  %v5731_v55 = vmul.f32 %v9966_v33, %v5197_v47  ;;  %v5199_v32 = vmax.f32 %v4586_v51, 0.0  ;;  %v4590_v17 = vadd.f32 %v10943_v14, %v9994_v9  ;;  %v11288_v8 = vpop.f32.mrf.mxu1 }
 0x300   : > { %v6259_v42 = vadd.f32 %v6258_v34, %v5724_v5  ;;  %v5729_v38 = vmul.f32 %v10003_v44, %v5195_v53  ;;  %v5730_v63 = vmul.f32 %v9842_v43, %v5196_v57  ;;  %6256 = vadd.xlane.f32.xlu0 %v6255_v2  ;;  %v5200_v40 = vmax.f32 %v3915_v29, 0.0  ;;  %14530 = vst [vmem:[#allocation66_spill] sm:$0xff] %v11288_v8  ;;  %v11294_v34 = vpop.f32.mrf.mxu0  ;;  %v14532_v57 = vld [vmem:[#allocation94_spill] sm:$0xff]  ;;  %v14533_v2 = vld [vmem:[#allocation109_spill] sm:$0xff] }
 0x301   : > { %v14527_v60 = vmax.f32 %v14526_v52, 0.0  ;;  %v14529_v59 = vmax.f32 %v14528_v15, 0.0  ;;  %v5201_v47 = vmax.f32 %v3917_v3, 0.0  ;;  %v3921_v14 = vadd.f32 %v10952_v7, %v9815_v61  ;;  %14531 = vst [vmem:[#allocation72_spill] sm:$0xff] %v11294_v34  ;;  %v11303_v3 = vpop.f32.mrf.mxu1 }
 0x302   : > { %v6260_v51 = vadd.f32 %v6259_v42, %v5725_v21  ;;  %v4594_v5 = vadd.f32 %v10960_v25, %v9889_v23  ;;  %v5732_v53 = vmul.f32 %v9920_v37, %v5198_v20  ;;  %v2857_v29 = vadd.f32 %v14354_v19, %v14532_v57  ;;  %14534 = vst [vmem:[#allocation36_spill] sm:$0xff] %v11303_v3  ;;  %v11306_v20 = vpop.f32.mrf.mxu0 }
 0x303   : > { %v3288_v10 = vpack.c.bf16 %v14529_v59, %v14527_v60  ;;  %v2859_v52 = vadd.f32 %v14354_v19, %v14533_v2  ;;  %v3923_v21 = vadd.f32 %v10969_v28, %v9959_v31  ;;  %v6268_v7 = vadd.f32 %v5731_v55, %v5730_v63  ;;  %v11308_v8 = vpop.f32.mrf.mxu1 }
 0x304   : > { %v5733_v42 = vmul.f32 %v10003_v44, %v5199_v32  ;;  %v5202_v25 = vmax.f32 %v4588_v0, 0.0  ;;  %v5203_v60 = vmax.f32 %v4590_v17, 0.0  ;;  %6261 = vadd.xlane.f32.xlu1 %v6260_v51  ;;  %v3113_v15 = vmax.f32 %v2857_v29, 0.0  ;;  %v11312_v63 = vpop.f32.mrf.mxu0 }
 0x305   : > { %4159 = vmatmul.mubr.bf16.gmra.mxu0 %v3288_v10  ;;  %4832 = vmatmul.mubr.bf16.gmra.mxu1 %v3288_v10  ;;  %v3115_v59 = vmax.f32 %v2859_v52, 0.0  ;;  %v5205_v57 = vmax.f32 %v3923_v21, 0.0  ;;  %v6264_v34 = vadd.f32 %v6263_v24, %v5728_v4  ;;  %v5734_v2 = vmul.f32 %v9842_v43, %v5200_v40  ;;  %v11318_v51 = vpop.f32.mrf.mxu1  ;;  %v14536_v40 = vld [vmem:[#allocation43_spill] sm:$0xff] }
 0x306   : > { %v5735_v28 = vmul.f32 %v9966_v33, %v5201_v47  ;;  %v5204_v3 = vmax.f32 %v3921_v14, 0.0  ;;  %v5206_v55 = vmax.f32 %v4594_v5, 0.0  ;;  %v4596_v32 = vadd.f32 %v10979_v30, %v9994_v9  ;;  %14535 = vst [vmem:[#allocation71_spill] sm:$0xff] %v11318_v51  ;;  %v14537_v14 = vld [vmem:[#allocation42_spill] sm:$0xff]  ;;  %v11326_v29 = vpop.f32.mrf.mxu0 }
 0x307   : > { %v3291_v0 = vpack.c.bf16 %v3115_v59, %v3113_v15  ;;  %v6265_v17 = vadd.f32 %v6264_v34, %v5729_v38  ;;  %v3927_v10 = vadd.f32 %v10997_v1, %v9959_v31  ;;  %v5736_v4 = vmul.f32 %v9920_v37, %v5202_v25  ;;  %14538 = vst [vmem:[#allocation70_spill] sm:$0xff] %v11326_v29  ;;  %v11332_v21 = vpop.f32.mrf.mxu1  ;;  %v14540_v59 = vld [vmem:[#allocation104_spill] sm:$0xff] }
 0x308   : > { %v5737_v24 = vmul.f32 %v10003_v44, %v5203_v60  ;;  %v3925_v47 = vadd.f32 %v14536_v40, %v9815_v61  ;;  %v4598_v5 = vadd.f32 %v14537_v14, %v9889_v23  ;;  %v5739_v1 = vmul.f32 %v9966_v33, %v5205_v57  ;;  %v14542_v14 = vld [vmem:[#allocation108_spill] sm:$0xff] }
 0x309   : > { %4168 = vmatprep.mubr.bf16.mxu0 %v3291_v0  ;;  %4841 = vmatprep.mubr.bf16.mxu1 %v3291_v0  ;;  %v4600_v38 = vadd.f32 %v11000_v50, %v9994_v9  ;;  %v6269_v34 = vadd.f32 %v6268_v7, %v5732_v53  ;;  %v6273_v25 = vadd.f32 %v5735_v28, %v5734_v2  ;;  %v14541_v40 = vmax.f32 %v14540_v59, 0.0  ;;  %v11340_v0 = vpop.f32.mrf.mxu0  ;;  %v14545_v50 = vld [vmem:[#allocation180_spill] sm:$0xff]  ;;  %v11344_v7 = vpop.f32.mrf.mxu1 }
 0x30a   : > { %v5738_v60 = vmul.f32 %v9842_v43, %v5204_v3  ;;  %v5740_v15 = vmul.f32 %v9920_v37, %v5206_v55  ;;  %6266 = vadd.xlane.f32.xlu0 %v6265_v17  ;;  %v14543_v30 = vmax.f32 %v14542_v14, 0.0  ;;  %14544 = vst [vmem:[#allocation69_spill] sm:$0xff] %v11340_v0  ;;  %v5207_v57 = vmax.f32 %v4596_v32, 0.0  ;;  %14546 = vst [vmem:[#allocation81_spill] sm:$0xff] %v11344_v7  ;;  %v14547_v3 = vld [vmem:[#allocation177_spill] sm:$0xff]  ;;  %v14548_v55 = vld [vmem:[#allocation99_spill] sm:$0xff] }
 0x30b   : > { %v5209_v29 = vmax.f32 %v3927_v10, 0.0  ;;  %v6270_v51 = vadd.f32 %v6269_v34, %v5733_v42  ;;  %v3931_v53 = vadd.f32 %v14545_v50, %v9815_v61  ;;  %v5208_v2 = vmax.f32 %v3925_v47, 0.0  ;;  %v11352_v32 = vpop.f32.mrf.mxu0  ;;  %v11356_v14 = vpop.f32.mrf.mxu1 }
 0x30c   : > { %v3290_v52 = vpack.c.bf16 %v14543_v30, %v14541_v40  ;;  %v4604_v28 = vadd.f32 %v14547_v3, %v9889_v23  ;;  %v2861_v17 = vadd.f32 %v14354_v19, %v14548_v55  ;;  %v14549_v30 = vld [vmem:[#allocation114_spill] sm:$0xff]  ;;  %14550 = vst [vmem:[#allocation35_spill] sm:$0xff] %v11352_v32  ;;  %v6278_v42 = vadd.f32 %v5739_v1, %v5738_v60  ;;  %v14551_v40 = vld [vmem:[#allocation185_spill] sm:$0xff] }
 0x30d   : > { %v2863_v59 = vadd.f32 %v14354_v19, %v14549_v30  ;;  %v5210_v10 = vmax.f32 %v4598_v5, 0.0  ;;  %v5211_v34 = vmax.f32 %v4600_v38, 0.0  ;;  %6271 = vadd.xlane.f32.xlu1 %v6270_v51  ;;  %v3933_v47 = vadd.f32 %v14551_v40, %v9959_v31  ;;  %v11360_v0 = vpop.f32.mrf.mxu0  ;;  %v11364_v51 = vpop.f32.mrf.mxu1 }
 0x30e   : > { %4169 = vmatmul.mubr.bf16.gmra.mxu0 %v3290_v52  ;;  %4842 = vmatmul.mubr.bf16.gmra.mxu1 %v3290_v52  ;;  %v3117_v50 = vmax.f32 %v2861_v17, 0.0  ;;  %v14552_v52 = vld [vmem:[#allocation62_spill] sm:$0xff]  ;;  %v6274_v55 = vadd.f32 %v6273_v25, %v5736_v4  ;;  %v5741_v30 = vmul.f32 %v10003_v44, %v5207_v57  ;;  %v5743_v1 = vmul.f32 %v9966_v33, %v5209_v29 }
 0x30f   : > { %v3119_v3 = vmax.f32 %v2863_v59, 0.0  ;;  %v4606_v7 = vadd.f32 %v14552_v52, %v9994_v9  ;;  %v5212_v5 = vmax.f32 %v3931_v53, 0.0  ;;  %v5213_v38 = vmax.f32 %v3933_v47, 0.0  ;;  %14553 = vst [vmem:[#allocation148_spill] sm:$0xff] %v11364_v51  ;;  %v11368_v59 = vpop.f32.mrf.mxu0  ;;  %v11375_v53 = vpop.f32.mrf.mxu1 }
 0x310   : > { %v5214_v60 = vmax.f32 %v4604_v28, 0.0  ;;  %v6275_v32 = vadd.f32 %v6274_v55, %v5737_v24  ;;  %v3937_v17 = vadd.f32 %v11049_v22, %v9959_v31  ;;  %14554 = vst [vmem:[#allocation145_spill] sm:$0xff] %v11368_v59  ;;  %v5742_v4 = vmul.f32 %v9842_v43, %v5208_v2  ;;  %14555 = vst [vmem:[#allocation74_spill] sm:$0xff] %v11375_v53  ;;  %v14556_v24 = vld [vmem:[#allocation183_spill] sm:$0xff]  ;;  %v14557_v22 = vld [vmem:[#allocation181_spill] sm:$0xff] }
 0x311   : > { %v3293_v40 = vpack.c.bf16 %v3119_v3, %v3117_v50  ;;  %v5744_v25 = vmul.f32 %v9920_v37, %v5210_v10  ;;  %v5745_v57 = vmul.f32 %v10003_v44, %v5211_v34  ;;  %v3935_v29 = vadd.f32 %v11035_v6, %v9815_v61  ;;  %v11381_v2 = vpop.f32.mrf.mxu0  ;;  %v11385_v55 = vpop.f32.mrf.mxu1  ;;  %v14561_v59 = vld [vmem:[#allocation98_spill] sm:$0xff] }
 0x312   : > { %v5215_v28 = vmax.f32 %v4606_v7, 0.0  ;;  %v4608_v47 = vadd.f32 %v14556_v24, %v9889_v23  ;;  %v4610_v50 = vadd.f32 %v14557_v22, %v9994_v9  ;;  %v6279_v3 = vadd.f32 %v6278_v42, %v5740_v15  ;;  %14558 = vst [vmem:[#allocation76_spill] sm:$0xff] %v11381_v2  ;;  %6276 = vadd.xlane.f32.xlu0 %v6275_v32  ;;  %v14560_v24 = vld [vmem:[#allocation186_spill] sm:$0xff]  ;;  %v14563_v15 = vld [vmem:[#allocation113_spill] sm:$0xff] }
 0x313   : > { %4178 = vmatprep.mubr.bf16.mxu0 %v3293_v40  ;;  %4851 = vmatprep.mubr.bf16.mxu1 %v3293_v40  ;;  %v6283_v10 = vadd.f32 %v5743_v1, %v5742_v4  ;;  %v5746_v34 = vmul.f32 %v9842_v43, %v5212_v5  ;;  %v5747_v52 = vmul.f32 %v9966_v33, %v5213_v38  ;;  %v5217_v6 = vmax.f32 %v3937_v17, 0.0  ;;  %v11394_v1 = vpop.f32.mrf.mxu0  ;;  %v14566_v38 = vld [vmem:[#allocation59_spill] sm:$0xff] }
 0x314   : > { %14559 = vst [vmem:[#allocation73_spill] sm:$0xff] %v11385_v55  ;;  %v5748_v7 = vmul.f32 %v9920_v37, %v5214_v60  ;;  %v6280_v40 = vadd.f32 %v6279_v3, %v5741_v30  ;;  %v3941_v53 = vadd.f32 %v14560_v24, %v9815_v61  ;;  %v14562_v22 = vmax.f32 %v14561_v59, 0.0  ;;  %14565 = vst [vmem:[#allocation85_spill] sm:$0xff] %v11394_v1  ;;  %v14567_v17 = vld [vmem:[#allocation103_spill] sm:$0xff]  ;;  %v14568_v55 = vld [vmem:[#allocation117_spill] sm:$0xff]  ;;  %v11402_v60 = vpop.f32.mrf.mxu1 }
 0x315   : > { %v14564_v42 = vmax.f32 %v14563_v15, 0.0  ;;  %v5216_v5 = vmax.f32 %v3935_v29, 0.0  ;;  %v4614_v32 = vadd.f32 %v14566_v38, %v9889_v23  ;;  %v2865_v4 = vadd.f32 %v14354_v19, %v14567_v17  ;;  %14569 = vst [vmem:[#allocation52_spill] sm:$0xff] %v11402_v60 }
 0x316   : > { %v2867_v30 = vadd.f32 %v14354_v19, %v14568_v55  ;;  %v5749_v3 = vmul.f32 %v10003_v44, %v5215_v28  ;;  %v5218_v59 = vmax.f32 %v4608_v47, 0.0  ;;  %v5219_v24 = vmax.f32 %v4610_v50, 0.0  ;;  %6281 = vadd.xlane.f32.xlu1 %v6280_v40  ;;  %v11410_v55 = vpop.f32.mrf.mxu1  ;;  %v14571_v47 = vld [vmem:[#allocation51_spill] sm:$0xff] }
 0x317   : > { %v3292_v2 = vpack.c.bf16 %v14564_v42, %v14562_v22  ;;  %v3943_v29 = vadd.f32 %v11081_v11, %v9959_v31  ;;  %v11407_v22 = vpop.f32.mrf.mxu0  ;;  %v6288_v15 = vadd.f32 %v5747_v52, %v5746_v34  ;;  %v5751_v42 = vmul.f32 %v9966_v33, %v5217_v6  ;;  %v14572_v34 = vld [vmem:[#allocation191_spill] sm:$0xff] }
 0x318   : > { %14570 = vst [vmem:[#allocation34_spill] sm:$0xff] %v11407_v22  ;;  %v3121_v38 = vmax.f32 %v2865_v4, 0.0  ;;  %v3123_v17 = vmax.f32 %v2867_v30, 0.0  ;;  %v5220_v60 = vmax.f32 %v3941_v53, 0.0  ;;  %v6284_v28 = vadd.f32 %v6283_v10, %v5744_v25  ;;  %v14573_v25 = vld [vmem:[#allocation184_spill] sm:$0xff] }
 0x319   : > { %4179 = vmatmul.mubr.bf16.gmra.mxu0 %v3292_v2  ;;  %4852 = vmatmul.mubr.bf16.gmra.mxu1 %v3292_v2  ;;  %v5221_v1 = vmax.f32 %v3943_v29, 0.0  ;;  %v3945_v50 = vadd.f32 %v14571_v47, %v9815_v61  ;;  %v11414_v40 = vpop.f32.mrf.mxu0  ;;  %v5750_v11 = vmul.f32 %v9842_v43, %v5216_v5  ;;  %v5222_v51 = vmax.f32 %v4614_v32, 0.0  ;;  %v11419_v2 = vpop.f32.mrf.mxu1  ;;  %v14574_v29 = vld [vmem:[#allocation47_spill] sm:$0xff] }
 0x31a   : > { %v3295_v22 = vpack.c.bf16 %v3123_v17, %v3121_v38  ;;  %v3947_v52 = vadd.f32 %v14572_v34, %v9959_v31  ;;  %v5752_v6 = vmul.f32 %v9920_v37, %v5218_v59  ;;  %v5753_v53 = vmul.f32 %v10003_v44, %v5219_v24 }
 0x31b   : > { %v4616_v10 = vadd.f32 %v14573_v25, %v9994_v9  ;;  %v6285_v4 = vadd.f32 %v6284_v28, %v5745_v57  ;;  %v11425_v30 = vpop.f32.mrf.mxu0  ;;  %v5755_v5 = vmul.f32 %v9966_v33, %v5221_v1  ;;  %v5224_v32 = vmax.f32 %v3945_v50, 0.0  ;;  %v11430_v47 = vpop.f32.mrf.mxu1  ;;  %v14576_v57 = vld [vmem:[#allocation49_spill] sm:$0xff] }
 0x31c   : > { %4188 = vmatprep.mubr.bf16.mxu0 %v3295_v22  ;;  %4861 = vmatprep.mubr.bf16.mxu1 %v3295_v22  ;;  %v4618_v38 = vadd.f32 %v14574_v29, %v9889_v23  ;;  %v6289_v17 = vadd.f32 %v6288_v15, %v5748_v7  ;;  %14575 = vst [vmem:[#allocation150_spill] sm:$0xff] %v11430_v47  ;;  %v5225_v34 = vmax.f32 %v3947_v52, 0.0  ;;  %v14578_v29 = vld [vmem:[#allocation102_spill] sm:$0xff] }
 0x31d   : > { %v6293_v59 = vadd.f32 %v5751_v42, %v5750_v11  ;;  %v5754_v24 = vmul.f32 %v9842_v43, %v5220_v60  ;;  %6286 = vadd.xlane.f32.xlu0 %v6285_v4  ;;  %v4620_v28 = vadd.f32 %v14576_v57, %v9994_v9  ;;  %v11435_v25 = vpop.f32.mrf.mxu0  ;;  %v5756_v22 = vmul.f32 %v9920_v37, %v5222_v51  ;;  %v14580_v15 = vld [vmem:[#allocation118_spill] sm:$0xff]  ;;  %v11444_v11 = vpop.f32.mrf.mxu1  ;;  %v14582_v4 = vld [vmem:[#allocation107_spill] sm:$0xff] }
 0x31e   : > { %14577 = vst [vmem:[#allocation147_spill] sm:$0xff] %v11435_v25  ;;  %v6290_v1 = vadd.f32 %v6289_v17, %v5749_v3  ;;  %v3951_v50 = vadd.f32 %v11116_v12, %v9815_v61  ;;  %v14579_v7 = vmax.f32 %v14578_v29, 0.0  ;;  %v14581_v47 = vmax.f32 %v14580_v15, 0.0  ;;  %v14583_v25 = vld [vmem:[#allocation120_spill] sm:$0xff] }
 0x31f   : > { %v5223_v60 = vmax.f32 %v4616_v10, 0.0  ;;  %v4624_v52 = vadd.f32 %v11121_v13, %v9889_v23  ;;  %v2869_v57 = vadd.f32 %v14354_v19, %v14582_v4  ;;  %v2871_v51 = vadd.f32 %v14354_v19, %v14583_v25  ;;  %v11452_v3 = vpop.f32.mrf.mxu0 }
 0x320   : > { %v3294_v42 = vpack.c.bf16 %v14581_v47, %v14579_v7  ;;  %14584 = vst [vmem:[#allocation75_spill] sm:$0xff] %v11452_v3  ;;  %v6298_v12 = vadd.f32 %v5755_v5, %v5754_v24  ;;  %v5758_v17 = vmul.f32 %v9842_v43, %v5224_v32  ;;  %v5226_v29 = vmax.f32 %v4618_v38, 0.0  ;;  %6291 = vadd.xlane.f32.xlu1 %v6290_v1  ;;  %v11457_v47 = vpop.f32.mrf.mxu1 }
 0x321   : > { %v3953_v10 = vadd.f32 %v11130_v45, %v9959_v31  ;;  %14585 = vst [vmem:[#allocation84_spill] sm:$0xff] %v11457_v47  ;;  %v5759_v13 = vmul.f32 %v9966_v33, %v5225_v34  ;;  %v5227_v7 = vmax.f32 %v4620_v28, 0.0  ;;  %v3125_v15 = vmax.f32 %v2869_v57, 0.0  ;;  %v11460_v25 = vpop.f32.mrf.mxu0 }
 0x322   : > { %4189 = vmatmul.mubr.bf16.gmra.mxu0 %v3294_v42  ;;  %4862 = vmatmul.mubr.bf16.gmra.mxu1 %v3294_v42  ;;  %v3127_v4 = vmax.f32 %v2871_v51, 0.0  ;;  %v5228_v3 = vmax.f32 %v3951_v50, 0.0  ;;  %v5230_v5 = vmax.f32 %v4624_v52, 0.0  ;;  %v6294_v32 = vadd.f32 %v6293_v59, %v5752_v6  ;;  %v11462_v38 = vpop.f32.mrf.mxu1 }
 0x323   : > { %v5229_v24 = vmax.f32 %v3953_v10, 0.0  ;;  %v4626_v45 = vadd.f32 %v11137_v46, %v9994_v9  ;;  %v3955_v47 = vadd.f32 %v11143_v18, %v9815_v61  ;;  %v3957_v34 = vadd.f32 %v11154_v39, %v9959_v31  ;;  %v11470_v28 = vpop.f32.mrf.mxu0 }
 0x324   : > { %v3297_v1 = vpack.c.bf16 %v3127_v4, %v3125_v15  ;;  %v5757_v42 = vmul.f32 %v10003_v44, %v5223_v60  ;;  %v5760_v50 = vmul.f32 %v9920_v37, %v5226_v29  ;;  %v6295_v52 = vadd.f32 %v6294_v32, %v5753_v53  ;;  %v11476_v59 = vpop.f32.mrf.mxu1 }
 0x325   : > { %v4628_v6 = vadd.f32 %v11151_v35, %v9889_v23  ;;  %v6303_v57 = vadd.f32 %v5759_v13, %v5758_v17  ;;  %v5763_v46 = vmul.f32 %v9966_v33, %v5229_v24  ;;  %v5233_v18 = vmax.f32 %v3957_v34, 0.0  ;;  %v11479_v39 = vpop.f32.mrf.mxu0  ;;  %v14591_v34 = vld [vmem:[#allocation112_spill] sm:$0xff] }
 0x326   : > { %4198 = vmatprep.mubr.bf16.mxu0 %v3297_v1  ;;  %4871 = vmatprep.mubr.bf16.mxu1 %v3297_v1  ;;  %v6299_v51 = vadd.f32 %v6298_v12, %v5756_v22  ;;  %v5761_v10 = vmul.f32 %v10003_v44, %v5227_v7  ;;  %v5762_v60 = vmul.f32 %v9842_v43, %v5228_v3  ;;  %v11487_v17 = vpop.f32.mrf.mxu1  ;;  %v5231_v13 = vmax.f32 %v4626_v45, 0.0  ;;  %v14587_v7 = vld [vmem:[#allocation106_spill] sm:$0xff]  ;;  %v14589_v3 = vld [vmem:[#allocation4_spill] sm:$0xff] }
 0x327   : > { %6296 = vadd.xlane.f32.xlu0 %v6295_v52  ;;  %v4630_v53 = vadd.f32 %v11159_v54, %v9994_v9  ;;  %v3961_v35 = vadd.f32 %v11167_v56, %v9815_v61  ;;  %v5764_v29 = vmul.f32 %v9920_v37, %v5230_v5  ;;  %v5232_v15 = vmax.f32 %v3955_v47, 0.0  ;;  %v11490_v12 = vpop.f32.mrf.mxu0  ;;  %v14593_v45 = vld [vmem:[#allocation6_spill] sm:$0xff] }
 0x328   : > { %v6300_v22 = vadd.f32 %v6299_v51, %v5757_v42  ;;  %14586 = vst [vmem:[#allocation77_spill] sm:$0xff] %v11490_v12  ;;  %v5234_v4 = vmax.f32 %v4628_v6, 0.0  ;;  %v14588_v24 = vmax.f32 %v14587_v7, 0.0  ;;  %v14590_v32 = vmax.f32 %v14589_v3, 0.0  ;;  %v11500_v52 = vpop.f32.mrf.mxu1  ;;  %v14594_v6 = vld [vmem:[#allocation189_spill] sm:$0xff] }
 0x329   : > { %v4634_v54 = vadd.f32 %v11173_v27, %v9889_v23  ;;  %v2873_v56 = vadd.f32 %v14354_v19, %v14591_v34  ;;  %14592 = vst [vmem:[#allocation153_spill] sm:$0xff] %v11500_v52  ;;  %v6308_v5 = vadd.f32 %v5763_v46, %v5762_v60  ;;  %v5767_v47 = vmul.f32 %v9966_v33, %v5233_v18  ;;  %v11507_v7 = vpop.f32.mrf.mxu0 }
 0x32a   : > { %v3296_v1 = vpack.c.bf16 %v14590_v32, %v14588_v24  ;;  %6301 = vadd.xlane.f32.xlu1 %v6300_v22  ;;  %v2875_v42 = vadd.f32 %v14354_v19, %v14593_v45  ;;  %v3963_v51 = vadd.f32 %v14594_v6, %v9959_v31  ;;  %v5235_v24 = vmax.f32 %v4630_v53, 0.0  ;;  %v14595_v32 = vld [vmem:[#allocation190_spill] sm:$0xff]  ;;  %v11511_v46 = vpop.f32.mrf.mxu1 }
 0x32b   : > { %v5236_v3 = vmax.f32 %v3961_v35, 0.0  ;;  %v3129_v27 = vmax.f32 %v2873_v56, 0.0  ;;  %v4636_v34 = vadd.f32 %v14595_v32, %v9994_v9  ;;  %14596 = vst [vmem:[#allocation89_spill] sm:$0xff] %v11511_v46  ;;  %v6304_v22 = vadd.f32 %v6303_v57, %v5760_v50  ;;  %v14597_v45 = vld [vmem:[#allocation50_spill] sm:$0xff]  ;;  %v11515_v12 = vpop.f32.mrf.mxu0 }
 0x32c   : > { %4199 = vmatmul.mubr.bf16.gmra.mxu0 %v3296_v1  ;;  %4872 = vmatmul.mubr.bf16.gmra.mxu1 %v3296_v1  ;;  %v3131_v18 = vmax.f32 %v2875_v42, 0.0  ;;  %v5237_v60 = vmax.f32 %v3963_v51, 0.0  ;;  %v3965_v52 = vadd.f32 %v14597_v45, %v9815_v61  ;;  %14598 = vst [vmem:[#allocation159_spill] sm:$0xff] %v11515_v12  ;;  %v5766_v6 = vmul.f32 %v9842_v43, %v5232_v15  ;;  %v11520_v56 = vpop.f32.mrf.mxu1 }
 0x32d   : > { %v5238_v53 = vmax.f32 %v4634_v54, 0.0  ;;  %v5239_v35 = vmax.f32 %v4636_v34, 0.0  ;;  %v3967_v1 = vadd.f32 %v11205_v49, %v9959_v31  ;;  %14599 = vst [vmem:[#allocation78_spill] sm:$0xff] %v11520_v56  ;;  %v5765_v32 = vmul.f32 %v10003_v44, %v5231_v13  ;;  %v11524_v57 = vpop.f32.mrf.mxu0  ;;  %v11528_v34 = vld [vmem:[#allocation2] ss:$0 sm:$0xff]  ;;  %v6142_v49 = vpop.xlane.xlu0 %6141 }
 0x32e   : > { %v5768_v42 = vmul.f32 %v9920_v37, %v5234_v4  ;;  %v3299_v51 = vpack.c.bf16 %v3131_v18, %v3129_v27  ;;  %v6305_v50 = vadd.f32 %v6304_v22, %v5761_v10  ;;  %14600 = vst [vmem:[#allocation88_spill] sm:$0xff] %v11524_v57  ;;  %v6313_v45 = vadd.f32 %v5767_v47, %v5766_v6  ;;  %v11530_v46 = vpop.f32.mrf.mxu1  ;;  %v14606_v22 = vld [vmem:[#allocation33_spill] sm:$0xff] }
 0x32f   : > { %v5769_v12 = vmul.f32 %v10003_v44, %v5235_v24  ;;  %v5771_v15 = vmul.f32 %v9966_v33, %v5237_v60  ;;  %v5240_v54 = vmax.f32 %v3965_v52, 0.0  ;;  %14601 = vst [vmem:[#allocation156_spill] sm:$0xff] %v11530_v46  ;;  %v5770_v13 = vmul.f32 %v9842_v43, %v5236_v3  ;;  %v11535_v47 = vpop.f32.mrf.mxu0  ;;  %v14604_v3 = vld [vmem:[#allocation111_spill] sm:$0xff] }
 0x330   : > { %4208 = vmatprep.mubr.bf16.mxu0 %v3299_v51  ;;  %4881 = vmatprep.mubr.bf16.mxu1 %v3299_v51  ;;  %v4638_v10 = vadd.f32 %v11203_v48, %v9889_v23  ;;  %v6309_v4 = vadd.f32 %v6308_v5, %v5764_v29  ;;  %14602 = vst [vmem:[#allocation154_spill] sm:$0xff] %v11535_v47  ;;  %v5241_v27 = vmax.f32 %v3967_v1, 0.0  ;;  %v11547_v48 = vpop.f32.mrf.mxu1  ;;  %v14605_v60 = vmax.f32 %v14604_v3, 0.0  ;;  %v14609_v47 = vld [vmem:[#allocation192_spill] sm:$0xff] }
 0x331   : > { %v5772_v24 = vmul.f32 %v9920_v37, %v5238_v53  ;;  %v5773_v52 = vmul.f32 %v10003_v44, %v5239_v35  ;;  %6306 = vadd.xlane.f32.xlu0 %v6305_v50  ;;  %v4640_v18 = vadd.f32 %v11209_v16, %v9994_v9  ;;  %14603 = vst [vmem:[#allocation79_spill] sm:$0xff] %v11547_v48  ;;  %v14607_v6 = vmax.f32 %v14606_v22, 0.0  ;;  %v6147_v16 = vpop.xlane.xlu1 %6146  ;;  %v11556_v1 = vpop.f32.mrf.mxu0 }
 0x332   : > { %v6310_v29 = vadd.f32 %v6309_v4, %v5765_v32  ;;  %v3971_v5 = vadd.f32 %v11214_v62, %v9815_v61  ;;  %v6785_v35 = vadd.f32 %v11528_v34, %v6142_v49  ;;  %14608 = vst [vmem:[#allocation92_spill] sm:$0xff] %v11556_v1  ;;  %v6318_v51 = vadd.f32 %v5771_v15, %v5770_v13  ;;  %v14610_v32 = vld [vmem:[#allocation116_spill] sm:$0xff]  ;;  %v11563_v62 = vpop.f32.mrf.mxu1  ;;  %v14613_v15 = vld [vmem:[#allocation131_spill] sm:$0xff] }
 0x333   : > { %v3298_v53 = vpack.c.bf16 %v14607_v6, %v14605_v60  ;;  %v5774_v50 = vmul.f32 %v9842_v43, %v5240_v54  ;;  %v4644_v48 = vadd.f32 %v14609_v47, %v9889_v23  ;;  %v2877_v4 = vadd.f32 %v14354_v19, %v14610_v32  ;;  %14611 = vst [vmem:[#allocation54_spill] sm:$0xff] %v11563_v62  ;;  %v14612_v49 = vld [vmem:[#allocation8_spill] sm:$0xff]  ;;  %v14614_v54 = vld [vmem:[#allocation65_spill] sm:$0xff] }
 0x334   : > { %v5242_v3 = vmax.f32 %v4638_v10, 0.0  ;;  %6311 = vadd.xlane.f32.xlu1 %v6310_v29  ;;  %6914 = vst.msk [vmem:[%s11545_s27] sm:$0xff] %vm6913_vm0, %v6785_v35  ;;  %v2879_v60 = vadd.f32 %v14354_v19, %v14612_v49  ;;  %v3973_v13 = vadd.f32 %v14613_v15, %v9959_v31  ;;  %v4646_v47 = vadd.f32 %v14614_v54, %v9994_v9  ;;  %v11575_v29 = vpop.f32.mrf.mxu0  ;;  %v11577_v46 = vpop.f32.mrf.mxu1 }
 0x335   : > { %4209 = vmatmul.mubr.bf16.gmra.mxu0 %v3298_v53  ;;  %v5775_v22 = vmul.f32 %v9966_v33, %v5241_v27  ;;  %v5243_v6 = vmax.f32 %v4640_v18, 0.0  ;;  %4882 = vmatmul.mubr.bf16.gmra.mxu1 %v3298_v53  ;;  %v6314_v32 = vadd.f32 %v6313_v45, %v5768_v42  ;;  %v6786_v10 = vadd.f32 %v11528_v34, %v6147_v16  ;;  %v14615_v27 = vld [vmem:[#allocation63_spill] sm:$0xff]  ;;  %v14616_v53 = vld [vmem:[#allocation110_spill] sm:$0xff] }
 0x336   : > { %v5244_v35 = vmax.f32 %v3971_v5, 0.0  ;;  %v3133_v62 = vmax.f32 %v2877_v4, 0.0  ;;  %v3135_v1 = vmax.f32 %v2879_v60, 0.0  ;;  %v5245_v49 = vmax.f32 %v3973_v13, 0.0  ;;  %v14617_v5 = vld [vmem:[#allocation67_spill] sm:$0xff]  ;;  %v6152_v60 = vpop.xlane.xlu0 %6151 }
 0x337   : > { %v5246_v15 = vmax.f32 %v4644_v48, 0.0  ;;  %v5247_v57 = vmax.f32 %v4646_v47, 0.0  ;;  %v6315_v56 = vadd.f32 %v6314_v32, %v5769_v12  ;;  %6915 = vst.msk [vmem:[%s11545_s27 + $0x8] sm:$0xff] %vm6913_vm0, %v6786_v10  ;;  %v3977_v18 = vadd.f32 %v14615_v27, %v9959_v31  ;;  %v14618_v12 = vld [vmem:[#allocation68_spill] sm:$0xff]  ;;  %v11591_v32 = vpop.f32.mrf.mxu0  ;;  %v14619_v10 = vld [vmem:[#allocation115_spill] sm:$0xff] }
 0x338   : > { %v5776_v42 = vmul.f32 %v9920_v37, %v5242_v3  ;;  %v3301_v45 = vpack.c.bf16 %v3135_v1, %v3133_v62  ;;  %v3975_v16 = vadd.f32 %v14616_v53, %v9815_v61  ;;  %v4648_v4 = vadd.f32 %v14617_v5, %v9889_v23 }
 0x339   : > { %v6323_v13 = vadd.f32 %v5775_v22, %v5774_v50  ;;  %v5779_v48 = vmul.f32 %v9966_v33, %v5245_v49  ;;  %6316 = vadd.xlane.f32.xlu0 %v6315_v56  ;;  %v4650_v54 = vadd.f32 %v14618_v12, %v9994_v9  ;;  %v6319_v47 = vadd.f32 %v6318_v51, %v5772_v24  ;;  %v14621_v50 = vld [vmem:[#allocation119_spill] sm:$0xff]  ;;  %v11600_v56 = vpop.f32.mrf.mxu1 }
 0x33a   : > { %v5777_v3 = vmul.f32 %v10003_v44, %v5243_v6  ;;  %4218 = vmatprep.mubr.bf16.mxu0 %v3301_v45  ;;  %4891 = vmatprep.mubr.bf16.mxu1 %v3301_v45  ;;  %v5249_v1 = vmax.f32 %v3977_v18, 0.0  ;;  %v3981_v62 = vadd.f32 %v11261_v36, %v9815_v61  ;;  %v14620_v27 = vmax.f32 %v14619_v10, 0.0 }
 0x33b   : > { %v14622_v22 = vmax.f32 %v14621_v50, 0.0  ;;  %v5778_v53 = vmul.f32 %v9842_v43, %v5244_v35  ;;  %v5780_v24 = vmul.f32 %v9920_v37, %v5246_v15  ;;  %v5781_v51 = vmul.f32 %v10003_v44, %v5247_v57  ;;  %v14624_v15 = vld [vmem:[#allocation121_spill] sm:$0xff]  ;;  %v11612_v50 = vpop.f32.mrf.mxu0 }
 0x33c   : > { %v6320_v6 = vadd.f32 %v6319_v47, %v5773_v52  ;;  %v5248_v45 = vmax.f32 %v3975_v16, 0.0  ;;  %v5250_v18 = vmax.f32 %v4648_v4, 0.0  ;;  %v4654_v36 = vadd.f32 %v11265_v58, %v9889_v23  ;;  %14625 = vst [vmem:[#allocation151_spill] sm:$0xff] %v11612_v50  ;;  %v14626_v4 = vld [vmem:[#allocation141_spill] sm:$0xff]  ;;  %v6162_v50 = vpop.xlane.xlu1 %6161 }
 0x33d   : > { %v3300_v49 = vpack.c.bf16 %v14622_v22, %v14620_v27  ;;  %v6787_v5 = vadd.f32 %v11528_v34, %v6152_v60  ;;  %v6328_v12 = vadd.f32 %v5779_v48, %v5778_v53  ;;  %v5251_v10 = vmax.f32 %v4650_v54, 0.0  ;;  %v14623_v27 = vld [vmem:[#allocation3_spill] sm:$0xff]  ;;  %v6157_v48 = vpop.xlane.xlu0 %6156  ;;  %v11621_v54 = vpop.f32.mrf.mxu1 }
 0x33e   : > { %6321 = vadd.xlane.f32.xlu1 %v6320_v6  ;;  %v2881_v35 = vadd.f32 %v14354_v19, %v14623_v27  ;;  %v2883_v57 = vadd.f32 %v14354_v19, %v14624_v15  ;;  %v5783_v52 = vmul.f32 %v9966_v33, %v5249_v1  ;;  %v5252_v16 = vmax.f32 %v3981_v62, 0.0  ;;  %14627 = vst [vmem:[#allocation160_spill] sm:$0xff] %v11621_v54  ;;  %v11628_v54 = vpop.f32.mrf.mxu0 }
 0x33f   : > { %4219 = vmatmul.mubr.bf16.gmra.mxu0 %v3300_v49  ;;  %4892 = vmatmul.mubr.bf16.gmra.mxu1 %v3300_v49  ;;  %6916 = vst.msk [vmem:[%s11545_s27 + $0x10] sm:$0xff] %vm6913_vm0, %v6787_v5  ;;  %v3983_v58 = vadd.f32 %v11270_v41, %v9959_v31  ;;  %v4656_v60 = vadd.f32 %v14626_v4, %v9994_v9  ;;  %v5254_v6 = vmax.f32 %v4654_v36, 0.0  ;;  %v11635_v36 = vpop.f32.mrf.mxu1 }
 0x340   : > { %v3137_v47 = vmax.f32 %v2881_v35, 0.0  ;;  %v3139_v22 = vmax.f32 %v2883_v57, 0.0  ;;  %v6324_v49 = vadd.f32 %v6323_v13, %v5776_v42  ;;  %v3985_v53 = vadd.f32 %v11280_v26, %v9815_v61  ;;  %v14628_v26 = vld [vmem:[#allocation66_spill] sm:$0xff] }
 0x341   : > { %v5782_v1 = vmul.f32 %v9842_v43, %v5248_v45  ;;  %v5784_v62 = vmul.f32 %v9920_v37, %v5250_v18  ;;  %v5253_v5 = vmax.f32 %v3983_v58, 0.0  ;;  %v5255_v27 = vmax.f32 %v4656_v60, 0.0  ;;  %v14629_v45 = vld [vmem:[#allocation72_spill] sm:$0xff] }
 0x342   : > { %v3303_v41 = vpack.c.bf16 %v3139_v22, %v3137_v47  ;;  %v6325_v15 = vadd.f32 %v6324_v49, %v5777_v3  ;;  %v6788_v4 = vadd.f32 %v11528_v34, %v6157_v48  ;;  %v5785_v42 = vmul.f32 %v10003_v44, %v5251_v10 }
 0x343   : > { %v6333_v35 = vadd.f32 %v5783_v52, %v5782_v1  ;;  %v4658_v13 = vadd.f32 %v14628_v26, %v9889_v23  ;;  %v3987_v18 = vadd.f32 %v14629_v45, %v9959_v31  ;;  %v5786_v57 = vmul.f32 %v9842_v43, %v5252_v16  ;;  %v14630_v52 = vld [vmem:[#allocation36_spill] sm:$0xff]  ;;  %v14631_v1 = vld [vmem:[#allocation122_spill] sm:$0xff] }
 0x344   : > { %4228 = vmatprep.mubr.bf16.mxu0 %v3303_v41  ;;  %4901 = vmatprep.mubr.bf16.mxu1 %v3303_v41  ;;  %v5256_v3 = vmax.f32 %v3985_v53, 0.0  ;;  %6917 = vst.msk [vmem:[%s11545_s27 + $0x18] sm:$0xff] %vm6913_vm0, %v6788_v4  ;;  %v4660_v58 = vadd.f32 %v14630_v52, %v9994_v9  ;;  %v6329_v10 = vadd.f32 %v6328_v12, %v5780_v24  ;;  %v14632_v41 = vmax.f32 %v14631_v1, 0.0  ;;  %v14633_v4 = vld [vmem:[#allocation10_spill] sm:$0xff]  ;;  %v11652_v24 = vpop.f32.mrf.mxu0  ;;  %v14639_v52 = vld [vmem:[#allocation71_spill] sm:$0xff] }
 0x345   : > { %v5788_v60 = vmul.f32 %v9920_v37, %v5254_v6  ;;  %v5787_v48 = vmul.f32 %v9966_v33, %v5253_v5  ;;  %6326 = vadd.xlane.f32.xlu0 %v6325_v15  ;;  %v5257_v47 = vmax.f32 %v3987_v18, 0.0  ;;  %v6789_v22 = vadd.f32 %v11528_v34, %v6162_v50  ;;  %14635 = vst [vmem:[#allocation163_spill] sm:$0xff] %v11652_v24  ;;  %v14636_v50 = vld [vmem:[#allocation5_spill] sm:$0xff] }
 0x346   : > { %v5789_v16 = vmul.f32 %v10003_v44, %v5255_v27  ;;  %v6330_v49 = vadd.f32 %v6329_v10, %v5781_v51  ;;  %v3991_v53 = vadd.f32 %v11306_v20, %v9815_v61  ;;  %v14634_v26 = vmax.f32 %v14633_v4, 0.0  ;;  %v14637_v51 = vld [vmem:[#allocation9_spill] sm:$0xff]  ;;  %v11662_v20 = vpop.f32.mrf.mxu1  ;;  %v6167_v4 = vpop.xlane.xlu0 %6166 }
 0x347   : > { %v5258_v12 = vmax.f32 %v4658_v13, 0.0  ;;  %6918 = vst.msk [vmem:[%s11545_s27 + $0x20] sm:$0xff] %vm6913_vm0, %v6789_v22  ;;  %v4664_v6 = vadd.f32 %v11308_v8, %v9889_v23  ;;  %v2885_v5 = vadd.f32 %v14354_v19, %v14636_v50  ;;  %v2887_v27 = vadd.f32 %v14354_v19, %v14637_v51  ;;  %14638 = vst [vmem:[#allocation80_spill] sm:$0xff] %v11662_v20 }
 0x348   : > { %v3302_v45 = vpack.c.bf16 %v14634_v26, %v14632_v41  ;;  %v5790_v15 = vmul.f32 %v9842_v43, %v5256_v3  ;;  %v5259_v18 = vmax.f32 %v4660_v58, 0.0  ;;  %6331 = vadd.xlane.f32.xlu1 %v6330_v49  ;;  %v3993_v13 = vadd.f32 %v11312_v63, %v9959_v31  ;;  %v11670_v58 = vpop.f32.mrf.mxu0  ;;  %v14640_v63 = vld [vmem:[#allocation70_spill] sm:$0xff] }
 0x349   : > { %v4666_v10 = vadd.f32 %v14639_v52, %v9994_v9  ;;  %v6338_v8 = vadd.f32 %v5787_v48, %v5786_v57  ;;  %v5791_v22 = vmul.f32 %v9966_v33, %v5257_v47  ;;  %v3141_v1 = vmax.f32 %v2885_v5, 0.0  ;;  %v6172_v48 = vpop.xlane.xlu1 %6171  ;;  %v11676_v47 = vpop.f32.mrf.mxu1 }
 0x34a   : > { %4229 = vmatmul.mubr.bf16.gmra.mxu0 %v3302_v45  ;;  %4902 = vmatmul.mubr.bf16.gmra.mxu1 %v3302_v45  ;;  %v3143_v41 = vmax.f32 %v2887_v27, 0.0  ;;  %v5260_v26 = vmax.f32 %v3991_v53, 0.0  ;;  %v5262_v50 = vmax.f32 %v4664_v6, 0.0  ;;  %v5261_v51 = vmax.f32 %v3993_v13, 0.0  ;;  %v14641_v13 = vld [vmem:[#allocation69_spill] sm:$0xff] }
 0x34b   : > { %v6334_v3 = vadd.f32 %v6333_v35, %v5784_v62  ;;  %v5263_v20 = vmax.f32 %v4666_v10, 0.0  ;;  %v3995_v24 = vadd.f32 %v14640_v63, %v9815_v61  ;;  %v4668_v57 = vadd.f32 %v11332_v21, %v9889_v23  ;;  %v14647_v63 = vld [vmem:[#allocation7_spill] sm:$0xff] }
 0x34c   : > { %v3305_v49 = vpack.c.bf16 %v3143_v41, %v3141_v1  ;;  %v5792_v45 = vmul.f32 %v9920_v37, %v5258_v12  ;;  %v5793_v53 = vmul.f32 %v10003_v44, %v5259_v18  ;;  %v6790_v62 = vadd.f32 %v11528_v34, %v6167_v4  ;;  %v14642_v12 = vld [vmem:[#allocation81_spill] sm:$0xff]  ;;  %v14643_v41 = vld [vmem:[#allocation35_spill] sm:$0xff] }
 0x34d   : > { %v6335_v6 = vadd.f32 %v6334_v3, %v5785_v42  ;;  %v6343_v35 = vadd.f32 %v5791_v22, %v5790_v15  ;;  %v5795_v5 = vmul.f32 %v9966_v33, %v5261_v51  ;;  %v5264_v27 = vmax.f32 %v3995_v24, 0.0  ;;  %v11689_v15 = vpop.f32.mrf.mxu0  ;;  %v11696_v51 = vpop.f32.mrf.mxu1 }
 0x34e   : > { %4238 = vmatprep.mubr.bf16.mxu0 %v3305_v49  ;;  %4911 = vmatprep.mubr.bf16.mxu1 %v3305_v49  ;;  %v3997_v21 = vadd.f32 %v14641_v13, %v9959_v31  ;;  %v5266_v52 = vmax.f32 %v4668_v57, 0.0  ;;  %6919 = vst.msk [vmem:[%s11545_s27 + $0x28] sm:$0xff] %vm6913_vm0, %v6790_v62  ;;  %v4670_v18 = vadd.f32 %v14642_v12, %v9994_v9  ;;  %14644 = vst [vmem:[#allocation93_spill] sm:$0xff] %v11696_v51  ;;  %v14650_v13 = vld [vmem:[#allocation125_spill] sm:$0xff] }
 0x34f   : > { %6336 = vadd.xlane.f32.xlu0 %v6335_v6  ;;  %v6339_v42 = vadd.f32 %v6338_v8, %v5788_v60  ;;  %v6791_v10 = vadd.f32 %v11528_v34, %v6172_v48  ;;  %v5794_v22 = vmul.f32 %v9842_v43, %v5260_v26  ;;  %v5796_v24 = vmul.f32 %v9920_v37, %v5262_v50  ;;  %v14645_v60 = vld [vmem:[#allocation124_spill] sm:$0xff]  ;;  %v14649_v6 = vld [vmem:[#allocation126_spill] sm:$0xff] }
 0x350   : > { %v5797_v1 = vmul.f32 %v10003_v44, %v5263_v20  ;;  %v4001_v4 = vadd.f32 %v14643_v41, %v9815_v61  ;;  %v5265_v3 = vmax.f32 %v3997_v21, 0.0  ;;  %v14646_v8 = vmax.f32 %v14645_v60, 0.0 }
 0x351   : > { %v6340_v49 = vadd.f32 %v6339_v42, %v5789_v16  ;;  %6920 = vst.msk [vmem:[%s11545_s27 + $0x30] sm:$0xff] %vm6913_vm0, %v6791_v10  ;;  %v14648_v57 = vmax.f32 %v14647_v63, 0.0  ;;  %v4674_v26 = vadd.f32 %v11356_v14, %v9889_v23  ;;  %v6348_v50 = vadd.f32 %v5795_v5, %v5794_v22  ;;  %v14651_v14 = vld [vmem:[#allocation148_spill] sm:$0xff]  ;;  %v6177_v10 = vpop.xlane.xlu0 %6176  ;;  %v11720_v63 = vpop.f32.mrf.mxu1 }
 0x352   : > { %v5798_v20 = vmul.f32 %v9842_v43, %v5264_v27  ;;  %v2889_v62 = vadd.f32 %v14354_v19, %v14649_v6  ;;  %v2891_v21 = vadd.f32 %v14354_v19, %v14650_v13  ;;  %v11712_v16 = vmul.f32 %v9920_v37, %v5266_v52  ;;  %v11718_v27 = vpop.f32.mrf.mxu0  ;;  %v6182_v6 = vpop.xlane.xlu1 %6181 }
 0x353   : > { %v3304_v48 = vpack.c.bf16 %v14648_v57, %v14646_v8  ;;  %v5267_v12 = vmax.f32 %v4670_v18, 0.0  ;;  %6341 = vadd.xlane.f32.xlu1 %v6340_v49  ;;  %v4003_v42 = vadd.f32 %v11360_v0, %v9959_v31  ;;  %v4676_v5 = vadd.f32 %v14651_v14, %v9994_v9  ;;  %v14652_v0 = vld [vmem:[#allocation145_spill] sm:$0xff] }
 0x354   : > { %v5268_v22 = vmax.f32 %v4001_v4, 0.0  ;;  %v3145_v41 = vmax.f32 %v2889_v62, 0.0  ;;  %v3147_v60 = vmax.f32 %v2891_v21, 0.0  ;;  %v6344_v8 = vadd.f32 %v6343_v35, %v5792_v45  ;;  %v14653_v35 = vld [vmem:[#allocation74_spill] sm:$0xff]  ;;  %v11732_v21 = vpop.f32.mrf.mxu0 }
 0x355   : > { %4239 = vmatmul.mubr.bf16.gmra.mxu0 %v3304_v48  ;;  %4912 = vmatmul.mubr.bf16.gmra.mxu1 %v3304_v48  ;;  %v5799_v52 = vmul.f32 %v9966_v33, %v5265_v3  ;;  %v5270_v18 = vmax.f32 %v4674_v26, 0.0  ;;  %v5269_v49 = vmax.f32 %v4003_v42, 0.0  ;;  %v4005_v57 = vadd.f32 %v14652_v0, %v9815_v61  ;;  %v14654_v3 = vld [vmem:[#allocation76_spill] sm:$0xff]  ;;  %v14657_v0 = vld [vmem:[#allocation85_spill] sm:$0xff] }
 0x356   : > { %v3307_v13 = vpack.c.bf16 %v3147_v60, %v3145_v41  ;;  %v5271_v14 = vmax.f32 %v4676_v5, 0.0  ;;  %v6345_v51 = vadd.f32 %v6344_v8, %v5793_v53  ;;  %v6792_v4 = vadd.f32 %v11528_v34, %v6177_v10  ;;  %v14655_v53 = vld [vmem:[#allocation73_spill] sm:$0xff]  ;;  %v11739_v41 = vpop.f32.mrf.mxu1 }
 0x357   : > { %v5801_v48 = vmul.f32 %v10003_v44, %v5267_v12  ;;  %v5803_v45 = vmul.f32 %v9966_v33, %v5269_v49  ;;  %v4678_v62 = vadd.f32 %v14653_v35, %v9889_v23  ;;  %v4007_v26 = vadd.f32 %v14654_v3, %v9959_v31  ;;  %14656 = vst [vmem:[#allocation83_spill] sm:$0xff] %v11739_v41  ;;  %v11756_v41 = vpop.f32.mrf.mxu0 }
 0x358   : > { %4248 = vmatprep.mubr.bf16.mxu0 %v3307_v13  ;;  %4921 = vmatprep.mubr.bf16.mxu1 %v3307_v13  ;;  %v5272_v42 = vmax.f32 %v4005_v57, 0.0  ;;  %6921 = vst.msk [vmem:[%s11545_s27 + $0x38] sm:$0xff] %vm6913_vm0, %v6792_v4  ;;  %v4680_v5 = vadd.f32 %v14655_v53, %v9994_v9  ;;  %v6349_v12 = vadd.f32 %v6348_v50, %v5796_v24  ;;  %v14658_v24 = vld [vmem:[#allocation12_spill] sm:$0xff] }
 0x359   : > { %v6793_v10 = vadd.f32 %v11528_v34, %v6182_v6  ;;  %v6353_v60 = vadd.f32 %v5799_v52, %v5798_v20  ;;  %v5802_v8 = vmul.f32 %v9842_v43, %v5268_v22  ;;  %6346 = vadd.xlane.f32.xlu0 %v6345_v51  ;;  %v5273_v49 = vmax.f32 %v4007_v26, 0.0  ;;  %v14660_v6 = vld [vmem:[#allocation128_spill] sm:$0xff]  ;;  %v14663_v26 = vld [vmem:[#allocation14_spill] sm:$0xff] }
 0x35a   : > { %v4011_v35 = vadd.f32 %v14657_v0, %v9815_v61  ;;  %v5804_v57 = vmul.f32 %v9920_v37, %v5270_v18  ;;  %v5805_v13 = vmul.f32 %v10003_v44, %v5271_v14  ;;  %v6350_v4 = vadd.f32 %v6349_v12, %v5797_v1  ;;  %v14662_v51 = vld [vmem:[#allocation52_spill] sm:$0xff]  ;;  %v14664_v14 = vld [vmem:[#allocation13_spill] sm:$0xff] }
 0x35b   : > { %6922 = vst.msk [vmem:[%s11545_s27 + $0x40] sm:$0xff] %vm6913_vm0, %v6793_v10  ;;  %v14659_v50 = vmax.f32 %v14658_v24, 0.0  ;;  %v14661_v3 = vmax.f32 %v14660_v6, 0.0  ;;  %v6358_v20 = vadd.f32 %v5803_v45, %v5802_v8  ;;  %v5274_v52 = vmax.f32 %v4678_v62, 0.0  ;;  %v14665_v10 = vld [vmem:[#allocation34_spill] sm:$0xff]  ;;  %v6187_v62 = vpop.xlane.xlu0 %6186  ;;  %v11763_v8 = vpop.f32.mrf.mxu1 }
 0x35c   : > { %v4684_v22 = vadd.f32 %v14662_v51, %v9889_v23  ;;  %v2893_v0 = vadd.f32 %v14354_v19, %v14663_v26  ;;  %v5806_v18 = vmul.f32 %v9842_v43, %v5272_v42  ;;  %v5275_v1 = vmax.f32 %v4680_v5, 0.0  ;;  %6351 = vadd.xlane.f32.xlu1 %v6350_v4 }
 0x35d   : > { %v3306_v53 = vpack.c.bf16 %v14661_v3, %v14659_v50  ;;  %v2895_v12 = vadd.f32 %v14354_v19, %v14664_v14  ;;  %v4013_v45 = vadd.f32 %v14665_v10, %v9959_v31  ;;  %v5807_v24 = vmul.f32 %v9966_v33, %v5273_v49  ;;  %v11779_v10 = vpop.f32.mrf.mxu1 }
 0x35e   : > { %v5276_v50 = vmax.f32 %v4011_v35, 0.0  ;;  %v5278_v6 = vmax.f32 %v4684_v22, 0.0  ;;  %v3149_v3 = vmax.f32 %v2893_v0, 0.0  ;;  %v4686_v5 = vadd.f32 %v11410_v55, %v9994_v9  ;;  %14666 = vst [vmem:[#allocation87_spill] sm:$0xff] %v11779_v10  ;;  %v14671_v10 = vld [vmem:[#allocation130_spill] sm:$0xff] }
 0x35f   : > { %4249 = vmatmul.mubr.bf16.gmra.mxu0 %v3306_v53  ;;  %4922 = vmatmul.mubr.bf16.gmra.mxu1 %v3306_v53  ;;  %v3151_v51 = vmax.f32 %v2895_v12, 0.0  ;;  %v5277_v42 = vmax.f32 %v4013_v45, 0.0  ;;  %v6354_v4 = vadd.f32 %v6353_v60, %v11712_v16  ;;  %v5808_v26 = vmul.f32 %v9920_v37, %v5274_v52  ;;  %v11775_v53 = vpop.f32.mrf.mxu0  ;;  %v6192_v45 = vpop.xlane.xlu1 %6191 }
 0x360   : > { %v4015_v14 = vadd.f32 %v11414_v40, %v9815_v61  ;;  %v4688_v49 = vadd.f32 %v11419_v2, %v9889_v23  ;;  %v6794_v35 = vadd.f32 %v11528_v34, %v6187_v62  ;;  %v5809_v22 = vmul.f32 %v10003_v44, %v5275_v1  ;;  %v14667_v2 = vld [vmem:[#allocation150_spill] sm:$0xff] }
 0x361   : > { %v3309_v0 = vpack.c.bf16 %v3151_v51, %v3149_v3  ;;  %v5811_v12 = vmul.f32 %v9966_v33, %v5277_v42  ;;  %v6355_v55 = vadd.f32 %v6354_v4, %v5801_v48  ;;  %v5810_v16 = vmul.f32 %v9842_v43, %v5276_v50  ;;  %v11789_v4 = vpop.f32.mrf.mxu0 }
 0x362   : > { %v5279_v60 = vmax.f32 %v4686_v5, 0.0  ;;  %6923 = vst.msk [vmem:[%s11545_s27 + $0x48] sm:$0xff] %vm6913_vm0, %v6794_v35  ;;  %v4017_v40 = vadd.f32 %v11425_v30, %v9959_v31  ;;  %v4690_v52 = vadd.f32 %v14667_v2, %v9994_v9  ;;  %v6363_v62 = vadd.f32 %v5807_v24, %v5806_v18  ;;  %v14668_v2 = vld [vmem:[#allocation147_spill] sm:$0xff] }
 0x363   : > { %v5812_v1 = vmul.f32 %v9920_v37, %v5278_v6  ;;  %4258 = vmatprep.mubr.bf16.mxu0 %v3309_v0  ;;  %4931 = vmatprep.mubr.bf16.mxu1 %v3309_v0  ;;  %v5280_v48 = vmax.f32 %v4015_v14, 0.0  ;;  %v6359_v3 = vadd.f32 %v6358_v20, %v5804_v57  ;;  %v6368_v51 = vadd.f32 %v5811_v12, %v5810_v16  ;;  %v14669_v24 = vld [vmem:[#allocation123_spill] sm:$0xff]  ;;  %v11798_v57 = vpop.f32.mrf.mxu1 }
 0x364   : > { %6356 = vadd.xlane.f32.xlu0 %v6355_v55  ;;  %v5282_v50 = vmax.f32 %v4688_v49, 0.0  ;;  %v5281_v42 = vmax.f32 %v4017_v40, 0.0  ;;  %v5283_v5 = vmax.f32 %v4690_v52, 0.0  ;;  %v6795_v35 = vadd.f32 %v11528_v34, %v6192_v45  ;;  %v14674_v40 = vld [vmem:[#allocation15_spill] sm:$0xff] }
 0x365   : > { %v6360_v30 = vadd.f32 %v6359_v3, %v5805_v13  ;;  %v4021_v18 = vadd.f32 %v14668_v2, %v9815_v61  ;;  %v14670_v6 = vmax.f32 %v14669_v24, 0.0  ;;  %v14672_v0 = vmax.f32 %v14671_v10, 0.0  ;;  %v14673_v13 = vld [vmem:[#allocation16_spill] sm:$0xff]  ;;  %v14675_v52 = vld [vmem:[#allocation75_spill] sm:$0xff] }
 0x366   : > { %v5813_v20 = vmul.f32 %v10003_v44, %v5279_v60  ;;  %v5815_v49 = vmul.f32 %v9966_v33, %v5281_v42  ;;  %v4694_v12 = vadd.f32 %v11444_v11, %v9889_v23  ;;  %v2897_v55 = vadd.f32 %v14354_v19, %v14673_v13  ;;  %6924 = vst.msk [vmem:[%s11545_s27 + $0x50] sm:$0xff] %vm6913_vm0, %v6795_v35  ;;  %v14676_v60 = vld [vmem:[#allocation84_spill] sm:$0xff]  ;;  %v6197_v35 = vpop.xlane.xlu0 %6196 }
 0x367   : > { %v3308_v14 = vpack.c.bf16 %v14672_v0, %v14670_v6  ;;  %6361 = vadd.xlane.f32.xlu1 %v6360_v30  ;;  %v5284_v16 = vmax.f32 %v4021_v18, 0.0  ;;  %v2899_v10 = vadd.f32 %v14354_v19, %v14674_v40  ;;  %v4023_v45 = vadd.f32 %v14675_v52, %v9959_v31  ;;  %v11819_v18 = vpop.f32.mrf.mxu0  ;;  %v11821_v40 = vpop.f32.mrf.mxu1 }
 0x368   : > { %v4696_v3 = vadd.f32 %v14676_v60, %v9994_v9  ;;  %v5814_v42 = vmul.f32 %v9842_v43, %v5280_v48  ;;  %v5816_v11 = vmul.f32 %v9920_v37, %v5282_v50  ;;  %v11817_v2 = vmul.f32 %v10003_v44, %v5283_v5  ;;  %v6202_v5 = vpop.xlane.xlu1 %6201 }
 0x369   : > { %4259 = vmatmul.mubr.bf16.gmra.mxu0 %v3308_v14  ;;  %4932 = vmatmul.mubr.bf16.gmra.mxu1 %v3308_v14  ;;  %v6364_v30 = vadd.f32 %v6363_v62, %v5808_v26  ;;  %v5286_v24 = vmax.f32 %v4694_v12, 0.0  ;;  %v3153_v6 = vmax.f32 %v2897_v55, 0.0  ;;  %v3155_v0 = vmax.f32 %v2899_v10, 0.0 }
 0x36a   : > { %v5285_v13 = vmax.f32 %v4023_v45, 0.0  ;;  %v5287_v52 = vmax.f32 %v4696_v3, 0.0  ;;  %v4025_v48 = vadd.f32 %v11460_v25, %v9815_v61  ;;  %v4698_v50 = vadd.f32 %v11462_v38, %v9889_v23  ;;  %v11834_v38 = vpop.f32.mrf.mxu0 }
 0x36b   : > { %v6365_v60 = vadd.f32 %v6364_v30, %v5809_v22  ;;  %v6373_v26 = vadd.f32 %v5815_v49, %v5814_v42  ;;  %v5818_v62 = vmul.f32 %v9842_v43, %v5284_v16  ;;  %v3311_v14 = vpack.c.bf16 %v3155_v0, %v3153_v6  ;;  %v11841_v30 = vpop.f32.mrf.mxu1  ;;  %v6207_v49 = vpop.xlane.xlu0 %6206 }
 0x36c   : > { %v6796_v12 = vadd.f32 %v11528_v34, %v6197_v35  ;;  %v5819_v55 = vmul.f32 %v9966_v33, %v5285_v13  ;;  %v5288_v10 = vmax.f32 %v4025_v48, 0.0  ;;  %v4027_v22 = vadd.f32 %v11470_v28, %v9959_v31  ;;  %v11844_v0 = vpop.f32.mrf.mxu0 }
 0x36d   : > { %6366 = vadd.xlane.f32.xlu0 %v6365_v60  ;;  %v4700_v25 = vadd.f32 %v11476_v59, %v9994_v9  ;;  %v5820_v16 = vmul.f32 %v9920_v37, %v5286_v24  ;;  %4268 = vmatprep.mubr.bf16.mxu0 %v3311_v14  ;;  %v6369_v3 = vadd.f32 %v6368_v51, %v5812_v1  ;;  %v5290_v35 = vmax.f32 %v4698_v50, 0.0  ;;  %v14678_v60 = vld [vmem:[#allocation11_spill] sm:$0xff]  ;;  %v14680_v1 = vld [vmem:[#allocation132_spill] sm:$0xff] }
 0x36e   : > { %4941 = vmatprep.mubr.bf16.mxu1 %v3311_v14  ;;  %6925 = vst.msk [vmem:[%s11545_s27 + $0x58] sm:$0xff] %vm6913_vm0, %v6796_v12  ;;  %v6797_v42 = vadd.f32 %v11528_v34, %v6202_v5  ;;  %v5821_v28 = vmul.f32 %v10003_v44, %v5287_v52  ;;  %v5289_v59 = vmax.f32 %v4027_v22, 0.0  ;;  %v4031_v24 = vadd.f32 %v11479_v39, %v9815_v61  ;;  %v11856_v52 = vpop.f32.mrf.mxu1  ;;  %v14683_v22 = vld [vmem:[#allocation18_spill] sm:$0xff] }
 0x36f   : > { %v5291_v6 = vmax.f32 %v4700_v25, 0.0  ;;  %v6370_v13 = vadd.f32 %v6369_v3, %v5813_v20  ;;  %v14679_v48 = vmax.f32 %v14678_v60, 0.0  ;;  %v14681_v51 = vmax.f32 %v14680_v1, 0.0  ;;  %14682 = vst [vmem:[#allocation57_spill] sm:$0xff] %v11856_v52  ;;  %v14684_v25 = vld [vmem:[#allocation134_spill] sm:$0xff]  ;;  %v14687_v1 = vld [vmem:[#allocation153_spill] sm:$0xff] }
 0x370   : > { %6926 = vst.msk [vmem:[%s11545_s27 + $0x60] sm:$0xff] %vm6913_vm0, %v6797_v42  ;;  %v4704_v14 = vadd.f32 %v11487_v17, %v9889_v23  ;;  %v6378_v50 = vadd.f32 %v5819_v55, %v5818_v62  ;;  %v5822_v12 = vmul.f32 %v9842_v43, %v5288_v10  ;;  %v2901_v20 = vadd.f32 %v14354_v19, %v14683_v22  ;;  %v11869_v55 = vpop.f32.mrf.mxu0  ;;  %v11872_v42 = vpop.f32.mrf.mxu1 }
 0x371   : > { %v3310_v5 = vpack.c.bf16 %v14681_v51, %v14679_v48  ;;  %v2903_v3 = vadd.f32 %v14354_v19, %v14684_v25  ;;  %v5823_v60 = vmul.f32 %v9966_v33, %v5289_v59  ;;  %6371 = vadd.xlane.f32.xlu1 %v6370_v13  ;;  %v14686_v48 = vld [vmem:[#allocation77_spill] sm:$0xff]  ;;  %v4706_v62 = vadd.f32 %v14687_v1, %v9994_v9 }
 0x372   : > { %v4033_v17 = vadd.f32 %v14686_v48, %v9959_v31  ;;  %14688 = vst [vmem:[#allocation161_spill] sm:$0xff] %v11869_v55  ;;  %v5824_v10 = vmul.f32 %v9920_v37, %v5290_v35  ;;  %v3157_v51 = vmax.f32 %v2901_v20, 0.0  ;;  %v6374_v25 = vadd.f32 %v6373_v26, %v5816_v11  ;;  %v6212_v35 = vpop.xlane.xlu1 %6211  ;;  %v14689_v11 = vld [vmem:[#allocation89_spill] sm:$0xff] }
 0x373   : > { %4269 = vmatmul.mubr.bf16.gmra.mxu0 %v3310_v5  ;;  %4942 = vmatmul.mubr.bf16.gmra.mxu1 %v3310_v5  ;;  %v3159_v22 = vmax.f32 %v2903_v3, 0.0  ;;  %v5825_v59 = vmul.f32 %v10003_v44, %v5291_v6  ;;  %v5292_v13 = vmax.f32 %v4031_v24, 0.0  ;;  %v5294_v39 = vmax.f32 %v4704_v14, 0.0  ;;  %v14690_v6 = vld [vmem:[#allocation159_spill] sm:$0xff]  ;;  %v11883_v14 = vpop.f32.mrf.mxu0 }
 0x374   : > { %v5293_v45 = vmax.f32 %v4033_v17, 0.0  ;;  %v5295_v52 = vmax.f32 %v4706_v62, 0.0  ;;  %v6375_v1 = vadd.f32 %v6374_v25, %v11817_v2  ;;  %v4035_v55 = vadd.f32 %v11507_v7, %v9815_v61  ;;  %14691 = vst [vmem:[#allocation164_spill] sm:$0xff] %v11883_v14  ;;  %v14693_v7 = vld [vmem:[#allocation78_spill] sm:$0xff]  ;;  %v11889_v62 = vpop.f32.mrf.mxu1  ;;  %v14695_v25 = vld [vmem:[#allocation88_spill] sm:$0xff] }
 0x375   : > { %v3313_v48 = vpack.c.bf16 %v3159_v22, %v3157_v51  ;;  %v6383_v5 = vadd.f32 %v5823_v60, %v5822_v12  ;;  %v4708_v26 = vadd.f32 %v14689_v11, %v9889_v23  ;;  %v6798_v20 = vadd.f32 %v11528_v34, %v6207_v49  ;;  %14694 = vst [vmem:[#allocation158_spill] sm:$0xff] %v11889_v62 }
 0x376   : > { %v4037_v24 = vadd.f32 %v14690_v6, %v9959_v31  ;;  %v5827_v2 = vmul.f32 %v9966_v33, %v5293_v45  ;;  %v4710_v12 = vadd.f32 %v14693_v7, %v9994_v9  ;;  %v6379_v60 = vadd.f32 %v6378_v50, %v5820_v16  ;;  %6376 = vadd.xlane.f32.xlu0 %v6375_v1 }
 0x377   : > { %4278 = vmatprep.mubr.bf16.mxu0 %v3313_v48  ;;  %4951 = vmatprep.mubr.bf16.mxu1 %v3313_v48  ;;  %v5296_v49 = vmax.f32 %v4035_v55, 0.0  ;;  %6927 = vst.msk [vmem:[%s11545_s27 + $0x68] sm:$0xff] %vm6913_vm0, %v6798_v20  ;;  %v6799_v22 = vadd.f32 %v11528_v34, %v6212_v35  ;;  %v4041_v11 = vadd.f32 %v14695_v25, %v9815_v61  ;;  %v5298_v16 = vmax.f32 %v4708_v26, 0.0  ;;  %v14696_v55 = vld [vmem:[#allocation127_spill] sm:$0xff]  ;;  %v14698_v20 = vld [vmem:[#allocation17_spill] sm:$0xff]  ;;  %v14700_v35 = vld [vmem:[#allocation156_spill] sm:$0xff]  ;;  %v11907_v25 = vpop.f32.mrf.mxu0 }
 0x378   : > { %v5297_v51 = vmax.f32 %v4037_v24, 0.0  ;;  %v5826_v48 = vmul.f32 %v9842_v43, %v5292_v13  ;;  %v5828_v45 = vmul.f32 %v9920_v37, %v5294_v39  ;;  %v5829_v6 = vmul.f32 %v10003_v44, %v5295_v52  ;;  %14701 = vst [vmem:[#allocation56_spill] sm:$0xff] %v11907_v25  ;;  %v14702_v39 = vld [vmem:[#allocation20_spill] sm:$0xff] }
 0x379   : > { %v6380_v7 = vadd.f32 %v6379_v60, %v5821_v28  ;;  %v5299_v50 = vmax.f32 %v4710_v12, 0.0  ;;  %6928 = vst.msk [vmem:[%s11545_s27 + $0x70] sm:$0xff] %vm6913_vm0, %v6799_v22  ;;  %v14697_v1 = vmax.f32 %v14696_v55, 0.0  ;;  %v14699_v24 = vmax.f32 %v14698_v20, 0.0  ;;  %v14703_v28 = vld [vmem:[#allocation133_spill] sm:$0xff]  ;;  %v14704_v12 = vld [vmem:[#allocation154_spill] sm:$0xff]  ;;  %v11915_v22 = vpop.f32.mrf.mxu1 }
 0x37a   : > { %v4714_v3 = vadd.f32 %v14700_v35, %v9889_v23  ;;  %v6388_v13 = vadd.f32 %v5827_v2, %v5826_v48  ;;  %v2905_v52 = vadd.f32 %v14354_v19, %v14702_v39  ;;  %v2907_v26 = vadd.f32 %v14354_v19, %v14703_v28  ;;  %14705 = vst [vmem:[#allocation82_spill] sm:$0xff] %v11915_v22  ;;  %v14706_v2 = vld [vmem:[#allocation79_spill] sm:$0xff] }
 0x37b   : > { %v3312_v17 = vpack.c.bf16 %v14699_v24, %v14697_v1  ;;  %6381 = vadd.xlane.f32.xlu1 %v6380_v7  ;;  %v4043_v60 = vadd.f32 %v14704_v12, %v9959_v31  ;;  %v5830_v55 = vmul.f32 %v9842_v43, %v5296_v49  ;;  %v5831_v1 = vmul.f32 %v9966_v33, %v5297_v51  ;;  %v6217_v7 = vpop.xlane.xlu0 %6216  ;;  %v11921_v24 = vpop.f32.mrf.mxu0 }
 0x37c   : > { %v5300_v20 = vmax.f32 %v4041_v11, 0.0  ;;  %v4716_v48 = vadd.f32 %v14706_v2, %v9994_v9  ;;  %14707 = vst [vmem:[#allocation97_spill] sm:$0xff] %v11921_v24  ;;  %v3161_v35 = vmax.f32 %v2905_v52, 0.0  ;;  %v3163_v39 = vmax.f32 %v2907_v26, 0.0  ;;  %v11923_v12 = vpop.f32.mrf.mxu1  ;;  %v14708_v11 = vld [vmem:[#allocation92_spill] sm:$0xff]  ;;  %v6222_v52 = vpop.xlane.xlu1 %6221 }
 0x37d   : > { %4279 = vmatmul.mubr.bf16.gmra.mxu0 %v3312_v17  ;;  %4952 = vmatmul.mubr.bf16.gmra.mxu1 %v3312_v17  ;;  %v5301_v28 = vmax.f32 %v4043_v60, 0.0  ;;  %v6384_v25 = vadd.f32 %v6383_v5, %v5824_v10  ;;  %v5832_v22 = vmul.f32 %v9920_v37, %v5298_v16  ;;  %v5833_v49 = vmul.f32 %v10003_v44, %v5299_v50  ;;  %v11930_v26 = vpop.f32.mrf.mxu0  ;;  %v14709_v16 = vld [vmem:[#allocation54_spill] sm:$0xff] }
 0x37e   : > { %v5302_v51 = vmax.f32 %v4714_v3, 0.0  ;;  %v4045_v17 = vadd.f32 %v14708_v11, %v9815_v61  ;;  %v3315_v62 = vpack.c.bf16 %v3163_v39, %v3161_v35  ;;  %v5303_v2 = vmax.f32 %v4716_v48, 0.0  ;;  %v11937_v50 = vpop.f32.mrf.mxu1 }
 0x37f   : > { %v6385_v14 = vadd.f32 %v6384_v25, %v5825_v59  ;;  %v6800_v24 = vadd.f32 %v11528_v34, %v6217_v7  ;;  %v6393_v10 = vadd.f32 %v5831_v1, %v5830_v55  ;;  %v5834_v5 = vmul.f32 %v9842_v43, %v5300_v20 }
 0x380   : > { %v4718_v60 = vadd.f32 %v14709_v16, %v9889_v23  ;;  %v4047_v3 = vadd.f32 %v11575_v29, %v9959_v31  ;;  %4288 = vmatprep.mubr.bf16.mxu0 %v3315_v62  ;;  %4961 = vmatprep.mubr.bf16.mxu1 %v3315_v62  ;;  %v5835_v59 = vmul.f32 %v9966_v33, %v5301_v28  ;;  %v5304_v20 = vmax.f32 %v4045_v17, 0.0  ;;  %v14711_v28 = vld [vmem:[#allocation129_spill] sm:$0xff] }
 0x381   : > { %6929 = vst.msk [vmem:[%s11545_s27 + $0x78] sm:$0xff] %vm6913_vm0, %v6800_v24  ;;  %v4720_v25 = vadd.f32 %v11577_v46, %v9994_v9  ;;  %v6389_v55 = vadd.f32 %v6388_v13, %v5828_v45  ;;  %v5836_v1 = vmul.f32 %v9920_v37, %v5302_v51  ;;  %6386 = vadd.xlane.f32.xlu0 %v6385_v14  ;;  %v14712_v16 = vmax.f32 %v14711_v28, 0.0  ;;  %v14713_v24 = vld [vmem:[#allocation19_spill] sm:$0xff]  ;;  %v11954_v46 = vpop.f32.mrf.mxu0  ;;  %v14715_v13 = vld [vmem:[#allocation136_spill] sm:$0xff] }
 0x382   : > { %v5305_v29 = vmax.f32 %v4047_v3, 0.0  ;;  %v6801_v48 = vadd.f32 %v11528_v34, %v6222_v52  ;;  %v5837_v7 = vmul.f32 %v10003_v44, %v5303_v2  ;;  %v4051_v62 = vadd.f32 %v11591_v32, %v9815_v61  ;;  %v11964_v32 = vpop.f32.mrf.mxu1  ;;  %v14718_v3 = vld [vmem:[#allocation151_spill] sm:$0xff] }
 0x383   : > { %v6390_v39 = vadd.f32 %v6389_v55, %v5829_v6  ;;  %v14714_v35 = vmax.f32 %v14713_v24, 0.0  ;;  %v5306_v45 = vmax.f32 %v4718_v60, 0.0  ;;  %v4724_v14 = vadd.f32 %v11600_v56, %v9889_v23  ;;  %v14716_v6 = vld [vmem:[#allocation24_spill] sm:$0xff]  ;;  %14717 = vst [vmem:[#allocation168_spill] sm:$0xff] %v11964_v32  ;;  %v6227_v24 = vpop.xlane.xlu0 %6226 }
 0x384   : > { %6930 = vst.msk [vmem:[%s11545_s27 + $0x80] sm:$0xff] %vm6913_vm0, %v6801_v48  ;;  %v2909_v51 = vadd.f32 %v14354_v19, %v14715_v13  ;;  %v2911_v17 = vadd.f32 %v14354_v19, %v14716_v6  ;;  %v6398_v2 = vadd.f32 %v5835_v59, %v5834_v5  ;;  %v5307_v52 = vmax.f32 %v4720_v25, 0.0  ;;  %v11972_v25 = vpop.f32.mrf.mxu0 }
 0x385   : > { %v3314_v11 = vpack.c.bf16 %v14714_v35, %v14712_v16  ;;  %6391 = vadd.xlane.f32.xlu1 %v6390_v39  ;;  %v4053_v60 = vadd.f32 %v14718_v3, %v9959_v31  ;;  %v14719_v35 = vld [vmem:[#allocation160_spill] sm:$0xff]  ;;  %v5838_v56 = vmul.f32 %v9842_v43, %v5304_v20  ;;  %v5839_v48 = vmul.f32 %v9966_v33, %v5305_v29 }
 0x386   : > { %v4726_v55 = vadd.f32 %v14719_v35, %v9994_v9  ;;  %v3165_v28 = vmax.f32 %v2909_v51, 0.0  ;;  %v3167_v16 = vmax.f32 %v2911_v17, 0.0  ;;  %v5308_v13 = vmax.f32 %v4051_v62, 0.0  ;;  %v6232_v35 = vpop.xlane.xlu1 %6231 }
 0x387   : > { %4289 = vmatmul.mubr.bf16.gmra.mxu0 %v3314_v11  ;;  %4962 = vmatmul.mubr.bf16.gmra.mxu1 %v3314_v11  ;;  %v5310_v6 = vmax.f32 %v4724_v14, 0.0  ;;  %v5309_v5 = vmax.f32 %v4053_v60, 0.0  ;;  %v6394_v59 = vadd.f32 %v6393_v10, %v5832_v22  ;;  %v4055_v3 = vadd.f32 %v11628_v54, %v9815_v61  ;;  %v11978_v11 = vpop.f32.mrf.mxu1  ;;  %v11983_v10 = vpop.f32.mrf.mxu0 }
 0x388   : > { %v3317_v39 = vpack.c.bf16 %v3167_v16, %v3165_v28  ;;  %v5311_v32 = vmax.f32 %v4726_v55, 0.0  ;;  %v4728_v20 = vadd.f32 %v11635_v36, %v9889_v23  ;;  %v5840_v29 = vmul.f32 %v9920_v37, %v5306_v45  ;;  %v14720_v36 = vld [vmem:[#allocation163_spill] sm:$0xff] }
 0x389   : > { %v5841_v62 = vmul.f32 %v10003_v44, %v5307_v52  ;;  %v6395_v14 = vadd.f32 %v6394_v59, %v5833_v49  ;;  %v6802_v22 = vadd.f32 %v11528_v34, %v6227_v24  ;;  %v6403_v51 = vadd.f32 %v5839_v48, %v5838_v56  ;;  %v11988_v55 = vpop.f32.mrf.mxu1  ;;  %v14721_v49 = vld [vmem:[#allocation80_spill] sm:$0xff]  ;;  %v12000_v59 = vpop.f32.mrf.mxu0 }
 0x38a   : > { %4298 = vmatprep.mubr.bf16.mxu0 %v3317_v39  ;;  %4971 = vmatprep.mubr.bf16.mxu1 %v3317_v39  ;;  %v5843_v54 = vmul.f32 %v9966_v33, %v5309_v5  ;;  %v5312_v17 = vmax.f32 %v4055_v3, 0.0  ;;  %v4057_v60 = vadd.f32 %v14720_v36, %v9959_v31  ;;  %v5314_v45 = vmax.f32 %v4728_v20, 0.0  ;;  %v14722_v20 = vld [vmem:[#allocation22_spill] sm:$0xff]  ;;  %v14727_v36 = vld [vmem:[#allocation53_spill] sm:$0xff] }
 0x38b   : > { %6396 = vadd.xlane.f32.xlu0 %v6395_v14  ;;  %6931 = vst.msk [vmem:[%s11545_s27 + $0x88] sm:$0xff] %vm6913_vm0, %v6802_v22  ;;  %v4730_v52 = vadd.f32 %v14721_v49, %v9994_v9  ;;  %v6399_v28 = vadd.f32 %v6398_v2, %v5836_v1  ;;  %v6803_v56 = vadd.f32 %v11528_v34, %v6232_v35  ;;  %v14723_v14 = vmax.f32 %v14722_v20, 0.0  ;;  %v14724_v1 = vld [vmem:[#allocation21_spill] sm:$0xff] }
 0x38c   : > { %v5842_v48 = vmul.f32 %v9842_v43, %v5308_v13  ;;  %v5844_v16 = vmul.f32 %v9920_v37, %v5310_v6  ;;  %v5845_v24 = vmul.f32 %v10003_v44, %v5311_v32  ;;  %v4061_v5 = vadd.f32 %v11670_v58, %v9815_v61  ;;  %v12010_v6 = vpop.f32.mrf.mxu1  ;;  %v14726_v58 = vld [vmem:[#allocation138_spill] sm:$0xff] }
 0x38d   : > { %v5313_v39 = vmax.f32 %v4057_v60, 0.0  ;;  %v6400_v3 = vadd.f32 %v6399_v28, %v5837_v7  ;;  %6932 = vst.msk [vmem:[%s11545_s27 + $0x90] sm:$0xff] %vm6913_vm0, %v6803_v56  ;;  %v14725_v2 = vmax.f32 %v14724_v1, 0.0  ;;  %v4734_v13 = vadd.f32 %v11676_v47, %v9889_v23  ;;  %v14728_v28 = vld [vmem:[#allocation93_spill] sm:$0xff]  ;;  %v6237_v56 = vpop.xlane.xlu0 %6236  ;;  %v12024_v1 = vpop.f32.mrf.mxu0 }
 0x38e   : > { %v6408_v32 = vadd.f32 %v5843_v54, %v5842_v48  ;;  %v5846_v35 = vmul.f32 %v9842_v43, %v5312_v17  ;;  %v2913_v22 = vadd.f32 %v14354_v19, %v14726_v58  ;;  %v2915_v7 = vadd.f32 %v14354_v19, %v14727_v36  ;;  %v12029_v58 = vpop.f32.mrf.mxu1 }
 0x38f   : > { %v3316_v34 = vpack.c.bf16 %v14725_v2, %v14723_v14  ;;  %v12018_v60 = vmul.f32 %v9920_v37, %v5314_v45  ;;  %v5315_v49 = vmax.f32 %v4730_v52, 0.0  ;;  %6401 = vadd.xlane.f32.xlu1 %v6400_v3  ;;  %v4063_v47 = vadd.f32 %v11689_v15, %v9959_v31  ;;  %v6242_v15 = vpop.xlane.xlu1 %6241 }
 0x390   : > { %v4736_v54 = vadd.f32 %v14728_v28, %v9994_v9  ;;  %v5316_v17 = vmax.f32 %v4061_v5, 0.0  ;;  %v3169_v48 = vmax.f32 %v2913_v22, 0.0  ;;  %v3171_v20 = vmax.f32 %v2915_v7, 0.0 }
 0x391   : > { %4299 = vmatmul.mubr.bf16.gmra.mxu0 %v3316_v34  ;;  %4972 = vmatmul.mubr.bf16.gmra.mxu1 %v3316_v34  ;;  %v6404_v14 = vadd.f32 %v6403_v51, %v5840_v29  ;;  %v5847_v45 = vmul.f32 %v9966_v33, %v5313_v39  ;;  %v5318_v2 = vmax.f32 %v4734_v13, 0.0  ;;  %v5317_v52 = vmax.f32 %v4063_v47, 0.0  ;;  %v12031_v34 = vld [vmem:[#allocation2] ss:$0 sm:$0xff] }
 0x392   : > { %v4065_v3 = vadd.f32 %v11718_v27, %v9815_v61  ;;  %v3319_v36 = vpack.c.bf16 %v3171_v20, %v3169_v48  ;;  %v5319_v28 = vmax.f32 %v4736_v54, 0.0  ;;  %v6804_v29 = vadd.f32 %v12031_v34, %v6237_v56  ;;  %v12045_v54 = vpop.f32.mrf.mxu0  ;;  %v12050_v20 = vpop.f32.mrf.mxu1 }
 0x393   : > { %v6405_v5 = vadd.f32 %v6404_v14, %v5841_v62  ;;  %v5849_v51 = vmul.f32 %v10003_v44, %v5315_v49  ;;  %v5851_v39 = vmul.f32 %v9966_v33, %v5317_v52  ;;  %v4738_v13 = vadd.f32 %v11720_v63, %v9889_v23  ;;  %v14729_v62 = vld [vmem:[#allocation83_spill] sm:$0xff] }
 0x394   : > { %v4067_v27 = vadd.f32 %v11732_v21, %v9959_v31  ;;  %4308 = vmatprep.mubr.bf16.mxu0 %v3319_v36  ;;  %4981 = vmatprep.mubr.bf16.mxu1 %v3319_v36  ;;  %v5320_v22 = vmax.f32 %v4065_v3, 0.0  ;;  %6933 = vst.msk [vmem:[%s11545_s27 + $0x98] sm:$0xff] %vm6913_vm0, %v6804_v29  ;;  %v4740_v7 = vadd.f32 %v14729_v62, %v9994_v9  ;;  %v14734_v29 = vld [vmem:[#allocation137_spill] sm:$0xff]  ;;  %v14735_v62 = vld [vmem:[#allocation23_spill] sm:$0xff] }
 0x395   : > { %v6409_v47 = vadd.f32 %v6408_v32, %v5844_v16  ;;  %v6805_v49 = vadd.f32 %v12031_v34, %v6242_v15  ;;  %v6413_v56 = vadd.f32 %v5847_v45, %v5846_v35  ;;  %v5850_v63 = vmul.f32 %v9842_v43, %v5316_v17  ;;  %6406 = vadd.xlane.f32.xlu0 %v6405_v5  ;;  %v14730_v16 = vld [vmem:[#allocation135_spill] sm:$0xff]  ;;  %v14732_v15 = vld [vmem:[#allocation140_spill] sm:$0xff]  ;;  %v12060_v17 = vpop.f32.mrf.mxu0 }
 0x396   : > { %v5321_v48 = vmax.f32 %v4067_v27, 0.0  ;;  %v4071_v21 = vadd.f32 %v11756_v41, %v9815_v61  ;;  %v5852_v14 = vmul.f32 %v9920_v37, %v5318_v2  ;;  %v5853_v52 = vmul.f32 %v10003_v44, %v5319_v28  ;;  %v12066_v27 = vpop.f32.mrf.mxu1 }
 0x397   : > { %v6410_v3 = vadd.f32 %v6409_v47, %v5845_v24  ;;  %6934 = vst.msk [vmem:[%s11545_s27 + $0xa0] sm:$0xff] %vm6913_vm0, %v6805_v49  ;;  %v14731_v32 = vmax.f32 %v14730_v16, 0.0  ;;  %v14733_v35 = vmax.f32 %v14732_v15, 0.0  ;;  %v6418_v36 = vadd.f32 %v5851_v39, %v5850_v63 }
 0x398   : > { %v5322_v5 = vmax.f32 %v4738_v13, 0.0  ;;  %v4744_v41 = vadd.f32 %v11763_v8, %v9889_v23  ;;  %v2917_v2 = vadd.f32 %v14354_v19, %v14734_v29  ;;  %v5854_v24 = vmul.f32 %v9842_v43, %v5320_v22  ;;  %v6247_v13 = vpop.xlane.xlu0 %6246  ;;  %v12079_v29 = vpop.f32.mrf.mxu1 }
 0x399   : > { %v3318_v45 = vpack.c.bf16 %v14733_v35, %v14731_v32  ;;  %v5323_v28 = vmax.f32 %v4740_v7, 0.0  ;;  %6411 = vadd.xlane.f32.xlu1 %v6410_v3  ;;  %v2919_v47 = vadd.f32 %v14354_v19, %v14735_v62  ;;  %v4073_v39 = vadd.f32 %v11775_v53, %v9959_v31  ;;  %v12074_v32 = vpop.f32.mrf.mxu0  ;;  %v14736_v3 = vld [vmem:[#allocation87_spill] sm:$0xff] }
 0x39a   : > { %v5855_v49 = vmul.f32 %v9966_v33, %v5321_v48  ;;  %v5324_v8 = vmax.f32 %v4071_v21, 0.0  ;;  %v5326_v63 = vmax.f32 %v4744_v41, 0.0  ;;  %v3173_v16 = vmax.f32 %v2917_v2, 0.0 }
 0x39b   : > { %4309 = vmatmul.mubr.bf16.gmra.mxu0 %v3318_v45  ;;  %4982 = vmatmul.mubr.bf16.gmra.mxu1 %v3318_v45  ;;  %v3175_v22 = vmax.f32 %v2919_v47, 0.0  ;;  %v5325_v7 = vmax.f32 %v4073_v39, 0.0  ;;  %v4746_v15 = vadd.f32 %v14736_v3, %v9994_v9  ;;  %v6414_v35 = vadd.f32 %v6413_v56, %v12018_v60  ;;  %v12096_v39 = vpop.f32.mrf.mxu0 }
 0x39c   : > { %v5856_v53 = vmul.f32 %v9920_v37, %v5322_v5  ;;  %v4075_v48 = vadd.f32 %v11789_v4, %v9815_v61  ;;  %v4748_v21 = vadd.f32 %v11798_v57, %v9889_v23  ;;  %v6806_v45 = vadd.f32 %v12031_v34, %v6247_v13  ;;  %v6252_v57 = vpop.xlane.xlu1 %6251 }
 0x39d   : > { %v5857_v41 = vmul.f32 %v10003_v44, %v5323_v28  ;;  %v3321_v2 = vpack.c.bf16 %v3175_v22, %v3173_v16  ;;  %v5859_v62 = vmul.f32 %v9966_v33, %v5325_v7  ;;  %v6415_v47 = vadd.f32 %v6414_v35, %v5849_v51  ;;  %v14739_v35 = vld [vmem:[#allocation26_spill] sm:$0xff] }
 0x39e   : > { %v5858_v60 = vmul.f32 %v9842_v43, %v5324_v8  ;;  %v5327_v56 = vmax.f32 %v4746_v15, 0.0  ;;  %6935 = vst.msk [vmem:[%s11545_s27 + $0xa8] sm:$0xff] %vm6913_vm0, %v6806_v45  ;;  %v4077_v5 = vadd.f32 %v11819_v18, %v9959_v31  ;;  %v4750_v4 = vadd.f32 %v11821_v40, %v9994_v9  ;;  %v12099_v8 = vpop.f32.mrf.mxu1 }
 0x39f   : > { %v6423_v13 = vadd.f32 %v5855_v49, %v5854_v24  ;;  %v5860_v28 = vmul.f32 %v9920_v37, %v5326_v63  ;;  %4318 = vmatprep.mubr.bf16.mxu0 %v3321_v2  ;;  %4991 = vmatprep.mubr.bf16.mxu1 %v3321_v2  ;;  %v5328_v51 = vmax.f32 %v4075_v48, 0.0  ;;  %v6419_v16 = vadd.f32 %v6418_v36, %v5852_v14  ;;  %v14737_v49 = vld [vmem:[#allocation28_spill] sm:$0xff]  ;;  %v14741_v2 = vld [vmem:[#allocation139_spill] sm:$0xff] }
 0x3a0   : > { %v6428_v22 = vadd.f32 %v5859_v62, %v5858_v60  ;;  %6416 = vadd.xlane.f32.xlu0 %v6415_v47  ;;  %v5330_v7 = vmax.f32 %v4748_v21, 0.0  ;;  %v5329_v18 = vmax.f32 %v4077_v5, 0.0  ;;  %v5331_v3 = vmax.f32 %v4750_v4, 0.0  ;;  %v12114_v62 = vpop.f32.mrf.mxu0  ;;  %v14742_v47 = vld [vmem:[#allocation25_spill] sm:$0xff] }
 0x3a1   : > { %v6420_v15 = vadd.f32 %v6419_v16, %v5853_v52  ;;  %v6807_v40 = vadd.f32 %v12031_v34, %v6252_v57  ;;  %v4081_v24 = vadd.f32 %v11834_v38, %v9815_v61  ;;  %v14738_v63 = vmax.f32 %v14737_v49, 0.0  ;;  %v14743_v5 = vld [vmem:[#allocation57_spill] sm:$0xff] }
 0x3a2   : > { %v14740_v45 = vmax.f32 %v14739_v35, 0.0  ;;  %v5861_v14 = vmul.f32 %v10003_v44, %v5327_v56  ;;  %v5863_v36 = vmul.f32 %v9966_v33, %v5329_v18  ;;  %v4754_v21 = vadd.f32 %v11841_v30, %v9889_v23  ;;  %v12124_v30 = vpop.f32.mrf.mxu1 }
 0x3a3   : > { %v2921_v52 = vadd.f32 %v14354_v19, %v14741_v2  ;;  %6421 = vadd.xlane.f32.xlu1 %v6420_v15  ;;  %6936 = vst.msk [vmem:[%s11545_s27 + $0xb0] sm:$0xff] %vm6913_vm0, %v6807_v40  ;;  %v5332_v38 = vmax.f32 %v4081_v24, 0.0  ;;  %v2923_v60 = vadd.f32 %v14354_v19, %v14742_v47  ;;  %v4083_v56 = vadd.f32 %v11844_v0, %v9959_v31  ;;  %v6257_v40 = vpop.xlane.xlu0 %6256  ;;  %v12128_v24 = vpop.f32.mrf.mxu0 }
 0x3a4   : > { %v3320_v48 = vpack.c.bf16 %v14740_v45, %v14738_v63  ;;  %v4756_v4 = vadd.f32 %v14743_v5, %v9994_v9  ;;  %v5862_v57 = vmul.f32 %v9842_v43, %v5328_v51  ;;  %v5864_v16 = vmul.f32 %v9920_v37, %v5330_v7  ;;  %v12131_v45 = vpop.f32.mrf.mxu1  ;;  %v14744_v5 = vld [vmem:[#allocation161_spill] sm:$0xff] }
 0x3a5   : > { %v3177_v18 = vmax.f32 %v2921_v52, 0.0  ;;  %v6424_v15 = vadd.f32 %v6423_v13, %v5856_v53  ;;  %v5865_v49 = vmul.f32 %v10003_v44, %v5331_v3  ;;  %v5334_v63 = vmax.f32 %v4754_v21, 0.0  ;;  %v12139_v21 = vpop.f32.mrf.mxu0 }
 0x3a6   : > { %4319 = vmatmul.mubr.bf16.gmra.mxu0 %v3320_v48  ;;  %4992 = vmatmul.mubr.bf16.gmra.mxu1 %v3320_v48  ;;  %v3179_v35 = vmax.f32 %v2923_v60, 0.0  ;;  %v5333_v0 = vmax.f32 %v4083_v56, 0.0  ;;  %v5335_v2 = vmax.f32 %v4756_v4, 0.0  ;;  %v4085_v51 = vadd.f32 %v14744_v5, %v9815_v61  ;;  %v6262_v48 = vpop.xlane.xlu1 %6261  ;;  %14745 = vst [vmem:[#allocation170_spill] sm:$0xff] %v12139_v21  ;;  %v14746_v56 = vld [vmem:[#allocation164_spill] sm:$0xff]  ;;  %v12146_v5 = vpop.f32.mrf.mxu1 }
 0x3a7   : > { %v6425_v47 = vadd.f32 %v6424_v15, %v5857_v41  ;;  %v4758_v7 = vadd.f32 %v11872_v42, %v9889_v23  ;;  %v6433_v53 = vadd.f32 %v5863_v36, %v5862_v57  ;;  %v5866_v13 = vmul.f32 %v9842_v43, %v5332_v38  ;;  %v14747_v42 = vld [vmem:[#allocation158_spill] sm:$0xff]  ;;  %14748 = vst [vmem:[#allocation86_spill] sm:$0xff] %v12146_v5  ;;  %v14751_v36 = vld [vmem:[#allocation144_spill] sm:$0xff] }
 0x3a8   : > { %v3323_v52 = vpack.c.bf16 %v3179_v35, %v3177_v18  ;;  %v6808_v3 = vadd.f32 %v12031_v34, %v6257_v40  ;;  %v5867_v60 = vmul.f32 %v9966_v33, %v5333_v0  ;;  %v5336_v41 = vmax.f32 %v4085_v51, 0.0  ;;  %v14753_v5 = vld [vmem:[#allocation142_spill] sm:$0xff] }
 0x3a9   : > { %6426 = vadd.xlane.f32.xlu0 %v6425_v47  ;;  %v4087_v4 = vadd.f32 %v14746_v56, %v9959_v31  ;;  %v4760_v15 = vadd.f32 %v14747_v42, %v9994_v9  ;;  %v5868_v57 = vmul.f32 %v9920_v37, %v5334_v63  ;;  %v6429_v18 = vadd.f32 %v6428_v22, %v5860_v28  ;;  %v14750_v42 = vld [vmem:[#allocation56_spill] sm:$0xff]  ;;  %v14755_v28 = vld [vmem:[#allocation82_spill] sm:$0xff] }
 0x3aa   : > { %4328 = vmatprep.mubr.bf16.mxu0 %v3323_v52  ;;  %5001 = vmatprep.mubr.bf16.mxu1 %v3323_v52  ;;  %6937 = vst.msk [vmem:[%s11545_s27 + $0xb8] sm:$0xff] %vm6913_vm0, %v6808_v3  ;;  %v6809_v40 = vadd.f32 %v12031_v34, %v6262_v48  ;;  %v5869_v35 = vmul.f32 %v10003_v44, %v5335_v2  ;;  %v5338_v0 = vmax.f32 %v4758_v7, 0.0  ;;  %v14752_v63 = vmax.f32 %v14751_v36, 0.0  ;;  %v12164_v48 = vpop.f32.mrf.mxu0  ;;  %v14757_v3 = vld [vmem:[#allocation32_spill] sm:$0xff] }
 0x3ab   : > { %v5337_v47 = vmax.f32 %v4087_v4, 0.0  ;;  %v5339_v51 = vmax.f32 %v4760_v15, 0.0  ;;  %v6430_v56 = vadd.f32 %v6429_v18, %v5861_v14  ;;  %v4091_v38 = vadd.f32 %v14750_v42, %v9815_v61  ;;  %14756 = vst [vmem:[#allocation100_spill] sm:$0xff] %v12164_v48  ;;  %v14758_v4 = vld [vmem:[#allocation30_spill] sm:$0xff]  ;;  %v12171_v18 = vpop.f32.mrf.mxu1  ;;  %v14761_v42 = vld [vmem:[#allocation97_spill] sm:$0xff] }
 0x3ac   : > { %6938 = vst.msk [vmem:[%s11545_s27 + $0xc0] sm:$0xff] %vm6913_vm0, %v6809_v40  ;;  %v14754_v52 = vmax.f32 %v14753_v5, 0.0  ;;  %v4764_v22 = vadd.f32 %v14755_v28, %v9889_v23  ;;  %v6438_v2 = vadd.f32 %v5867_v60, %v5866_v13  ;;  %v5870_v7 = vmul.f32 %v9842_v43, %v5336_v41  ;;  %14759 = vst [vmem:[#allocation162_spill] sm:$0xff] %v12171_v18  ;;  %v12185_v36 = vpop.f32.mrf.mxu0 }
 0x3ad   : > { %v2925_v14 = vadd.f32 %v14354_v19, %v14757_v3  ;;  %v2927_v15 = vadd.f32 %v14354_v19, %v14758_v4  ;;  %v5871_v5 = vmul.f32 %v9966_v33, %v5337_v47  ;;  %6431 = vadd.xlane.f32.xlu1 %v6430_v56  ;;  %v4766_v13 = vadd.f32 %v11923_v12, %v9994_v9  ;;  %v6267_v3 = vpop.xlane.xlu0 %6266 }
 0x3ae   : > { %v3322_v21 = vpack.c.bf16 %v14754_v52, %v14752_v63  ;;  %v4093_v63 = vadd.f32 %v14761_v42, %v9959_v31  ;;  %v12180_v60 = vmul.f32 %v9920_v37, %v5338_v0  ;;  %v6434_v28 = vadd.f32 %v6433_v53, %v5864_v16  ;;  %v6272_v0 = vpop.xlane.xlu1 %6271 }
 0x3af   : > { %v3181_v41 = vmax.f32 %v2925_v14, 0.0  ;;  %v3183_v52 = vmax.f32 %v2927_v15, 0.0  ;;  %v12183_v4 = vmul.f32 %v10003_v44, %v5339_v51  ;;  %v5340_v47 = vmax.f32 %v4091_v38, 0.0  ;;  %v14763_v15 = vld [vmem:[#allocation168_spill] sm:$0xff] }
 0x3b0   : > { %4329 = vmatmul.mubr.bf16.gmra.mxu0 %v3322_v21  ;;  %5002 = vmatmul.mubr.bf16.gmra.mxu1 %v3322_v21  ;;  %v5342_v56 = vmax.f32 %v4764_v22, 0.0  ;;  %v5341_v40 = vmax.f32 %v4093_v63, 0.0  ;;  %v5343_v18 = vmax.f32 %v4766_v13, 0.0  ;;  %v6435_v48 = vadd.f32 %v6434_v28, %v5865_v49  ;;  %v12189_v21 = vpop.f32.mrf.mxu1  ;;  %v12196_v22 = vpop.f32.mrf.mxu0 }
 0x3b1   : > { %v3325_v42 = vpack.c.bf16 %v3183_v52, %v3181_v41  ;;  %v4095_v12 = vadd.f32 %v11930_v26, %v9815_v61  ;;  %v6443_v16 = vadd.f32 %v5871_v5, %v5870_v7  ;;  %v4768_v53 = vadd.f32 %v11937_v50, %v9889_v23 }
 0x3b2   : > { %v6810_v38 = vadd.f32 %v12031_v34, %v6267_v3  ;;  %v4097_v51 = vadd.f32 %v11954_v46, %v9959_v31  ;;  %v5875_v26 = vmul.f32 %v9966_v33, %v5341_v40  ;;  %v4770_v63 = vadd.f32 %v14763_v15, %v9994_v9  ;;  %v12202_v5 = vpop.f32.mrf.mxu1  ;;  %6436 = vadd.xlane.f32.xlu0 %v6435_v48  ;;  %v12209_v52 = vpop.f32.mrf.mxu0 }
 0x3b3   : > { %4338 = vmatprep.mubr.bf16.mxu0 %v3325_v42  ;;  %5011 = vmatprep.mubr.bf16.mxu1 %v3325_v42  ;;  %v6439_v7 = vadd.f32 %v6438_v2, %v5868_v57  ;;  %v5344_v50 = vmax.f32 %v4095_v12, 0.0  ;;  %v6811_v13 = vadd.f32 %v12031_v34, %v6272_v0  ;;  %v4101_v41 = vadd.f32 %v11972_v25, %v9815_v61  ;;  %v14764_v12 = vld [vmem:[#allocation146_spill] sm:$0xff] }
 0x3b4   : > { %6939 = vst.msk [vmem:[%s11545_s27 + $0xc8] sm:$0xff] %vm6913_vm0, %v6810_v38  ;;  %v5345_v46 = vmax.f32 %v4097_v51, 0.0  ;;  %v5874_v40 = vmul.f32 %v9842_v43, %v5340_v47  ;;  %v5876_v28 = vmul.f32 %v9920_v37, %v5342_v56  ;;  %v5877_v57 = vmul.f32 %v10003_v44, %v5343_v18  ;;  %v12214_v3 = vpop.f32.mrf.mxu1  ;;  %v14766_v38 = vld [vmem:[#allocation27_spill] sm:$0xff]  ;;  %v12224_v47 = vpop.f32.mrf.mxu0 }
 0x3b5   : > { %v6440_v2 = vadd.f32 %v6439_v7, %v5869_v35  ;;  %v5346_v48 = vmax.f32 %v4768_v53, 0.0  ;;  %v5347_v42 = vmax.f32 %v4770_v63, 0.0  ;;  %6940 = vst.msk [vmem:[%s11545_s27 + $0xd0] sm:$0xff] %vm6913_vm0, %v6811_v13  ;;  %v14765_v0 = vmax.f32 %v14764_v12, 0.0  ;;  %v14768_v18 = vld [vmem:[#allocation31_spill] sm:$0xff]  ;;  %v14769_v7 = vld [vmem:[#allocation29_spill] sm:$0xff] }
 0x3b6   : > { %v14767_v51 = vmax.f32 %v14766_v38, 0.0  ;;  %v4774_v15 = vadd.f32 %v11978_v11, %v9889_v23  ;;  %v6448_v56 = vadd.f32 %v5875_v26, %v5874_v40  ;;  %v2929_v35 = vadd.f32 %v14354_v19, %v14768_v18  ;;  %v12232_v13 = vpop.f32.mrf.mxu1  ;;  %v6277_v40 = vpop.xlane.xlu0 %6276 }
 0x3b7   : > { %6441 = vadd.xlane.f32.xlu1 %v6440_v2  ;;  %v2931_v53 = vadd.f32 %v14354_v19, %v14769_v7  ;;  %v4103_v63 = vadd.f32 %v11983_v10, %v9959_v31  ;;  %v5878_v12 = vmul.f32 %v9842_v43, %v5344_v50  ;;  %v5348_v11 = vmax.f32 %v4101_v41, 0.0  ;;  %v12239_v7 = vpop.f32.mrf.mxu0 }
 0x3b8   : > { %v3324_v25 = vpack.c.bf16 %v14767_v51, %v14765_v0  ;;  %v5879_v0 = vmul.f32 %v9966_v33, %v5345_v46  ;;  %v4776_v26 = vadd.f32 %v11988_v55, %v9994_v9  ;;  %v3185_v2 = vmax.f32 %v2929_v35, 0.0 }
 0x3b9   : > { %v3187_v38 = vmax.f32 %v2931_v53, 0.0  ;;  %v5349_v51 = vmax.f32 %v4103_v63, 0.0  ;;  %v6444_v18 = vadd.f32 %v6443_v16, %v12180_v60  ;;  %v5880_v10 = vmul.f32 %v9920_v37, %v5346_v48  ;;  %v6282_v16 = vpop.xlane.xlu1 %6281  ;;  %v12251_v63 = vpop.f32.mrf.mxu0 }
 0x3ba   : > { %4339 = vmatmul.mubr.bf16.gmra.mxu0 %v3324_v25  ;;  %5012 = vmatmul.mubr.bf16.gmra.mxu1 %v3324_v25  ;;  %v12243_v50 = vmul.f32 %v10003_v44, %v5347_v42  ;;  %v5350_v46 = vmax.f32 %v4774_v15, 0.0  ;;  %v4105_v41 = vadd.f32 %v12000_v59, %v9815_v61  ;;  %v12247_v25 = vpop.f32.mrf.mxu1  ;;  %v5351_v35 = vmax.f32 %v4776_v26, 0.0  ;;  %v14771_v26 = vld [vmem:[#allocation152_spill] sm:$0xff] }
 0x3bb   : > { %v3327_v55 = vpack.c.bf16 %v3187_v38, %v3185_v2  ;;  %v6445_v53 = vadd.f32 %v6444_v18, %v12183_v4  ;;  %v6812_v60 = vadd.f32 %v12031_v34, %v6277_v40  ;;  %v6453_v48 = vadd.f32 %v5879_v0, %v5878_v12 }
 0x3bc   : > { %v5882_v42 = vmul.f32 %v9842_v43, %v5348_v11  ;;  %v4778_v15 = vadd.f32 %v12010_v6, %v9889_v23  ;;  %v4107_v59 = vadd.f32 %v12024_v1, %v9959_v31  ;;  %v12258_v49 = vpop.f32.mrf.mxu1  ;;  %v5883_v4 = vmul.f32 %v9966_v33, %v5349_v51  ;;  %v12266_v11 = vpop.f32.mrf.mxu0 }
 0x3bd   : > { %4348 = vmatprep.mubr.bf16.mxu0 %v3327_v55  ;;  %5021 = vmatprep.mubr.bf16.mxu1 %v3327_v55  ;;  %6941 = vst.msk [vmem:[%s11545_s27 + $0xd8] sm:$0xff] %vm6913_vm0, %v6812_v60  ;;  %v4780_v12 = vadd.f32 %v12029_v58, %v9994_v9  ;;  %v6449_v0 = vadd.f32 %v6448_v56, %v5876_v28  ;;  %v5352_v1 = vmax.f32 %v4105_v41, 0.0  ;;  %v14772_v58 = vmax.f32 %v14771_v26, 0.0  ;;  %v14773_v28 = vld [vmem:[#allocation143_spill] sm:$0xff] }
 0x3be   : > { %v5884_v6 = vmul.f32 %v9920_v37, %v5350_v46  ;;  %6446 = vadd.xlane.f32.xlu0 %v6445_v53  ;;  %v5353_v40 = vmax.f32 %v4107_v59, 0.0  ;;  %v6813_v38 = vadd.f32 %v12031_v34, %v6282_v16  ;;  %v12270_v18 = vpop.f32.mrf.mxu1  ;;  %v5885_v51 = vmul.f32 %v10003_v44, %v5351_v35  ;;  %v12279_v14 = vpop.f32.mrf.mxu0  ;;  %v14775_v53 = vld [vmem:[#allocation38_spill] sm:$0xff] }
 0x3bf   : > { %v6450_v55 = vadd.f32 %v6449_v0, %v5877_v57  ;;  %v4111_v60 = vadd.f32 %v12045_v54, %v9815_v61  ;;  %v14774_v56 = vmax.f32 %v14773_v28, 0.0  ;;  %v5354_v46 = vmax.f32 %v4778_v15, 0.0  ;;  %v14776_v57 = vld [vmem:[#allocation41_spill] sm:$0xff] }
 0x3c0   : > { %6942 = vst.msk [vmem:[%s11545_s27 + $0xe0] sm:$0xff] %vm6913_vm0, %v6813_v38  ;;  %v4784_v41 = vadd.f32 %v12050_v20, %v9889_v23  ;;  %v2933_v35 = vadd.f32 %v14354_v19, %v14775_v53  ;;  %v2935_v16 = vadd.f32 %v14354_v19, %v14776_v57  ;;  %v12289_v54 = vpop.f32.mrf.mxu1  ;;  %v6458_v59 = vadd.f32 %v5883_v4, %v5882_v42 }
 0x3c1   : > { %v3326_v2 = vpack.c.bf16 %v14774_v56, %v14772_v58  ;;  %14777 = vst [vmem:[#allocation171_spill] sm:$0xff] %v12289_v54  ;;  %v5355_v26 = vmax.f32 %v4780_v12, 0.0  ;;  %6451 = vadd.xlane.f32.xlu1 %v6450_v55  ;;  %v4113_v15 = vadd.f32 %v12060_v17, %v9959_v31  ;;  %v4786_v0 = vadd.f32 %v12066_v27, %v9994_v9  ;;  %v6287_v56 = vpop.xlane.xlu0 %6286  ;;  %v12297_v12 = vpop.f32.mrf.mxu0 }
 0x3c2   : > { %v5886_v20 = vmul.f32 %v9842_v43, %v5352_v1  ;;  %v5887_v38 = vmul.f32 %v9966_v33, %v5353_v40  ;;  %v3189_v58 = vmax.f32 %v2933_v35, 0.0  ;;  %v3191_v28 = vmax.f32 %v2935_v16, 0.0  ;;  %v6292_v1 = vpop.xlane.xlu1 %6291 }
 0x3c3   : > { %4349 = vmatmul.mubr.bf16.gmra.mxu0 %v3326_v2  ;;  %5022 = vmatmul.mubr.bf16.gmra.mxu1 %v3326_v2  ;;  %v5356_v53 = vmax.f32 %v4111_v60, 0.0  ;;  %v5358_v57 = vmax.f32 %v4784_v41, 0.0  ;;  %v5357_v42 = vmax.f32 %v4113_v15, 0.0  ;;  %v6454_v4 = vadd.f32 %v6453_v48, %v5880_v10  ;;  %v12303_v2 = vpop.f32.mrf.mxu1  ;;  %v12309_v41 = vpop.f32.mrf.mxu0 }
 0x3c4   : > { %v3329_v55 = vpack.c.bf16 %v3191_v28, %v3189_v58  ;;  %v5359_v54 = vmax.f32 %v4786_v0, 0.0  ;;  %v4115_v17 = vadd.f32 %v12074_v32, %v9815_v61  ;;  %v4788_v27 = vadd.f32 %v12079_v29, %v9889_v23 }
 0x3c5   : > { %v5888_v40 = vmul.f32 %v9920_v37, %v5354_v46  ;;  %v5889_v60 = vmul.f32 %v10003_v44, %v5355_v26  ;;  %v6455_v10 = vadd.f32 %v6454_v4, %v12243_v50  ;;  %v6814_v48 = vadd.f32 %v12031_v34, %v6287_v56  ;;  %v12314_v15 = vpop.f32.mrf.mxu1 }
 0x3c6   : > { %v6463_v35 = vadd.f32 %v5887_v38, %v5886_v20  ;;  %4358 = vmatprep.mubr.bf16.mxu0 %v3329_v55  ;;  %5031 = vmatprep.mubr.bf16.mxu1 %v3329_v55  ;;  %v5891_v32 = vmul.f32 %v9966_v33, %v5357_v42  ;;  %v5360_v29 = vmax.f32 %v4115_v17, 0.0  ;;  %v4117_v16 = vadd.f32 %v12096_v39, %v9959_v31  ;;  %v12321_v20 = vpop.f32.mrf.mxu0 }
 0x3c7   : > { %6456 = vadd.xlane.f32.xlu0 %v6455_v10  ;;  %v5362_v46 = vmax.f32 %v4788_v27, 0.0  ;;  %6943 = vst.msk [vmem:[%s11545_s27 + $0xe8] sm:$0xff] %vm6913_vm0, %v6814_v48  ;;  %v4790_v50 = vadd.f32 %v12099_v8, %v9994_v9  ;;  %v6459_v26 = vadd.f32 %v6458_v59, %v5884_v6  ;;  %v6815_v0 = vadd.f32 %v12031_v34, %v6292_v1  ;;  %v12328_v56 = vpop.f32.mrf.mxu1  ;;  %v14778_v8 = vld [vmem:[#allocation37_spill] sm:$0xff] }
 0x3c8   : > { %v5890_v38 = vmul.f32 %v9842_v43, %v5356_v53  ;;  %v5892_v58 = vmul.f32 %v9920_v37, %v5358_v57  ;;  %v5893_v39 = vmul.f32 %v10003_v44, %v5359_v54  ;;  %v4121_v28 = vadd.f32 %v12114_v62, %v9815_v61  ;;  %v14780_v59 = vld [vmem:[#allocation149_spill] sm:$0xff]  ;;  %v12338_v57 = vpop.f32.mrf.mxu0  ;;  %v14782_v62 = vld [vmem:[#allocation167_spill] sm:$0xff] }
 0x3c9   : > { %v5361_v42 = vmax.f32 %v4117_v16, 0.0  ;;  %v6460_v4 = vadd.f32 %v6459_v26, %v5885_v51  ;;  %6944 = vst.msk [vmem:[%s11545_s27 + $0xf0] sm:$0xff] %vm6913_vm0, %v6815_v0  ;;  %v14779_v6 = vmax.f32 %v14778_v8, 0.0  ;;  %v14781_v55 = vmax.f32 %v14780_v59, 0.0  ;;  %v14783_v10 = vld [vmem:[#allocation157_spill] sm:$0xff]  ;;  %v12345_v48 = vpop.f32.mrf.mxu1 }
 0x3ca   : > { %v4794_v53 = vadd.f32 %v12124_v30, %v9889_v23  ;;  %v6468_v54 = vadd.f32 %v5891_v32, %v5890_v38  ;;  %v5894_v27 = vmul.f32 %v9842_v43, %v5360_v29  ;;  %v2937_v1 = vadd.f32 %v14354_v19, %v14782_v62  ;;  %14784 = vst [vmem:[#allocation166_spill] sm:$0xff] %v12345_v48  ;;  %v6297_v29 = vpop.xlane.xlu0 %6296  ;;  %v12354_v0 = vpop.f32.mrf.mxu0  ;;  %v14786_v62 = vld [vmem:[#allocation170_spill] sm:$0xff] }
 0x3cb   : > { %v3328_v17 = vpack.c.bf16 %v14781_v55, %v14779_v6  ;;  %v2939_v51 = vadd.f32 %v14354_v19, %v14783_v10  ;;  %v12348_v16 = vmul.f32 %v9920_v37, %v5362_v46  ;;  %v5363_v26 = vmax.f32 %v4790_v50, 0.0  ;;  %6461 = vadd.xlane.f32.xlu1 %v6460_v4  ;;  %14785 = vst [vmem:[#allocation96_spill] sm:$0xff] %v12354_v0  ;;  %v12356_v55 = vpop.f32.mrf.mxu1  ;;  %v6302_v10 = vpop.xlane.xlu1 %6301 }
 0x3cc   : > { %v4123_v30 = vadd.f32 %v12128_v24, %v9959_v31  ;;  %v4796_v32 = vadd.f32 %v12131_v45, %v9994_v9  ;;  %v5364_v38 = vmax.f32 %v4121_v28, 0.0  ;;  %v3193_v8 = vmax.f32 %v2937_v1, 0.0  ;;  %v12361_v45 = vpop.f32.mrf.mxu0 }
 0x3cd   : > { %4359 = vmatmul.mubr.bf16.gmra.mxu0 %v3328_v17  ;;  %5032 = vmatmul.mubr.bf16.gmra.mxu1 %v3328_v17  ;;  %v3195_v6 = vmax.f32 %v2939_v51, 0.0  ;;  %v6464_v59 = vadd.f32 %v6463_v35, %v5888_v40  ;;  %v5895_v46 = vmul.f32 %v9966_v33, %v5361_v42  ;;  %v5366_v50 = vmax.f32 %v4794_v53, 0.0  ;;  %v12364_v1 = vpop.f32.mrf.mxu1  ;;  %v14787_v42 = vld [vmem:[#allocation86_spill] sm:$0xff]  ;;  %v14788_v51 = vld [vmem:[#allocation100_spill] sm:$0xff] }
 0x3ce   : > { %v5365_v4 = vmax.f32 %v4123_v30, 0.0  ;;  %v4125_v24 = vadd.f32 %v14786_v62, %v9815_v61  ;;  %v5367_v0 = vmax.f32 %v4796_v32, 0.0  ;;  %v6816_v17 = vadd.f32 %v12031_v34, %v6297_v29  ;;  %v12372_v62 = vpop.f32.mrf.mxu0  ;;  %v14789_v32 = vld [vmem:[#allocation162_spill] sm:$0xff] }
 0x3cf   : > { %v3331_v48 = vpack.c.bf16 %v3195_v6, %v3193_v8  ;;  %v6465_v28 = vadd.f32 %v6464_v59, %v5889_v60  ;;  %v5897_v40 = vmul.f32 %v10003_v44, %v5363_v26  ;;  %v4798_v53 = vadd.f32 %v14787_v42, %v9889_v23  ;;  %v12379_v6 = vpop.f32.mrf.mxu1 }
 0x3d0   : > { %v5899_v35 = vmul.f32 %v9966_v33, %v5365_v4  ;;  %v4127_v30 = vadd.f32 %v14788_v51, %v9959_v31  ;;  %v5368_v60 = vmax.f32 %v4125_v24, 0.0  ;;  %6945 = vst.msk [vmem:[%s11545_s27 + $0xf8] sm:$0xff] %vm6913_vm0, %v6816_v17  ;;  %v4800_v29 = vadd.f32 %v14789_v32, %v9994_v9  ;;  %14790 = vst [vmem:[#allocation101_spill] sm:$0xff] %v12379_v6  ;;  %v12384_v51 = vpop.f32.mrf.mxu0  ;;  %v6307_v6 = vpop.xlane.xlu0 %6306 }
 0x3d1   : > { %4368 = vmatprep.mubr.bf16.mxu0 %v3331_v48  ;;  %5041 = vmatprep.mubr.bf16.mxu1 %v3331_v48  ;;  %v6469_v26 = vadd.f32 %v6468_v54, %v5892_v58  ;;  %v6817_v8 = vadd.f32 %v12031_v34, %v6302_v10  ;;  %v6473_v59 = vadd.f32 %v5895_v46, %v5894_v27  ;;  %v14792_v58 = vld [vmem:[#allocation55_spill] sm:$0xff] }
 0x3d2   : > { %v5898_v4 = vmul.f32 %v9842_v43, %v5364_v38  ;;  %6466 = vadd.xlane.f32.xlu0 %v6465_v28  ;;  %v5369_v42 = vmax.f32 %v4127_v30, 0.0  ;;  %v4131_v48 = vadd.f32 %v12185_v36, %v9815_v61  ;;  %14791 = vst [vmem:[#allocation90_spill] sm:$0xff] %v12384_v51  ;;  %v5900_v24 = vmul.f32 %v9920_v37, %v5366_v50  ;;  %v14794_v10 = vld [vmem:[#allocation155_spill] sm:$0xff]  ;;  %v12394_v38 = vpop.f32.mrf.mxu1  ;;  %v14796_v51 = vld [vmem:[#allocation58_spill] sm:$0xff] }
 0x3d3   : > { %v5901_v17 = vmul.f32 %v10003_v44, %v5367_v0  ;;  %v6470_v32 = vadd.f32 %v6469_v26, %v5893_v39  ;;  %6946 = vst.msk [vmem:[%s11545_s27 + $0x100] sm:$0xff] %vm6913_vm0, %v6817_v8  ;;  %v14793_v54 = vmax.f32 %v14792_v58, 0.0  ;;  %v14795_v27 = vmax.f32 %v14794_v10, 0.0  ;;  %v14797_v26 = vld [vmem:[#allocation165_spill] sm:$0xff] }
 0x3d4   : > { %v6478_v28 = vadd.f32 %v5899_v35, %v5898_v4  ;;  %v5370_v30 = vmax.f32 %v4798_v53, 0.0  ;;  %v4804_v36 = vadd.f32 %v12189_v21, %v9889_v23  ;;  %v2941_v50 = vadd.f32 %v14354_v19, %v14796_v51  ;;  %v12405_v35 = vpop.f32.mrf.mxu0  ;;  %v12407_v53 = vpop.f32.mrf.mxu1 }
 0x3d5   : > { %v3330_v46 = vpack.c.bf16 %v14795_v27, %v14793_v54  ;;  %v5902_v39 = vmul.f32 %v9842_v43, %v5368_v60  ;;  %v5371_v0 = vmax.f32 %v4800_v29, 0.0  ;;  %6471 = vadd.xlane.f32.xlu1 %v6470_v32  ;;  %v2943_v8 = vadd.f32 %v14354_v19, %v14797_v26 }
 0x3d6   : > { %v4133_v58 = vadd.f32 %v12196_v22, %v9959_v31  ;;  %v5903_v21 = vmul.f32 %v9966_v33, %v5369_v42  ;;  %v5372_v4 = vmax.f32 %v4131_v48, 0.0  ;;  %v5374_v51 = vmax.f32 %v4804_v36, 0.0  ;;  %v12413_v27 = vpop.f32.mrf.mxu0 }
 0x3d7   : > { %4369 = vmatmul.mubr.bf16.gmra.mxu0 %v3330_v46  ;;  %5042 = vmatmul.mubr.bf16.gmra.mxu1 %v3330_v46  ;;  %v3197_v54 = vmax.f32 %v2941_v50, 0.0  ;;  %v3199_v60 = vmax.f32 %v2943_v8, 0.0  ;;  %v4806_v32 = vadd.f32 %v12202_v5, %v9994_v9  ;;  %v6474_v10 = vadd.f32 %v6473_v59, %v12348_v16  ;;  %v12421_v46 = vpop.f32.mrf.mxu1 }
 0x3d8   : > { %v5373_v29 = vmax.f32 %v4133_v58, 0.0  ;;  %v5904_v22 = vmul.f32 %v9920_v37, %v5370_v30  ;;  %v4135_v26 = vadd.f32 %v12209_v52, %v9815_v61  ;;  %v4808_v42 = vadd.f32 %v12214_v3, %v9889_v23  ;;  %14798 = vst [vmem:[#allocation95_spill] sm:$0xff] %v12421_v46  ;;  %v12425_v59 = vpop.f32.mrf.mxu0  ;;  %v6312_v3 = vpop.xlane.xlu1 %6311  ;;  %v14799_v46 = vld [vmem:[#allocation40_spill] sm:$0xff] }
 0x3d9   : > { %v6818_v48 = vadd.f32 %v12031_v34, %v6307_v6  ;;  %v5905_v36 = vmul.f32 %v10003_v44, %v5371_v0  ;;  %v3333_v5 = vpack.c.bf16 %v3199_v60, %v3197_v54  ;;  %v6475_v16 = vadd.f32 %v6474_v10, %v5897_v40  ;;  %v12432_v6 = vpop.f32.mrf.mxu1 }
 0x3da   : > { %v5907_v50 = vmul.f32 %v9966_v33, %v5373_v29  ;;  %v6483_v8 = vadd.f32 %v5903_v21, %v5902_v39  ;;  %v5906_v30 = vmul.f32 %v9842_v43, %v5372_v4  ;;  %v5375_v58 = vmax.f32 %v4806_v32, 0.0  ;;  %v12438_v21 = vpop.f32.mrf.mxu0 }
 0x3db   : > { %6947 = vst.msk [vmem:[%s11545_s27 + $0x108] sm:$0xff] %vm6913_vm0, %v6818_v48  ;;  %v4137_v52 = vadd.f32 %v12224_v47, %v9959_v31  ;;  %v5908_v54 = vmul.f32 %v9920_v37, %v5374_v51  ;;  %4378 = vmatprep.mubr.bf16.mxu0 %v3333_v5  ;;  %5051 = vmatprep.mubr.bf16.mxu1 %v3333_v5  ;;  %v5376_v60 = vmax.f32 %v4135_v26, 0.0  ;;  %v5378_v47 = vmax.f32 %v4808_v42, 0.0  ;;  %v12440_v32 = vpop.f32.mrf.mxu1  ;;  %v14800_v5 = vld [vmem:[#allocation44_spill] sm:$0xff] }
 0x3dc   : > { %v4810_v40 = vadd.f32 %v12232_v13, %v9994_v9  ;;  %v6479_v39 = vadd.f32 %v6478_v28, %v5900_v24  ;;  %v6488_v4 = vadd.f32 %v5907_v50, %v5906_v30  ;;  %6476 = vadd.xlane.f32.xlu0 %v6475_v16  ;;  %v6819_v48 = vadd.f32 %v12031_v34, %v6312_v3  ;;  %v14802_v13 = vld [vmem:[#allocation174_spill] sm:$0xff]  ;;  %v14804_v42 = vld [vmem:[#allocation60_spill] sm:$0xff] }
 0x3dd   : > { %v5377_v29 = vmax.f32 %v4137_v52, 0.0  ;;  %v4141_v51 = vadd.f32 %v12239_v7, %v9815_v61  ;;  %v14801_v0 = vmax.f32 %v14800_v5, 0.0  ;;  %v14803_v24 = vmax.f32 %v14802_v13, 0.0  ;;  %v14805_v7 = vld [vmem:[#allocation176_spill] sm:$0xff] }
 0x3de   : > { %v6480_v10 = vadd.f32 %v6479_v39, %v5901_v17  ;;  %v5909_v50 = vmul.f32 %v10003_v44, %v5375_v58  ;;  %v4814_v26 = vadd.f32 %v12247_v25, %v9889_v23  ;;  %v2945_v17 = vadd.f32 %v14354_v19, %v14804_v42  ;;  %6948 = vst.msk [vmem:[%s11545_s27 + $0x110] sm:$0xff] %vm6913_vm0, %v6819_v48  ;;  %v12467_v48 = vpop.f32.mrf.mxu1 }
 0x3df   : > { %v3332_v28 = vpack.c.bf16 %v14803_v24, %v14801_v0  ;;  %v5911_v16 = vmul.f32 %v9966_v33, %v5377_v29  ;;  %v5379_v30 = vmax.f32 %v4810_v40, 0.0  ;;  %v2947_v52 = vadd.f32 %v14354_v19, %v14805_v7  ;;  %v12463_v0 = vpop.f32.mrf.mxu0 }
 0x3e0   : > { %6481 = vadd.xlane.f32.xlu1 %v6480_v10  ;;  %v4143_v3 = vadd.f32 %v12251_v63, %v9959_v31  ;;  %v4816_v58 = vadd.f32 %v12258_v49, %v9994_v9  ;;  %14806 = vst [vmem:[#allocation178_spill] sm:$0xff] %v12463_v0  ;;  %v5910_v25 = vmul.f32 %v9842_v43, %v5376_v60  ;;  %v3201_v40 = vmax.f32 %v2945_v17, 0.0  ;;  %v6317_v10 = vpop.xlane.xlu0 %6316 }
 0x3e1   : > { %4379 = vmatmul.mubr.bf16.gmra.mxu0 %v3332_v28  ;;  %v5912_v39 = vmul.f32 %v9920_v37, %v5378_v47  ;;  %5052 = vmatmul.mubr.bf16.gmra.mxu1 %v3332_v28  ;;  %v6484_v29 = vadd.f32 %v6483_v8, %v5904_v22  ;;  %v5380_v5 = vmax.f32 %v4141_v51, 0.0  ;;  %v5382_v13 = vmax.f32 %v4814_v26, 0.0  ;;  %v12469_v63 = vpop.f32.mrf.mxu0  ;;  %v6322_v47 = vpop.xlane.xlu1 %6321 }
 0x3e2   : > { %v3203_v24 = vmax.f32 %v2947_v52, 0.0  ;;  %v5381_v42 = vmax.f32 %v4143_v3, 0.0  ;;  %v5383_v7 = vmax.f32 %v4816_v58, 0.0  ;;  %v4145_v0 = vadd.f32 %v12266_v11, %v9815_v61  ;;  %v12475_v28 = vpop.f32.mrf.mxu1 }
 0x3e3   : > { %v6485_v49 = vadd.f32 %v6484_v29, %v5905_v36  ;;  %v4818_v60 = vadd.f32 %v12270_v18, %v9889_v23  ;;  %v6493_v22 = vadd.f32 %v5911_v16, %v5910_v25  ;;  %v5913_v8 = vmul.f32 %v10003_v44, %v5379_v30  ;;  %v12479_v17 = vpop.f32.mrf.mxu0  ;;  %v14807_v18 = vld [vmem:[#allocation171_spill] sm:$0xff] }
 0x3e4   : > { %v3335_v51 = vpack.c.bf16 %v3203_v24, %v3201_v40  ;;  %v6820_v26 = vadd.f32 %v12031_v34, %v6317_v10  ;;  %v5915_v36 = vmul.f32 %v9966_v33, %v5381_v42  ;;  %v5384_v52 = vmax.f32 %v4145_v0, 0.0  ;;  %v12486_v58 = vpop.f32.mrf.mxu1 }
 0x3e5   : > { %6486 = vadd.xlane.f32.xlu0 %v6485_v49  ;;  %v4147_v11 = vadd.f32 %v12279_v14, %v9959_v31  ;;  %v4820_v3 = vadd.f32 %v14807_v18, %v9994_v9  ;;  %v5914_v16 = vmul.f32 %v9842_v43, %v5380_v5  ;;  %v5386_v30 = vmax.f32 %v4818_v60, 0.0  ;;  %v12492_v0 = vpop.f32.mrf.mxu0  ;;  %v14808_v60 = vld [vmem:[#allocation173_spill] sm:$0xff] }
 0x3e6   : > { %4388 = vmatprep.mubr.bf16.mxu0 %v3335_v51  ;;  %5061 = vmatprep.mubr.bf16.mxu1 %v3335_v51  ;;  %6949 = vst.msk [vmem:[%s11545_s27 + $0x118] sm:$0xff] %vm6913_vm0, %v6820_v26  ;;  %v6489_v25 = vadd.f32 %v6488_v4, %v5908_v54  ;;  %v6821_v40 = vadd.f32 %v12031_v34, %v6322_v47  ;;  %v12496_v42 = vpop.f32.mrf.mxu1  ;;  %v14809_v54 = vmax.f32 %v14808_v60, 0.0  ;;  %v14810_v4 = vld [vmem:[#allocation179_spill] sm:$0xff] }
 0x3e7   : > { %v5916_v14 = vmul.f32 %v9920_v37, %v5382_v13  ;;  %v5917_v29 = vmul.f32 %v10003_v44, %v5383_v7  ;;  %v5385_v10 = vmax.f32 %v4147_v11, 0.0  ;;  %v5387_v24 = vmax.f32 %v4820_v3, 0.0  ;;  %v14812_v11 = vld [vmem:[#allocation188_spill] sm:$0xff] }
 0x3e8   : > { %v6490_v49 = vadd.f32 %v6489_v25, %v5909_v50  ;;  %6950 = vst.msk [vmem:[%s11545_s27 + $0x120] sm:$0xff] %vm6913_vm0, %v6821_v40  ;;  %v4151_v5 = vadd.f32 %v12297_v12, %v9815_v61  ;;  %v14811_v47 = vmax.f32 %v14810_v4, 0.0  ;;  %v4824_v13 = vadd.f32 %v12303_v2, %v9889_v23  ;;  %v14813_v50 = vld [vmem:[#allocation64_spill] sm:$0xff]  ;;  %v12513_v25 = vpop.f32.mrf.mxu0 }
 0x3e9   : > { %v6498_v26 = vadd.f32 %v5915_v36, %v5914_v16  ;;  %v5918_v7 = vmul.f32 %v9842_v43, %v5384_v52  ;;  %v2949_v18 = vadd.f32 %v14354_v19, %v14812_v11  ;;  %v2951_v3 = vadd.f32 %v14354_v19, %v14813_v50  ;;  %14814 = vst [vmem:[#allocation175_spill] sm:$0xff] %v12513_v25  ;;  %v12522_v52 = vpop.f32.mrf.mxu1 }
 0x3ea   : > { %v3334_v51 = vpack.c.bf16 %v14811_v47, %v14809_v54  ;;  %v12516_v12 = vmul.f32 %v9920_v37, %v5386_v30  ;;  %6491 = vadd.xlane.f32.xlu1 %v6490_v49  ;;  %v5388_v40 = vmax.f32 %v4151_v5, 0.0  ;;  %v4153_v2 = vadd.f32 %v12309_v41, %v9959_v31  ;;  %v6327_v47 = vpop.xlane.xlu0 %6326  ;;  %v12525_v30 = vpop.f32.mrf.mxu0 }
 0x3eb   : > { %v4826_v36 = vadd.f32 %v12314_v15, %v9994_v9  ;;  %v5919_v16 = vmul.f32 %v9966_v33, %v5385_v10  ;;  %v3205_v60 = vmax.f32 %v2949_v18, 0.0  ;;  %v3207_v54 = vmax.f32 %v2951_v3, 0.0  ;;  %v12530_v50 = vpop.f32.mrf.mxu1 }
 0x3ec   : > { %4389 = vmatmul.mubr.bf16.gmra.mxu0 %v3334_v51  ;;  %5062 = vmatmul.mubr.bf16.gmra.mxu1 %v3334_v51  ;;  %v6494_v4 = vadd.f32 %v6493_v22, %v5912_v39  ;;  %v12528_v49 = vmul.f32 %v10003_v44, %v5387_v24  ;;  %v5390_v5 = vmax.f32 %v4824_v13, 0.0  ;;  %v5389_v11 = vmax.f32 %v4153_v2, 0.0  ;;  %v6332_v39 = vpop.xlane.xlu1 %6331  ;;  %v12536_v22 = vpop.f32.mrf.mxu0 }
 0x3ed   : > { %v5391_v41 = vmax.f32 %v4826_v36, 0.0  ;;  %v3337_v15 = vpack.c.bf16 %v3207_v54, %v3205_v60  ;;  %v4155_v10 = vadd.f32 %v12321_v20, %v9815_v61  ;;  %v4828_v51 = vadd.f32 %v12328_v56, %v9889_v23  ;;  %v14815_v56 = vld [vmem:[#allocation166_spill] sm:$0xff] }
 0x3ee   : > { %v6495_v25 = vadd.f32 %v6494_v4, %v5913_v8  ;;  %v5922_v24 = vmul.f32 %v9842_v43, %v5388_v40  ;;  %v5923_v13 = vmul.f32 %v9966_v33, %v5389_v11  ;;  %v6822_v18 = vadd.f32 %v12031_v34, %v6327_v47  ;;  %v12543_v8 = vpop.f32.mrf.mxu1  ;;  %v12547_v54 = vpop.f32.mrf.mxu0  ;;  %v12551_v4 = vld [vmem:[#allocation2] ss:$0 sm:$0xff]  ;;  %v14816_v47 = vld [vmem:[#allocation96_spill] sm:$0xff] }
 0x3ef   : > { %v4157_v3 = vadd.f32 %v12338_v57, %v9959_v31  ;;  %4398 = vmatprep.mubr.bf16.mxu0 %v3337_v15  ;;  %5071 = vmatprep.mubr.bf16.mxu1 %v3337_v15  ;;  %v5392_v20 = vmax.f32 %v4155_v10, 0.0  ;;  %v5394_v2 = vmax.f32 %v4828_v51, 0.0  ;;  %v4830_v36 = vadd.f32 %v14815_v56, %v9994_v9 }
 0x3f0   : > { %v6499_v60 = vadd.f32 %v6498_v26, %v5916_v14  ;;  %v6503_v40 = vadd.f32 %v5919_v16, %v5918_v7  ;;  %6496 = vadd.xlane.f32.xlu0 %v6495_v25  ;;  %6951 = vst.msk [vmem:[%s11545_s27 + $0x128] sm:$0xff] %vm6913_vm0, %v6822_v18  ;;  %v6823_v57 = vadd.f32 %v12551_v4, %v6332_v39  ;;  %v12556_v15 = vpop.f32.mrf.mxu1  ;;  %v14818_v16 = vld [vmem:[#allocation46_spill] sm:$0xff] }
 0x3f1   : > { %v5393_v34 = vmax.f32 %v4157_v3, 0.0  ;;  %v4161_v11 = vadd.f32 %v14816_v47, %v9815_v61  ;;  %14817 = vst [vmem:[#allocation172_spill] sm:$0xff] %v12556_v15  ;;  %v5924_v10 = vmul.f32 %v9920_v37, %v5390_v5  ;;  %v6508_v14 = vadd.f32 %v5923_v13, %v5922_v24  ;;  %v14820_v3 = vld [vmem:[#allocation45_spill] sm:$0xff]  ;;  %v14822_v5 = vld [vmem:[#allocation39_spill] sm:$0xff] }
 0x3f2   : > { %v5925_v26 = vmul.f32 %v10003_v44, %v5391_v41  ;;  %v6500_v51 = vadd.f32 %v6499_v60, %v5917_v29  ;;  %v5926_v7 = vmul.f32 %v9842_v43, %v5392_v20  ;;  %v5395_v25 = vmax.f32 %v4830_v36, 0.0  ;;  %6952 = vst.msk [vmem:[%s11545_s27 + $0x130] sm:$0xff] %vm6913_vm0, %v6823_v57  ;;  %v14823_v41 = vld [vmem:[#allocation187_spill] sm:$0xff]  ;;  %v12578_v20 = vpop.f32.mrf.mxu0  ;;  %v12580_v36 = vpop.f32.mrf.mxu1 }
 0x3f3   : > { %v14819_v18 = vmax.f32 %v14818_v16, 0.0  ;;  %v14821_v39 = vmax.f32 %v14820_v3, 0.0  ;;  %v4834_v47 = vadd.f32 %v12356_v55, %v9889_v23  ;;  %v12570_v15 = vmul.f32 %v9920_v37, %v5394_v2 }
 0x3f4   : > { %6501 = vadd.xlane.f32.xlu1 %v6500_v51  ;;  %v2953_v29 = vadd.f32 %v14354_v19, %v14822_v5  ;;  %v2955_v24 = vadd.f32 %v14354_v19, %v14823_v41  ;;  %v4163_v13 = vadd.f32 %v12361_v45, %v9959_v31  ;;  %v5927_v60 = vmul.f32 %v9966_v33, %v5393_v34  ;;  %v6337_v51 = vpop.xlane.xlu0 %6336  ;;  %v12586_v45 = vpop.f32.mrf.mxu0 }
 0x3f5   : > { %v3336_v56 = vpack.c.bf16 %v14821_v39, %v14819_v18  ;;  %v5396_v55 = vmax.f32 %v4161_v11, 0.0  ;;  %v5398_v2 = vmax.f32 %v4834_v47, 0.0  ;;  %v4836_v57 = vadd.f32 %v12364_v1, %v9994_v9  ;;  %v14824_v11 = vld [vmem:[#allocation101_spill] sm:$0xff]  ;;  %v12593_v47 = vpop.f32.mrf.mxu1 }
 0x3f6   : > { %v3209_v16 = vmax.f32 %v2953_v29, 0.0  ;;  %v3211_v18 = vmax.f32 %v2955_v24, 0.0  ;;  %v5397_v19 = vmax.f32 %v4163_v13, 0.0  ;;  %v6504_v3 = vadd.f32 %v6503_v40, %v12516_v12  ;;  %14825 = vst [vmem:[#allocation61_spill] sm:$0xff] %v12593_v47  ;;  %v6342_v40 = vpop.xlane.xlu1 %6341  ;;  %v12598_v24 = vpop.f32.mrf.mxu0 }
 0x3f7   : > { %4399 = vmatmul.mubr.bf16.gmra.mxu0 %v3336_v56  ;;  %5072 = vmatmul.mubr.bf16.gmra.mxu1 %v3336_v56  ;;  %v5929_v39 = vmul.f32 %v10003_v44, %v5395_v25  ;;  %v5399_v5 = vmax.f32 %v4836_v57, 0.0  ;;  %v4165_v34 = vadd.f32 %v12372_v62, %v9815_v61  ;;  %v4838_v56 = vadd.f32 %v14824_v11, %v9889_v23  ;;  %v14826_v57 = vld [vmem:[#allocation90_spill] sm:$0xff]  ;;  %v12604_v47 = vpop.f32.mrf.mxu1 }
 0x3f8   : > { %v3339_v1 = vpack.c.bf16 %v3211_v18, %v3209_v16  ;;  %v5931_v29 = vmul.f32 %v9966_v33, %v5397_v19  ;;  %v6505_v41 = vadd.f32 %v6504_v3, %v12528_v49  ;;  %v6824_v12 = vadd.f32 %v12551_v4, %v6337_v51 }
 0x3f9   : > { %v6513_v25 = vadd.f32 %v5927_v60, %v5926_v7  ;;  %v5930_v13 = vmul.f32 %v9842_v43, %v5396_v55  ;;  %v5932_v62 = vmul.f32 %v9920_v37, %v5398_v2  ;;  %v4167_v11 = vadd.f32 %v14826_v57, %v9959_v31  ;;  %v12613_v55 = vpop.f32.mrf.mxu0  ;;  %v12616_v3 = vpop.f32.mrf.mxu1  ;;  %v14828_v57 = vld [vmem:[#allocation48_spill] sm:$0xff] }
 0x3fa   : > { %4408 = vmatprep.mubr.bf16.mxu0 %v3339_v1  ;;  %5081 = vmatprep.mubr.bf16.mxu1 %v3339_v1  ;;  %v12607_v16 = vmul.f32 %v10003_v44, %v5399_v5  ;;  %v5400_v49 = vmax.f32 %v4165_v34, 0.0  ;;  %6953 = vst.msk [vmem:[%s11545_s27 + $0x138] sm:$0xff] %vm6913_vm0, %v6824_v12  ;;  %v4840_v7 = vadd.f32 %v12394_v38, %v9994_v9  ;;  %v5402_v51 = vmax.f32 %v4838_v56, 0.0 }
 0x3fb   : > { %v6509_v60 = vadd.f32 %v6508_v14, %v5924_v10  ;;  %v6518_v2 = vadd.f32 %v5931_v29, %v5930_v13  ;;  %6506 = vadd.xlane.f32.xlu0 %v6505_v41  ;;  %v5401_v18 = vmax.f32 %v4167_v11, 0.0  ;;  %v6825_v19 = vadd.f32 %v12551_v4, %v6342_v40  ;;  %v12633_v40 = vpop.f32.mrf.mxu0 }
 0x3fc   : > { %v5403_v5 = vmax.f32 %v4840_v7, 0.0  ;;  %v4171_v34 = vadd.f32 %v12405_v35, %v9815_v61  ;;  %v14827_v12 = vmax.f32 %v14799_v46, 0.0  ;;  %v14829_v38 = vmax.f32 %v14828_v57, 0.0  ;;  %v6347_v7 = vpop.xlane.xlu0 %6346 }
 0x3fd   : > { %v6510_v1 = vadd.f32 %v6509_v60, %v5925_v26  ;;  %v5935_v14 = vmul.f32 %v9966_v33, %v5401_v18  ;;  %6954 = vst.msk [vmem:[%s11545_s27 + $0x140] sm:$0xff] %vm6913_vm0, %v6825_v19  ;;  %v4844_v56 = vadd.f32 %v12407_v53, %v9889_v23  ;;  %v4173_v29 = vadd.f32 %v12413_v27, %v9959_v31  ;;  %v14830_v26 = vld [vmem:[#allocation95_spill] sm:$0xff]  ;;  %v12639_v53 = vpop.f32.mrf.mxu1 }
 0x3fe   : > { %v3338_v10 = vpack.c.bf16 %v14829_v38, %v14827_v12  ;;  %v4846_v41 = vadd.f32 %v14830_v26, %v9994_v9  ;;  %v5934_v35 = vmul.f32 %v9842_v43, %v5400_v49  ;;  %v5404_v46 = vmax.f32 %v4171_v34, 0.0  ;;  %v12642_v12 = vpop.f32.mrf.mxu0 }
 0x3ff   : > { %6511 = vadd.xlane.f32.xlu1 %v6510_v1  ;;  %v6514_v13 = vadd.f32 %v6513_v25, %v12570_v15  ;;  %v4175_v11 = vadd.f32 %v12425_v59, %v9815_v61  ;;  %v5936_v27 = vmul.f32 %v9920_v37, %v5402_v51  ;;  %v5406_v60 = vmax.f32 %v4844_v56, 0.0  ;;  %v6352_v59 = vpop.xlane.xlu1 %6351  ;;  %v12647_v25 = vpop.f32.mrf.mxu1 }
 0x400   : > { %4409 = vmatmul.mubr.bf16.gmra.mxu0 %v3338_v10  ;;  %5082 = vmatmul.mubr.bf16.gmra.mxu1 %v3338_v10  ;;  %v5405_v18 = vmax.f32 %v4173_v29, 0.0  ;;  %v5407_v19 = vmax.f32 %v4846_v41, 0.0  ;;  %v5937_v49 = vmul.f32 %v10003_v44, %v5403_v5  ;;  %v4848_v15 = vadd.f32 %v12432_v6, %v9889_v23  ;;  %v12652_v56 = vpop.f32.mrf.mxu0 }
 0x401   : > { %v6515_v1 = vadd.f32 %v6514_v13, %v5929_v39  ;;  %v5408_v34 = vmax.f32 %v4175_v11, 0.0  ;;  %v6523_v57 = vadd.f32 %v5935_v14, %v5934_v35  ;;  %v5938_v51 = vmul.f32 %v9842_v43, %v5404_v46  ;;  %v12660_v29 = vpop.f32.mrf.mxu1  ;;  %v14831_v46 = vld [vmem:[#allocation178_spill] sm:$0xff] }
 0x402   : > { %v5940_v38 = vmul.f32 %v9920_v37, %v5406_v60  ;;  %v6826_v10 = vadd.f32 %v12551_v4, %v6347_v7  ;;  %v5939_v5 = vmul.f32 %v9966_v33, %v5405_v18  ;;  %v5941_v39 = vmul.f32 %v10003_v44, %v5407_v19  ;;  %v12667_v11 = vpop.f32.mrf.mxu0 }
 0x403   : > { %6516 = vadd.xlane.f32.xlu0 %v6515_v1  ;;  %v4177_v6 = vadd.f32 %v12438_v21, %v9959_v31  ;;  %v4850_v14 = vadd.f32 %v12440_v32, %v9994_v9  ;;  %v5410_v26 = vmax.f32 %v4848_v15, 0.0  ;;  %v6519_v41 = vadd.f32 %v6518_v2, %v5932_v62  ;;  %v12672_v18 = vpop.f32.mrf.mxu1 }
 0x404   : > { %6955 = vst.msk [vmem:[%s11545_s27 + $0x148] sm:$0xff] %vm6913_vm0, %v6826_v10  ;;  %v6827_v35 = vadd.f32 %v12551_v4, %v6352_v59  ;;  %v4181_v13 = vadd.f32 %v14831_v46, %v9815_v61  ;;  %v5942_v7 = vmul.f32 %v9842_v43, %v5408_v34  ;;  %v4854_v32 = vadd.f32 %v12467_v48, %v9889_v23  ;;  %v12681_v15 = vpop.f32.mrf.mxu0 }
 0x405   : > { %v5409_v60 = vmax.f32 %v4177_v6, 0.0  ;;  %v5411_v21 = vmax.f32 %v4850_v14, 0.0  ;;  %v6520_v19 = vadd.f32 %v6519_v41, %v12607_v16  ;;  %v4183_v2 = vadd.f32 %v12469_v63, %v9959_v31  ;;  %v6357_v6 = vpop.xlane.xlu0 %6356  ;;  %v12684_v14 = vpop.f32.mrf.mxu1 }
 0x406   : > { %6956 = vst.msk [vmem:[%s11545_s27 + $0x150] sm:$0xff] %vm6913_vm0, %v6827_v35  ;;  %v5412_v62 = vmax.f32 %v4181_v13, 0.0  ;;  %v4856_v1 = vadd.f32 %v12475_v28, %v9994_v9  ;;  %v6528_v34 = vadd.f32 %v5939_v5, %v5938_v51  ;;  %v5414_v10 = vmax.f32 %v4854_v32, 0.0  ;;  %v12689_v46 = vpop.f32.mrf.mxu0 }
 0x407   : > { %v5943_v59 = vmul.f32 %v9966_v33, %v5409_v60  ;;  %v6524_v48 = vadd.f32 %v6523_v57, %v5936_v27  ;;  %v5944_v16 = vmul.f32 %v9920_v37, %v5410_v26  ;;  %6521 = vadd.xlane.f32.xlu1 %v6520_v19  ;;  %v5413_v41 = vmax.f32 %v4183_v2, 0.0  ;;  %v6362_v57 = vpop.xlane.xlu1 %6361  ;;  %v12695_v13 = vpop.f32.mrf.mxu1 }
 0x408   : > { %v5415_v35 = vmax.f32 %v4856_v1, 0.0  ;;  %v4185_v63 = vadd.f32 %v12479_v17, %v9815_v61  ;;  %v5945_v28 = vmul.f32 %v10003_v44, %v5411_v21  ;;  %v5946_v51 = vmul.f32 %v9842_v43, %v5412_v62  ;;  %v12700_v19 = vpop.f32.mrf.mxu0 }
 0x409   : > { %v6525_v5 = vadd.f32 %v6524_v48, %v5937_v49  ;;  %v4858_v27 = vadd.f32 %v12486_v58, %v9889_v23  ;;  %v6533_v26 = vadd.f32 %v5943_v59, %v5942_v7  ;;  %v5948_v60 = vmul.f32 %v9920_v37, %v5414_v10  ;;  %v12706_v2 = vpop.f32.mrf.mxu1  ;;  %v14832_v10 = vld [vmem:[#allocation175_spill] sm:$0xff] }
 0x40a   : > { %v5947_v32 = vmul.f32 %v9966_v33, %v5413_v41  ;;  %v6828_v17 = vadd.f32 %v12551_v4, %v6357_v6  ;;  %v5416_v21 = vmax.f32 %v4185_v63, 0.0  ;;  %v4187_v49 = vadd.f32 %v12492_v0, %v9959_v31 }
 0x40b   : > { %6526 = vadd.xlane.f32.xlu0 %v6525_v5  ;;  %v4860_v58 = vadd.f32 %v12496_v42, %v9994_v9  ;;  %v6529_v62 = vadd.f32 %v6528_v34, %v5940_v38  ;;  %v5949_v7 = vmul.f32 %v10003_v44, %v5415_v35  ;;  %v5418_v1 = vmax.f32 %v4858_v27, 0.0  ;;  %v12714_v5 = vpop.f32.mrf.mxu0  ;;  %v12724_v27 = vpop.f32.mrf.mxu1 }
 0x40c   : > { %6957 = vst.msk [vmem:[%s11545_s27 + $0x158] sm:$0xff] %vm6913_vm0, %v6828_v17  ;;  %v6829_v59 = vadd.f32 %v12551_v4, %v6362_v57  ;;  %v4191_v48 = vadd.f32 %v14832_v10, %v9815_v61  ;;  %v6538_v6 = vadd.f32 %v5947_v32, %v5946_v51  ;;  %v5417_v41 = vmax.f32 %v4187_v49, 0.0  ;;  %v6367_v17 = vpop.xlane.xlu0 %6366  ;;  %v6372_v10 = vpop.xlane.xlu1 %6371 }
 0x40d   : > { %v5419_v63 = vmax.f32 %v4860_v58, 0.0  ;;  %v6530_v0 = vadd.f32 %v6529_v62, %v5941_v39  ;;  %v4864_v38 = vadd.f32 %v12522_v52, %v9889_v23  ;;  %v4193_v34 = vadd.f32 %v12525_v30, %v9959_v31 }
 0x40e   : > { %6958 = vst.msk [vmem:[%s11545_s27 + $0x160] sm:$0xff] %vm6913_vm0, %v6829_v59  ;;  %v5420_v42 = vmax.f32 %v4191_v48, 0.0  ;;  %v4866_v35 = vadd.f32 %v12530_v50, %v9994_v9  ;;  %v5950_v51 = vmul.f32 %v9842_v43, %v5416_v21  ;;  %v5951_v39 = vmul.f32 %v9966_v33, %v5417_v41  ;;  %v12734_v48 = vpop.f32.mrf.mxu0  ;;  %v12739_v41 = vpop.f32.mrf.mxu1 }
 0x40f   : > { %6531 = vadd.xlane.f32.xlu1 %v6530_v0  ;;  %v6534_v57 = vadd.f32 %v6533_v26, %v5944_v16  ;;  %v4195_v32 = vadd.f32 %v12536_v22, %v9815_v61  ;;  %v5952_v52 = vmul.f32 %v9920_v37, %v5418_v1  ;;  %v5422_v49 = vmax.f32 %v4864_v38, 0.0  ;;  %v14833_v0 = vld [vmem:[#allocation172_spill] sm:$0xff] }
 0x410   : > { %v5421_v58 = vmax.f32 %v4193_v34, 0.0  ;;  %v5423_v30 = vmax.f32 %v4866_v35, 0.0  ;;  %v5953_v62 = vmul.f32 %v10003_v44, %v5419_v63  ;;  %v4868_v21 = vadd.f32 %v12543_v8, %v9889_v23  ;;  %v12747_v34 = vpop.f32.mrf.mxu0 }
 0x411   : > { %v6535_v50 = vadd.f32 %v6534_v57, %v5945_v28  ;;  %v5424_v59 = vmax.f32 %v4195_v32, 0.0  ;;  %v6543_v16 = vadd.f32 %v5951_v39, %v5950_v51  ;;  %v5954_v22 = vmul.f32 %v9842_v43, %v5420_v42  ;;  %v12754_v57 = vpop.f32.mrf.mxu1 }
 0x412   : > { %v5956_v26 = vmul.f32 %v9920_v37, %v5422_v49  ;;  %v6830_v1 = vadd.f32 %v12551_v4, %v6367_v17  ;;  %v5955_v63 = vmul.f32 %v9966_v33, %v5421_v58  ;;  %v5957_v28 = vmul.f32 %v10003_v44, %v5423_v30  ;;  %v12759_v58 = vpop.f32.mrf.mxu0 }
 0x413   : > { %6536 = vadd.xlane.f32.xlu0 %v6535_v50  ;;  %v4197_v8 = vadd.f32 %v12547_v54, %v9959_v31  ;;  %v4870_v38 = vadd.f32 %v14833_v0, %v9994_v9  ;;  %v5426_v42 = vmax.f32 %v4868_v21, 0.0  ;;  %v6539_v35 = vadd.f32 %v6538_v6, %v5948_v60  ;;  %v12767_v21 = vpop.f32.mrf.mxu1 }
 0x414   : > { %6959 = vst.msk [vmem:[%s11545_s27 + $0x168] sm:$0xff] %vm6913_vm0, %v6830_v1  ;;  %v6831_v51 = vadd.f32 %v12551_v4, %v6372_v10  ;;  %v4201_v39 = vadd.f32 %v12578_v20, %v9815_v61  ;;  %v5958_v32 = vmul.f32 %v9842_v43, %v5424_v59  ;;  %v4874_v49 = vadd.f32 %v12580_v36, %v9889_v23  ;;  %v14834_v20 = vld [vmem:[#allocation61_spill] sm:$0xff]  ;;  %v6377_v36 = vpop.xlane.xlu0 %6376  ;;  %v12770_v0 = vpop.f32.mrf.mxu0 }
 0x415   : > { %v5425_v17 = vmax.f32 %v4197_v8, 0.0  ;;  %v5427_v54 = vmax.f32 %v4870_v38, 0.0  ;;  %v6540_v30 = vadd.f32 %v6539_v35, %v5949_v7  ;;  %v4203_v6 = vadd.f32 %v12586_v45, %v9959_v31 }
 0x416   : > { %6960 = vst.msk [vmem:[%s11545_s27 + $0x170] sm:$0xff] %vm6913_vm0, %v6831_v51  ;;  %v5428_v60 = vmax.f32 %v4201_v39, 0.0  ;;  %v4876_v50 = vadd.f32 %v14834_v20, %v9994_v9  ;;  %v6548_v59 = vadd.f32 %v5955_v63, %v5954_v22  ;;  %v5430_v1 = vmax.f32 %v4874_v49, 0.0  ;;  %v12775_v51 = vpop.f32.mrf.mxu1 }
 0x417   : > { %v5959_v10 = vmul.f32 %v9966_v33, %v5425_v17  ;;  %v6544_v8 = vadd.f32 %v6543_v16, %v5952_v52  ;;  %v5960_v7 = vmul.f32 %v9920_v37, %v5426_v42  ;;  %6541 = vadd.xlane.f32.xlu1 %v6540_v30  ;;  %v5429_v38 = vmax.f32 %v4203_v6, 0.0  ;;  %v6382_v16 = vpop.xlane.xlu1 %6381  ;;  %v12788_v6 = vpop.f32.mrf.mxu0 }
 0x418   : > { %v5431_v35 = vmax.f32 %v4876_v50, 0.0  ;;  %v4205_v45 = vadd.f32 %v12598_v24, %v9815_v61  ;;  %v5961_v39 = vmul.f32 %v10003_v44, %v5427_v54  ;;  %v5962_v22 = vmul.f32 %v9842_v43, %v5428_v60 }
 0x419   : > { %v6545_v63 = vadd.f32 %v6544_v8, %v5953_v62  ;;  %v4878_v52 = vadd.f32 %v12604_v47, %v9889_v23  ;;  %v6553_v17 = vadd.f32 %v5959_v10, %v5958_v32  ;;  %v5964_v42 = vmul.f32 %v9920_v37, %v5430_v1  ;;  %v12796_v10 = vpop.f32.mrf.mxu1 }
 0x41a   : > { %v5963_v49 = vmul.f32 %v9966_v33, %v5429_v38  ;;  %v6832_v30 = vadd.f32 %v12551_v4, %v6377_v36  ;;  %v5432_v24 = vmax.f32 %v4205_v45, 0.0  ;;  %v4207_v54 = vadd.f32 %v12613_v55, %v9959_v31 }
 0x41b   : > { %6546 = vadd.xlane.f32.xlu0 %v6545_v63  ;;  %v4880_v62 = vadd.f32 %v12616_v3, %v9994_v9  ;;  %v6549_v60 = vadd.f32 %v6548_v59, %v5956_v26  ;;  %v5965_v47 = vmul.f32 %v10003_v44, %v5431_v35  ;;  %v5434_v32 = vmax.f32 %v4878_v52, 0.0  ;;  %v12798_v3 = vpop.f32.mrf.mxu0  ;;  %v12808_v35 = vpop.f32.mrf.mxu1 }
 0x41c   : > { %6961 = vst.msk [vmem:[%s11545_s27 + $0x178] sm:$0xff] %vm6913_vm0, %v6832_v30  ;;  %v6833_v20 = vadd.f32 %v12551_v4, %v6382_v16  ;;  %v4211_v50 = vadd.f32 %v12633_v40, %v9815_v61  ;;  %v6558_v1 = vadd.f32 %v5963_v49, %v5962_v22  ;;  %v5433_v55 = vmax.f32 %v4207_v54, 0.0  ;;  %v6387_v52 = vpop.xlane.xlu0 %6386 }
 0x41d   : > { %v5435_v8 = vmax.f32 %v4880_v62, 0.0  ;;  %v6550_v36 = vadd.f32 %v6549_v60, %v5957_v28  ;;  %v4884_v59 = vadd.f32 %v12639_v53, %v9889_v23  ;;  %v4213_v38 = vadd.f32 %v12642_v12, %v9959_v31  ;;  %v12814_v16 = vpop.f32.mrf.mxu0 }
 0x41e   : > { %6962 = vst.msk [vmem:[%s11545_s27 + $0x180] sm:$0xff] %vm6913_vm0, %v6833_v20  ;;  %v5436_v26 = vmax.f32 %v4211_v50, 0.0  ;;  %v4886_v40 = vadd.f32 %v12647_v25, %v9994_v9  ;;  %v5966_v45 = vmul.f32 %v9842_v43, %v5432_v24  ;;  %v5967_v28 = vmul.f32 %v9966_v33, %v5433_v55  ;;  %v12817_v25 = vpop.f32.mrf.mxu1 }
 0x41f   : > { %6551 = vadd.xlane.f32.xlu1 %v6550_v36  ;;  %v6554_v22 = vadd.f32 %v6553_v17, %v5960_v7  ;;  %v4215_v63 = vadd.f32 %v12652_v56, %v9815_v61  ;;  %v5968_v53 = vmul.f32 %v9920_v37, %v5434_v32  ;;  %v5438_v12 = vmax.f32 %v4884_v59, 0.0  ;;  %v6392_v17 = vpop.xlane.xlu1 %6391  ;;  %v12822_v56 = vpop.f32.mrf.mxu0 }
 0x420   : > { %v5437_v49 = vmax.f32 %v4213_v38, 0.0  ;;  %v5439_v30 = vmax.f32 %v4886_v40, 0.0  ;;  %v5969_v54 = vmul.f32 %v10003_v44, %v5435_v8  ;;  %v4888_v7 = vadd.f32 %v12660_v29, %v9889_v23  ;;  %v12827_v55 = vpop.f32.mrf.mxu1 }
 0x421   : > { %v6555_v24 = vadd.f32 %v6554_v22, %v5961_v39  ;;  %v5440_v62 = vmax.f32 %v4215_v63, 0.0  ;;  %v6563_v60 = vadd.f32 %v5967_v28, %v5966_v45  ;;  %v5970_v20 = vmul.f32 %v9842_v43, %v5436_v26  ;;  %v12840_v45 = vpop.f32.mrf.mxu0 }
 0x422   : > { %v5972_v32 = vmul.f32 %v9920_v37, %v5438_v12  ;;  %v6834_v50 = vadd.f32 %v12551_v4, %v6387_v52  ;;  %v5971_v8 = vmul.f32 %v9966_v33, %v5437_v49  ;;  %v5973_v39 = vmul.f32 %v10003_v44, %v5439_v30  ;;  %v12845_v52 = vpop.f32.mrf.mxu1 }
 0x423   : > { %6556 = vadd.xlane.f32.xlu0 %v6555_v24  ;;  %v4217_v29 = vadd.f32 %v12667_v11, %v9959_v31  ;;  %v4890_v36 = vadd.f32 %v12672_v18, %v9994_v9  ;;  %v5442_v59 = vmax.f32 %v4888_v7, 0.0  ;;  %v6559_v26 = vadd.f32 %v6558_v1, %v5964_v42  ;;  %v12853_v12 = vpop.f32.mrf.mxu0 }
 0x424   : > { %6963 = vst.msk [vmem:[%s11545_s27 + $0x188] sm:$0xff] %vm6913_vm0, %v6834_v50  ;;  %v6835_v38 = vadd.f32 %v12551_v4, %v6392_v17  ;;  %v4221_v40 = vadd.f32 %v12681_v15, %v9815_v61  ;;  %v5974_v28 = vmul.f32 %v9842_v43, %v5440_v62  ;;  %v4894_v11 = vadd.f32 %v12684_v14, %v9889_v23  ;;  %v6397_v14 = vpop.xlane.xlu0 %6396  ;;  %v12856_v7 = vpop.f32.mrf.mxu1 }
 0x425   : > { %v5441_v22 = vmax.f32 %v4217_v29, 0.0  ;;  %v5443_v63 = vmax.f32 %v4890_v36, 0.0  ;;  %v6560_v18 = vadd.f32 %v6559_v26, %v5965_v47  ;;  %v4223_v1 = vadd.f32 %v12689_v46, %v9959_v31  ;;  %v12861_v29 = vpop.f32.mrf.mxu0 }
 0x426   : > { %6964 = vst.msk [vmem:[%s11545_s27 + $0x190] sm:$0xff] %vm6913_vm0, %v6835_v38  ;;  %v5444_v42 = vmax.f32 %v4221_v40, 0.0  ;;  %v4896_v15 = vadd.f32 %v12695_v13, %v9994_v9  ;;  %v6568_v49 = vadd.f32 %v5971_v8, %v5970_v20  ;;  %v5446_v24 = vmax.f32 %v4894_v11, 0.0  ;;  %v12867_v36 = vpop.f32.mrf.mxu1 }
 0x427   : > { %v5975_v30 = vmul.f32 %v9966_v33, %v5441_v22  ;;  %v6564_v62 = vadd.f32 %v6563_v60, %v5968_v53  ;;  %v5976_v47 = vmul.f32 %v9920_v37, %v5442_v59  ;;  %6561 = vadd.xlane.f32.xlu1 %v6560_v18  ;;  %v5445_v17 = vmax.f32 %v4223_v1, 0.0  ;;  %v6402_v60 = vpop.xlane.xlu1 %6401  ;;  %v12872_v40 = vpop.f32.mrf.mxu0 }
 0x428   : > { %v5447_v50 = vmax.f32 %v4896_v15, 0.0  ;;  %v4225_v46 = vadd.f32 %v12700_v19, %v9815_v61  ;;  %v5977_v13 = vmul.f32 %v10003_v44, %v5443_v63  ;;  %v5978_v20 = vmul.f32 %v9842_v43, %v5444_v42  ;;  %v12878_v11 = vpop.f32.mrf.mxu1 }
 0x429   : > { %v6565_v8 = vadd.f32 %v6564_v62, %v5969_v54  ;;  %v4898_v53 = vadd.f32 %v12706_v2, %v9889_v23  ;;  %v6573_v59 = vadd.f32 %v5975_v30, %v5974_v28  ;;  %v5980_v26 = vmul.f32 %v9920_v37, %v5446_v24 }
 0x42a   : > { %v5979_v38 = vmul.f32 %v9966_v33, %v5445_v17  ;;  %v6836_v19 = vadd.f32 %v12551_v4, %v6397_v14  ;;  %v5448_v22 = vmax.f32 %v4225_v46, 0.0  ;;  %v4227_v54 = vadd.f32 %v12714_v5, %v9959_v31  ;;  %v12894_v14 = vpop.f32.mrf.mxu0  ;;  %v6407_v46 = vpop.xlane.xlu0 %6406 }
 0x42b   : > { %6566 = vadd.xlane.f32.xlu0 %v6565_v8  ;;  %v4900_v2 = vadd.f32 %v12724_v27, %v9994_v9  ;;  %v6569_v63 = vadd.f32 %v6568_v49, %v5972_v32  ;;  %v5981_v28 = vmul.f32 %v10003_v44, %v5447_v50  ;;  %v5450_v18 = vmax.f32 %v4898_v53, 0.0 }
 0x42c   : > { %6965 = vst.msk [vmem:[%s11545_s27 + $0x198] sm:$0xff] %vm6913_vm0, %v6836_v19  ;;  %v6837_v42 = vadd.f32 %v12551_v4, %v6402_v60  ;;  %v4231_v1 = vadd.f32 %v12734_v48, %v9815_v61  ;;  %v6578_v15 = vadd.f32 %v5979_v38, %v5978_v20  ;;  %v5449_v30 = vmax.f32 %v4227_v54, 0.0  ;;  %v12900_v20 = vpop.f32.mrf.mxu1 }
 0x42d   : > { %v5451_v24 = vmax.f32 %v4900_v2, 0.0  ;;  %v6570_v5 = vadd.f32 %v6569_v63, %v5973_v39  ;;  %v4904_v32 = vadd.f32 %v12739_v41, %v9889_v23  ;;  %v4233_v49 = vadd.f32 %v12747_v34, %v9959_v31 }
 0x42e   : > { %6966 = vst.msk [vmem:[%s11545_s27 + $0x1a0] sm:$0xff] %vm6913_vm0, %v6837_v42  ;;  %v5452_v27 = vmax.f32 %v4231_v1, 0.0  ;;  %v4906_v62 = vadd.f32 %v12754_v57, %v9994_v9  ;;  %v5982_v48 = vmul.f32 %v9842_v43, %v5448_v22  ;;  %v5983_v17 = vmul.f32 %v9966_v33, %v5449_v30  ;;  %v12903_v57 = vpop.f32.mrf.mxu0 }
 0x42f   : > { %6571 = vadd.xlane.f32.xlu1 %v6570_v5  ;;  %v6574_v39 = vadd.f32 %v6573_v59, %v5976_v47  ;;  %v4235_v50 = vadd.f32 %v12759_v58, %v9815_v61  ;;  %v5984_v41 = vmul.f32 %v9920_v37, %v5450_v18  ;;  %v5454_v34 = vmax.f32 %v4904_v32, 0.0  ;;  %v6412_v59 = vpop.xlane.xlu1 %6411  ;;  %v12908_v58 = vpop.f32.mrf.mxu1 }
 0x430   : > { %v5453_v8 = vmax.f32 %v4233_v49, 0.0  ;;  %v5455_v53 = vmax.f32 %v4906_v62, 0.0  ;;  %v5985_v60 = vmul.f32 %v10003_v44, %v5451_v24  ;;  %v4908_v47 = vadd.f32 %v12767_v21, %v9889_v23  ;;  %v12913_v18 = vpop.f32.mrf.mxu0 }
 0x431   : > { %v6575_v38 = vadd.f32 %v6574_v39, %v5977_v13  ;;  %v5456_v19 = vmax.f32 %v4235_v50, 0.0  ;;  %v6583_v22 = vadd.f32 %v5983_v17, %v5982_v48  ;;  %v5986_v54 = vmul.f32 %v9842_v43, %v5452_v27  ;;  %v12921_v30 = vpop.f32.mrf.mxu1 }
 0x432   : > { %v5988_v2 = vmul.f32 %v9920_v37, %v5454_v34  ;;  %v6838_v63 = vadd.f32 %v12551_v4, %v6407_v46  ;;  %v5987_v42 = vmul.f32 %v9966_v33, %v5453_v8  ;;  %v5989_v13 = vmul.f32 %v10003_v44, %v5455_v53  ;;  %v12928_v49 = vpop.f32.mrf.mxu0  ;;  %v6417_v53 = vpop.xlane.xlu0 %6416 }
 0x433   : > { %6576 = vadd.xlane.f32.xlu0 %v6575_v38  ;;  %v4237_v21 = vadd.f32 %v12770_v0, %v9959_v31  ;;  %v4910_v1 = vadd.f32 %v12775_v51, %v9994_v9  ;;  %v5458_v24 = vmax.f32 %v4908_v47, 0.0  ;;  %v6579_v5 = vadd.f32 %v6578_v15, %v5980_v26  ;;  %v12933_v17 = vpop.f32.mrf.mxu1 }
 0x434   : > { %6967 = vst.msk [vmem:[%s11545_s27 + $0x1a8] sm:$0xff] %vm6913_vm0, %v6838_v63  ;;  %v6839_v27 = vadd.f32 %v12551_v4, %v6412_v59  ;;  %v4241_v32 = vadd.f32 %v12788_v6, %v9815_v61  ;;  %v5990_v62 = vmul.f32 %v9842_v43, %v5456_v19  ;;  %v4914_v51 = vadd.f32 %v12796_v10, %v9889_v23  ;;  %v12945_v47 = vpop.f32.mrf.mxu0 }
 0x435   : > { %v5457_v48 = vmax.f32 %v4237_v21, 0.0  ;;  %v5459_v0 = vmax.f32 %v4910_v1, 0.0  ;;  %v6580_v39 = vadd.f32 %v6579_v5, %v5981_v28  ;;  %v4243_v15 = vadd.f32 %v12798_v3, %v9959_v31 }
 0x436   : > { %6968 = vst.msk [vmem:[%s11545_s27 + $0x1b0] sm:$0xff] %vm6913_vm0, %v6839_v27  ;;  %v5460_v26 = vmax.f32 %v4241_v32, 0.0  ;;  %v4916_v6 = vadd.f32 %v12808_v35, %v9994_v9  ;;  %v6588_v50 = vadd.f32 %v5987_v42, %v5986_v54  ;;  %v5462_v34 = vmax.f32 %v4914_v51, 0.0  ;;  %v12956_v1 = vpop.f32.mrf.mxu0 }
 0x437   : > { %v5991_v46 = vmul.f32 %v9966_v33, %v5457_v48  ;;  %v6584_v8 = vadd.f32 %v6583_v22, %v5984_v41  ;;  %v5992_v10 = vmul.f32 %v9920_v37, %v5458_v24  ;;  %6581 = vadd.xlane.f32.xlu1 %v6580_v39  ;;  %v5461_v38 = vmax.f32 %v4243_v15, 0.0  ;;  %v6422_v41 = vpop.xlane.xlu1 %6421  ;;  %v12951_v22 = vpop.f32.mrf.mxu1 }
 0x438   : > { %v5463_v28 = vmax.f32 %v4916_v6, 0.0  ;;  %v4245_v19 = vadd.f32 %v12814_v16, %v9815_v61  ;;  %v5993_v3 = vmul.f32 %v10003_v44, %v5459_v0  ;;  %v5994_v35 = vmul.f32 %v9842_v43, %v5460_v26  ;;  %v12970_v51 = vpop.f32.mrf.mxu0 }
 0x439   : > { %v6585_v59 = vadd.f32 %v6584_v8, %v5985_v60  ;;  %v4918_v54 = vadd.f32 %v12817_v25, %v9889_v23  ;;  %v6593_v63 = vadd.f32 %v5991_v46, %v5990_v62  ;;  %v5996_v42 = vmul.f32 %v9920_v37, %v5462_v34  ;;  %v12962_v27 = vpop.f32.mrf.mxu1 }
 0x43a   : > { %v5995_v21 = vmul.f32 %v9966_v33, %v5461_v38  ;;  %v6840_v16 = vadd.f32 %v12551_v4, %v6417_v53  ;;  %v5464_v24 = vmax.f32 %v4245_v19, 0.0  ;;  %v4247_v60 = vadd.f32 %v12822_v56, %v9959_v31  ;;  %v12982_v46 = vpop.f32.mrf.mxu0  ;;  %v6427_v38 = vpop.xlane.xlu0 %6426 }
 0x43b   : > { %6586 = vadd.xlane.f32.xlu0 %v6585_v59  ;;  %v4920_v25 = vadd.f32 %v12827_v55, %v9994_v9  ;;  %v6589_v5 = vadd.f32 %v6588_v50, %v5988_v2  ;;  %v5997_v32 = vmul.f32 %v10003_v44, %v5463_v28  ;;  %v5466_v62 = vmax.f32 %v4918_v54, 0.0  ;;  %v12972_v55 = vpop.f32.mrf.mxu1 }
 0x43c   : > { %6969 = vst.msk [vmem:[%s11545_s27 + $0x1b8] sm:$0xff] %vm6913_vm0, %v6840_v16  ;;  %v6841_v48 = vadd.f32 %v12551_v4, %v6422_v41  ;;  %v4251_v0 = vadd.f32 %v12840_v45, %v9815_v61  ;;  %v6598_v39 = vadd.f32 %v5995_v21, %v5994_v35  ;;  %v5465_v56 = vmax.f32 %v4247_v60, 0.0 }
 0x43d   : > { %v5467_v26 = vmax.f32 %v4920_v25, 0.0  ;;  %v6590_v15 = vadd.f32 %v6589_v5, %v5989_v13  ;;  %v4924_v6 = vadd.f32 %v12845_v52, %v9889_v23  ;;  %v4253_v50 = vadd.f32 %v12853_v12, %v9959_v31  ;;  %v12988_v28 = vpop.f32.mrf.mxu1 }
 0x43e   : > { %6970 = vst.msk [vmem:[%s11545_s27 + $0x1c0] sm:$0xff] %vm6913_vm0, %v6841_v48  ;;  %v5468_v2 = vmax.f32 %v4251_v0, 0.0  ;;  %v4926_v45 = vadd.f32 %v12856_v7, %v9994_v9  ;;  %v5998_v34 = vmul.f32 %v9842_v43, %v5464_v24  ;;  %v5999_v13 = vmul.f32 %v9966_v33, %v5465_v56  ;;  %v12997_v24 = vpop.f32.mrf.mxu0 }
 0x43f   : > { %6591 = vadd.xlane.f32.xlu1 %v6590_v15  ;;  %v6594_v8 = vadd.f32 %v6593_v63, %v5992_v10  ;;  %v4255_v53 = vadd.f32 %v12861_v29, %v9815_v61  ;;  %v6000_v52 = vmul.f32 %v9920_v37, %v5466_v62  ;;  %v5470_v12 = vmax.f32 %v4924_v6, 0.0  ;;  %v6432_v10 = vpop.xlane.xlu1 %6431  ;;  %v12999_v60 = vpop.f32.mrf.mxu1 }
 0x440   : > { %v5469_v19 = vmax.f32 %v4253_v50, 0.0  ;;  %v5471_v35 = vmax.f32 %v4926_v45, 0.0  ;;  %v6001_v7 = vmul.f32 %v10003_v44, %v5467_v26  ;;  %v4928_v41 = vadd.f32 %v12867_v36, %v9889_v23  ;;  %v13012_v26 = vpop.f32.mrf.mxu0 }
 0x441   : > { %v6595_v59 = vadd.f32 %v6594_v8, %v5993_v3  ;;  %v5472_v54 = vmax.f32 %v4255_v53, 0.0  ;;  %v6603_v63 = vadd.f32 %v5999_v13, %v5998_v34  ;;  %v6002_v29 = vmul.f32 %v9842_v43, %v5468_v2  ;;  %v13017_v50 = vpop.f32.mrf.mxu1 }
 0x442   : > { %v6004_v21 = vmul.f32 %v9920_v37, %v5470_v12  ;;  %v6842_v16 = vadd.f32 %v12551_v4, %v6427_v38  ;;  %v6003_v25 = vmul.f32 %v9966_v33, %v5469_v19  ;;  %v6005_v3 = vmul.f32 %v10003_v44, %v5471_v35  ;;  %v13025_v45 = vpop.f32.mrf.mxu0 }
 0x443   : > { %6596 = vadd.xlane.f32.xlu0 %v6595_v59  ;;  %v4257_v36 = vadd.f32 %v12872_v40, %v9959_v31  ;;  %v4930_v5 = vadd.f32 %v12878_v11, %v9994_v9  ;;  %v5474_v62 = vmax.f32 %v4928_v41, 0.0  ;;  %v6599_v48 = vadd.f32 %v6598_v39, %v5996_v42  ;;  %v13028_v38 = vpop.f32.mrf.mxu1  ;;  %v6442_v41 = vpop.xlane.xlu1 %6441 }
 0x444   : > { %6971 = vst.msk [vmem:[%s11545_s27 + $0x1c8] sm:$0xff] %vm6913_vm0, %v6842_v16  ;;  %v6843_v0 = vadd.f32 %v12551_v4, %v6432_v10  ;;  %v4261_v56 = vadd.f32 %v12894_v14, %v9815_v61  ;;  %v6006_v15 = vmul.f32 %v9842_v43, %v5472_v54  ;;  %v4934_v40 = vadd.f32 %v12900_v20, %v9889_v23  ;;  %v6437_v20 = vpop.xlane.xlu0 %6436  ;;  %v13033_v35 = vpop.f32.mrf.mxu0 }
 0x445   : > { %v5473_v2 = vmax.f32 %v4257_v36, 0.0  ;;  %v5475_v6 = vmax.f32 %v4930_v5, 0.0  ;;  %v6600_v11 = vadd.f32 %v6599_v48, %v5997_v32  ;;  %v4263_v39 = vadd.f32 %v12903_v57, %v9959_v31  ;;  %v13039_v10 = vpop.f32.mrf.mxu1 }
 0x446   : > { %6972 = vst.msk [vmem:[%s11545_s27 + $0x1d0] sm:$0xff] %vm6913_vm0, %v6843_v0  ;;  %v5476_v42 = vmax.f32 %v4261_v56, 0.0  ;;  %v4936_v14 = vadd.f32 %v12908_v58, %v9994_v9  ;;  %v6608_v34 = vadd.f32 %v6003_v25, %v6002_v29  ;;  %v5478_v8 = vmax.f32 %v4934_v40, 0.0 }
 0x447   : > { %v6007_v13 = vmul.f32 %v9966_v33, %v5473_v2  ;;  %v6604_v53 = vadd.f32 %v6603_v63, %v6000_v52  ;;  %v6008_v32 = vmul.f32 %v9920_v37, %v5474_v62  ;;  %6601 = vadd.xlane.f32.xlu1 %v6600_v11  ;;  %v5477_v12 = vmax.f32 %v4263_v39, 0.0  ;;  %v13048_v5 = vpop.f32.mrf.mxu0 }
 0x448   : > { %v5479_v19 = vmax.f32 %v4936_v14, 0.0  ;;  %v4265_v57 = vadd.f32 %v12913_v18, %v9815_v61  ;;  %v6009_v58 = vmul.f32 %v10003_v44, %v5475_v6  ;;  %v6010_v59 = vmul.f32 %v9842_v43, %v5476_v42 }
 0x449   : > { %v6605_v54 = vadd.f32 %v6604_v53, %v6001_v7  ;;  %v4938_v52 = vadd.f32 %v12921_v30, %v9889_v23  ;;  %v6613_v63 = vadd.f32 %v6007_v13, %v6006_v15  ;;  %v6012_v29 = vmul.f32 %v9920_v37, %v5478_v8  ;;  %v13056_v15 = vpop.f32.mrf.mxu1  ;;  %v6447_v13 = vpop.xlane.xlu0 %6446 }
 0x44a   : > { %v6011_v16 = vmul.f32 %v9966_v33, %v5477_v12  ;;  %v6844_v18 = vadd.f32 %v12551_v4, %v6437_v20  ;;  %v5480_v25 = vmax.f32 %v4265_v57, 0.0  ;;  %v4267_v7 = vadd.f32 %v12928_v49, %v9959_v31 }
 0x44b   : > { %6606 = vadd.xlane.f32.xlu0 %v6605_v54  ;;  %v4940_v36 = vadd.f32 %v12933_v17, %v9994_v9  ;;  %v6609_v30 = vadd.f32 %v6608_v34, %v6004_v21  ;;  %v6013_v62 = vmul.f32 %v10003_v44, %v5479_v19  ;;  %v5482_v48 = vmax.f32 %v4938_v52, 0.0  ;;  %v13058_v17 = vpop.f32.mrf.mxu0  ;;  %v13068_v42 = vpop.f32.mrf.mxu1 }
 0x44c   : > { %6973 = vst.msk [vmem:[%s11545_s27 + $0x1d8] sm:$0xff] %vm6913_vm0, %v6844_v18  ;;  %v6845_v0 = vadd.f32 %v12551_v4, %v6442_v41  ;;  %v4271_v56 = vadd.f32 %v12945_v47, %v9815_v61  ;;  %v6618_v2 = vadd.f32 %v6011_v16, %v6010_v59  ;;  %v5481_v49 = vmax.f32 %v4267_v7, 0.0  ;;  %v6452_v59 = vpop.xlane.xlu1 %6451 }
 0x44d   : > { %v5483_v6 = vmax.f32 %v4940_v36, 0.0  ;;  %v6610_v40 = vadd.f32 %v6609_v30, %v6005_v3  ;;  %v4944_v11 = vadd.f32 %v12951_v22, %v9889_v23  ;;  %v4273_v4 = vadd.f32 %v12956_v1, %v9959_v31  ;;  %v13074_v8 = vpop.f32.mrf.mxu0 }
 0x44e   : > { %6974 = vst.msk [vmem:[%s11545_s27 + $0x1e0] sm:$0xff] %vm6913_vm0, %v6845_v0  ;;  %v5484_v21 = vmax.f32 %v4271_v56, 0.0  ;;  %v4946_v47 = vadd.f32 %v12962_v27, %v9994_v9  ;;  %v6014_v39 = vmul.f32 %v9842_v43, %v5480_v25  ;;  %v6015_v3 = vmul.f32 %v9966_v33, %v5481_v49  ;;  %v13077_v27 = vpop.f32.mrf.mxu1 }
 0x44f   : > { %6611 = vadd.xlane.f32.xlu1 %v6610_v40  ;;  %v6614_v14 = vadd.f32 %v6613_v63, %v6008_v32  ;;  %v4275_v34 = vadd.f32 %v12970_v51, %v9815_v61  ;;  %v6016_v22 = vmul.f32 %v9920_v37, %v5482_v48  ;;  %v5486_v1 = vmax.f32 %v4944_v11, 0.0  ;;  %v13082_v51 = vpop.f32.mrf.mxu0  ;;  %v13086_v63 = vld [vmem:[#allocation2] ss:$0 sm:$0xff] }
 0x450   : > { %v5485_v53 = vmax.f32 %v4273_v4, 0.0  ;;  %v5487_v20 = vmax.f32 %v4946_v47, 0.0  ;;  %v6017_v12 = vmul.f32 %v10003_v44, %v5483_v6  ;;  %v4948_v32 = vadd.f32 %v12972_v55, %v9889_v23  ;;  %v13089_v18 = vpop.f32.mrf.mxu1 }
 0x451   : > { %v6615_v19 = vadd.f32 %v6614_v14, %v6009_v58  ;;  %v5488_v57 = vmax.f32 %v4275_v34, 0.0  ;;  %v6623_v54 = vadd.f32 %v6015_v3, %v6014_v39  ;;  %v6018_v52 = vmul.f32 %v9842_v43, %v5484_v21 }
 0x452   : > { %v6020_v41 = vmul.f32 %v9920_v37, %v5486_v1  ;;  %v6846_v16 = vadd.f32 %v13086_v63, %v6447_v13  ;;  %v6019_v58 = vmul.f32 %v9966_v33, %v5485_v53  ;;  %v6021_v25 = vmul.f32 %v10003_v44, %v5487_v20 }
 0x453   : > { %6616 = vadd.xlane.f32.xlu0 %v6615_v19  ;;  %v4277_v55 = vadd.f32 %v12982_v46, %v9959_v31  ;;  %v4950_v7 = vadd.f32 %v12988_v28, %v9994_v9  ;;  %v5490_v36 = vmax.f32 %v4948_v32, 0.0  ;;  %v6619_v30 = vadd.f32 %v6618_v2, %v6012_v29  ;;  %v13105_v46 = vpop.f32.mrf.mxu0 }
 0x454   : > { %6975 = vst.msk [vmem:[%s11545_s27 + $0x1e8] sm:$0xff] %vm6913_vm0, %v6846_v16  ;;  %v6847_v48 = vadd.f32 %v13086_v63, %v6452_v59  ;;  %v4281_v0 = vadd.f32 %v12997_v24, %v9815_v61  ;;  %v6022_v56 = vmul.f32 %v9842_v43, %v5488_v57  ;;  %v4954_v40 = vadd.f32 %v12999_v60, %v9889_v23  ;;  %v13113_v24 = vpop.f32.mrf.mxu1  ;;  %v6457_v60 = vpop.xlane.xlu0 %6456 }
 0x455   : > { %v5489_v49 = vmax.f32 %v4277_v55, 0.0  ;;  %v5491_v6 = vmax.f32 %v4950_v7, 0.0  ;;  %v6620_v21 = vadd.f32 %v6619_v30, %v6013_v62  ;;  %v4283_v29 = vadd.f32 %v13012_v26, %v9959_v31  ;;  %v13116_v3 = vpop.f32.mrf.mxu0  ;;  %v6462_v20 = vpop.xlane.xlu1 %6461 }
 0x456   : > { %6976 = vst.msk [vmem:[%s11545_s27 + $0x1f0] sm:$0xff] %vm6913_vm0, %v6847_v48  ;;  %v5492_v28 = vmax.f32 %v4281_v0, 0.0  ;;  %v4956_v2 = vadd.f32 %v13017_v50, %v9994_v9  ;;  %v6628_v11 = vadd.f32 %v6019_v58, %v6018_v52  ;;  %v5494_v47 = vmax.f32 %v4954_v40, 0.0  ;;  %v13121_v13 = vpop.f32.mrf.mxu1 }
 0x457   : > { %v6023_v4 = vmul.f32 %v9966_v33, %v5489_v49  ;;  %v6624_v39 = vadd.f32 %v6623_v54, %v6016_v22  ;;  %v6024_v62 = vmul.f32 %v9920_v37, %v5490_v36  ;;  %6621 = vadd.xlane.f32.xlu1 %v6620_v21  ;;  %v5493_v14 = vmax.f32 %v4283_v29, 0.0  ;;  %v13127_v19 = vpop.f32.mrf.mxu0 }
 0x458   : > { %v5495_v34 = vmax.f32 %v4956_v2, 0.0  ;;  %v4285_v26 = vadd.f32 %v13025_v45, %v9815_v61  ;;  %v6025_v50 = vmul.f32 %v10003_v44, %v5491_v6  ;;  %v6026_v1 = vmul.f32 %v9842_v43, %v5492_v28  ;;  %v13132_v54 = vpop.f32.mrf.mxu1 }
 0x459   : > { %v6625_v53 = vadd.f32 %v6624_v39, %v6017_v12  ;;  %v4958_v22 = vadd.f32 %v13028_v38, %v9889_v23  ;;  %v6633_v57 = vadd.f32 %v6023_v4, %v6022_v56  ;;  %v6028_v32 = vmul.f32 %v9920_v37, %v5494_v47  ;;  %v13138_v58 = vpop.f32.mrf.mxu0 }
 0x45a   : > { %v6027_v59 = vmul.f32 %v9966_v33, %v5493_v14  ;;  %v6848_v45 = vadd.f32 %v13086_v63, %v6457_v60  ;;  %v5496_v52 = vmax.f32 %v4285_v26, 0.0  ;;  %v4287_v12 = vadd.f32 %v13033_v35, %v9959_v31  ;;  %v13146_v48 = vpop.f32.mrf.mxu1 }
 0x45b   : > { %6626 = vadd.xlane.f32.xlu0 %v6625_v53  ;;  %v4960_v38 = vadd.f32 %v13039_v10, %v9994_v9  ;;  %v6629_v16 = vadd.f32 %v6628_v11, %v6020_v41  ;;  %v6029_v55 = vmul.f32 %v10003_v44, %v5495_v34  ;;  %v5498_v7 = vmax.f32 %v4958_v22, 0.0  ;;  %v13156_v21 = vpop.f32.mrf.mxu0  ;;  %v6467_v2 = vpop.xlane.xlu0 %6466 }
 0x45c   : > { %6977 = vst.msk [vmem:[%s11545_s27 + $0x1f8] sm:$0xff] %vm6913_vm0, %v6848_v45  ;;  %v6849_v36 = vadd.f32 %v13086_v63, %v6462_v20  ;;  %v4291_v30 = vadd.f32 %v13048_v5, %v9815_v61  ;;  %v6638_v0 = vadd.f32 %v6027_v59, %v6026_v1  ;;  %v5497_v35 = vmax.f32 %v4287_v12, 0.0  ;;  %v13162_v11 = vpop.f32.mrf.mxu1 }
 0x45d   : > { %v5499_v56 = vmax.f32 %v4960_v38, 0.0  ;;  %v6630_v49 = vadd.f32 %v6629_v16, %v6021_v25  ;;  %v4964_v41 = vadd.f32 %v13056_v15, %v9889_v23  ;;  %v4293_v6 = vadd.f32 %v13058_v17, %v9959_v31 }
 0x45e   : > { %6978 = vst.msk [vmem:[%s11545_s27 + $0x200] sm:$0xff] %vm6913_vm0, %v6849_v36  ;;  %v5500_v10 = vmax.f32 %v4291_v30, 0.0  ;;  %v4966_v40 = vadd.f32 %v13068_v42, %v9994_v9  ;;  %v6030_v5 = vmul.f32 %v9842_v43, %v5496_v52  ;;  %v6031_v28 = vmul.f32 %v9966_v33, %v5497_v35  ;;  %v13165_v42 = vpop.f32.mrf.mxu0  ;;  %v6472_v34 = vpop.xlane.xlu1 %6471 }
 0x45f   : > { %6631 = vadd.xlane.f32.xlu1 %v6630_v49  ;;  %v6634_v25 = vadd.f32 %v6633_v57, %v6024_v62  ;;  %v4295_v29 = vadd.f32 %v13074_v8, %v9815_v61  ;;  %v6032_v15 = vmul.f32 %v9920_v37, %v5498_v7  ;;  %v5502_v17 = vmax.f32 %v4964_v41, 0.0  ;;  %v13170_v8 = vpop.f32.mrf.mxu1 }
 0x460   : > { %v5501_v4 = vmax.f32 %v4293_v6, 0.0  ;;  %v5503_v47 = vmax.f32 %v4966_v40, 0.0  ;;  %v6033_v39 = vmul.f32 %v10003_v44, %v5499_v56  ;;  %v4968_v62 = vadd.f32 %v13077_v27, %v9889_v23  ;;  %v13175_v20 = vpop.f32.mrf.mxu0 }
 0x461   : > { %v6635_v60 = vadd.f32 %v6634_v25, %v6025_v50  ;;  %v5504_v14 = vmax.f32 %v4295_v29, 0.0  ;;  %v6643_v26 = vadd.f32 %v6031_v28, %v6030_v5  ;;  %v6034_v1 = vmul.f32 %v9842_v43, %v5500_v10  ;;  %v13183_v45 = vpop.f32.mrf.mxu1 }
 0x462   : > { %v6036_v53 = vmul.f32 %v9920_v37, %v5502_v17  ;;  %v6850_v22 = vadd.f32 %v13086_v63, %v6467_v2  ;;  %v6035_v57 = vmul.f32 %v9966_v33, %v5501_v4  ;;  %v6037_v50 = vmul.f32 %v10003_v44, %v5503_v47  ;;  %v13190_v7 = vpop.f32.mrf.mxu0 }
 0x463   : > { %6636 = vadd.xlane.f32.xlu0 %v6635_v60  ;;  %v4297_v27 = vadd.f32 %v13082_v51, %v9959_v31  ;;  %v4970_v59 = vadd.f32 %v13089_v18, %v9994_v9  ;;  %v5506_v52 = vmax.f32 %v4968_v62, 0.0  ;;  %v6639_v12 = vadd.f32 %v6638_v0, %v6028_v32  ;;  %v13195_v35 = vpop.f32.mrf.mxu1 }
 0x464   : > { %6979 = vst.msk [vmem:[%s11545_s27 + $0x208] sm:$0xff] %vm6913_vm0, %v6850_v22  ;;  %v6851_v38 = vadd.f32 %v13086_v63, %v6472_v34  ;;  %v4301_v16 = vadd.f32 %v13105_v46, %v9815_v61  ;;  %v6038_v36 = vmul.f32 %v9842_v43, %v5504_v14  ;;  %v4974_v18 = vadd.f32 %v13113_v24, %v9889_v23 }
 0x465   : > { %v5505_v30 = vmax.f32 %v4297_v27, 0.0  ;;  %v5507_v51 = vmax.f32 %v4970_v59, 0.0  ;;  %v6640_v56 = vadd.f32 %v6639_v12, %v6029_v55  ;;  %v4303_v0 = vadd.f32 %v13116_v3, %v9959_v31  ;;  %v6477_v28 = vpop.xlane.xlu0 %6476 }
 0x466   : > { %6980 = vst.msk [vmem:[%s11545_s27 + $0x210] sm:$0xff] %vm6913_vm0, %v6851_v38  ;;  %v5508_v32 = vmax.f32 %v4301_v16, 0.0  ;;  %v4976_v46 = vadd.f32 %v13121_v13, %v9994_v9  ;;  %v6648_v49 = vadd.f32 %v6035_v57, %v6034_v1  ;;  %v5510_v41 = vmax.f32 %v4974_v18, 0.0  ;;  %v13207_v25 = vpop.f32.mrf.mxu0 }
 0x467   : > { %v6039_v10 = vmul.f32 %v9966_v33, %v5505_v30  ;;  %v6644_v6 = vadd.f32 %v6643_v26, %v6032_v15  ;;  %v6040_v40 = vmul.f32 %v9920_v37, %v5506_v52  ;;  %6641 = vadd.xlane.f32.xlu1 %v6640_v56  ;;  %v5509_v24 = vmax.f32 %v4303_v0, 0.0  ;;  %v4993_v15 = vpop.f32.mrf.mxu1 }
 0x468   : > { %v5511_v5 = vmax.f32 %v4976_v46, 0.0  ;;  %v4305_v55 = vadd.f32 %v13127_v19, %v9815_v61  ;;  %v6041_v3 = vmul.f32 %v10003_v44, %v5507_v51  ;;  %v6042_v13 = vmul.f32 %v9842_v43, %v5508_v32  ;;  %v4322_v60 = vpop.f32.mrf.mxu0 }
 0x469   : > { %v6645_v29 = vadd.f32 %v6644_v6, %v6033_v39  ;;  %v4978_v2 = vadd.f32 %v13132_v54, %v9889_v23  ;;  %v6653_v17 = vadd.f32 %v6039_v10, %v6038_v36  ;;  %v6044_v4 = vmul.f32 %v9920_v37, %v5510_v41  ;;  %v6482_v34 = vpop.xlane.xlu1 %6481  ;;  %v13220_v26 = vpop.f32.mrf.mxu1 }
 0x46a   : > { %v6043_v47 = vmul.f32 %v9966_v33, %v5509_v24  ;;  %v6852_v19 = vadd.f32 %v13086_v63, %v6477_v28  ;;  %v5512_v14 = vmax.f32 %v4305_v55, 0.0  ;;  %v4307_v62 = vadd.f32 %v13138_v58, %v9959_v31  ;;  %v13228_v59 = vpop.f32.mrf.mxu0 }
 0x46b   : > { %6646 = vadd.xlane.f32.xlu0 %v6645_v29  ;;  %v4980_v39 = vadd.f32 %v13146_v48, %v9994_v9  ;;  %v6649_v54 = vadd.f32 %v6648_v49, %v6036_v53  ;;  %v6045_v1 = vmul.f32 %v10003_v44, %v5511_v5  ;;  %v5514_v22 = vmax.f32 %v4978_v2, 0.0  ;;  %v13230_v53 = vpop.f32.mrf.mxu1 }
 0x46c   : > { %6981 = vst.msk [vmem:[%s11545_s27 + $0x218] sm:$0xff] %vm6913_vm0, %v6852_v19  ;;  %v6853_v57 = vadd.f32 %v13086_v63, %v6482_v34  ;;  %v4311_v27 = vadd.f32 %v13156_v21, %v9815_v61  ;;  %v6658_v58 = vadd.f32 %v6043_v47, %v6042_v13  ;;  %v5513_v52 = vmax.f32 %v4307_v62, 0.0  ;;  %v13240_v30 = vpop.f32.mrf.mxu0 }
 0x46d   : > { %v5515_v12 = vmax.f32 %v4980_v39, 0.0  ;;  %v6650_v48 = vadd.f32 %v6649_v54, %v6037_v50  ;;  %v4984_v16 = vadd.f32 %v13162_v11, %v9889_v23  ;;  %v4313_v36 = vadd.f32 %v13165_v42, %v9959_v31  ;;  %v4999_v32 = vpop.f32.mrf.mxu1 }
 0x46e   : > { %6982 = vst.msk [vmem:[%s11545_s27 + $0x220] sm:$0xff] %vm6913_vm0, %v6853_v57  ;;  %v5516_v38 = vmax.f32 %v4311_v27, 0.0  ;;  %v4986_v21 = vadd.f32 %v13170_v8, %v9994_v9  ;;  %v6046_v51 = vmul.f32 %v9842_v43, %v5512_v14  ;;  %v6047_v50 = vmul.f32 %v9966_v33, %v5513_v52  ;;  %v6487_v49 = vpop.xlane.xlu0 %6486 }
 0x46f   : > { %6651 = vadd.xlane.f32.xlu1 %v6650_v48  ;;  %v6654_v18 = vadd.f32 %v6653_v17, %v6040_v40  ;;  %v4315_v56 = vadd.f32 %v13175_v20, %v9815_v61  ;;  %v6048_v11 = vmul.f32 %v9920_v37, %v5514_v22  ;;  %v5518_v0 = vmax.f32 %v4984_v16, 0.0 }
 0x470   : > { %v5517_v46 = vmax.f32 %v4313_v36, 0.0  ;;  %v5519_v42 = vmax.f32 %v4986_v21, 0.0  ;;  %v6049_v8 = vmul.f32 %v10003_v44, %v5515_v12  ;;  %v4988_v6 = vadd.f32 %v13183_v45, %v9889_v23  ;;  %v4330_v55 = vpop.f32.mrf.mxu0  ;;  %v5003_v45 = vpop.f32.mrf.mxu1 }
 0x471   : > { %v6655_v10 = vadd.f32 %v6654_v18, %v6041_v3  ;;  %v5520_v41 = vmax.f32 %v4315_v56, 0.0  ;;  %v6663_v24 = vadd.f32 %v6047_v50, %v6046_v51  ;;  %v6050_v40 = vmul.f32 %v9842_v43, %v5516_v38 }
 0x472   : > { %v6051_v20 = vmul.f32 %v9966_v33, %v5517_v46  ;;  %v6854_v5 = vadd.f32 %v13086_v63, %v6487_v49  ;;  %v6052_v28 = vmul.f32 %v9920_v37, %v5518_v0  ;;  %v6053_v13 = vmul.f32 %v10003_v44, %v5519_v42  ;;  %v4332_v14 = vpop.f32.mrf.mxu0 }
 0x473   : > { %6656 = vadd.xlane.f32.xlu0 %v6655_v10  ;;  %v4317_v3 = vadd.f32 %v13190_v7, %v9959_v31  ;;  %v4990_v29 = vadd.f32 %v13195_v35, %v9994_v9  ;;  %v5522_v2 = vmax.f32 %v4988_v6, 0.0  ;;  %v6659_v17 = vadd.f32 %v6658_v58, %v6044_v4  ;;  %v6492_v34 = vpop.xlane.xlu1 %6491  ;;  %v5005_v35 = vpop.f32.mrf.mxu1 }
 0x474   : > { %6983 = vst.msk [vmem:[%s11545_s27 + $0x228] sm:$0xff] %vm6913_vm0, %v6854_v5  ;;  %v4321_v47 = vadd.f32 %v13207_v25, %v9815_v61  ;;  %v4994_v19 = vadd.f32 %v4993_v15, %v9889_v23  ;;  %v6054_v62 = vmul.f32 %v9842_v43, %v5520_v41  ;;  %v4323_v7 = vadd.f32 %v4322_v60, %v9959_v31  ;;  %v4334_v58 = vpop.f32.mrf.mxu0 }
 0x475   : > { %v5521_v39 = vmax.f32 %v4317_v3, 0.0  ;;  %v5523_v54 = vmax.f32 %v4990_v29, 0.0  ;;  %v6668_v22 = vadd.f32 %v6051_v20, %v6050_v40  ;;  %v6660_v57 = vadd.f32 %v6659_v17, %v6045_v1  ;;  %v5007_v48 = vpop.f32.mrf.mxu1 }
 0x476   : > { %v6855_v27 = vadd.f32 %v13086_v63, %v6492_v34  ;;  %v5524_v4 = vmax.f32 %v4321_v47, 0.0  ;;  %v5526_v52 = vmax.f32 %v4994_v19, 0.0  ;;  %v5525_v15 = vmax.f32 %v4323_v7, 0.0  ;;  %v4336_v36 = vpop.f32.mrf.mxu0 }
 0x477   : > { %v6055_v25 = vmul.f32 %v9966_v33, %v5521_v39  ;;  %v4996_v12 = vadd.f32 %v13220_v26, %v9994_v9  ;;  %v6056_v38 = vmul.f32 %v9920_v37, %v5522_v2  ;;  %v6057_v16 = vmul.f32 %v10003_v44, %v5523_v54  ;;  %6661 = vadd.xlane.f32.xlu1 %v6660_v57  ;;  %v5009_v18 = vpop.f32.mrf.mxu1 }
 0x478   : > { %6984 = vst.msk [vmem:[%s11545_s27 + $0x230] sm:$0xff] %vm6913_vm0, %v6855_v27  ;;  %v6664_v60 = vadd.f32 %v6663_v24, %v6048_v11  ;;  %v4325_v1 = vadd.f32 %v13228_v59, %v9815_v61  ;;  %v6058_v21 = vmul.f32 %v9842_v43, %v5524_v4  ;;  %v6059_v51 = vmul.f32 %v9966_v33, %v5525_v15 }
 0x479   : > { %v5527_v50 = vmax.f32 %v4996_v12, 0.0  ;;  %v4998_v26 = vadd.f32 %v13230_v53, %v9889_v23  ;;  %v4327_v46 = vadd.f32 %v13240_v30, %v9959_v31  ;;  %v5000_v11 = vadd.f32 %v4999_v32, %v9994_v9  ;;  %v6497_v10 = vpop.xlane.xlu0 %6496 }
 0x47a   : > { %v6665_v56 = vadd.f32 %v6664_v60, %v6049_v8  ;;  %v5528_v0 = vmax.f32 %v4325_v1, 0.0  ;;  %v6673_v42 = vadd.f32 %v6055_v25, %v6054_v62  ;;  %v6060_v59 = vmul.f32 %v9920_v37, %v5526_v52  ;;  %v4340_v40 = vpop.f32.mrf.mxu0  ;;  %v5013_v20 = vpop.f32.mrf.mxu1 }
 0x47b   : > { %v5530_v49 = vmax.f32 %v4998_v26, 0.0  ;;  %v6669_v41 = vadd.f32 %v6668_v22, %v6052_v28  ;;  %v6678_v6 = vadd.f32 %v6059_v51, %v6058_v21  ;;  %v6061_v24 = vmul.f32 %v10003_v44, %v5527_v50 }
 0x47c   : > { %6666 = vadd.xlane.f32.xlu0 %v6665_v56  ;;  %v6856_v53 = vadd.f32 %v13086_v63, %v6497_v10  ;;  %v5529_v8 = vmax.f32 %v4327_v46, 0.0  ;;  %v5531_v5 = vmax.f32 %v5000_v11, 0.0  ;;  %v4331_v32 = vadd.f32 %v4330_v55, %v9815_v61  ;;  %v4342_v19 = vpop.f32.mrf.mxu0  ;;  %v5015_v39 = vpop.f32.mrf.mxu1 }
 0x47d   : > { %v6670_v30 = vadd.f32 %v6669_v41, %v6053_v13  ;;  %v5004_v3 = vadd.f32 %v5003_v45, %v9889_v23  ;;  %v6062_v29 = vmul.f32 %v9842_v43, %v5528_v0  ;;  %v6502_v2 = vpop.xlane.xlu1 %6501  ;;  %v4333_v17 = vadd.f32 %v4332_v14, %v9959_v31 }
 0x47e   : > { %6985 = vst.msk [vmem:[%s11545_s27 + $0x238] sm:$0xff] %vm6913_vm0, %v6856_v53  ;;  %v6063_v28 = vmul.f32 %v9966_v33, %v5529_v8  ;;  %v5006_v47 = vadd.f32 %v5005_v35, %v9994_v9  ;;  %v6064_v62 = vmul.f32 %v9920_v37, %v5530_v49  ;;  %v6857_v55 = vadd.f32 %v13086_v63, %v6502_v2  ;;  %v4344_v57 = vpop.f32.mrf.mxu0  ;;  %v5017_v25 = vpop.f32.mrf.mxu1 }
 0x47f   : > { %6671 = vadd.xlane.f32.xlu1 %v6670_v30  ;;  %v5532_v13 = vmax.f32 %v4331_v32, 0.0  ;;  %v6674_v45 = vadd.f32 %v6673_v42, %v6056_v38  ;;  %v5534_v54 = vmax.f32 %v5004_v3, 0.0  ;;  %v5533_v34 = vmax.f32 %v4333_v17, 0.0 }
 0x480   : > { %v5535_v7 = vmax.f32 %v5006_v47, 0.0  ;;  %v4335_v22 = vadd.f32 %v4334_v58, %v9815_v61  ;;  %v6683_v27 = vadd.f32 %v6063_v28, %v6062_v29  ;;  %v6065_v14 = vmul.f32 %v10003_v44, %v5531_v5  ;;  %6986 = vst.msk [vmem:[%s11545_s27 + $0x240] sm:$0xff] %vm6913_vm0, %v6857_v55  ;;  %v4346_v60 = vpop.f32.mrf.mxu0  ;;  %v5019_v50 = vpop.f32.mrf.mxu1 }
 0x481   : > { %v6675_v35 = vadd.f32 %v6674_v45, %v6057_v16  ;;  %v5008_v4 = vadd.f32 %v5007_v48, %v9889_v23  ;;  %v6066_v52 = vmul.f32 %v9842_v43, %v5532_v13  ;;  %v6067_v15 = vmul.f32 %v9966_v33, %v5533_v34 }
 0x482   : > { %v5536_v12 = vmax.f32 %v4335_v22, 0.0  ;;  %v4337_v38 = vadd.f32 %v4336_v36, %v9959_v31  ;;  %v5010_v1 = vadd.f32 %v5009_v18, %v9994_v9  ;;  %v6679_v21 = vadd.f32 %v6678_v6, %v6060_v59 }
 0x483   : > { %6676 = vadd.xlane.f32.xlu0 %v6675_v35  ;;  %v5538_v58 = vmax.f32 %v5008_v4, 0.0  ;;  %v4341_v51 = vadd.f32 %v4340_v40, %v9815_v61  ;;  %v6068_v16 = vmul.f32 %v9920_v37, %v5534_v54  ;;  %v6069_v48 = vmul.f32 %v10003_v44, %v5535_v7  ;;  %v4350_v49 = vpop.f32.mrf.mxu0  ;;  %v5023_v6 = vpop.f32.mrf.mxu1 }
 0x484   : > { %v5537_v26 = vmax.f32 %v4337_v38, 0.0  ;;  %v5014_v56 = vadd.f32 %v5013_v20, %v9889_v23  ;;  %v6688_v0 = vadd.f32 %v6067_v15, %v6066_v52  ;;  %v6507_v46 = vpop.xlane.xlu0 %6506  ;;  %v5539_v36 = vmax.f32 %v5010_v1, 0.0 }
 0x485   : > { %v6680_v11 = vadd.f32 %v6679_v21, %v6061_v24  ;;  %v5540_v42 = vmax.f32 %v4341_v51, 0.0  ;;  %v6070_v18 = vmul.f32 %v9842_v43, %v5536_v12  ;;  %v6072_v59 = vmul.f32 %v9920_v37, %v5538_v58  ;;  %v4352_v5 = vpop.f32.mrf.mxu0  ;;  %v5025_v28 = vpop.f32.mrf.mxu1 }
 0x486   : > { %v6858_v10 = vadd.f32 %v13086_v63, %v6507_v46  ;;  %v4343_v41 = vadd.f32 %v4342_v19, %v9959_v31  ;;  %v6071_v53 = vmul.f32 %v9966_v33, %v5537_v26  ;;  %v5542_v8 = vmax.f32 %v5014_v56, 0.0 }
 0x487   : > { %6681 = vadd.xlane.f32.xlu1 %v6680_v11  ;;  %v5016_v40 = vadd.f32 %v5015_v39, %v9994_v9  ;;  %v6684_v20 = vadd.f32 %v6683_v27, %v6064_v62  ;;  %v6073_v24 = vmul.f32 %v10003_v44, %v5539_v36  ;;  %v6074_v32 = vmul.f32 %v9842_v43, %v5540_v42  ;;  %v4354_v62 = vpop.f32.mrf.mxu0  ;;  %v5027_v54 = vpop.f32.mrf.mxu1 }
 0x488   : > { %6987 = vst.msk [vmem:[%s11545_s27 + $0x248] sm:$0xff] %vm6913_vm0, %v6858_v10  ;;  %v6512_v30 = vpop.xlane.xlu1 %6511  ;;  %v5541_v3 = vmax.f32 %v4343_v41, 0.0  ;;  %v4345_v29 = vadd.f32 %v4344_v57, %v9815_v61  ;;  %v5018_v19 = vadd.f32 %v5017_v25, %v9889_v23  ;;  %v4347_v45 = vadd.f32 %v4346_v60, %v9959_v31 }
 0x489   : > { %v6859_v2 = vadd.f32 %v13086_v63, %v6512_v30  ;;  %v5543_v17 = vmax.f32 %v5016_v40, 0.0  ;;  %v6685_v47 = vadd.f32 %v6684_v20, %v6065_v14  ;;  %v5020_v39 = vadd.f32 %v5019_v50, %v9994_v9  ;;  %v4356_v27 = vpop.f32.mrf.mxu0  ;;  %v5029_v15 = vpop.f32.mrf.mxu1 }
 0x48a   : > { %v6075_v55 = vmul.f32 %v9966_v33, %v5541_v3  ;;  %v5544_v13 = vmax.f32 %v4345_v29, 0.0  ;;  %v6693_v34 = vadd.f32 %v6071_v53, %v6070_v18  ;;  %v5546_v7 = vmax.f32 %v5018_v19, 0.0 }
 0x48b   : > { %6988 = vst.msk [vmem:[%s11545_s27 + $0x250] sm:$0xff] %vm6913_vm0, %v6859_v2  ;;  %6686 = vadd.xlane.f32.xlu0 %v6685_v47  ;;  %v6689_v22 = vadd.f32 %v6688_v0, %v6068_v16  ;;  %v4351_v57 = vadd.f32 %v4350_v49, %v9815_v61  ;;  %v6076_v14 = vmul.f32 %v9920_v37, %v5542_v8  ;;  %v5545_v25 = vmax.f32 %v4347_v45, 0.0 }
 0x48c   : > { %v6077_v35 = vmul.f32 %v10003_v44, %v5543_v17  ;;  %v6517_v4 = vpop.xlane.xlu0 %6516  ;;  %v5547_v52 = vmax.f32 %v5020_v39, 0.0  ;;  %v6698_v12 = vadd.f32 %v6075_v55, %v6074_v32  ;;  %v6078_v38 = vmul.f32 %v9842_v43, %v5544_v13 }
 0x48d   : > { %v6860_v60 = vadd.f32 %v13086_v63, %v6517_v4  ;;  %v6690_v58 = vadd.f32 %v6689_v22, %v6069_v48  ;;  %v6079_v1 = vmul.f32 %v9966_v33, %v5545_v25  ;;  %v5548_v21 = vmax.f32 %v4351_v57, 0.0  ;;  %v4360_v46 = vpop.f32.mrf.mxu0  ;;  %v5033_v49 = vpop.f32.mrf.mxu1 }
 0x48e   : > { %v5024_v51 = vadd.f32 %v5023_v6, %v9889_v23  ;;  %v4353_v50 = vadd.f32 %v4352_v5, %v9959_v31  ;;  %v6080_v16 = vmul.f32 %v9920_v37, %v5546_v7  ;;  %v5026_v26 = vadd.f32 %v5025_v28, %v9994_v9 }
 0x48f   : > { %6989 = vst.msk [vmem:[%s11545_s27 + $0x258] sm:$0xff] %vm6913_vm0, %v6860_v60  ;;  %6691 = vadd.xlane.f32.xlu1 %v6690_v58  ;;  %v6694_v56 = vadd.f32 %v6693_v34, %v6072_v59  ;;  %v4355_v0 = vadd.f32 %v4354_v62, %v9815_v61  ;;  %v6081_v48 = vmul.f32 %v10003_v44, %v5547_v52  ;;  %v4362_v8 = vpop.f32.mrf.mxu0  ;;  %v5035_v30 = vpop.f32.mrf.mxu1 }
 0x490   : > { %v5550_v36 = vmax.f32 %v5024_v51, 0.0  ;;  %v5549_v11 = vmax.f32 %v4353_v50, 0.0  ;;  %v5028_v42 = vadd.f32 %v5027_v54, %v9889_v23  ;;  %v6522_v18 = vpop.xlane.xlu1 %6521  ;;  %v5551_v10 = vmax.f32 %v5026_v26, 0.0 }
 0x491   : > { %v6695_v41 = vadd.f32 %v6694_v56, %v6073_v24  ;;  %v5552_v6 = vmax.f32 %v4355_v0, 0.0  ;;  %v4357_v53 = vadd.f32 %v4356_v27, %v9959_v31  ;;  %v6703_v40 = vadd.f32 %v6079_v1, %v6078_v38  ;;  %v4364_v24 = vpop.f32.mrf.mxu0  ;;  %v5037_v55 = vpop.f32.mrf.mxu1 }
 0x492   : > { %v6861_v59 = vadd.f32 %v13086_v63, %v6522_v18  ;;  %v6082_v20 = vmul.f32 %v9842_v43, %v5548_v21  ;;  %v6084_v5 = vmul.f32 %v9920_v37, %v5550_v36  ;;  %v6083_v32 = vmul.f32 %v9966_v33, %v5549_v11 }
 0x493   : > { %6696 = vadd.xlane.f32.xlu0 %v6695_v41  ;;  %v5554_v3 = vmax.f32 %v5028_v42, 0.0  ;;  %v5553_v29 = vmax.f32 %v4357_v53, 0.0  ;;  %v5030_v28 = vadd.f32 %v5029_v15, %v9994_v9  ;;  %v6085_v2 = vmul.f32 %v10003_v44, %v5551_v10  ;;  %v4366_v34 = vpop.f32.mrf.mxu0  ;;  %v5039_v4 = vpop.f32.mrf.mxu1 }
 0x494   : > { %6990 = vst.msk [vmem:[%s11545_s27 + $0x260] sm:$0xff] %vm6913_vm0, %v6861_v59  ;;  %v6086_v17 = vmul.f32 %v9842_v43, %v5552_v6  ;;  %v6527_v47 = vpop.xlane.xlu0 %6526  ;;  %v6699_v19 = vadd.f32 %v6698_v12, %v6076_v14  ;;  %v4361_v62 = vadd.f32 %v4360_v46, %v9815_v61  ;;  %v5034_v54 = vadd.f32 %v5033_v49, %v9889_v23 }
 0x495   : > { %v6862_v13 = vadd.f32 %v13086_v63, %v6527_v47  ;;  %v6087_v45 = vmul.f32 %v9966_v33, %v5553_v29  ;;  %v5555_v39 = vmax.f32 %v5030_v28, 0.0  ;;  %v4363_v57 = vadd.f32 %v4362_v8, %v9959_v31 }
 0x496   : > { %v6700_v7 = vadd.f32 %v6699_v19, %v6077_v35  ;;  %v5556_v22 = vmax.f32 %v4361_v62, 0.0  ;;  %v5036_v27 = vadd.f32 %v5035_v30, %v9994_v9  ;;  %v6708_v25 = vadd.f32 %v6083_v32, %v6082_v20 }
 0x497   : > { %v6088_v14 = vmul.f32 %v9920_v37, %v5554_v3  ;;  %6991 = vst.msk [vmem:[%s11545_s27 + $0x268] sm:$0xff] %vm6913_vm0, %v6862_v13  ;;  %v5558_v52 = vmax.f32 %v5034_v54, 0.0  ;;  %v6704_v15 = vadd.f32 %v6703_v40, %v6080_v16  ;;  %v6713_v12 = vadd.f32 %v6087_v45, %v6086_v17  ;;  %v4370_v1 = vpop.f32.mrf.mxu0  ;;  %v5043_v56 = vpop.f32.mrf.mxu1 }
 0x498   : > { %6701 = vadd.xlane.f32.xlu1 %v6700_v7  ;;  %v6532_v38 = vpop.xlane.xlu1 %6531  ;;  %v5557_v60 = vmax.f32 %v4363_v57, 0.0  ;;  %v5559_v58 = vmax.f32 %v5036_v27, 0.0  ;;  %v4365_v35 = vadd.f32 %v4364_v24, %v9815_v61  ;;  %v6089_v21 = vmul.f32 %v10003_v44, %v5555_v39 }
 0x499   : > { %v6863_v51 = vadd.f32 %v13086_v63, %v6532_v38  ;;  %v6705_v50 = vadd.f32 %v6704_v15, %v6081_v48  ;;  %v5038_v26 = vadd.f32 %v5037_v55, %v9889_v23  ;;  %v6090_v0 = vmul.f32 %v9842_v43, %v5556_v22  ;;  %v4372_v11 = vpop.f32.mrf.mxu0  ;;  %v5045_v10 = vpop.f32.mrf.mxu1 }
 0x49a   : > { %v6091_v16 = vmul.f32 %v9966_v33, %v5557_v60  ;;  %v5560_v46 = vmax.f32 %v4365_v35, 0.0  ;;  %v4367_v36 = vadd.f32 %v4366_v34, %v9959_v31  ;;  %v6092_v42 = vmul.f32 %v9920_v37, %v5558_v52 }
 0x49b   : > { %6992 = vst.msk [vmem:[%s11545_s27 + $0x270] sm:$0xff] %vm6913_vm0, %v6863_v51  ;;  %6706 = vadd.xlane.f32.xlu0 %v6705_v50  ;;  %v5040_v49 = vadd.f32 %v5039_v4, %v9994_v9  ;;  %v6709_v18 = vadd.f32 %v6708_v25, %v6084_v5  ;;  %v4371_v48 = vadd.f32 %v4370_v1, %v9815_v61  ;;  %v5562_v6 = vmax.f32 %v5038_v26, 0.0  ;;  %v4374_v59 = vpop.f32.mrf.mxu0  ;;  %v5047_v29 = vpop.f32.mrf.mxu1 }
 0x49c   : > { %v6093_v41 = vmul.f32 %v10003_v44, %v5559_v58  ;;  %v6537_v53 = vpop.xlane.xlu0 %6536  ;;  %v5561_v8 = vmax.f32 %v4367_v36, 0.0  ;;  %v5044_v40 = vadd.f32 %v5043_v56, %v9889_v23  ;;  %v6718_v20 = vadd.f32 %v6091_v16, %v6090_v0 }
 0x49d   : > { %v6864_v30 = vadd.f32 %v13086_v63, %v6537_v53  ;;  %v5563_v32 = vmax.f32 %v5040_v49, 0.0  ;;  %v6710_v3 = vadd.f32 %v6709_v18, %v6085_v2  ;;  %v6094_v5 = vmul.f32 %v9842_v43, %v5560_v46  ;;  %v4376_v47 = vpop.f32.mrf.mxu0  ;;  %v5049_v45 = vpop.f32.mrf.mxu1 }
 0x49e   : > { %v6095_v28 = vmul.f32 %v9966_v33, %v5561_v8  ;;  %v5564_v24 = vmax.f32 %v4371_v48, 0.0  ;;  %v4373_v17 = vadd.f32 %v4372_v11, %v9959_v31  ;;  %v5566_v19 = vmax.f32 %v5044_v40, 0.0 }
 0x49f   : > { %6993 = vst.msk [vmem:[%s11545_s27 + $0x278] sm:$0xff] %vm6913_vm0, %v6864_v30  ;;  %6711 = vadd.xlane.f32.xlu1 %v6710_v3  ;;  %v5046_v62 = vadd.f32 %v5045_v10, %v9994_v9  ;;  %v6714_v55 = vadd.f32 %v6713_v12, %v6088_v14  ;;  %v4375_v13 = vadd.f32 %v4374_v59, %v9815_v61 }
 0x4a0   : > { %v6096_v2 = vmul.f32 %v9920_v37, %v5562_v6  ;;  %v6723_v39 = vadd.f32 %v6095_v28, %v6094_v5  ;;  %v6097_v54 = vmul.f32 %v10003_v44, %v5563_v32  ;;  %v5565_v34 = vmax.f32 %v4373_v17, 0.0  ;;  %v6542_v7 = vpop.xlane.xlu1 %6541 }
 0x4a1   : > { %v5567_v22 = vmax.f32 %v5046_v62, 0.0  ;;  %v6715_v57 = vadd.f32 %v6714_v55, %v6089_v21  ;;  %v5568_v27 = vmax.f32 %v4375_v13, 0.0  ;;  %v5048_v4 = vadd.f32 %v5047_v29, %v9889_v23  ;;  %v4380_v12 = vpop.f32.mrf.mxu0  ;;  %v5053_v1 = vpop.f32.mrf.mxu1 }
 0x4a2   : > { %v6865_v25 = vadd.f32 %v13086_v63, %v6542_v7  ;;  %v6099_v14 = vmul.f32 %v9966_v33, %v5565_v34  ;;  %v4377_v52 = vadd.f32 %v4376_v47, %v9959_v31  ;;  %v5050_v15 = vadd.f32 %v5049_v45, %v9994_v9 }
 0x4a3   : > { %v6098_v38 = vmul.f32 %v9842_v43, %v5564_v24  ;;  %v6100_v60 = vmul.f32 %v9920_v37, %v5566_v19  ;;  %v6101_v58 = vmul.f32 %v10003_v44, %v5567_v22  ;;  %6716 = vadd.xlane.f32.xlu0 %v6715_v57  ;;  %v6719_v35 = vadd.f32 %v6718_v20, %v6092_v42  ;;  %v4382_v0 = vpop.f32.mrf.mxu0  ;;  %v5055_v49 = vpop.f32.mrf.mxu1 }
 0x4a4   : > { %6994 = vst.msk [vmem:[%s11545_s27 + $0x280] sm:$0xff] %vm6913_vm0, %v6865_v25  ;;  %v6102_v21 = vmul.f32 %v9842_v43, %v5568_v27  ;;  %v5570_v51 = vmax.f32 %v5048_v4, 0.0  ;;  %v6547_v50 = vpop.xlane.xlu0 %6546  ;;  %v5569_v26 = vmax.f32 %v4377_v52, 0.0  ;;  %v4381_v56 = vadd.f32 %v4380_v12, %v9815_v61 }
 0x4a5   : > { %v6866_v16 = vadd.f32 %v13086_v63, %v6547_v50  ;;  %v5571_v46 = vmax.f32 %v5050_v15, 0.0  ;;  %v6720_v36 = vadd.f32 %v6719_v35, %v6093_v41  ;;  %v5054_v11 = vadd.f32 %v5053_v1, %v9889_v23  ;;  %v4384_v6 = vpop.f32.mrf.mxu0  ;;  %v5057_v41 = vpop.f32.mrf.mxu1 }
 0x4a6   : > { %v6728_v42 = vadd.f32 %v6099_v14, %v6098_v38  ;;  %v6103_v18 = vmul.f32 %v9966_v33, %v5569_v26  ;;  %v5572_v48 = vmax.f32 %v4381_v56, 0.0  ;;  %v4383_v10 = vadd.f32 %v4382_v0, %v9959_v31 }
 0x4a7   : > { %6995 = vst.msk [vmem:[%s11545_s27 + $0x288] sm:$0xff] %vm6913_vm0, %v6866_v16  ;;  %6721 = vadd.xlane.f32.xlu1 %v6720_v36  ;;  %v5574_v53 = vmax.f32 %v5054_v11, 0.0  ;;  %v5056_v8 = vadd.f32 %v5055_v49, %v9994_v9  ;;  %v6724_v40 = vadd.f32 %v6723_v39, %v6096_v2  ;;  %v4385_v59 = vadd.f32 %v4384_v6, %v9815_v61  ;;  %v4386_v5 = vpop.f32.mrf.mxu0  ;;  %v5059_v19 = vpop.f32.mrf.mxu1 }
 0x4a8   : > { %v6104_v20 = vmul.f32 %v9920_v37, %v5570_v51  ;;  %v6733_v30 = vadd.f32 %v6103_v18, %v6102_v21  ;;  %v6552_v32 = vpop.xlane.xlu1 %6551  ;;  %v5573_v3 = vmax.f32 %v4383_v10, 0.0  ;;  %v5058_v29 = vadd.f32 %v5057_v41, %v9889_v23  ;;  %v13428_v10 = vld [vmem:[#allocation2] ss:$0 sm:$0xff] }
 0x4a9   : > { %v6105_v28 = vmul.f32 %v10003_v44, %v5571_v46  ;;  %v6867_v24 = vadd.f32 %v13086_v63, %v6552_v32  ;;  %v5575_v17 = vmax.f32 %v5056_v8, 0.0  ;;  %v6725_v47 = vadd.f32 %v6724_v40, %v6097_v54 }
 0x4aa   : > { %v6106_v62 = vmul.f32 %v9842_v43, %v5572_v48  ;;  %v6107_v55 = vmul.f32 %v9966_v33, %v5573_v3  ;;  %v5576_v13 = vmax.f32 %v4385_v59, 0.0  ;;  %v4387_v45 = vadd.f32 %v4386_v5, %v9959_v31 }
 0x4ab   : > { %6996 = vst.msk [vmem:[%s11545_s27 + $0x290] sm:$0xff] %vm6913_vm0, %v6867_v24  ;;  %v6108_v2 = vmul.f32 %v9920_v37, %v5574_v53  ;;  %6726 = vadd.xlane.f32.xlu0 %v6725_v47  ;;  %v5060_v39 = vadd.f32 %v5059_v19, %v9994_v9  ;;  %v6729_v34 = vadd.f32 %v6728_v42, %v6100_v60  ;;  %v5578_v57 = vmax.f32 %v5058_v29, 0.0 }
 0x4ac   : > { %v6734_v7 = vadd.f32 %v6733_v30, %v6104_v20  ;;  %v6738_v22 = vadd.f32 %v6107_v55, %v6106_v62  ;;  %v6109_v54 = vmul.f32 %v10003_v44, %v5575_v17  ;;  %v6557_v27 = vpop.xlane.xlu0 %6556  ;;  %v5577_v4 = vmax.f32 %v4387_v45, 0.0  ;;  %v4390_v25 = vpop.f32.mrf.mxu0 }
 0x4ad   : > { %v6110_v14 = vmul.f32 %v9842_v43, %v5576_v13  ;;  %v6868_v52 = vadd.f32 %v13086_v63, %v6557_v27  ;;  %v6730_v15 = vadd.f32 %v6729_v34, %v6101_v58  ;;  %v4391_v12 = vadd.f32 %v4390_v25, %v9815_v61  ;;  %v5063_v38 = vpop.f32.mrf.mxu1 }
 0x4ae   : > { %v6111_v35 = vmul.f32 %v9966_v33, %v5577_v4  ;;  %v5064_v60 = vadd.f32 %v5063_v38, %v9889_v23  ;;  %v4392_v1 = vpop.f32.mrf.mxu0  ;;  %v6735_v21 = vadd.f32 %v6734_v7, %v6105_v28  ;;  %v6739_v51 = vadd.f32 %v6738_v22, %v6108_v2 }
 0x4af   : > { %6997 = vst.msk [vmem:[%s11545_s27 + $0x298] sm:$0xff] %vm6913_vm0, %v6868_v52  ;;  %v5579_v50 = vmax.f32 %v5060_v39, 0.0  ;;  %6731 = vadd.xlane.f32.xlu1 %v6730_v15  ;;  %v5580_v26 = vmax.f32 %v4391_v12, 0.0  ;;  %v4393_v56 = vadd.f32 %v4392_v1, %v9959_v31  ;;  %v5065_v0 = vpop.f32.mrf.mxu1  ;;  %v6112_v11 = vmul.f32 %v9920_v37, %v5578_v57 }
 0x4b0   : > { %v6743_v63 = vadd.f32 %v6111_v35, %v6110_v14  ;;  %v5582_v58 = vmax.f32 %v5064_v60, 0.0  ;;  %v5066_v16 = vadd.f32 %v5065_v0, %v9994_v9  ;;  %6736 = vadd.xlane.f32.xlu0 %v6735_v21  ;;  %v4394_v46 = vpop.f32.mrf.mxu0  ;;  %v6740_v36 = vadd.f32 %v6739_v51, %v6109_v54  ;;  %v6562_v49 = vpop.xlane.xlu1 %6561 }
 0x4b1   : > { %v5581_v42 = vmax.f32 %v4393_v56, 0.0  ;;  %v4395_v18 = vadd.f32 %v4394_v46, %v9815_v61  ;;  %v5067_v48 = vpop.f32.mrf.mxu1  ;;  %v6869_v6 = vadd.f32 %v13428_v10, %v6562_v49  ;;  %v6114_v53 = vmul.f32 %v9842_v43, %v5580_v26 }
 0x4b2   : > { %v5068_v8 = vadd.f32 %v5067_v48, %v9889_v23  ;;  %v4396_v40 = vpop.f32.mrf.mxu0  ;;  %v6744_v32 = vadd.f32 %v6743_v63, %v6112_v11  ;;  %v6113_v3 = vmul.f32 %v10003_v44, %v5579_v50  ;;  %v6116_v29 = vmul.f32 %v9920_v37, %v5582_v58 }
 0x4b3   : > { %v6115_v59 = vmul.f32 %v9966_v33, %v5581_v42  ;;  %v5584_v41 = vmax.f32 %v4395_v18, 0.0  ;;  %v4397_v20 = vadd.f32 %v4396_v40, %v9959_v31  ;;  %v5069_v30 = vpop.f32.mrf.mxu1  ;;  %6741 = vadd.xlane.f32.xlu1 %v6740_v36  ;;  %6998 = vst.msk [vmem:[%s11545_s27 + $0x2a0] sm:$0xff] %vm6913_vm0, %v6869_v6  ;;  %v5583_v5 = vmax.f32 %v5066_v16, 0.0 }
 0x4b4   : > { %v6567_v28 = vpop.xlane.xlu0 %6566  ;;  %v5070_v24 = vadd.f32 %v5069_v30, %v9994_v9  ;;  %v5586_v47 = vmax.f32 %v5068_v8, 0.0  ;;  %v6745_v2 = vadd.f32 %v6744_v32, %v6113_v3 }
 0x4b5   : > { %v6748_v17 = vadd.f32 %v6115_v59, %v6114_v53  ;;  %v6870_v19 = vadd.f32 %v13428_v10, %v6567_v28  ;;  %v5585_v62 = vmax.f32 %v4397_v20, 0.0  ;;  %v6118_v55 = vmul.f32 %v9842_v43, %v5584_v41 }
 0x4b6   : > { %v5587_v34 = vmax.f32 %v5070_v24, 0.0  ;;  %v6117_v54 = vmul.f32 %v10003_v44, %v5583_v5  ;;  %6746 = vadd.xlane.f32.xlu0 %v6745_v2  ;;  %v6120_v25 = vmul.f32 %v9920_v37, %v5586_v47 }
 0x4b7   : > { %v4400_v13 = vpop.f32.mrf.mxu0  ;;  %v5073_v45 = vpop.f32.mrf.mxu1  ;;  %6999 = vst.msk [vmem:[%s11545_s27 + $0x2a8] sm:$0xff] %vm6913_vm0, %v6870_v19  ;;  %v6119_v39 = vmul.f32 %v9966_v33, %v5585_v62  ;;  %v6749_v22 = vadd.f32 %v6748_v17, %v6116_v29 }
 0x4b8   : > { %v4401_v7 = vadd.f32 %v4400_v13, %v9815_v61  ;;  %v6572_v57 = vpop.xlane.xlu1 %6571  ;;  %v5074_v27 = vadd.f32 %v5073_v45, %v9889_v23  ;;  %v6121_v21 = vmul.f32 %v10003_v44, %v5587_v34 }
 0x4b9   : > { %v4402_v4 = vpop.f32.mrf.mxu0  ;;  %v6753_v14 = vadd.f32 %v6119_v39, %v6118_v55  ;;  %v6871_v52 = vadd.f32 %v13428_v10, %v6572_v57  ;;  %v5075_v15 = vpop.f32.mrf.mxu1  ;;  %v6750_v1 = vadd.f32 %v6749_v22, %v6117_v54 }
 0x4ba   : > { %v5588_v12 = vmax.f32 %v4401_v7, 0.0  ;;  %v4403_v38 = vadd.f32 %v4402_v4, %v9959_v31  ;;  %v5076_v35 = vadd.f32 %v5075_v15, %v9994_v9  ;;  %v5590_v56 = vmax.f32 %v5074_v27, 0.0 }
 0x4bb   : > { %v4404_v60 = vpop.f32.mrf.mxu0  ;;  %7000 = vst.msk [vmem:[%s11545_s27 + $0x2b0] sm:$0xff] %vm6913_vm0, %v6871_v52  ;;  %v5077_v50 = vpop.f32.mrf.mxu1  ;;  %v6754_v26 = vadd.f32 %v6753_v14, %v6120_v25  ;;  %6751 = vadd.xlane.f32.xlu1 %v6750_v1 }
 0x4bc   : > { %v4405_v51 = vadd.f32 %v4404_v60, %v9815_v61  ;;  %v5589_v0 = vmax.f32 %v4403_v38, 0.0  ;;  %v5078_v63 = vadd.f32 %v5077_v50, %v9889_v23  ;;  %v6577_v58 = vpop.xlane.xlu0 %6576  ;;  %v6122_v18 = vmul.f32 %v9842_v43, %v5588_v12 }
 0x4bd   : > { %v4406_v16 = vpop.f32.mrf.mxu0  ;;  %v6872_v36 = vadd.f32 %v13428_v10, %v6577_v58  ;;  %v5079_v49 = vpop.f32.mrf.mxu1  ;;  %v6755_v42 = vadd.f32 %v6754_v26, %v6121_v21  ;;  %v5591_v6 = vmax.f32 %v5076_v35, 0.0  ;;  %v6124_v32 = vmul.f32 %v9920_v37, %v5590_v56 }
 0x4be   : > { %v5592_v46 = vmax.f32 %v4405_v51, 0.0  ;;  %v4407_v11 = vadd.f32 %v4406_v16, %v9959_v31  ;;  %v6123_v48 = vmul.f32 %v9966_v33, %v5589_v0  ;;  %v5080_v8 = vadd.f32 %v5079_v49, %v9994_v9 }
 0x4bf   : > { %7001 = vst.msk [vmem:[%s11545_s27 + $0x2b8] sm:$0xff] %vm6913_vm0, %v6872_v36  ;;  %6756 = vadd.xlane.f32.xlu0 %v6755_v42  ;;  %v5594_v41 = vmax.f32 %v5078_v63, 0.0  ;;  %v6125_v17 = vmul.f32 %v10003_v44, %v5591_v6 }
 0x4c0   : > { %v5593_v53 = vmax.f32 %v4407_v11, 0.0  ;;  %v4410_v40 = vpop.f32.mrf.mxu0  ;;  %v6758_v59 = vadd.f32 %v6123_v48, %v6122_v18  ;;  %v5083_v30 = vpop.f32.mrf.mxu1  ;;  %v6126_v3 = vmul.f32 %v9842_v43, %v5592_v46  ;;  %v5595_v45 = vmax.f32 %v5080_v8, 0.0 }
 0x4c1   : > { %v4411_v20 = vadd.f32 %v4410_v40, %v9815_v61  ;;  %v6582_v5 = vpop.xlane.xlu1 %6581  ;;  %v5084_v28 = vadd.f32 %v5083_v30, %v9889_v23  ;;  %v6128_v7 = vmul.f32 %v9920_v37, %v5594_v41 }
 0x4c2   : > { %v6127_v29 = vmul.f32 %v9966_v33, %v5593_v53  ;;  %v4412_v24 = vpop.f32.mrf.mxu0  ;;  %v6873_v47 = vadd.f32 %v13428_v10, %v6582_v5  ;;  %v5085_v55 = vpop.f32.mrf.mxu1  ;;  %v6759_v34 = vadd.f32 %v6758_v59, %v6124_v32  ;;  %v6129_v51 = vmul.f32 %v10003_v44, %v5595_v45 }
 0x4c3   : > { %v5596_v19 = vmax.f32 %v4411_v20, 0.0  ;;  %v4413_v62 = vadd.f32 %v4412_v24, %v9959_v31  ;;  %v5086_v2 = vadd.f32 %v5085_v55, %v9994_v9  ;;  %v5598_v22 = vmax.f32 %v5084_v28, 0.0 }
 0x4c4   : > { %v6763_v13 = vadd.f32 %v6127_v29, %v6126_v3  ;;  %v4414_v39 = vpop.f32.mrf.mxu0  ;;  %7002 = vst.msk [vmem:[%s11545_s27 + $0x2c0] sm:$0xff] %vm6913_vm0, %v6873_v47  ;;  %v5087_v27 = vpop.f32.mrf.mxu1  ;;  %v6760_v21 = vadd.f32 %v6759_v34, %v6125_v17 }
 0x4c5   : > { %v5597_v54 = vmax.f32 %v4413_v62, 0.0  ;;  %v4415_v57 = vadd.f32 %v4414_v39, %v9815_v61  ;;  %v6587_v4 = vpop.xlane.xlu0 %6586  ;;  %v6130_v25 = vmul.f32 %v9842_v43, %v5596_v19  ;;  %v5599_v14 = vmax.f32 %v5086_v2, 0.0 }
 0x4c6   : > { %v5088_v52 = vadd.f32 %v5087_v27, %v9889_v23  ;;  %v6874_v15 = vadd.f32 %v13428_v10, %v6587_v4  ;;  %v4416_v12 = vpop.f32.mrf.mxu0  ;;  %v5089_v1 = vpop.f32.mrf.mxu1  ;;  %v6764_v50 = vadd.f32 %v6763_v13, %v6128_v7  ;;  %v6132_v23 = vmul.f32 %v9920_v37, %v5598_v22  ;;  %6761 = vadd.xlane.f32.xlu1 %v6760_v21 }
 0x4c7   : > { %v6131_v38 = vmul.f32 %v9966_v33, %v5597_v54  ;;  %v5600_v35 = vmax.f32 %v4415_v57, 0.0  ;;  %v4417_v60 = vadd.f32 %v4416_v12, %v9959_v31  ;;  %v5090_v61 = vadd.f32 %v5089_v1, %v9994_v9 }
 0x4c8   : > { %7003 = vst.msk [vmem:[%s11545_s27 + $0x2c8] sm:$0xff] %vm6913_vm0, %v6874_v15  ;;  %v5602_v56 = vmax.f32 %v5088_v52, 0.0  ;;  %v6592_v63 = vpop.xlane.xlu1 %6591  ;;  %v6133_v58 = vmul.f32 %v10003_v44, %v5599_v14  ;;  %v6765_v16 = vadd.f32 %v6764_v50, %v6129_v51 }
 0x4c9   : > { %v6768_v26 = vadd.f32 %v6131_v38, %v6130_v25  ;;  %v5601_v0 = vmax.f32 %v4417_v60, 0.0  ;;  %v6875_v31 = vadd.f32 %v13428_v10, %v6592_v63  ;;  %v6134_v46 = vmul.f32 %v9842_v43, %v5600_v35 }
 0x4ca   : > { %v5603_v11 = vmax.f32 %v5090_v61, 0.0  ;;  %6766 = vadd.xlane.f32.xlu0 %v6765_v16  ;;  %v6136_v49 = vmul.f32 %v9920_v37, %v5602_v56 }
 0x4cb   : > { %v6135_v36 = vmul.f32 %v9966_v33, %v5601_v0  ;;  %v6769_v9 = vadd.f32 %v6768_v26, %v6132_v23  ;;  %7004 = vst.msk [vmem:[%s11545_s27 + $0x2d0] sm:$0xff] %vm6913_vm0, %v6875_v31 }
 0x4cc   : > { %v6597_v18 = vpop.xlane.xlu0 %6596  ;;  %v6137_v53 = vmul.f32 %v10003_v44, %v5603_v11 }
 0x4cd   : > { %v6773_v42 = vadd.f32 %v6135_v36, %v6134_v46  ;;  %v6770_v48 = vadd.f32 %v6769_v9, %v6133_v58  ;;  %v6876_v6 = vadd.f32 %v13428_v10, %v6597_v18 }
 0x4cf   : > { %6771 = vadd.xlane.f32.xlu1 %v6770_v48  ;;  %v6774_v43 = vadd.f32 %v6773_v42, %v6136_v49  ;;  %7005 = vst.msk [vmem:[%s11545_s27 + $0x2d8] sm:$0xff] %vm6913_vm0, %v6876_v6 }
 0x4d0   : > { %v6602_v8 = vpop.xlane.xlu1 %6601 }
 0x4d1   : > { %v6775_v33 = vadd.f32 %v6774_v43, %v6137_v53  ;;  %v6877_v40 = vadd.f32 %v13428_v10, %v6602_v8 }
 0x4d3   : > { %6776 = vadd.xlane.f32.xlu0 %v6775_v33  ;;  %7006 = vst.msk [vmem:[%s11545_s27 + $0x2e0] sm:$0xff] %vm6913_vm0, %v6877_v40 }
 0x4d4   : > { %v6607_v37 = vpop.xlane.xlu0 %6606 }
 0x4d5   : > { %v6878_v59 = vadd.f32 %v13428_v10, %v6607_v37 }
 0x4d7   : > { %7007 = vst.msk [vmem:[%s11545_s27 + $0x2e8] sm:$0xff] %vm6913_vm0, %v6878_v59 }
 0x4d8   : > { %v6612_v44 = vpop.xlane.xlu1 %6611 }
 0x4d9   : > { %v6879_v41 = vadd.f32 %v13428_v10, %v6612_v44 }
 0x4db   : > { %7008 = vst.msk [vmem:[%s11545_s27 + $0x2f0] sm:$0xff] %vm6913_vm0, %v6879_v41 }
 0x4dc   : > { %v6617_v20 = vpop.xlane.xlu0 %6616 }
 0x4dd   : > { %v6880_v30 = vadd.f32 %v13428_v10, %v6617_v20 }
 0x4df   : > { %7009 = vst.msk [vmem:[%s11545_s27 + $0x2f8] sm:$0xff] %vm6913_vm0, %v6880_v30 }
 0x4e0   : > { %v6622_v32 = vpop.xlane.xlu1 %6621 }
 0x4e1   : > { %v6881_v3 = vadd.f32 %v13428_v10, %v6622_v32 }
 0x4e3   : > { %7010 = vst.msk [vmem:[%s11545_s27 + $0x300] sm:$0xff] %vm6913_vm0, %v6881_v3 }
 0x4e4   : > { %v6627_v29 = vpop.xlane.xlu0 %6626 }
 0x4e5   : > { %v6882_v5 = vadd.f32 %v13428_v10, %v6627_v29 }
 0x4e7   : > { %7011 = vst.msk [vmem:[%s11545_s27 + $0x308] sm:$0xff] %vm6913_vm0, %v6882_v5 }
 0x4e8   : > { %v6632_v28 = vpop.xlane.xlu1 %6631 }
 0x4e9   : > { %v6883_v24 = vadd.f32 %v13428_v10, %v6632_v28 }
 0x4eb   : > { %7012 = vst.msk [vmem:[%s11545_s27 + $0x310] sm:$0xff] %vm6913_vm0, %v6883_v24 }
 0x4ec   : > { %v6637_v17 = vpop.xlane.xlu0 %6636 }
 0x4ed   : > { %v6884_v47 = vadd.f32 %v13428_v10, %v6637_v17 }
 0x4ef   : > { %7013 = vst.msk [vmem:[%s11545_s27 + $0x318] sm:$0xff] %vm6913_vm0, %v6884_v47 }
 0x4f0   : > { %v6642_v19 = vpop.xlane.xlu1 %6641 }
 0x4f1   : > { %v6885_v62 = vadd.f32 %v13428_v10, %v6642_v19 }
 0x4f3   : > { %7014 = vst.msk [vmem:[%s11545_s27 + $0x320] sm:$0xff] %vm6913_vm0, %v6885_v62 }
 0x4f4   : > { %v6647_v55 = vpop.xlane.xlu0 %6646 }
 0x4f5   : > { %v6886_v13 = vadd.f32 %v13428_v10, %v6647_v55 }
 0x4f7   : > { %7015 = vst.msk [vmem:[%s11545_s27 + $0x328] sm:$0xff] %vm6913_vm0, %v6886_v13 }
 0x4f8   : > { %v6652_v45 = vpop.xlane.xlu1 %6651 }
 0x4f9   : > { %v6887_v2 = vadd.f32 %v13428_v10, %v6652_v45 }
 0x4fb   : > { %7016 = vst.msk [vmem:[%s11545_s27 + $0x330] sm:$0xff] %vm6913_vm0, %v6887_v2 }
 0x4fc   : > { %v6657_v39 = vpop.xlane.xlu0 %6656 }
 0x4fd   : > { %v6888_v34 = vadd.f32 %v13428_v10, %v6657_v39 }
 0x4ff   : > { %7017 = vst.msk [vmem:[%s11545_s27 + $0x338] sm:$0xff] %vm6913_vm0, %v6888_v34 }
 0x500   : > { %v6662_v7 = vpop.xlane.xlu1 %6661 }
 0x501   : > { %v6889_v22 = vadd.f32 %v13428_v10, %v6662_v7 }
 0x503   : > { %7018 = vst.msk [vmem:[%s11545_s27 + $0x340] sm:$0xff] %vm6913_vm0, %v6889_v22 }
 0x505   : > { %v6667_v54 = vpop.xlane.xlu0 %6666 }
 0x506   : > { %v6890_v57 = vadd.f32 %v13428_v10, %v6667_v54 }
 0x508   : > { %7019 = vst.msk [vmem:[%s11545_s27 + $0x348] sm:$0xff] %vm6913_vm0, %v6890_v57  ;;  %v6672_v27 = vpop.xlane.xlu1 %6671 }
 0x509   : > { %v6891_v4 = vadd.f32 %v13428_v10, %v6672_v27 }
 0x50b   : > { %7020 = vst.msk [vmem:[%s11545_s27 + $0x350] sm:$0xff] %vm6913_vm0, %v6891_v4 }
 0x50c   : > { %v6677_v25 = vpop.xlane.xlu0 %6676 }
 0x50d   : > { %v6892_v14 = vadd.f32 %v13428_v10, %v6677_v25 }
 0x50f   : > { %7021 = vst.msk [vmem:[%s11545_s27 + $0x358] sm:$0xff] %vm6913_vm0, %v6892_v14 }
 0x510   : > { %v6682_v52 = vpop.xlane.xlu1 %6681 }
 0x511   : > { %v6893_v15 = vadd.f32 %v13428_v10, %v6682_v52 }
 0x513   : > { %7022 = vst.msk [vmem:[%s11545_s27 + $0x360] sm:$0xff] %vm6913_vm0, %v6893_v15 }
 0x514   : > { %v6687_v12 = vpop.xlane.xlu0 %6686 }
 0x515   : > { %v6894_v38 = vadd.f32 %v13428_v10, %v6687_v12 }
 0x517   : > { %7023 = vst.msk [vmem:[%s11545_s27 + $0x368] sm:$0xff] %vm6913_vm0, %v6894_v38 }
 0x518   : > { %v6692_v35 = vpop.xlane.xlu1 %6691 }
 0x519   : > { %v6895_v60 = vadd.f32 %v13428_v10, %v6692_v35 }
 0x51b   : > { %7024 = vst.msk [vmem:[%s11545_s27 + $0x370] sm:$0xff] %vm6913_vm0, %v6895_v60 }
 0x51c   : > { %v6697_v1 = vpop.xlane.xlu0 %6696 }
 0x51d   : > { %v6896_v21 = vadd.f32 %v13428_v10, %v6697_v1 }
 0x51f   : > { %7025 = vst.msk [vmem:[%s11545_s27 + $0x378] sm:$0xff] %vm6913_vm0, %v6896_v21 }
 0x521   : > { %v6702_v51 = vpop.xlane.xlu1 %6701 }
 0x522   : > { %v6897_v61 = vadd.f32 %v13428_v10, %v6702_v51 }
 0x524   : > { %7026 = vst.msk [vmem:[%s11545_s27 + $0x380] sm:$0xff] %vm6913_vm0, %v6897_v61  ;;  %v6707_v50 = vpop.xlane.xlu0 %6706 }
 0x525   : > { %v6898_v23 = vadd.f32 %v13428_v10, %v6707_v50 }
 0x527   : > { %7027 = vst.msk [vmem:[%s11545_s27 + $0x388] sm:$0xff] %vm6913_vm0, %v6898_v23 }
 0x528   : > { %v6712_v26 = vpop.xlane.xlu1 %6711 }
 0x529   : > { %v6899_v56 = vadd.f32 %v13428_v10, %v6712_v26 }
 0x52b   : > { %7028 = vst.msk [vmem:[%s11545_s27 + $0x390] sm:$0xff] %vm6913_vm0, %v6899_v56 }
 0x52c   : > { %v6717_v0 = vpop.xlane.xlu0 %6716 }
 0x52d   : > { %v6900_v63 = vadd.f32 %v13428_v10, %v6717_v0 }
 0x52f   : > { %7029 = vst.msk [vmem:[%s11545_s27 + $0x398] sm:$0xff] %vm6913_vm0, %v6900_v63 }
 0x530   : > { %v6722_v58 = vpop.xlane.xlu1 %6721 }
 0x531   : > { %v6901_v31 = vadd.f32 %v13428_v10, %v6722_v58 }
 0x533   : > { %7030 = vst.msk [vmem:[%s11545_s27 + $0x3a0] sm:$0xff] %vm6913_vm0, %v6901_v31 }
 0x534   : > { %v6727_v16 = vpop.xlane.xlu0 %6726 }
 0x535   : > { %v6902_v46 = vadd.f32 %v13428_v10, %v6727_v16 }
 0x537   : > { %7031 = vst.msk [vmem:[%s11545_s27 + $0x3a8] sm:$0xff] %vm6913_vm0, %v6902_v46 }
 0x538   : > { %v6732_v36 = vpop.xlane.xlu1 %6731 }
 0x539   : > { %v6903_v11 = vadd.f32 %v13428_v10, %v6732_v36  ;;  %v6737_v9 = vpop.xlane.xlu0 %6736 }
 0x53a   : > { %v6904_v49 = vadd.f32 %v13428_v10, %v6737_v9 }
 0x53b   : > { %7032 = vst.msk [vmem:[%s11545_s27 + $0x3b0] sm:$0xff] %vm6913_vm0, %v6903_v11 }
 0x53c   : > { %7033 = vst.msk [vmem:[%s11545_s27 + $0x3b8] sm:$0xff] %vm6913_vm0, %v6904_v49  ;;  %v6742_v42 = vpop.xlane.xlu1 %6741 }
 0x53d   : > { %v6905_v18 = vadd.f32 %v13428_v10, %v6742_v42 }
 0x53f   : > { %7034 = vst.msk [vmem:[%s11545_s27 + $0x3c0] sm:$0xff] %vm6913_vm0, %v6905_v18  ;;  %v6747_v48 = vpop.xlane.xlu0 %6746 }
 0x540   : > { %v6906_v6 = vadd.f32 %v13428_v10, %v6747_v48 }
 0x542   : > { %7035 = vst.msk [vmem:[%s11545_s27 + $0x3c8] sm:$0xff] %vm6913_vm0, %v6906_v6 }
 0x544   : > { %v6752_v53 = vpop.xlane.xlu1 %6751 }
 0x545   : > { %v6907_v43 = vadd.f32 %v13428_v10, %v6752_v53 }
 0x547   : > { %7036 = vst.msk [vmem:[%s11545_s27 + $0x3d0] sm:$0xff] %vm6913_vm0, %v6907_v43 }
 0x548   : > { %v6757_v33 = vpop.xlane.xlu0 %6756 }
 0x549   : > { %v6908_v8 = vadd.f32 %v13428_v10, %v6757_v33 }
 0x54b   : > { %7037 = vst.msk [vmem:[%s11545_s27 + $0x3d8] sm:$0xff] %vm6913_vm0, %v6908_v8 }
 0x54f   : > { %v6762_v40 = vpop.xlane.xlu1 %6761 }
 0x550   : > { %v6909_v37 = vadd.f32 %v13428_v10, %v6762_v40 }
 0x552   : > { %7038 = vst.msk [vmem:[%s11545_s27 + $0x3e0] sm:$0xff] %vm6913_vm0, %v6909_v37 }
 0x553   : > { %v6767_v59 = vpop.xlane.xlu0 %6766 }
 0x554   : > { %v6910_v44 = vadd.f32 %v13428_v10, %v6767_v59 }
 0x556   : > { %7039 = vst.msk [vmem:[%s11545_s27 + $0x3e8] sm:$0xff] %vm6913_vm0, %v6910_v44 }
 0x558   : > { %v6772_v41 = vpop.xlane.xlu1 %6771 }
 0x559   : > { %v6911_v20 = vadd.f32 %v13428_v10, %v6772_v41 }
 0x55b   : > { %7040 = vst.msk [vmem:[%s11545_s27 + $0x3f0] sm:$0xff] %vm6913_vm0, %v6911_v20 }
 0x55c   : > { %v6777_v30 = vpop.xlane.xlu0 %6776 }
 0x55d   : > { %v6912_v32 = vadd.f32 %v13428_v10, %v6777_v30 }
 0x55f   : > { %7041 = vst.msk [vmem:[%s11545_s27 + $0x3f8] sm:$0xff] %vm6913_vm0, %v6912_v32 }
 0x560 PF: > { %s21_s11 = sadd.s32 1, %s7305_s11  }
 0x561   : > { %p18_p4 = scmp.ge.s32.totalorder %s21_s11, 4  }
 0x563   :  { %20 = sbr.rel (!%p18_p4) target bundleno = 3 (0x3), region = 89 }

</bundles_post_ra>
